<compile_context>
chip_gen: v5e
topology: v5e:2x2
jax: 0.10.0
libtpu: 0.0.40
codegen_flags: <defaults>
</compile_context>

<pallas_src>
import functools

import jax
import jax.numpy as jnp
import numpy as np
from jax.experimental import pallas as pl
from jax.experimental.pallas import tpu as pltpu

EPS = 1e-5  # BatchNorm / GroupNorm eps (PyTorch default)


# --------------------------------------------------------------------------
# Fused kernel helpers
# --------------------------------------------------------------------------
def _gn1(x, gamma, beta):
    """GroupNorm(num_groups=1) over a (C, T) tile + per-channel affine."""
    inv_n = 1.0 / (x.shape[0] * x.shape[1])
    mu = jnp.sum(x) * inv_n
    var = jnp.sum(x * x) * inv_n - mu * mu          # single-pass variance
    return (x - mu) * jax.lax.rsqrt(var + EPS) * gamma + beta


def _fused_kernel(x_ref, dww_ref, dwsc_ref, dwsh_ref, win_ref,
                  u_ref, ut_ref, bsame_ref,
                  g1_ref, be1_ref, wq_ref, bq_ref,
                  wk_ref, bk_ref, wv_ref, bv_ref, wo_ref, bo_ref,
                  g2_ref, be2_ref, w1_ref, b1_ref, w2_ref, b2_ref,
                  gng_ref, gnb_ref, wproj_ref, psc_ref, psh_ref,
                  o_ref, *, W, pad_l, n_blocks):
    cin = x_ref.shape[1]
    T = o_ref.shape[2]
    f32 = jnp.float32

    # ---- local_rep[0]: depthwise 3x3 conv (SAME) + folded BN + SiLU -------
    # Channel-major flat layout (C, H*W).  Width-wrap at row edges is killed
    # with lane masks; height edges read the flat zero padding of the input.
    lane = jax.lax.broadcasted_iota(jnp.int32, (1, T), 1)
    w_idx = lane % W
    mask_l = (w_idx >= 1).astype(f32)          # source column w-1 valid
    mask_r = (w_idx <= W - 2).astype(f32)      # source column w+1 valid
    acc = jnp.zeros((cin, T), f32)
    for dh in (-1, 0, 1):
        for dw in (-1, 0, 1):
            tap = (dh + 1) * 3 + (dw + 1)
            start = pad_l + dh * W + dw
            sh = x_ref[0, :, start:start + T]              # (C, T)
            if dw == -1:
                sh = sh * mask_l
            elif dw == 1:
                sh = sh * mask_r
            acc = acc + sh * dww_ref[:, tap:tap + 1]
    y = acc * dwsc_ref[...] + dwsh_ref[...]                # folded BatchNorm
    y = y * jax.nn.sigmoid(y)                              # SiLU

    # ---- local_rep[1]: 1x1 conv (Cin -> d), no norm / act ------------------
    fm = jnp.dot(win_ref[...], y, preferred_element_type=f32)      # (d, T)

    # ---- unfold (F.unfold, kernel==stride==patch) as permutation matmul ----
    xg = jnp.dot(fm, u_ref[...], preferred_element_type=f32)       # (d, P*N)

    for blk in range(n_blocks):               # static unroll over attn blocks
        # -- pre_norm_attn: GroupNorm + LinearSelfAttention + residual --
        y = _gn1(xg, g1_ref[blk], be1_ref[blk])
        q = jnp.sum(y * wq_ref[blk], axis=0, keepdims=True) + bq_ref[blk]
        k = jnp.dot(wk_ref[blk], y, preferred_element_type=f32) + bk_ref[blk]
        v = jnp.dot(wv_ref[blk], y, preferred_element_type=f32) + bv_ref[blk]
        # softmax over the N patches of each patch-position p: tokens are
        # ordered t = p*N + n, so each softmax group is a contiguous lane
        # block; group sums run on the MXU via the block-diagonal `bsame`.
        e = jnp.exp(q - jnp.max(q))                                  # (1, T)
        ke = k * e                                                   # (d, T)
        num = jnp.dot(ke, bsame_ref[...], preferred_element_type=f32)
        den = jnp.dot(jnp.broadcast_to(e, ke.shape), bsame_ref[...],
                      preferred_element_type=f32)
        ctx = num / den        # per-group context, already broadcast per token
        attn = jnp.maximum(v, 0.0) * ctx                   # relu(value) * ctx
        attn = (jnp.dot(wo_ref[blk], attn, preferred_element_type=f32)
                + bo_ref[blk])
        xg = xg + attn
        # -- pre_norm_ffn: GroupNorm + 1x1(SiLU) + 1x1 + residual --
        y = _gn1(xg, g2_ref[blk], be2_ref[blk])
        h = jnp.dot(w1_ref[blk], y, preferred_element_type=f32) + b1_ref[blk]
        h = h * jax.nn.sigmoid(h)
        h = jnp.dot(w2_ref[blk], h, preferred_element_type=f32) + b2_ref[blk]
        xg = xg + h

    # ---- final GroupNorm of global_rep -------------------------------------
    xg = _gn1(xg, gng_ref[...], gnb_ref[...])

    # ---- fold (inverse permutation) + conv_proj (1x1 + folded BN) ----------
    fm2 = jnp.dot(xg, ut_ref[...], preferred_element_type=f32)      # (d, T)
    out = jnp.dot(wproj_ref[...], fm2, preferred_element_type=f32)  # (Cin, T)
    o_ref[0] = out * psc_ref[...] + psh_ref[...]


# --------------------------------------------------------------------------
# Constant layout matrices (unfold permutation & same-patch-position mask)
# --------------------------------------------------------------------------
def _make_layout_constants(H, W, ph, pw):
    T = H * W
    nH, nW = H // ph, W // pw
    N = nH * nW
    U = np.zeros((T, T), np.float32)
    for i in range(ph):
        for j in range(pw):
            for nh in range(nH):
                for nw in range(nW):
                    t = (nh * ph + i) * W + (nw * pw + j)   # spatial index
                    tp = (i * pw + j) * N + nh * nW + nw    # (p, n) index
                    U[t, tp] = 1.0
    grp = np.arange(T) // N
    bsame = (grp[:, None] == grp[None, :]).astype(np.float32)
    return jnp.asarray(U), jnp.asarray(U.T), jnp.asarray(bsame)


def _const_spec(a):
    return pl.BlockSpec(a.shape, lambda b: (0,) * a.ndim)


# --------------------------------------------------------------------------
# Full MobileViTBlockv2 forward (single fused pallas_call)
# --------------------------------------------------------------------------
def mobilevit_block_v2(x_nchw, params, patch_h, patch_w):
    B, Cin, H, W = x_nchw.shape
    # resize_input_if_needed is a no-op: H, W divisible by the patch size.
    assert H % patch_h == 0 and W % patch_w == 0
    T = H * W
    nb = len(params["blocks"])
    pad_l = 2 * W            # >= W+1, covers tap offsets down to -(W+1)

    # NCHW -> channel-major flat (B, C, H*W); flat zero pad for conv edges.
    x3 = x_nchw.reshape(B, Cin, T).astype(jnp.float32)
    xpad = jnp.pad(x3, ((0, 0), (0, 0), (pad_l, pad_l)))

    U, UT, bsame = _make_layout_constants(H, W, patch_h, patch_w)

    # Re-layout parameters to channel-major; stack per-block weights.
    dww = params["dw_w"].reshape(9, Cin).T          # (Cin, 9), tap = kh*3+kw
    dwsc = params["dw_scale"].T                     # (Cin, 1)
    dwsh = params["dw_shift"].T
    win = params["w_in"].T                          # (d, Cin)

    def stk(name, transpose=True):
        return jnp.stack([b[name].T if transpose else b[name]
                          for b in params["blocks"]])

    g1, be1 = stk("g1"), stk("be1")
    wq, bq = stk("wq"), stk("bq", False)
    wk, bk = stk("wk"), stk("bk")
    wv, bv = stk("wv"), stk("bv")
    wo, bo = stk("wo"), stk("bo")
    g2, be2 = stk("g2"), stk("be2")
    w1, b1 = stk("w1"), stk("b1")
    w2, b2 = stk("w2"), stk("b2")

    gng, gnb = params["gn_g"].T, params["gn_b"].T
    wproj = params["w_proj"].T                      # (Cin, d)
    psc, psh = params["proj_scale"].T, params["proj_shift"].T

    consts = [dww, dwsc, dwsh, win, U, UT, bsame,
              g1, be1, wq, bq, wk, bk, wv, bv, wo, bo, g2, be2,
              w1, b1, w2, b2, gng, gnb, wproj, psc, psh]

    kernel = functools.partial(_fused_kernel, W=W, pad_l=pad_l, n_blocks=nb)
    out3 = pl.pallas_call(
        kernel,
        out_shape=jax.ShapeDtypeStruct((B, Cin, T), jnp.float32),
        grid=(B,),
        in_specs=[pl.BlockSpec((1, Cin, T + 2 * pad_l), lambda b: (b, 0, 0))]
        + [_const_spec(a) for a in consts],
        out_specs=pl.BlockSpec((1, Cin, T), lambda b: (b, 0, 0)),
        compiler_params=pltpu.CompilerParams(
            dimension_semantics=("parallel",)),    # one batch per TensorCore
    )(xpad, *consts)
    return out3.reshape(B, Cin, H, W)


# --------------------------------------------------------------------------
# Deterministic parameter init (synthetic; matches the module's shapes)
# --------------------------------------------------------------------------
def init_params(key, Cin, d, ffn, n_blocks):
    ks = iter(jax.random.split(key, 64))

    def nrm(shape, s=0.1):
        return (s * jax.random.normal(next(ks), shape)).astype(jnp.float32)

    params = {}
    params["dw_w"] = nrm((3, 3, Cin), 0.2)
    dw_gamma = 1.0 + nrm((1, Cin), 0.05)
    dw_beta = nrm((1, Cin), 0.05)
    # BatchNorm eval with running_mean=0, running_var=1 folded to scale/shift
    params["dw_scale"] = dw_gamma / jnp.sqrt(1.0 + EPS)
    params["dw_shift"] = dw_beta
    params["w_in"] = nrm((Cin, d), 0.2)

    blocks = []
    for _ in range(n_blocks):
        blk = {
            "g1": 1.0 + nrm((1, d), 0.05), "be1": nrm((1, d), 0.05),
            "wq": nrm((1, d), 0.2), "bq": nrm((1, 1), 0.05),
            "wk": nrm((d, d), 0.1), "bk": nrm((1, d), 0.05),
            "wv": nrm((d, d), 0.1), "bv": nrm((1, d), 0.05),
            "wo": nrm((d, d), 0.1), "bo": nrm((1, d), 0.05),
            "g2": 1.0 + nrm((1, d), 0.05), "be2": nrm((1, d), 0.05),
            "w1": nrm((d, ffn), 0.1), "b1": nrm((1, ffn), 0.05),
            "w2": nrm((ffn, d), 0.1), "b2": nrm((1, d), 0.05),
        }
        blocks.append(blk)
    params["blocks"] = blocks

    params["gn_g"] = 1.0 + nrm((1, d), 0.05)
    params["gn_b"] = nrm((1, d), 0.05)

    params["w_proj"] = nrm((d, Cin), 0.2)
    pj_gamma = 1.0 + nrm((1, Cin), 0.05)
    pj_beta = nrm((1, Cin), 0.05)
    params["proj_scale"] = pj_gamma / jnp.sqrt(1.0 + EPS)
    params["proj_shift"] = pj_beta
    return params


# --------------------------------------------------------------------------
# Pure-JAX reference (same math, no Pallas) for validation
# --------------------------------------------------------------------------
def unfold_nhwc(fm, ph, pw):
    B, H, W, C = fm.shape
    nH, nW = H // ph, W // pw
    p = fm.reshape(B, nH, ph, nW, pw, C)
    p = p.transpose(0, 2, 4, 1, 3, 5)          # (B, ph, pw, nH, nW, C)
    return p.reshape(B, ph * pw, nH * nW, C)   # (B, P, N, C)


def fold_nhwc(patches, H, W, ph, pw):
    B, P, N, C = patches.shape
    nH, nW = H // ph, W // pw
    fm = patches.reshape(B, ph, pw, nH, nW, C)
    fm = fm.transpose(0, 3, 1, 4, 2, 5)        # (B, nH, ph, nW, pw, C)
    return fm.reshape(B, H, W, C)


def _ref_gn4(x, g, b):
    mu = jnp.mean(x, axis=(1, 2, 3), keepdims=True)
    var = jnp.mean((x - mu) ** 2, axis=(1, 2, 3), keepdims=True)
    return (x - mu) * jax.lax.rsqrt(var + EPS) * g[0] + b[0]


def _ref_block(x, p):
    y = _ref_gn4(x, p["g1"], p["be1"])
    q = jnp.sum(y * p["wq"][0], axis=-1, keepdims=True) + p["bq"][0, 0]
    k = y @ p["wk"] + p["bk"][0]
    v = y @ p["wv"] + p["bv"][0]
    scores = jax.nn.softmax(q, axis=2)
    ctx = jnp.sum(k * scores, axis=2, keepdims=True)
    attn = jax.nn.relu(v) * ctx
    attn = attn @ p["wo"] + p["bo"][0]
    x = x + attn
    y = _ref_gn4(x, p["g2"], p["be2"])
    h = y @ p["w1"] + p["b1"][0]
    h = h * jax.nn.sigmoid(h)
    h = h @ p["w2"] + p["b2"][0]
    return x + h


def reference(x_nchw, params, ph, pw):
    x = jnp.transpose(x_nchw, (0, 2, 3, 1)).astype(jnp.float32)
    B, H, W, Cin = x.shape
    w = params["dw_w"].reshape(3, 3, 1, Cin)
    y = jax.lax.conv_general_dilated(
        x, w, (1, 1), "SAME",
        dimension_numbers=("NHWC", "HWIO", "NHWC"),
        feature_group_count=Cin)
    y = y * params["dw_scale"][0] + params["dw_shift"][0]
    y = y * jax.nn.sigmoid(y)
    fm = y @ params["w_in"]
    patches = unfold_nhwc(fm, ph, pw)
    for blk in params["blocks"]:
        patches = _ref_block(patches, blk)
    patches = _ref_gn4(patches, params["gn_g"], params["gn_b"])
    fm = fold_nhwc(patches, H, W, ph, pw)
    out = (fm @ params["w_proj"]) * params["proj_scale"][0] + params["proj_shift"][0]
    return jnp.transpose(out, (0, 3, 1, 2))


if __name__ == "__main__":
    # Small config: in_channels=8, attn_unit_dim=32, ffn_mult=2.0 -> ffn=64,
    # n_attn_blocks=2, patch 2x2, input (2, 8, 16, 16).
    B, Cin, H, W = 2, 8, 16, 16
    d, n_blocks = 32, 2
    ffn = int(2.0 * d // 16 * 16)           # = 64, as in _build_attn_layer
    ph = pw = 2

    key = jax.random.PRNGKey(0)
    kx, kp = jax.random.split(key)
    x = jax.random.normal(kx, (B, Cin, H, W), dtype=jnp.float32)
    params = init_params(kp, Cin, d, ffn, n_blocks)

    fwd = jax.jit(mobilevit_block_v2, static_argnums=(2, 3))
    out = jax.block_until_ready(fwd(x, params, ph, pw))
    assert out.shape == (B, Cin, H, W)

    ref = jax.block_until_ready(reference(x, params, ph, pw))
    np.testing.assert_allclose(np.asarray(out), np.asarray(ref),
                               rtol=2e-3, atol=2e-3)
    print("KERNEL_OK")
</pallas_src>

<mosaic_0001>
module attributes {stable_mosaic.version = 11 : i64} {
  func.func @_fused_kernel(%arg0: i32, %arg1: memref<1x8x320xf32, #tpu.memory_space<vmem>>, %arg2: memref<8x9xf32, #tpu.memory_space<vmem>>, %arg3: memref<8x1xf32, #tpu.memory_space<vmem>>, %arg4: memref<8x1xf32, #tpu.memory_space<vmem>>, %arg5: memref<32x8xf32, #tpu.memory_space<vmem>>, %arg6: memref<256x256xf32, #tpu.memory_space<vmem>>, %arg7: memref<256x256xf32, #tpu.memory_space<vmem>>, %arg8: memref<256x256xf32, #tpu.memory_space<vmem>>, %arg9: memref<2x32x1xf32, #tpu.memory_space<vmem>>, %arg10: memref<2x32x1xf32, #tpu.memory_space<vmem>>, %arg11: memref<2x32x1xf32, #tpu.memory_space<vmem>>, %arg12: memref<2x1x1xf32, #tpu.memory_space<vmem>>, %arg13: memref<2x32x32xf32, #tpu.memory_space<vmem>>, %arg14: memref<2x32x1xf32, #tpu.memory_space<vmem>>, %arg15: memref<2x32x32xf32, #tpu.memory_space<vmem>>, %arg16: memref<2x32x1xf32, #tpu.memory_space<vmem>>, %arg17: memref<2x32x32xf32, #tpu.memory_space<vmem>>, %arg18: memref<2x32x1xf32, #tpu.memory_space<vmem>>, %arg19: memref<2x32x1xf32, #tpu.memory_space<vmem>>, %arg20: memref<2x32x1xf32, #tpu.memory_space<vmem>>, %arg21: memref<2x64x32xf32, #tpu.memory_space<vmem>>, %arg22: memref<2x64x1xf32, #tpu.memory_space<vmem>>, %arg23: memref<2x32x64xf32, #tpu.memory_space<vmem>>, %arg24: memref<2x32x1xf32, #tpu.memory_space<vmem>>, %arg25: memref<32x1xf32, #tpu.memory_space<vmem>>, %arg26: memref<32x1xf32, #tpu.memory_space<vmem>>, %arg27: memref<8x32xf32, #tpu.memory_space<vmem>>, %arg28: memref<8x1xf32, #tpu.memory_space<vmem>>, %arg29: memref<8x1xf32, #tpu.memory_space<vmem>>, %arg30: memref<1x8x256xf32, #tpu.memory_space<vmem>>) attributes {dimension_semantics = [#tpu.dimension_semantics<parallel>], iteration_bounds = array<i64: 2>, scalar_prefetch = 0 : i64, scratch_operands = 0 : i64, tpu.core_type = #tpu.core_type<tc>, window_params = [{transform_indices = @transform_0, window_bounds = array<i64: 1, 8, 320>}, {pipeline_mode = #tpu.pipeline_mode<synchronous>, transform_indices = @transform_1, window_bounds = array<i64: 8, 9>}, {pipeline_mode = #tpu.pipeline_mode<synchronous>, transform_indices = @transform_2, window_bounds = array<i64: 8, 1>}, {pipeline_mode = #tpu.pipeline_mode<synchronous>, transform_indices = @transform_3, window_bounds = array<i64: 8, 1>}, {pipeline_mode = #tpu.pipeline_mode<synchronous>, transform_indices = @transform_4, window_bounds = array<i64: 32, 8>}, {pipeline_mode = #tpu.pipeline_mode<synchronous>, transform_indices = @transform_5, window_bounds = array<i64: 256, 256>}, {pipeline_mode = #tpu.pipeline_mode<synchronous>, transform_indices = @transform_6, window_bounds = array<i64: 256, 256>}, {pipeline_mode = #tpu.pipeline_mode<synchronous>, transform_indices = @transform_7, window_bounds = array<i64: 256, 256>}, {pipeline_mode = #tpu.pipeline_mode<synchronous>, transform_indices = @transform_8, window_bounds = array<i64: 2, 32, 1>}, {pipeline_mode = #tpu.pipeline_mode<synchronous>, transform_indices = @transform_9, window_bounds = array<i64: 2, 32, 1>}, {pipeline_mode = #tpu.pipeline_mode<synchronous>, transform_indices = @transform_10, window_bounds = array<i64: 2, 32, 1>}, {pipeline_mode = #tpu.pipeline_mode<synchronous>, transform_indices = @transform_11, window_bounds = array<i64: 2, 1, 1>}, {pipeline_mode = #tpu.pipeline_mode<synchronous>, transform_indices = @transform_12, window_bounds = array<i64: 2, 32, 32>}, {pipeline_mode = #tpu.pipeline_mode<synchronous>, transform_indices = @transform_13, window_bounds = array<i64: 2, 32, 1>}, {pipeline_mode = #tpu.pipeline_mode<synchronous>, transform_indices = @transform_14, window_bounds = array<i64: 2, 32, 32>}, {pipeline_mode = #tpu.pipeline_mode<synchronous>, transform_indices = @transform_15, window_bounds = array<i64: 2, 32, 1>}, {pipeline_mode = #tpu.pipeline_mode<synchronous>, transform_indices = @transform_16, window_bounds = array<i64: 2, 32, 32>}, {pipeline_mode = #tpu.pipeline_mode<synchronous>, transform_indices = @transform_17, window_bounds = array<i64: 2, 32, 1>}, {pipeline_mode = #tpu.pipeline_mode<synchronous>, transform_indices = @transform_18, window_bounds = array<i64: 2, 32, 1>}, {pipeline_mode = #tpu.pipeline_mode<synchronous>, transform_indices = @transform_19, window_bounds = array<i64: 2, 32, 1>}, {pipeline_mode = #tpu.pipeline_mode<synchronous>, transform_indices = @transform_20, window_bounds = array<i64: 2, 64, 32>}, {pipeline_mode = #tpu.pipeline_mode<synchronous>, transform_indices = @transform_21, window_bounds = array<i64: 2, 64, 1>}, {pipeline_mode = #tpu.pipeline_mode<synchronous>, transform_indices = @transform_22, window_bounds = array<i64: 2, 32, 64>}, {pipeline_mode = #tpu.pipeline_mode<synchronous>, transform_indices = @transform_23, window_bounds = array<i64: 2, 32, 1>}, {pipeline_mode = #tpu.pipeline_mode<synchronous>, transform_indices = @transform_24, window_bounds = array<i64: 32, 1>}, {pipeline_mode = #tpu.pipeline_mode<synchronous>, transform_indices = @transform_25, window_bounds = array<i64: 32, 1>}, {pipeline_mode = #tpu.pipeline_mode<synchronous>, transform_indices = @transform_26, window_bounds = array<i64: 8, 32>}, {pipeline_mode = #tpu.pipeline_mode<synchronous>, transform_indices = @transform_27, window_bounds = array<i64: 8, 1>}, {pipeline_mode = #tpu.pipeline_mode<synchronous>, transform_indices = @transform_28, window_bounds = array<i64: 8, 1>}, {transform_indices = @transform_29, window_bounds = array<i64: 1, 8, 256>}]} {
    %0 = tpu.iota {dimensions = array<i32: 1>} : vector<1x256xi32>
    %c16_i32 = arith.constant 16 : i32
    %c0_i32 = arith.constant 0 : i32
    %1 = arith.cmpi eq, %c16_i32, %c0_i32 : i32
    %c1_i32 = arith.constant 1 : i32
    %2 = arith.select %1, %c1_i32, %c16_i32 : i32
    %3 = vector.broadcast %2 : i32 to vector<1x256xi32>
    %4 = arith.remsi %0, %3 : vector<1x256xi32>
    %c0_i32_0 = arith.constant 0 : i32
    %5 = vector.broadcast %c0_i32_0 : i32 to vector<1x256xi32>
    %6 = arith.cmpi ne, %4, %5 : vector<1x256xi32>
    %c0_i32_1 = arith.constant 0 : i32
    %7 = vector.broadcast %c0_i32_1 : i32 to vector<1x256xi32>
    %8 = arith.cmpi slt, %4, %7 : vector<1x256xi32>
    %c0_i32_2 = arith.constant 0 : i32
    %9 = arith.cmpi slt, %2, %c0_i32_2 : i32
    %10 = vector.broadcast %9 : i1 to vector<1x256xi1>
    %11 = vector.broadcast %10 : vector<1x256xi1> to vector<1x256xi1>
    %12 = arith.xori %8, %11 : vector<1x256xi1>
    %13 = arith.andi %12, %6 : vector<1x256xi1>
    %14 = vector.broadcast %2 : i32 to vector<1x256xi32>
    %15 = arith.addi %4, %14 : vector<1x256xi32>
    %16 = arith.select %13, %15, %4 : vector<1x256xi1>, vector<1x256xi32>
    %c1_i32_3 = arith.constant 1 : i32
    %17 = vector.broadcast %c1_i32_3 : i32 to vector<1x256xi32>
    %18 = arith.cmpi sge, %16, %17 : vector<1x256xi32>
    %19 = arith.extui %18 : vector<1x256xi1> to vector<1x256xi32>
    %20 = arith.sitofp %19 : vector<1x256xi32> to vector<1x256xf32>
    %c14_i32 = arith.constant 14 : i32
    %21 = vector.broadcast %c14_i32 : i32 to vector<1x256xi32>
    %22 = arith.cmpi sle, %16, %21 : vector<1x256xi32>
    %23 = arith.extui %22 : vector<1x256xi1> to vector<1x256xi32>
    %24 = arith.sitofp %23 : vector<1x256xi32> to vector<1x256xf32>
    %cst = arith.constant 0.000000e+00 : f32
    %25 = vector.broadcast %cst : f32 to vector<8x256xf32>
    %c0 = arith.constant 0 : index
    %c0_4 = arith.constant 0 : index
    %c15 = arith.constant 15 : index
    %26 = vector.load %arg1[%c0, %c0_4, %c15] : memref<1x8x320xf32, #tpu.memory_space<vmem>>, vector<1x8x256xf32>
    %27 = vector.shape_cast %26 : vector<1x8x256xf32> to vector<8x256xf32>
    %28 = vector.broadcast %20 : vector<1x256xf32> to vector<8x256xf32>
    %29 = arith.mulf %27, %28 : vector<8x256xf32>
    %c0_5 = arith.constant 0 : index
    %c0_6 = arith.constant 0 : index
    %30 = vector.load %arg2[%c0_5, %c0_6] : memref<8x9xf32, #tpu.memory_space<vmem>>, vector<8x1xf32>
    %31 = vector.broadcast %30 : vector<8x1xf32> to vector<8x256xf32>
    %32 = arith.mulf %29, %31 : vector<8x256xf32>
    %33 = arith.addf %25, %32 : vector<8x256xf32>
    %c0_7 = arith.constant 0 : index
    %c0_8 = arith.constant 0 : index
    %c16 = arith.constant 16 : index
    %34 = vector.load %arg1[%c0_7, %c0_8, %c16] : memref<1x8x320xf32, #tpu.memory_space<vmem>>, vector<1x8x256xf32>
    %35 = vector.shape_cast %34 : vector<1x8x256xf32> to vector<8x256xf32>
    %c0_9 = arith.constant 0 : index
    %c1 = arith.constant 1 : index
    %36 = vector.load %arg2[%c0_9, %c1] : memref<8x9xf32, #tpu.memory_space<vmem>>, vector<8x1xf32>
    %37 = vector.broadcast %36 : vector<8x1xf32> to vector<8x256xf32>
    %38 = arith.mulf %35, %37 : vector<8x256xf32>
    %39 = arith.addf %33, %38 : vector<8x256xf32>
    %c0_10 = arith.constant 0 : index
    %c0_11 = arith.constant 0 : index
    %c17 = arith.constant 17 : index
    %40 = vector.load %arg1[%c0_10, %c0_11, %c17] : memref<1x8x320xf32, #tpu.memory_space<vmem>>, vector<1x8x256xf32>
    %41 = vector.shape_cast %40 : vector<1x8x256xf32> to vector<8x256xf32>
    %42 = vector.broadcast %24 : vector<1x256xf32> to vector<8x256xf32>
    %43 = arith.mulf %41, %42 : vector<8x256xf32>
    %c0_12 = arith.constant 0 : index
    %c2 = arith.constant 2 : index
    %44 = vector.load %arg2[%c0_12, %c2] : memref<8x9xf32, #tpu.memory_space<vmem>>, vector<8x1xf32>
    %45 = vector.broadcast %44 : vector<8x1xf32> to vector<8x256xf32>
    %46 = arith.mulf %43, %45 : vector<8x256xf32>
    %47 = arith.addf %39, %46 : vector<8x256xf32>
    %c0_13 = arith.constant 0 : index
    %c0_14 = arith.constant 0 : index
    %c31 = arith.constant 31 : index
    %48 = vector.load %arg1[%c0_13, %c0_14, %c31] : memref<1x8x320xf32, #tpu.memory_space<vmem>>, vector<1x8x256xf32>
    %49 = vector.shape_cast %48 : vector<1x8x256xf32> to vector<8x256xf32>
    %50 = vector.broadcast %20 : vector<1x256xf32> to vector<8x256xf32>
    %51 = arith.mulf %49, %50 : vector<8x256xf32>
    %c0_15 = arith.constant 0 : index
    %c3 = arith.constant 3 : index
    %52 = vector.load %arg2[%c0_15, %c3] : memref<8x9xf32, #tpu.memory_space<vmem>>, vector<8x1xf32>
    %53 = vector.broadcast %52 : vector<8x1xf32> to vector<8x256xf32>
    %54 = arith.mulf %51, %53 : vector<8x256xf32>
    %55 = arith.addf %47, %54 : vector<8x256xf32>
    %c0_16 = arith.constant 0 : index
    %c0_17 = arith.constant 0 : index
    %c32 = arith.constant 32 : index
    %56 = vector.load %arg1[%c0_16, %c0_17, %c32] : memref<1x8x320xf32, #tpu.memory_space<vmem>>, vector<1x8x256xf32>
    %57 = vector.shape_cast %56 : vector<1x8x256xf32> to vector<8x256xf32>
    %c0_18 = arith.constant 0 : index
    %c4 = arith.constant 4 : index
    %58 = vector.load %arg2[%c0_18, %c4] : memref<8x9xf32, #tpu.memory_space<vmem>>, vector<8x1xf32>
    %59 = vector.broadcast %58 : vector<8x1xf32> to vector<8x256xf32>
    %60 = arith.mulf %57, %59 : vector<8x256xf32>
    %61 = arith.addf %55, %60 : vector<8x256xf32>
    %c0_19 = arith.constant 0 : index
    %c0_20 = arith.constant 0 : index
    %c33 = arith.constant 33 : index
    %62 = vector.load %arg1[%c0_19, %c0_20, %c33] : memref<1x8x320xf32, #tpu.memory_space<vmem>>, vector<1x8x256xf32>
    %63 = vector.shape_cast %62 : vector<1x8x256xf32> to vector<8x256xf32>
    %64 = vector.broadcast %24 : vector<1x256xf32> to vector<8x256xf32>
    %65 = arith.mulf %63, %64 : vector<8x256xf32>
    %c0_21 = arith.constant 0 : index
    %c5 = arith.constant 5 : index
    %66 = vector.load %arg2[%c0_21, %c5] : memref<8x9xf32, #tpu.memory_space<vmem>>, vector<8x1xf32>
    %67 = vector.broadcast %66 : vector<8x1xf32> to vector<8x256xf32>
    %68 = arith.mulf %65, %67 : vector<8x256xf32>
    %69 = arith.addf %61, %68 : vector<8x256xf32>
    %c0_22 = arith.constant 0 : index
    %c0_23 = arith.constant 0 : index
    %c47 = arith.constant 47 : index
    %70 = vector.load %arg1[%c0_22, %c0_23, %c47] : memref<1x8x320xf32, #tpu.memory_space<vmem>>, vector<1x8x256xf32>
    %71 = vector.shape_cast %70 : vector<1x8x256xf32> to vector<8x256xf32>
    %72 = vector.broadcast %20 : vector<1x256xf32> to vector<8x256xf32>
    %73 = arith.mulf %71, %72 : vector<8x256xf32>
    %c0_24 = arith.constant 0 : index
    %c6 = arith.constant 6 : index
    %74 = vector.load %arg2[%c0_24, %c6] : memref<8x9xf32, #tpu.memory_space<vmem>>, vector<8x1xf32>
    %75 = vector.broadcast %74 : vector<8x1xf32> to vector<8x256xf32>
    %76 = arith.mulf %73, %75 : vector<8x256xf32>
    %77 = arith.addf %69, %76 : vector<8x256xf32>
    %c0_25 = arith.constant 0 : index
    %c0_26 = arith.constant 0 : index
    %c48 = arith.constant 48 : index
    %78 = vector.load %arg1[%c0_25, %c0_26, %c48] : memref<1x8x320xf32, #tpu.memory_space<vmem>>, vector<1x8x256xf32>
    %79 = vector.shape_cast %78 : vector<1x8x256xf32> to vector<8x256xf32>
    %c0_27 = arith.constant 0 : index
    %c7 = arith.constant 7 : index
    %80 = vector.load %arg2[%c0_27, %c7] : memref<8x9xf32, #tpu.memory_space<vmem>>, vector<8x1xf32>
    %81 = vector.broadcast %80 : vector<8x1xf32> to vector<8x256xf32>
    %82 = arith.mulf %79, %81 : vector<8x256xf32>
    %83 = arith.addf %77, %82 : vector<8x256xf32>
    %c0_28 = arith.constant 0 : index
    %c0_29 = arith.constant 0 : index
    %c49 = arith.constant 49 : index
    %84 = vector.load %arg1[%c0_28, %c0_29, %c49] : memref<1x8x320xf32, #tpu.memory_space<vmem>>, vector<1x8x256xf32>
    %85 = vector.shape_cast %84 : vector<1x8x256xf32> to vector<8x256xf32>
    %86 = vector.broadcast %24 : vector<1x256xf32> to vector<8x256xf32>
    %87 = arith.mulf %85, %86 : vector<8x256xf32>
    %c0_30 = arith.constant 0 : index
    %c8 = arith.constant 8 : index
    %88 = vector.load %arg2[%c0_30, %c8] : memref<8x9xf32, #tpu.memory_space<vmem>>, vector<8x1xf32>
    %89 = vector.broadcast %88 : vector<8x1xf32> to vector<8x256xf32>
    %90 = arith.mulf %87, %89 : vector<8x256xf32>
    %91 = arith.addf %83, %90 : vector<8x256xf32>
    %c0_31 = arith.constant 0 : index
    %c0_32 = arith.constant 0 : index
    %92 = vector.load %arg3[%c0_31, %c0_32] : memref<8x1xf32, #tpu.memory_space<vmem>>, vector<8x1xf32>
    %93 = vector.broadcast %92 : vector<8x1xf32> to vector<8x256xf32>
    %94 = arith.mulf %91, %93 : vector<8x256xf32>
    %c0_33 = arith.constant 0 : index
    %c0_34 = arith.constant 0 : index
    %95 = vector.load %arg4[%c0_33, %c0_34] : memref<8x1xf32, #tpu.memory_space<vmem>>, vector<8x1xf32>
    %96 = vector.broadcast %95 : vector<8x1xf32> to vector<8x256xf32>
    %97 = arith.addf %94, %96 : vector<8x256xf32>
    %98 = arith.negf %97 : vector<8x256xf32>
    %99 = math.exp %98 : vector<8x256xf32>
    %cst_35 = arith.constant 1.000000e+00 : f32
    %100 = vector.broadcast %cst_35 : f32 to vector<8x256xf32>
    %101 = arith.addf %100, %99 : vector<8x256xf32>
    %102 = arith.divf %100, %101 : vector<8x256xf32>
    %103 = arith.mulf %97, %102 : vector<8x256xf32>
    %c0_36 = arith.constant 0 : index
    %c0_37 = arith.constant 0 : index
    %104 = vector.load %arg5[%c0_36, %c0_37] : memref<32x8xf32, #tpu.memory_space<vmem>>, vector<32x8xf32>
    %cst_38 = arith.constant dense<0.000000e+00> : vector<32x256xf32>
    %105 = tpu.matmul %104, %103, %cst_38 {dimension_numbers = #tpu.dot_dimension_numbers<[1], [0], [0], [1], [0, 0, 1, 1], [], []>} : vector<32x8xf32>, vector<8x256xf32>, vector<32x256xf32> -> vector<32x256xf32>
    %c0_39 = arith.constant 0 : index
    %c0_40 = arith.constant 0 : index
    %106 = vector.load %arg6[%c0_39, %c0_40] : memref<256x256xf32, #tpu.memory_space<vmem>>, vector<256x256xf32>
    %cst_41 = arith.constant dense<0.000000e+00> : vector<32x256xf32>
    %107 = tpu.matmul %105, %106, %cst_41 {dimension_numbers = #tpu.dot_dimension_numbers<[1], [0], [0], [1], [0, 0, 1, 1], [], []>} : vector<32x256xf32>, vector<256x256xf32>, vector<32x256xf32> -> vector<32x256xf32>
    %c0_42 = arith.constant 0 : index
    %c0_43 = arith.constant 0 : index
    %c0_44 = arith.constant 0 : index
    %108 = vector.load %arg9[%c0_42, %c0_43, %c0_44] : memref<2x32x1xf32, #tpu.memory_space<vmem>>, vector<1x32x1xf32>
    %109 = vector.shape_cast %108 : vector<1x32x1xf32> to vector<32x1xf32>
    %c0_45 = arith.constant 0 : index
    %c0_46 = arith.constant 0 : index
    %c0_47 = arith.constant 0 : index
    %110 = vector.load %arg10[%c0_45, %c0_46, %c0_47] : memref<2x32x1xf32, #tpu.memory_space<vmem>>, vector<1x32x1xf32>
    %111 = vector.shape_cast %110 : vector<1x32x1xf32> to vector<32x1xf32>
    %112 = vector.shape_cast %107 : vector<32x256xf32> to vector<1x32x256xf32>
    %cst_48 = arith.constant dense<0.000000e+00> : vector<1xf32>
    %113 = vector.multi_reduction <add>, %112, %cst_48 [1, 2] : vector<1x32x256xf32> to vector<1xf32>
    %114 = vector.shape_cast %113 : vector<1xf32> to vector<1x1x1xf32>
    %115 = vector.extract %114[0, 0, 0] : f32 from vector<1x1x1xf32>
    %cst_49 = arith.constant 1.22070313E-4 : f32
    %116 = arith.mulf %115, %cst_49 : f32
    %117 = arith.mulf %107, %107 : vector<32x256xf32>
    %118 = vector.shape_cast %117 : vector<32x256xf32> to vector<1x32x256xf32>
    %cst_50 = arith.constant dense<0.000000e+00> : vector<1xf32>
    %119 = vector.multi_reduction <add>, %118, %cst_50 [1, 2] : vector<1x32x256xf32> to vector<1xf32>
    %120 = vector.shape_cast %119 : vector<1xf32> to vector<1x1x1xf32>
    %121 = vector.extract %120[0, 0, 0] : f32 from vector<1x1x1xf32>
    %cst_51 = arith.constant 1.22070313E-4 : f32
    %122 = arith.mulf %121, %cst_51 : f32
    %123 = arith.mulf %116, %116 : f32
    %124 = arith.subf %122, %123 : f32
    %125 = vector.broadcast %116 : f32 to vector<32x256xf32>
    %126 = arith.subf %107, %125 : vector<32x256xf32>
    %cst_52 = arith.constant 9.99999974E-6 : f32
    %127 = arith.addf %124, %cst_52 : f32
    %128 = math.rsqrt %127 : f32
    %129 = vector.broadcast %128 : f32 to vector<32x256xf32>
    %130 = arith.mulf %126, %129 : vector<32x256xf32>
    %131 = vector.broadcast %109 : vector<32x1xf32> to vector<32x256xf32>
    %132 = arith.mulf %130, %131 : vector<32x256xf32>
    %133 = vector.broadcast %111 : vector<32x1xf32> to vector<32x256xf32>
    %134 = arith.addf %132, %133 : vector<32x256xf32>
    %c0_53 = arith.constant 0 : index
    %c0_54 = arith.constant 0 : index
    %c0_55 = arith.constant 0 : index
    %135 = vector.load %arg11[%c0_53, %c0_54, %c0_55] : memref<2x32x1xf32, #tpu.memory_space<vmem>>, vector<1x32x1xf32>
    %136 = vector.shape_cast %135 : vector<1x32x1xf32> to vector<32x1xf32>
    %137 = vector.broadcast %136 : vector<32x1xf32> to vector<32x256xf32>
    %138 = arith.mulf %134, %137 : vector<32x256xf32>
    %cst_56 = arith.constant dense<0.000000e+00> : vector<256xf32>
    %139 = vector.multi_reduction <add>, %138, %cst_56 [0] : vector<32x256xf32> to vector<256xf32>
    %140 = vector.shape_cast %139 : vector<256xf32> to vector<1x256xf32>
    %c0_57 = arith.constant 0 : index
    %c0_58 = arith.constant 0 : index
    %c0_59 = arith.constant 0 : index
    %141 = vector.load %arg12[%c0_57, %c0_58, %c0_59] : memref<2x1x1xf32, #tpu.memory_space<vmem>>, vector<1x1x1xf32>
    %142 = vector.shape_cast %141 : vector<1x1x1xf32> to vector<1x1xf32>
    %143 = vector.broadcast %142 : vector<1x1xf32> to vector<1x256xf32>
    %144 = arith.addf %140, %143 : vector<1x256xf32>
    %c0_60 = arith.constant 0 : index
    %c0_61 = arith.constant 0 : index
    %c0_62 = arith.constant 0 : index
    %145 = vector.load %arg13[%c0_60, %c0_61, %c0_62] : memref<2x32x32xf32, #tpu.memory_space<vmem>>, vector<1x32x32xf32>
    %146 = vector.shape_cast %145 : vector<1x32x32xf32> to vector<32x32xf32>
    %cst_63 = arith.constant dense<0.000000e+00> : vector<32x256xf32>
    %147 = tpu.matmul %146, %134, %cst_63 {dimension_numbers = #tpu.dot_dimension_numbers<[1], [0], [0], [1], [0, 0, 1, 1], [], []>} : vector<32x32xf32>, vector<32x256xf32>, vector<32x256xf32> -> vector<32x256xf32>
    %c0_64 = arith.constant 0 : index
    %c0_65 = arith.constant 0 : index
    %c0_66 = arith.constant 0 : index
    %148 = vector.load %arg14[%c0_64, %c0_65, %c0_66] : memref<2x32x1xf32, #tpu.memory_space<vmem>>, vector<1x32x1xf32>
    %149 = vector.shape_cast %148 : vector<1x32x1xf32> to vector<32x1xf32>
    %150 = vector.broadcast %149 : vector<32x1xf32> to vector<32x256xf32>
    %151 = arith.addf %147, %150 : vector<32x256xf32>
    %c0_67 = arith.constant 0 : index
    %c0_68 = arith.constant 0 : index
    %c0_69 = arith.constant 0 : index
    %152 = vector.load %arg15[%c0_67, %c0_68, %c0_69] : memref<2x32x32xf32, #tpu.memory_space<vmem>>, vector<1x32x32xf32>
    %153 = vector.shape_cast %152 : vector<1x32x32xf32> to vector<32x32xf32>
    %cst_70 = arith.constant dense<0.000000e+00> : vector<32x256xf32>
    %154 = tpu.matmul %153, %134, %cst_70 {dimension_numbers = #tpu.dot_dimension_numbers<[1], [0], [0], [1], [0, 0, 1, 1], [], []>} : vector<32x32xf32>, vector<32x256xf32>, vector<32x256xf32> -> vector<32x256xf32>
    %c0_71 = arith.constant 0 : index
    %c0_72 = arith.constant 0 : index
    %c0_73 = arith.constant 0 : index
    %155 = vector.load %arg16[%c0_71, %c0_72, %c0_73] : memref<2x32x1xf32, #tpu.memory_space<vmem>>, vector<1x32x1xf32>
    %156 = vector.shape_cast %155 : vector<1x32x1xf32> to vector<32x1xf32>
    %157 = vector.broadcast %156 : vector<32x1xf32> to vector<32x256xf32>
    %158 = arith.addf %154, %157 : vector<32x256xf32>
    %159 = vector.shape_cast %144 : vector<1x256xf32> to vector<1x1x256xf32>
    %cst_74 = arith.constant dense<0xFF800000> : vector<1xf32>
    %160 = vector.multi_reduction <maximumf>, %159, %cst_74 [1, 2] : vector<1x1x256xf32> to vector<1xf32>
    %161 = vector.shape_cast %160 : vector<1xf32> to vector<1x1x1xf32>
    %162 = vector.extract %161[0, 0, 0] : f32 from vector<1x1x1xf32>
    %163 = vector.broadcast %162 : f32 to vector<1x256xf32>
    %164 = arith.subf %144, %163 : vector<1x256xf32>
    %165 = math.exp %164 : vector<1x256xf32>
    %166 = vector.broadcast %165 : vector<1x256xf32> to vector<32x256xf32>
    %167 = arith.mulf %151, %166 : vector<32x256xf32>
    %c0_75 = arith.constant 0 : index
    %c0_76 = arith.constant 0 : index
    %168 = vector.load %arg8[%c0_75, %c0_76] : memref<256x256xf32, #tpu.memory_space<vmem>>, vector<256x256xf32>
    %cst_77 = arith.constant dense<0.000000e+00> : vector<32x256xf32>
    %169 = tpu.matmul %167, %168, %cst_77 {dimension_numbers = #tpu.dot_dimension_numbers<[1], [0], [0], [1], [0, 0, 1, 1], [], []>} : vector<32x256xf32>, vector<256x256xf32>, vector<32x256xf32> -> vector<32x256xf32>
    %170 = vector.shape_cast %165 : vector<1x256xf32> to vector<1x256xf32>
    %171 = vector.broadcast %170 : vector<1x256xf32> to vector<32x256xf32>
    %c0_78 = arith.constant 0 : index
    %c0_79 = arith.constant 0 : index
    %172 = vector.load %arg8[%c0_78, %c0_79] : memref<256x256xf32, #tpu.memory_space<vmem>>, vector<256x256xf32>
    %cst_80 = arith.constant dense<0.000000e+00> : vector<32x256xf32>
    %173 = tpu.matmul %171, %172, %cst_80 {dimension_numbers = #tpu.dot_dimension_numbers<[1], [0], [0], [1], [0, 0, 1, 1], [], []>} : vector<32x256xf32>, vector<256x256xf32>, vector<32x256xf32> -> vector<32x256xf32>
    %174 = arith.divf %169, %173 : vector<32x256xf32>
    %cst_81 = arith.constant 0.000000e+00 : f32
    %175 = vector.broadcast %cst_81 : f32 to vector<32x256xf32>
    %176 = arith.maximumf %158, %175 : vector<32x256xf32>
    %177 = arith.mulf %176, %174 : vector<32x256xf32>
    %c0_82 = arith.constant 0 : index
    %c0_83 = arith.constant 0 : index
    %c0_84 = arith.constant 0 : index
    %178 = vector.load %arg17[%c0_82, %c0_83, %c0_84] : memref<2x32x32xf32, #tpu.memory_space<vmem>>, vector<1x32x32xf32>
    %179 = vector.shape_cast %178 : vector<1x32x32xf32> to vector<32x32xf32>
    %cst_85 = arith.constant dense<0.000000e+00> : vector<32x256xf32>
    %180 = tpu.matmul %179, %177, %cst_85 {dimension_numbers = #tpu.dot_dimension_numbers<[1], [0], [0], [1], [0, 0, 1, 1], [], []>} : vector<32x32xf32>, vector<32x256xf32>, vector<32x256xf32> -> vector<32x256xf32>
    %c0_86 = arith.constant 0 : index
    %c0_87 = arith.constant 0 : index
    %c0_88 = arith.constant 0 : index
    %181 = vector.load %arg18[%c0_86, %c0_87, %c0_88] : memref<2x32x1xf32, #tpu.memory_space<vmem>>, vector<1x32x1xf32>
    %182 = vector.shape_cast %181 : vector<1x32x1xf32> to vector<32x1xf32>
    %183 = vector.broadcast %182 : vector<32x1xf32> to vector<32x256xf32>
    %184 = arith.addf %180, %183 : vector<32x256xf32>
    %185 = arith.addf %107, %184 : vector<32x256xf32>
    %c0_89 = arith.constant 0 : index
    %c0_90 = arith.constant 0 : index
    %c0_91 = arith.constant 0 : index
    %186 = vector.load %arg19[%c0_89, %c0_90, %c0_91] : memref<2x32x1xf32, #tpu.memory_space<vmem>>, vector<1x32x1xf32>
    %187 = vector.shape_cast %186 : vector<1x32x1xf32> to vector<32x1xf32>
    %c0_92 = arith.constant 0 : index
    %c0_93 = arith.constant 0 : index
    %c0_94 = arith.constant 0 : index
    %188 = vector.load %arg20[%c0_92, %c0_93, %c0_94] : memref<2x32x1xf32, #tpu.memory_space<vmem>>, vector<1x32x1xf32>
    %189 = vector.shape_cast %188 : vector<1x32x1xf32> to vector<32x1xf32>
    %190 = vector.shape_cast %185 : vector<32x256xf32> to vector<1x32x256xf32>
    %cst_95 = arith.constant dense<0.000000e+00> : vector<1xf32>
    %191 = vector.multi_reduction <add>, %190, %cst_95 [1, 2] : vector<1x32x256xf32> to vector<1xf32>
    %192 = vector.shape_cast %191 : vector<1xf32> to vector<1x1x1xf32>
    %193 = vector.extract %192[0, 0, 0] : f32 from vector<1x1x1xf32>
    %cst_96 = arith.constant 1.22070313E-4 : f32
    %194 = arith.mulf %193, %cst_96 : f32
    %195 = arith.mulf %185, %185 : vector<32x256xf32>
    %196 = vector.shape_cast %195 : vector<32x256xf32> to vector<1x32x256xf32>
    %cst_97 = arith.constant dense<0.000000e+00> : vector<1xf32>
    %197 = vector.multi_reduction <add>, %196, %cst_97 [1, 2] : vector<1x32x256xf32> to vector<1xf32>
    %198 = vector.shape_cast %197 : vector<1xf32> to vector<1x1x1xf32>
    %199 = vector.extract %198[0, 0, 0] : f32 from vector<1x1x1xf32>
    %cst_98 = arith.constant 1.22070313E-4 : f32
    %200 = arith.mulf %199, %cst_98 : f32
    %201 = arith.mulf %194, %194 : f32
    %202 = arith.subf %200, %201 : f32
    %203 = vector.broadcast %194 : f32 to vector<32x256xf32>
    %204 = arith.subf %185, %203 : vector<32x256xf32>
    %cst_99 = arith.constant 9.99999974E-6 : f32
    %205 = arith.addf %202, %cst_99 : f32
    %206 = math.rsqrt %205 : f32
    %207 = vector.broadcast %206 : f32 to vector<32x256xf32>
    %208 = arith.mulf %204, %207 : vector<32x256xf32>
    %209 = vector.broadcast %187 : vector<32x1xf32> to vector<32x256xf32>
    %210 = arith.mulf %208, %209 : vector<32x256xf32>
    %211 = vector.broadcast %189 : vector<32x1xf32> to vector<32x256xf32>
    %212 = arith.addf %210, %211 : vector<32x256xf32>
    %c0_100 = arith.constant 0 : index
    %c0_101 = arith.constant 0 : index
    %c0_102 = arith.constant 0 : index
    %213 = vector.load %arg21[%c0_100, %c0_101, %c0_102] : memref<2x64x32xf32, #tpu.memory_space<vmem>>, vector<1x64x32xf32>
    %214 = vector.shape_cast %213 : vector<1x64x32xf32> to vector<64x32xf32>
    %cst_103 = arith.constant dense<0.000000e+00> : vector<64x256xf32>
    %215 = tpu.matmul %214, %212, %cst_103 {dimension_numbers = #tpu.dot_dimension_numbers<[1], [0], [0], [1], [0, 0, 1, 1], [], []>} : vector<64x32xf32>, vector<32x256xf32>, vector<64x256xf32> -> vector<64x256xf32>
    %c0_104 = arith.constant 0 : index
    %c0_105 = arith.constant 0 : index
    %c0_106 = arith.constant 0 : index
    %216 = vector.load %arg22[%c0_104, %c0_105, %c0_106] : memref<2x64x1xf32, #tpu.memory_space<vmem>>, vector<1x64x1xf32>
    %217 = vector.shape_cast %216 : vector<1x64x1xf32> to vector<64x1xf32>
    %218 = vector.broadcast %217 : vector<64x1xf32> to vector<64x256xf32>
    %219 = arith.addf %215, %218 : vector<64x256xf32>
    %220 = arith.negf %219 : vector<64x256xf32>
    %221 = math.exp %220 : vector<64x256xf32>
    %cst_107 = arith.constant 1.000000e+00 : f32
    %222 = vector.broadcast %cst_107 : f32 to vector<64x256xf32>
    %223 = arith.addf %222, %221 : vector<64x256xf32>
    %224 = arith.divf %222, %223 : vector<64x256xf32>
    %225 = arith.mulf %219, %224 : vector<64x256xf32>
    %c0_108 = arith.constant 0 : index
    %c0_109 = arith.constant 0 : index
    %c0_110 = arith.constant 0 : index
    %226 = vector.load %arg23[%c0_108, %c0_109, %c0_110] : memref<2x32x64xf32, #tpu.memory_space<vmem>>, vector<1x32x64xf32>
    %227 = vector.shape_cast %226 : vector<1x32x64xf32> to vector<32x64xf32>
    %cst_111 = arith.constant dense<0.000000e+00> : vector<32x256xf32>
    %228 = tpu.matmul %227, %225, %cst_111 {dimension_numbers = #tpu.dot_dimension_numbers<[1], [0], [0], [1], [0, 0, 1, 1], [], []>} : vector<32x64xf32>, vector<64x256xf32>, vector<32x256xf32> -> vector<32x256xf32>
    %c0_112 = arith.constant 0 : index
    %c0_113 = arith.constant 0 : index
    %c0_114 = arith.constant 0 : index
    %229 = vector.load %arg24[%c0_112, %c0_113, %c0_114] : memref<2x32x1xf32, #tpu.memory_space<vmem>>, vector<1x32x1xf32>
    %230 = vector.shape_cast %229 : vector<1x32x1xf32> to vector<32x1xf32>
    %231 = vector.broadcast %230 : vector<32x1xf32> to vector<32x256xf32>
    %232 = arith.addf %228, %231 : vector<32x256xf32>
    %233 = arith.addf %185, %232 : vector<32x256xf32>
    %c1_115 = arith.constant 1 : index
    %c0_116 = arith.constant 0 : index
    %c0_117 = arith.constant 0 : index
    %234 = vector.load %arg9[%c1_115, %c0_116, %c0_117] : memref<2x32x1xf32, #tpu.memory_space<vmem>>, vector<1x32x1xf32>
    %235 = vector.shape_cast %234 : vector<1x32x1xf32> to vector<32x1xf32>
    %c1_118 = arith.constant 1 : index
    %c0_119 = arith.constant 0 : index
    %c0_120 = arith.constant 0 : index
    %236 = vector.load %arg10[%c1_118, %c0_119, %c0_120] : memref<2x32x1xf32, #tpu.memory_space<vmem>>, vector<1x32x1xf32>
    %237 = vector.shape_cast %236 : vector<1x32x1xf32> to vector<32x1xf32>
    %238 = vector.shape_cast %233 : vector<32x256xf32> to vector<1x32x256xf32>
    %cst_121 = arith.constant dense<0.000000e+00> : vector<1xf32>
    %239 = vector.multi_reduction <add>, %238, %cst_121 [1, 2] : vector<1x32x256xf32> to vector<1xf32>
    %240 = vector.shape_cast %239 : vector<1xf32> to vector<1x1x1xf32>
    %241 = vector.extract %240[0, 0, 0] : f32 from vector<1x1x1xf32>
    %cst_122 = arith.constant 1.22070313E-4 : f32
    %242 = arith.mulf %241, %cst_122 : f32
    %243 = arith.mulf %233, %233 : vector<32x256xf32>
    %244 = vector.shape_cast %243 : vector<32x256xf32> to vector<1x32x256xf32>
    %cst_123 = arith.constant dense<0.000000e+00> : vector<1xf32>
    %245 = vector.multi_reduction <add>, %244, %cst_123 [1, 2] : vector<1x32x256xf32> to vector<1xf32>
    %246 = vector.shape_cast %245 : vector<1xf32> to vector<1x1x1xf32>
    %247 = vector.extract %246[0, 0, 0] : f32 from vector<1x1x1xf32>
    %cst_124 = arith.constant 1.22070313E-4 : f32
    %248 = arith.mulf %247, %cst_124 : f32
    %249 = arith.mulf %242, %242 : f32
    %250 = arith.subf %248, %249 : f32
    %251 = vector.broadcast %242 : f32 to vector<32x256xf32>
    %252 = arith.subf %233, %251 : vector<32x256xf32>
    %cst_125 = arith.constant 9.99999974E-6 : f32
    %253 = arith.addf %250, %cst_125 : f32
    %254 = math.rsqrt %253 : f32
    %255 = vector.broadcast %254 : f32 to vector<32x256xf32>
    %256 = arith.mulf %252, %255 : vector<32x256xf32>
    %257 = vector.broadcast %235 : vector<32x1xf32> to vector<32x256xf32>
    %258 = arith.mulf %256, %257 : vector<32x256xf32>
    %259 = vector.broadcast %237 : vector<32x1xf32> to vector<32x256xf32>
    %260 = arith.addf %258, %259 : vector<32x256xf32>
    %c1_126 = arith.constant 1 : index
    %c0_127 = arith.constant 0 : index
    %c0_128 = arith.constant 0 : index
    %261 = vector.load %arg11[%c1_126, %c0_127, %c0_128] : memref<2x32x1xf32, #tpu.memory_space<vmem>>, vector<1x32x1xf32>
    %262 = vector.shape_cast %261 : vector<1x32x1xf32> to vector<32x1xf32>
    %263 = vector.broadcast %262 : vector<32x1xf32> to vector<32x256xf32>
    %264 = arith.mulf %260, %263 : vector<32x256xf32>
    %cst_129 = arith.constant dense<0.000000e+00> : vector<256xf32>
    %265 = vector.multi_reduction <add>, %264, %cst_129 [0] : vector<32x256xf32> to vector<256xf32>
    %266 = vector.shape_cast %265 : vector<256xf32> to vector<1x256xf32>
    %c1_130 = arith.constant 1 : index
    %c0_131 = arith.constant 0 : index
    %c0_132 = arith.constant 0 : index
    %267 = vector.load %arg12[%c1_130, %c0_131, %c0_132] : memref<2x1x1xf32, #tpu.memory_space<vmem>>, vector<1x1x1xf32>
    %268 = vector.shape_cast %267 : vector<1x1x1xf32> to vector<1x1xf32>
    %269 = vector.broadcast %268 : vector<1x1xf32> to vector<1x256xf32>
    %270 = arith.addf %266, %269 : vector<1x256xf32>
    %c1_133 = arith.constant 1 : index
    %c0_134 = arith.constant 0 : index
    %c0_135 = arith.constant 0 : index
    %271 = vector.load %arg13[%c1_133, %c0_134, %c0_135] : memref<2x32x32xf32, #tpu.memory_space<vmem>>, vector<1x32x32xf32>
    %272 = vector.shape_cast %271 : vector<1x32x32xf32> to vector<32x32xf32>
    %cst_136 = arith.constant dense<0.000000e+00> : vector<32x256xf32>
    %273 = tpu.matmul %272, %260, %cst_136 {dimension_numbers = #tpu.dot_dimension_numbers<[1], [0], [0], [1], [0, 0, 1, 1], [], []>} : vector<32x32xf32>, vector<32x256xf32>, vector<32x256xf32> -> vector<32x256xf32>
    %c1_137 = arith.constant 1 : index
    %c0_138 = arith.constant 0 : index
    %c0_139 = arith.constant 0 : index
    %274 = vector.load %arg14[%c1_137, %c0_138, %c0_139] : memref<2x32x1xf32, #tpu.memory_space<vmem>>, vector<1x32x1xf32>
    %275 = vector.shape_cast %274 : vector<1x32x1xf32> to vector<32x1xf32>
    %276 = vector.broadcast %275 : vector<32x1xf32> to vector<32x256xf32>
    %277 = arith.addf %273, %276 : vector<32x256xf32>
    %c1_140 = arith.constant 1 : index
    %c0_141 = arith.constant 0 : index
    %c0_142 = arith.constant 0 : index
    %278 = vector.load %arg15[%c1_140, %c0_141, %c0_142] : memref<2x32x32xf32, #tpu.memory_space<vmem>>, vector<1x32x32xf32>
    %279 = vector.shape_cast %278 : vector<1x32x32xf32> to vector<32x32xf32>
    %cst_143 = arith.constant dense<0.000000e+00> : vector<32x256xf32>
    %280 = tpu.matmul %279, %260, %cst_143 {dimension_numbers = #tpu.dot_dimension_numbers<[1], [0], [0], [1], [0, 0, 1, 1], [], []>} : vector<32x32xf32>, vector<32x256xf32>, vector<32x256xf32> -> vector<32x256xf32>
    %c1_144 = arith.constant 1 : index
    %c0_145 = arith.constant 0 : index
    %c0_146 = arith.constant 0 : index
    %281 = vector.load %arg16[%c1_144, %c0_145, %c0_146] : memref<2x32x1xf32, #tpu.memory_space<vmem>>, vector<1x32x1xf32>
    %282 = vector.shape_cast %281 : vector<1x32x1xf32> to vector<32x1xf32>
    %283 = vector.broadcast %282 : vector<32x1xf32> to vector<32x256xf32>
    %284 = arith.addf %280, %283 : vector<32x256xf32>
    %285 = vector.shape_cast %270 : vector<1x256xf32> to vector<1x1x256xf32>
    %cst_147 = arith.constant dense<0xFF800000> : vector<1xf32>
    %286 = vector.multi_reduction <maximumf>, %285, %cst_147 [1, 2] : vector<1x1x256xf32> to vector<1xf32>
    %287 = vector.shape_cast %286 : vector<1xf32> to vector<1x1x1xf32>
    %288 = vector.extract %287[0, 0, 0] : f32 from vector<1x1x1xf32>
    %289 = vector.broadcast %288 : f32 to vector<1x256xf32>
    %290 = arith.subf %270, %289 : vector<1x256xf32>
    %291 = math.exp %290 : vector<1x256xf32>
    %292 = vector.broadcast %291 : vector<1x256xf32> to vector<32x256xf32>
    %293 = arith.mulf %277, %292 : vector<32x256xf32>
    %c0_148 = arith.constant 0 : index
    %c0_149 = arith.constant 0 : index
    %294 = vector.load %arg8[%c0_148, %c0_149] : memref<256x256xf32, #tpu.memory_space<vmem>>, vector<256x256xf32>
    %cst_150 = arith.constant dense<0.000000e+00> : vector<32x256xf32>
    %295 = tpu.matmul %293, %294, %cst_150 {dimension_numbers = #tpu.dot_dimension_numbers<[1], [0], [0], [1], [0, 0, 1, 1], [], []>} : vector<32x256xf32>, vector<256x256xf32>, vector<32x256xf32> -> vector<32x256xf32>
    %296 = vector.shape_cast %291 : vector<1x256xf32> to vector<1x256xf32>
    %297 = vector.broadcast %296 : vector<1x256xf32> to vector<32x256xf32>
    %c0_151 = arith.constant 0 : index
    %c0_152 = arith.constant 0 : index
    %298 = vector.load %arg8[%c0_151, %c0_152] : memref<256x256xf32, #tpu.memory_space<vmem>>, vector<256x256xf32>
    %cst_153 = arith.constant dense<0.000000e+00> : vector<32x256xf32>
    %299 = tpu.matmul %297, %298, %cst_153 {dimension_numbers = #tpu.dot_dimension_numbers<[1], [0], [0], [1], [0, 0, 1, 1], [], []>} : vector<32x256xf32>, vector<256x256xf32>, vector<32x256xf32> -> vector<32x256xf32>
    %300 = arith.divf %295, %299 : vector<32x256xf32>
    %cst_154 = arith.constant 0.000000e+00 : f32
    %301 = vector.broadcast %cst_154 : f32 to vector<32x256xf32>
    %302 = arith.maximumf %284, %301 : vector<32x256xf32>
    %303 = arith.mulf %302, %300 : vector<32x256xf32>
    %c1_155 = arith.constant 1 : index
    %c0_156 = arith.constant 0 : index
    %c0_157 = arith.constant 0 : index
    %304 = vector.load %arg17[%c1_155, %c0_156, %c0_157] : memref<2x32x32xf32, #tpu.memory_space<vmem>>, vector<1x32x32xf32>
    %305 = vector.shape_cast %304 : vector<1x32x32xf32> to vector<32x32xf32>
    %cst_158 = arith.constant dense<0.000000e+00> : vector<32x256xf32>
    %306 = tpu.matmul %305, %303, %cst_158 {dimension_numbers = #tpu.dot_dimension_numbers<[1], [0], [0], [1], [0, 0, 1, 1], [], []>} : vector<32x32xf32>, vector<32x256xf32>, vector<32x256xf32> -> vector<32x256xf32>
    %c1_159 = arith.constant 1 : index
    %c0_160 = arith.constant 0 : index
    %c0_161 = arith.constant 0 : index
    %307 = vector.load %arg18[%c1_159, %c0_160, %c0_161] : memref<2x32x1xf32, #tpu.memory_space<vmem>>, vector<1x32x1xf32>
    %308 = vector.shape_cast %307 : vector<1x32x1xf32> to vector<32x1xf32>
    %309 = vector.broadcast %308 : vector<32x1xf32> to vector<32x256xf32>
    %310 = arith.addf %306, %309 : vector<32x256xf32>
    %311 = arith.addf %233, %310 : vector<32x256xf32>
    %c1_162 = arith.constant 1 : index
    %c0_163 = arith.constant 0 : index
    %c0_164 = arith.constant 0 : index
    %312 = vector.load %arg19[%c1_162, %c0_163, %c0_164] : memref<2x32x1xf32, #tpu.memory_space<vmem>>, vector<1x32x1xf32>
    %313 = vector.shape_cast %312 : vector<1x32x1xf32> to vector<32x1xf32>
    %c1_165 = arith.constant 1 : index
    %c0_166 = arith.constant 0 : index
    %c0_167 = arith.constant 0 : index
    %314 = vector.load %arg20[%c1_165, %c0_166, %c0_167] : memref<2x32x1xf32, #tpu.memory_space<vmem>>, vector<1x32x1xf32>
    %315 = vector.shape_cast %314 : vector<1x32x1xf32> to vector<32x1xf32>
    %316 = vector.shape_cast %311 : vector<32x256xf32> to vector<1x32x256xf32>
    %cst_168 = arith.constant dense<0.000000e+00> : vector<1xf32>
    %317 = vector.multi_reduction <add>, %316, %cst_168 [1, 2] : vector<1x32x256xf32> to vector<1xf32>
    %318 = vector.shape_cast %317 : vector<1xf32> to vector<1x1x1xf32>
    %319 = vector.extract %318[0, 0, 0] : f32 from vector<1x1x1xf32>
    %cst_169 = arith.constant 1.22070313E-4 : f32
    %320 = arith.mulf %319, %cst_169 : f32
    %321 = arith.mulf %311, %311 : vector<32x256xf32>
    %322 = vector.shape_cast %321 : vector<32x256xf32> to vector<1x32x256xf32>
    %cst_170 = arith.constant dense<0.000000e+00> : vector<1xf32>
    %323 = vector.multi_reduction <add>, %322, %cst_170 [1, 2] : vector<1x32x256xf32> to vector<1xf32>
    %324 = vector.shape_cast %323 : vector<1xf32> to vector<1x1x1xf32>
    %325 = vector.extract %324[0, 0, 0] : f32 from vector<1x1x1xf32>
    %cst_171 = arith.constant 1.22070313E-4 : f32
    %326 = arith.mulf %325, %cst_171 : f32
    %327 = arith.mulf %320, %320 : f32
    %328 = arith.subf %326, %327 : f32
    %329 = vector.broadcast %320 : f32 to vector<32x256xf32>
    %330 = arith.subf %311, %329 : vector<32x256xf32>
    %cst_172 = arith.constant 9.99999974E-6 : f32
    %331 = arith.addf %328, %cst_172 : f32
    %332 = math.rsqrt %331 : f32
    %333 = vector.broadcast %332 : f32 to vector<32x256xf32>
    %334 = arith.mulf %330, %333 : vector<32x256xf32>
    %335 = vector.broadcast %313 : vector<32x1xf32> to vector<32x256xf32>
    %336 = arith.mulf %334, %335 : vector<32x256xf32>
    %337 = vector.broadcast %315 : vector<32x1xf32> to vector<32x256xf32>
    %338 = arith.addf %336, %337 : vector<32x256xf32>
    %c1_173 = arith.constant 1 : index
    %c0_174 = arith.constant 0 : index
    %c0_175 = arith.constant 0 : index
    %339 = vector.load %arg21[%c1_173, %c0_174, %c0_175] : memref<2x64x32xf32, #tpu.memory_space<vmem>>, vector<1x64x32xf32>
    %340 = vector.shape_cast %339 : vector<1x64x32xf32> to vector<64x32xf32>
    %cst_176 = arith.constant dense<0.000000e+00> : vector<64x256xf32>
    %341 = tpu.matmul %340, %338, %cst_176 {dimension_numbers = #tpu.dot_dimension_numbers<[1], [0], [0], [1], [0, 0, 1, 1], [], []>} : vector<64x32xf32>, vector<32x256xf32>, vector<64x256xf32> -> vector<64x256xf32>
    %c1_177 = arith.constant 1 : index
    %c0_178 = arith.constant 0 : index
    %c0_179 = arith.constant 0 : index
    %342 = vector.load %arg22[%c1_177, %c0_178, %c0_179] : memref<2x64x1xf32, #tpu.memory_space<vmem>>, vector<1x64x1xf32>
    %343 = vector.shape_cast %342 : vector<1x64x1xf32> to vector<64x1xf32>
    %344 = vector.broadcast %343 : vector<64x1xf32> to vector<64x256xf32>
    %345 = arith.addf %341, %344 : vector<64x256xf32>
    %346 = arith.negf %345 : vector<64x256xf32>
    %347 = math.exp %346 : vector<64x256xf32>
    %cst_180 = arith.constant 1.000000e+00 : f32
    %348 = vector.broadcast %cst_180 : f32 to vector<64x256xf32>
    %349 = arith.addf %348, %347 : vector<64x256xf32>
    %350 = arith.divf %348, %349 : vector<64x256xf32>
    %351 = arith.mulf %345, %350 : vector<64x256xf32>
    %c1_181 = arith.constant 1 : index
    %c0_182 = arith.constant 0 : index
    %c0_183 = arith.constant 0 : index
    %352 = vector.load %arg23[%c1_181, %c0_182, %c0_183] : memref<2x32x64xf32, #tpu.memory_space<vmem>>, vector<1x32x64xf32>
    %353 = vector.shape_cast %352 : vector<1x32x64xf32> to vector<32x64xf32>
    %cst_184 = arith.constant dense<0.000000e+00> : vector<32x256xf32>
    %354 = tpu.matmul %353, %351, %cst_184 {dimension_numbers = #tpu.dot_dimension_numbers<[1], [0], [0], [1], [0, 0, 1, 1], [], []>} : vector<32x64xf32>, vector<64x256xf32>, vector<32x256xf32> -> vector<32x256xf32>
    %c1_185 = arith.constant 1 : index
    %c0_186 = arith.constant 0 : index
    %c0_187 = arith.constant 0 : index
    %355 = vector.load %arg24[%c1_185, %c0_186, %c0_187] : memref<2x32x1xf32, #tpu.memory_space<vmem>>, vector<1x32x1xf32>
    %356 = vector.shape_cast %355 : vector<1x32x1xf32> to vector<32x1xf32>
    %357 = vector.broadcast %356 : vector<32x1xf32> to vector<32x256xf32>
    %358 = arith.addf %354, %357 : vector<32x256xf32>
    %359 = arith.addf %311, %358 : vector<32x256xf32>
    %c0_188 = arith.constant 0 : index
    %c0_189 = arith.constant 0 : index
    %360 = vector.load %arg25[%c0_188, %c0_189] : memref<32x1xf32, #tpu.memory_space<vmem>>, vector<32x1xf32>
    %c0_190 = arith.constant 0 : index
    %c0_191 = arith.constant 0 : index
    %361 = vector.load %arg26[%c0_190, %c0_191] : memref<32x1xf32, #tpu.memory_space<vmem>>, vector<32x1xf32>
    %362 = vector.shape_cast %359 : vector<32x256xf32> to vector<1x32x256xf32>
    %cst_192 = arith.constant dense<0.000000e+00> : vector<1xf32>
    %363 = vector.multi_reduction <add>, %362, %cst_192 [1, 2] : vector<1x32x256xf32> to vector<1xf32>
    %364 = vector.shape_cast %363 : vector<1xf32> to vector<1x1x1xf32>
    %365 = vector.extract %364[0, 0, 0] : f32 from vector<1x1x1xf32>
    %cst_193 = arith.constant 1.22070313E-4 : f32
    %366 = arith.mulf %365, %cst_193 : f32
    %367 = arith.mulf %359, %359 : vector<32x256xf32>
    %368 = vector.shape_cast %367 : vector<32x256xf32> to vector<1x32x256xf32>
    %cst_194 = arith.constant dense<0.000000e+00> : vector<1xf32>
    %369 = vector.multi_reduction <add>, %368, %cst_194 [1, 2] : vector<1x32x256xf32> to vector<1xf32>
    %370 = vector.shape_cast %369 : vector<1xf32> to vector<1x1x1xf32>
    %371 = vector.extract %370[0, 0, 0] : f32 from vector<1x1x1xf32>
    %cst_195 = arith.constant 1.22070313E-4 : f32
    %372 = arith.mulf %371, %cst_195 : f32
    %373 = arith.mulf %366, %366 : f32
    %374 = arith.subf %372, %373 : f32
    %375 = vector.broadcast %366 : f32 to vector<32x256xf32>
    %376 = arith.subf %359, %375 : vector<32x256xf32>
    %cst_196 = arith.constant 9.99999974E-6 : f32
    %377 = arith.addf %374, %cst_196 : f32
    %378 = math.rsqrt %377 : f32
    %379 = vector.broadcast %378 : f32 to vector<32x256xf32>
    %380 = arith.mulf %376, %379 : vector<32x256xf32>
    %381 = vector.broadcast %360 : vector<32x1xf32> to vector<32x256xf32>
    %382 = arith.mulf %380, %381 : vector<32x256xf32>
    %383 = vector.broadcast %361 : vector<32x1xf32> to vector<32x256xf32>
    %384 = arith.addf %382, %383 : vector<32x256xf32>
    %c0_197 = arith.constant 0 : index
    %c0_198 = arith.constant 0 : index
    %385 = vector.load %arg7[%c0_197, %c0_198] : memref<256x256xf32, #tpu.memory_space<vmem>>, vector<256x256xf32>
    %cst_199 = arith.constant dense<0.000000e+00> : vector<32x256xf32>
    %386 = tpu.matmul %384, %385, %cst_199 {dimension_numbers = #tpu.dot_dimension_numbers<[1], [0], [0], [1], [0, 0, 1, 1], [], []>} : vector<32x256xf32>, vector<256x256xf32>, vector<32x256xf32> -> vector<32x256xf32>
    %c0_200 = arith.constant 0 : index
    %c0_201 = arith.constant 0 : index
    %387 = vector.load %arg27[%c0_200, %c0_201] : memref<8x32xf32, #tpu.memory_space<vmem>>, vector<8x32xf32>
    %cst_202 = arith.constant dense<0.000000e+00> : vector<8x256xf32>
    %388 = tpu.matmul %387, %386, %cst_202 {dimension_numbers = #tpu.dot_dimension_numbers<[1], [0], [0], [1], [0, 0, 1, 1], [], []>} : vector<8x32xf32>, vector<32x256xf32>, vector<8x256xf32> -> vector<8x256xf32>
    %c0_203 = arith.constant 0 : index
    %c0_204 = arith.constant 0 : index
    %389 = vector.load %arg28[%c0_203, %c0_204] : memref<8x1xf32, #tpu.memory_space<vmem>>, vector<8x1xf32>
    %390 = vector.broadcast %389 : vector<8x1xf32> to vector<8x256xf32>
    %391 = arith.mulf %388, %390 : vector<8x256xf32>
    %c0_205 = arith.constant 0 : index
    %c0_206 = arith.constant 0 : index
    %392 = vector.load %arg29[%c0_205, %c0_206] : memref<8x1xf32, #tpu.memory_space<vmem>>, vector<8x1xf32>
    %393 = vector.broadcast %392 : vector<8x1xf32> to vector<8x256xf32>
    %394 = arith.addf %391, %393 : vector<8x256xf32>
    %c0_207 = arith.constant 0 : index
    %c0_208 = arith.constant 0 : index
    %c0_209 = arith.constant 0 : index
    %395 = vector.load %arg30[%c0_207, %c0_208, %c0_209] : memref<1x8x256xf32, #tpu.memory_space<vmem>>, vector<1x8x256xf32>
    %396 = vector.shape_cast %395 : vector<1x8x256xf32> to vector<8x256xf32>
    %397 = vector.shape_cast %394 : vector<8x256xf32> to vector<1x8x256xf32>
    tpu.vector_store %arg30[%c0_207, %c0_208, %c0_209], %397 {strides = array<i32>} : memref<1x8x256xf32, #tpu.memory_space<vmem>>, vector<1x8x256xf32>,
    return
  }
  func.func @transform_0(%arg0: i32) -> (i32, i32, i32) {
    %c0_i32 = arith.constant 0 : i32
    %c0_i32_0 = arith.constant 0 : i32
    %c0_i32_1 = arith.constant 0 : i32
    return %arg0, %c0_i32, %c0_i32_0 : i32, i32, i32
  }
  func.func @transform_1(%arg0: i32) -> (i32, i32) {
    %c0_i32 = arith.constant 0 : i32
    %c0_i32_0 = arith.constant 0 : i32
    %c0_i32_1 = arith.constant 0 : i32
    return %c0_i32, %c0_i32_0 : i32, i32
  }
  func.func @transform_2(%arg0: i32) -> (i32, i32) {
    %c0_i32 = arith.constant 0 : i32
    %c0_i32_0 = arith.constant 0 : i32
    %c0_i32_1 = arith.constant 0 : i32
    return %c0_i32, %c0_i32_0 : i32, i32
  }
  func.func @transform_3(%arg0: i32) -> (i32, i32) {
    %c0_i32 = arith.constant 0 : i32
    %c0_i32_0 = arith.constant 0 : i32
    %c0_i32_1 = arith.constant 0 : i32
    return %c0_i32, %c0_i32_0 : i32, i32
  }
  func.func @transform_4(%arg0: i32) -> (i32, i32) {
    %c0_i32 = arith.constant 0 : i32
    %c0_i32_0 = arith.constant 0 : i32
    %c0_i32_1 = arith.constant 0 : i32
    return %c0_i32, %c0_i32_0 : i32, i32
  }
  func.func @transform_5(%arg0: i32) -> (i32, i32) {
    %c0_i32 = arith.constant 0 : i32
    %c0_i32_0 = arith.constant 0 : i32
    %c0_i32_1 = arith.constant 0 : i32
    return %c0_i32, %c0_i32_0 : i32, i32
  }
  func.func @transform_6(%arg0: i32) -> (i32, i32) {
    %c0_i32 = arith.constant 0 : i32
    %c0_i32_0 = arith.constant 0 : i32
    %c0_i32_1 = arith.constant 0 : i32
    return %c0_i32, %c0_i32_0 : i32, i32
  }
  func.func @transform_7(%arg0: i32) -> (i32, i32) {
    %c0_i32 = arith.constant 0 : i32
    %c0_i32_0 = arith.constant 0 : i32
    %c0_i32_1 = arith.constant 0 : i32
    return %c0_i32, %c0_i32_0 : i32, i32
  }
  func.func @transform_8(%arg0: i32) -> (i32, i32, i32) {
    %c0_i32 = arith.constant 0 : i32
    %c0_i32_0 = arith.constant 0 : i32
    %c0_i32_1 = arith.constant 0 : i32
    %c0_i32_2 = arith.constant 0 : i32
    return %c0_i32, %c0_i32_0, %c0_i32_1 : i32, i32, i32
  }
  func.func @transform_9(%arg0: i32) -> (i32, i32, i32) {
    %c0_i32 = arith.constant 0 : i32
    %c0_i32_0 = arith.constant 0 : i32
    %c0_i32_1 = arith.constant 0 : i32
    %c0_i32_2 = arith.constant 0 : i32
    return %c0_i32, %c0_i32_0, %c0_i32_1 : i32, i32, i32
  }
  func.func @transform_10(%arg0: i32) -> (i32, i32, i32) {
    %c0_i32 = arith.constant 0 : i32
    %c0_i32_0 = arith.constant 0 : i32
    %c0_i32_1 = arith.constant 0 : i32
    %c0_i32_2 = arith.constant 0 : i32
    return %c0_i32, %c0_i32_0, %c0_i32_1 : i32, i32, i32
  }
  func.func @transform_11(%arg0: i32) -> (i32, i32, i32) {
    %c0_i32 = arith.constant 0 : i32
    %c0_i32_0 = arith.constant 0 : i32
    %c0_i32_1 = arith.constant 0 : i32
    %c0_i32_2 = arith.constant 0 : i32
    return %c0_i32, %c0_i32_0, %c0_i32_1 : i32, i32, i32
  }
  func.func @transform_12(%arg0: i32) -> (i32, i32, i32) {
    %c0_i32 = arith.constant 0 : i32
    %c0_i32_0 = arith.constant 0 : i32
    %c0_i32_1 = arith.constant 0 : i32
    %c0_i32_2 = arith.constant 0 : i32
    return %c0_i32, %c0_i32_0, %c0_i32_1 : i32, i32, i32
  }
  func.func @transform_13(%arg0: i32) -> (i32, i32, i32) {
    %c0_i32 = arith.constant 0 : i32
    %c0_i32_0 = arith.constant 0 : i32
    %c0_i32_1 = arith.constant 0 : i32
    %c0_i32_2 = arith.constant 0 : i32
    return %c0_i32, %c0_i32_0, %c0_i32_1 : i32, i32, i32
  }
  func.func @transform_14(%arg0: i32) -> (i32, i32, i32) {
    %c0_i32 = arith.constant 0 : i32
    %c0_i32_0 = arith.constant 0 : i32
    %c0_i32_1 = arith.constant 0 : i32
    %c0_i32_2 = arith.constant 0 : i32
    return %c0_i32, %c0_i32_0, %c0_i32_1 : i32, i32, i32
  }
  func.func @transform_15(%arg0: i32) -> (i32, i32, i32) {
    %c0_i32 = arith.constant 0 : i32
    %c0_i32_0 = arith.constant 0 : i32
    %c0_i32_1 = arith.constant 0 : i32
    %c0_i32_2 = arith.constant 0 : i32
    return %c0_i32, %c0_i32_0, %c0_i32_1 : i32, i32, i32
  }
  func.func @transform_16(%arg0: i32) -> (i32, i32, i32) {
    %c0_i32 = arith.constant 0 : i32
    %c0_i32_0 = arith.constant 0 : i32
    %c0_i32_1 = arith.constant 0 : i32
    %c0_i32_2 = arith.constant 0 : i32
    return %c0_i32, %c0_i32_0, %c0_i32_1 : i32, i32, i32
  }
  func.func @transform_17(%arg0: i32) -> (i32, i32, i32) {
    %c0_i32 = arith.constant 0 : i32
    %c0_i32_0 = arith.constant 0 : i32
    %c0_i32_1 = arith.constant 0 : i32
    %c0_i32_2 = arith.constant 0 : i32
    return %c0_i32, %c0_i32_0, %c0_i32_1 : i32, i32, i32
  }
  func.func @transform_18(%arg0: i32) -> (i32, i32, i32) {
    %c0_i32 = arith.constant 0 : i32
    %c0_i32_0 = arith.constant 0 : i32
    %c0_i32_1 = arith.constant 0 : i32
    %c0_i32_2 = arith.constant 0 : i32
    return %c0_i32, %c0_i32_0, %c0_i32_1 : i32, i32, i32
  }
  func.func @transform_19(%arg0: i32) -> (i32, i32, i32) {
    %c0_i32 = arith.constant 0 : i32
    %c0_i32_0 = arith.constant 0 : i32
    %c0_i32_1 = arith.constant 0 : i32
    %c0_i32_2 = arith.constant 0 : i32
    return %c0_i32, %c0_i32_0, %c0_i32_1 : i32, i32, i32
  }
  func.func @transform_20(%arg0: i32) -> (i32, i32, i32) {
    %c0_i32 = arith.constant 0 : i32
    %c0_i32_0 = arith.constant 0 : i32
    %c0_i32_1 = arith.constant 0 : i32
    %c0_i32_2 = arith.constant 0 : i32
    return %c0_i32, %c0_i32_0, %c0_i32_1 : i32, i32, i32
  }
  func.func @transform_21(%arg0: i32) -> (i32, i32, i32) {
    %c0_i32 = arith.constant 0 : i32
    %c0_i32_0 = arith.constant 0 : i32
    %c0_i32_1 = arith.constant 0 : i32
    %c0_i32_2 = arith.constant 0 : i32
    return %c0_i32, %c0_i32_0, %c0_i32_1 : i32, i32, i32
  }
  func.func @transform_22(%arg0: i32) -> (i32, i32, i32) {
    %c0_i32 = arith.constant 0 : i32
    %c0_i32_0 = arith.constant 0 : i32
    %c0_i32_1 = arith.constant 0 : i32
    %c0_i32_2 = arith.constant 0 : i32
    return %c0_i32, %c0_i32_0, %c0_i32_1 : i32, i32, i32
  }
  func.func @transform_23(%arg0: i32) -> (i32, i32, i32) {
    %c0_i32 = arith.constant 0 : i32
    %c0_i32_0 = arith.constant 0 : i32
    %c0_i32_1 = arith.constant 0 : i32
    %c0_i32_2 = arith.constant 0 : i32
    return %c0_i32, %c0_i32_0, %c0_i32_1 : i32, i32, i32
  }
  func.func @transform_24(%arg0: i32) -> (i32, i32) {
    %c0_i32 = arith.constant 0 : i32
    %c0_i32_0 = arith.constant 0 : i32
    %c0_i32_1 = arith.constant 0 : i32
    return %c0_i32, %c0_i32_0 : i32, i32
  }
  func.func @transform_25(%arg0: i32) -> (i32, i32) {
    %c0_i32 = arith.constant 0 : i32
    %c0_i32_0 = arith.constant 0 : i32
    %c0_i32_1 = arith.constant 0 : i32
    return %c0_i32, %c0_i32_0 : i32, i32
  }
  func.func @transform_26(%arg0: i32) -> (i32, i32) {
    %c0_i32 = arith.constant 0 : i32
    %c0_i32_0 = arith.constant 0 : i32
    %c0_i32_1 = arith.constant 0 : i32
    return %c0_i32, %c0_i32_0 : i32, i32
  }
  func.func @transform_27(%arg0: i32) -> (i32, i32) {
    %c0_i32 = arith.constant 0 : i32
    %c0_i32_0 = arith.constant 0 : i32
    %c0_i32_1 = arith.constant 0 : i32
    return %c0_i32, %c0_i32_0 : i32, i32
  }
  func.func @transform_28(%arg0: i32) -> (i32, i32) {
    %c0_i32 = arith.constant 0 : i32
    %c0_i32_0 = arith.constant 0 : i32
    %c0_i32_1 = arith.constant 0 : i32
    return %c0_i32, %c0_i32_0 : i32, i32
  }
  func.func @transform_29(%arg0: i32) -> (i32, i32, i32) {
    %c0_i32 = arith.constant 0 : i32
    %c0_i32_0 = arith.constant 0 : i32
    %c0_i32_1 = arith.constant 0 : i32
    return %arg0, %c0_i32, %c0_i32_0 : i32, i32, i32
  }
}

</mosaic_0001>

<bundles_post_ra>
// kernel: mobilevit_block_v2.1
= control target key start
LH: loop header
LB: loop body
LE: loop exit
PB: predicated region body
PF: predicated region fallthrough
CT: control target
= control target key end

     0   :  { %s6203_s6 = smov 1   ;;  %s6204_s10 = smov 2   ;;  %s9251_s0 = inlined_call_operand.smem [shape: u32[30], index: -1, kind: input, shape index: {}] }
   0x1   :  { %s6270_s5 = sld [smem:[%s9251_s0]]   ;;  %s6205_s14 = smov 3  }
   0x2   :  { %s6275_s9 = sld [smem:[%s9251_s0 + %s6203_s6]]   ;;  %s6206_s18 = smov 4  }
   0x3   :  { %s6280_s13 = sld [smem:[%s9251_s0 + %s6204_s10]]   ;;  %s6207_s22 = smov 5  }
   0x4   :  { %s6285_s17 = sld [smem:[%s9251_s0 + %s6205_s14]]   ;;  %s6208_s26 = smov 6  }
   0x5   :  { %s6290_s21 = sld [smem:[%s9251_s0 + %s6206_s18]]   ;;  %s6209_s30 = smov 7  }
   0x6   :  { %s6295_s25 = sld [smem:[%s9251_s0 + %s6207_s22]]   ;;  %s6210_s4 = smov 8  }
   0x7   :  { %9340 = sst [smem:[#allocation9_spill]] %s6270_s5  ;;  %s6211_s10 = smov 9  }
   0x8   :  { %9341 = sst [smem:[#allocation10_spill]] %s6275_s9  ;;  %s6212_s15 = smov 10  }
   0x9   :  { %s6300_s29 = sld [smem:[%s9251_s0 + %s6208_s26]]   ;;  %s6213_s20 = smov 11  }
   0xa   :  { %s6305_s3 = sld [smem:[%s9251_s0 + %s6209_s30]]   ;;  %s6214_s26 = smov 12  }
   0xb   :  { %9342 = sst [smem:[#allocation11_spill]] %s6290_s21  ;;  %s6215_s1 = smov 13  }
   0xc   :  { %9343 = sst [smem:[#allocation12_spill]] %s6295_s25  ;;  %s6216_s7 = smov 14  }
   0xd   :  { %s6310_s8 = sld [smem:[%s9251_s0 + %s6210_s4]]   ;;  %s6218_s22 = smov 16  }
   0xe   :  { %s6315_s14 = sld [smem:[%s9251_s0 + %s6211_s10]]   ;;  %s6219_s28 = smov 17  }
   0xf   :  { %s6320_s19 = sld [smem:[%s9251_s0 + %s6212_s15]]   ;;  %s6217_s15 = smov 15  }
  0x10   :  { %9344 = sst [smem:[#allocation13_spill]] %s6305_s3 }
  0x11   :  { %s6325_s24 = sld [smem:[%s9251_s0 + %s6213_s20]]  }
  0x12   :  { %s6330_s30 = sld [smem:[%s9251_s0 + %s6214_s26]]  }
  0x13   :  { %9345 = sst [smem:[#allocation14_spill]] %s6310_s8 }
  0x14   :  { %s6335_s6 = sld [smem:[%s9251_s0 + %s6215_s1]]  }
  0x15   :  { %s6340_s12 = sld [smem:[%s9251_s0 + %s6216_s7]]   ;;  %s6220_s7 = smov 18  }
  0x16   :  { %s6345_s20 = sld [smem:[%s9251_s0 + %s6217_s15]]   ;;  %s6221_s15 = smov 19  }
  0x17   :  { %s6350_s27 = sld [smem:[%s9251_s0 + %s6218_s22]]   ;;  %s6222_s22 = smov 20  }
  0x18   :  { %9346 = sst [smem:[#allocation15_spill]] %s6330_s30 }
  0x19   :  { %s6355_s4 = sld [smem:[%s9251_s0 + %s6219_s28]]   ;;  %s6223_s28 = smov 21  }
  0x1a   :  { %9347 = sst [smem:[#allocation16_spill]] %s6335_s6 }
  0x1b   :  { %9348 = sst [smem:[#allocation17_spill]] %s6340_s12 }
  0x1c   :  { %s6360_s12 = sld [smem:[%s9251_s0 + %s6220_s7]]   ;;  %s6224_s7 = smov 22  }
  0x1d   :  { %9349 = sst [smem:[#allocation18_spill]] %s6350_s27 }
  0x1e   :  { %s6365_s30 = sld [smem:[%s9251_s0 + %s6221_s15]]   ;;  %s6225_s15 = smov 23  }
  0x1f   :  { %9350 = sst [smem:[#allocation19_spill]] %s6355_s4 }
  0x20   :  { %s6370_s27 = sld [smem:[%s9251_s0 + %s6222_s22]]   ;;  %s6226_s22 = smov 24  }
  0x21   :  { %s6375_s21 = sld [smem:[%s9251_s0 + %s6223_s28]]   ;;  %s6227_s28 = smov 25  }
  0x22   :  { %9351 = sst [smem:[#allocation20_spill]] %s6360_s12 }
  0x23   :  { %s6380_s12 = sld [smem:[%s9251_s0 + %s6224_s7]]   ;;  %s6228_s7 = smov 26  }
  0x24   :  { %9352 = sst [smem:[#allocation21_spill]] %s6365_s30 }
  0x25   :  { %s6385_s30 = sld [smem:[%s9251_s0 + %s6225_s15]]   ;;  %s6229_s15 = smov 27  }
  0x26   :  { %9353 = sst [smem:[#allocation22_spill]] %s6370_s27 }
  0x27   :  { %9354 = sst [smem:[#allocation23_spill]] %s6375_s21 }
  0x28   :  { %s6390_s27 = sld [smem:[%s9251_s0 + %s6226_s22]]   ;;  %s6230_s22 = smov 28  }
  0x29   :  { %9355 = sst [smem:[#allocation24_spill]] %s6380_s12 }
  0x2a   :  { %s6395_s21 = sld [smem:[%s9251_s0 + %s6227_s28]]   ;;  %s6231_s28 = smov 29  }
  0x2b   :  { %9356 = sst [smem:[#allocation25_spill]] %s6385_s30 }
  0x2c   :  { %s6400_s12 = sld [smem:[%s9251_s0 + %s6228_s7]]  }
  0x2d   :  { %s6405_s30 = sld [smem:[%s9251_s0 + %s6229_s15]]  }
  0x2e   :  { %9357 = sst [smem:[#allocation26_spill]] %s6390_s27 }
  0x2f   :  { %s6410_s27 = sld [smem:[%s9251_s0 + %s6230_s22]]  }
  0x30   :  { %9358 = sst [smem:[#allocation27_spill]] %s6395_s21 }
  0x31   :  { %s6415_s21 = sld [smem:[%s9251_s0 + %s6231_s28]]  }
  0x32   :  { %64 = vsyncpa [#allocation3], 0 }
  0x33   :  { %65 = vsyncpa [#allocation5], 0  ;;  %s6417_s7 = smov 0  }
  0x34 LB: > { %s9359_s4 = sld [smem:[#allocation19_spill]]  ;;  %s6423_s10 = sadd.s32 4294967295, %s6201_s7   ;;  %s6201_s7 = sphi %s6417_s7, %s71_s7  }
  0x35   : > { %s9360_s8 = sld [smem:[#allocation14_spill]]  ;;  %p5438_p0 = scmp.ge.s32.totalorder %s6201_s7, 1 }
  0x36   : > { %s9361_s6 = sld [smem:[#allocation16_spill]]  ;;  %p716_p1 = scmp.lt.s32.totalorder %s6201_s7, 3 }
  0x37   : > { %s9362_s3 = sld [smem:[#allocation13_spill]]  ;;  %p5724_p2 = scmp.eq.s32.totalorder %s6423_s10, 0 }
  0x38   : > { %s9363_s25 = sld [smem:[#allocation12_spill]]  ;;  %s753_s0 = sshll.u32 %s6300_s29, 4  ;;  %s6433_s0 = int_to_ptr.hbm [resolvable:$true] %s753_s0 }
  0x39   : > { %p6429_p3 = pnand %p5438_p0, %p716_p1  ;;  %s6232_s16 = smov [#allocation4]  }
  0x3a   : > { %s755_s18 = sshll.u32 %s6232_s16, 4  ;;  %s6233_s23 = smov [#allocation2]   ;;  %s756_s18 = int_to_ptr.vmem [resolvable:$true] %s755_s18 }
  0x3b   : > { %p5714_p4 = pneg %p6429_p3  ;;  %s6446_s26 = sshll.u32 %s6233_s23, 4 }
  0x3c   : > { %9366 = sst [smem:[#allocation28_spill]] %s6446_s26  ;;  %s6097_s1 = sshra.s32 %s6433_s0, 4  ;;  %s6098_s1 = int_to_ptr.hbm [resolvable:$true] %s6097_s1 }
  0x3d   : > { %p6442_p5 = pnand %p5724_p2, %p5714_p4  ;;  %s6099_s2 = scalar_lea.hbm %s6098_s1, 512 }
  0x3e   : > { %s739_s15 = sshll.u32 %s9363_s25, 4  ;;  %p6100_p6 = scmp.ne.s32.totalorder %s6098_s1, %s6099_s2  ;;  %s6438_s15 = int_to_ptr.hbm [resolvable:$true] %s739_s15 }
  0x3f   : > { %p6101_p7 = pneg %p6442_p5  ;;  %s6104_s16 = scalar_lea.hbm %s6300_s29, 512 }
  0x40   : > { %p6105_p10 = scmp.lt.s32.totalorder %s6098_s1, %s6300_s29  ;;  %p6106_p11 = scmp.lt.s32.totalorder %s6104_s16, %s6099_s2 }
  0x41   : > { %p6102_p8 = pnand %p6101_p7, %p6100_p6 }
  0x42   : > { %p6107_p12 = por %p6106_p11, %p6105_p10 }
  0x43   : > { %p6103_p9 = pneg %p6102_p8 }
  0x45   : > { %p6108_p13 = pnand %p6107_p12, %p6103_p9 }
  0x47   : > { %6111 = shalt.err (!%p6108_p13)
}
  0x48   : > { %s6234_s23 = smov 256   ;;  %s6235_s28 = smov 16  }
  0x49   : > { %5720 = dma.hbm_to_vmem [thread:$0]  (!%p6442_p5), %s6433_s0, 8192, %s756_s18, [#allocation5], %s6234_s23, %s6234_s23, %s6235_s28  }
  0x4a   : > { %s6127_s26 = sshra.s32 %s6438_s15, 4  ;;  %s6134_s2 = scalar_lea.hbm %s9363_s25, 512  ;;  %s6128_s26 = int_to_ptr.hbm [resolvable:$true] %s6127_s26 }
  0x4b   : > { %s6129_s1 = scalar_lea.hbm %s6128_s26, 512  ;;  %p6135_p6 = scmp.lt.s32.totalorder %s6128_s26, %s9363_s25 }
  0x4c   : > { %p6130_p0 = scmp.ne.s32.totalorder %s6128_s26, %s6129_s1  ;;  %p6136_p8 = scmp.lt.s32.totalorder %s6134_s2, %s6129_s1 }
  0x4e   : > { %p6132_p1 = pnand %p6130_p0, %p6101_p7  ;;  %p6137_p9 = por %p6136_p8, %p6135_p6 }
  0x50   : > { %p6133_p4 = pneg %p6132_p1 }
  0x52   : > { %p6138_p10 = pnand %p6137_p9, %p6133_p4 }
  0x54   : > { %6141 = shalt.err (!%p6138_p10)
}
  0x55   : > { %s9367_s0 = sld [smem:[#allocation28_spill]]  ;;  %s9369_s16 = sshll.u32 %s9362_s3, 4  ;;  %s768_s16 = int_to_ptr.hbm [resolvable:$true] %s9369_s16 }
  0x56   : > { %s6236_s26 = smov [#allocation6]   ;;  %s6157_s2 = sshra.s32 %s768_s16, 4  ;;  %s6158_s2 = int_to_ptr.hbm [resolvable:$true] %s6157_s2 }
  0x57   : > { %s769_s1 = sshll.u32 %s6236_s26, 4  ;;  %s6159_s25 = scalar_lea.hbm %s6158_s2, 512  ;;  %s770_s1 = int_to_ptr.vmem [resolvable:$true] %s769_s1 }
  0x58   : > { %p6160_p11 = scmp.ne.s32.totalorder %s6158_s2, %s6159_s25  ;;  %p6165_p0 = scmp.lt.s32.totalorder %s6158_s2, %s9362_s3 }
  0x5a   : > { %p6162_p12 = pnand %p6160_p11, %p6101_p7 }
  0x5b   : > { %s9368_s18 = int_to_ptr.vmem [resolvable:$true] %s9367_s0  ;;  %s6164_s0 = scalar_lea.hbm %s9362_s3, 512 }
  0x5c   : > { %5717 = dma.hbm_to_vmem [thread:$0]  (!%p6442_p5), %s6438_s15, 8192, %s9368_s18, [#allocation3], %s6234_s23, %s6234_s23, %s6235_s28  }
  0x5d   : > { %p6163_p13 = pneg %p6162_p12  ;;  %p6166_p1 = scmp.lt.s32.totalorder %s6164_s0, %s6159_s25 }
  0x5f   : > { %p6167_p4 = por %p6166_p1, %p6165_p0 }
  0x61   : > { %p6168_p6 = pnand %p6167_p4, %p6163_p13 }
  0x63   : > { %6171 = shalt.err (!%p6168_p6)
}
  0x64   : > { %5723 = dma.hbm_to_vmem [thread:$0]  (!%p6442_p5), %s768_s16, 8192, %s770_s1, [#allocation5], %s6234_s23, %s6234_s23, %s6235_s28  }
  0x65   : > { %856 = sbr.rel (%p6429_p3) target bundleno = 4479 (0x117f), region = 136 }
  0x6a   : > { %6192 = dma.done.wait (%p5724_p2), [#allocation3], 8192  }
  0x6b   : > { %6194 = vsyncadd (%p5724_p2), [#allocation3], 4294959104 }
  0x6c   : > { %6196 = dma.done.wait (%p5724_p2), [#allocation5], 16384  }
  0x6d   : > { %6198 = vsyncadd (%p5724_p2), [#allocation5], 4294950912  ;;  %s9370_s9 = sld [smem:[#allocation10_spill]]  ;;  %v953_v0 = vlaneseq  ;;  %v6237_v1 = vmov 2   ;;  %v6238_v3 = vmov 1   ;;  %v6239_v4 = vmov 3  }
  0x6e   : > { %5803 = vset.pattern.permute.xlu1 %v6237_v1  ;;  %5802 = vset.pattern.permute.xlu0 %v6238_v3  ;;  %v6240_v9 = vmov 0.0   ;;  %s6241_s25 = smov 17   ;;  %s6242_s11 = smov 31   ;;  %v6244_v16 = vmov 4   ;;  %v6245_v17 = vmov 8   ;;  %v6247_v18 = vmov 5  }
  0x6f   : > { %v954_v2 = vand.u32 127, %v953_v0  ;;  %5804 = vset.pattern.permute.xlu2 %v6239_v4  ;;  %s6243_s15 = smov 33   ;;  %s6246_s22 = smov 47   ;;  %v6248_v19 = vmov 6   ;;  %v6250_v20 = vmov 7   ;;  %v6251_v21 = vmov 0  }
  0x70   : > { %s6249_s28 = smov 49   ;;  %s9371_s5 = sld [smem:[#allocation9_spill]]  ;;  %vm1052_vm4 = vcmask 138240   ;;  %vm1089_vm5 = vcmask 252928   ;;  %vm1151_vm6 = vcmask 269312   ;;  %vm1188_vm7 = vcmask 384000  }
  0x71   : > { %v955_v5 = vadd.s32 128, %v954_v2  ;;  %v960_v6 = vand.u32 15, %v954_v2  ;;  %s6252_s23 = smov 15   ;;  %p943_p2 = scmp.lt.s32.totalorder %s6423_s10, 1  ;;  %vm1250_vm8 = vcmask 400384   ;;  %vm1001_vm9 = vcmask 121856  }
  0x72   : > { %s6253_s26 = smov 127   ;;  %s6254_s1 = smov 111   ;;  %vm1037_vm10 = vcmask 1039360   ;;  %vm1076_vm11 = vcmask 1031168   ;;  %vm1113_vm12 = vcmask 916480   ;;  %vm1138_vm13 = vcmask 908288  }
  0x73   : > { %v967_v7 = vand.u32 15, %v955_v5  ;;  %vm986_vm0 = vcmp.le.s32.totalorder %v960_v6, 14  ;;  %vm980_vm1 = vcmp.ge.s32.totalorder %v960_v6, 1  ;;  %v1009_v8 = vld [vmem:[%s9370_s9] sm:$0xff]  ;;  %s9764_s10 = smov (!%p943_p2, %s6423_s10), 1  ;;  %s6255_s2 = smov 95  }
  0x74   : > { %v5452_v10 = vsel %vm986_vm0, 1.0, %v6240_v9  ;;  %1061 = vperm.xlu1 %5803, %v1009_v8   ;;  %1098 = vperm.xlu2 %5804, %v1009_v8   ;;  %v5450_v12 = vsel %vm980_vm1, 1.0, %v6240_v9  ;;  %s5667_s18 = smul.u32 24, %s9764_s10  ;;  %s6256_s0 = smov 126   ;;  %vm1175_vm14 = vcmask 900096   ;;  %vm1212_vm15 = vcmask 785408  }
  0x75   : > { %vm987_vm2 = vcmp.le.s32.totalorder %v967_v7, 14  ;;  %vm981_vm3 = vcmp.ge.s32.totalorder %v967_v7, 1  ;;  %vm1237_vm0 = vcmask 777216   ;;  %vm1274_vm1 = vcmask 769024  }
  0x76   : > { %v5453_v11 = vsel %vm987_vm2, 1.0, %v6240_v9  ;;  %v5451_v13 = vsel %vm981_vm3, 1.0, %v6240_v9  ;;  %s947_s16 = scalar_lea.vmem %s9371_s5, %s5667_s18 }
  0x77   : > { %v5797_v14 = vpack.i.bf16 %v5453_v11, %v5452_v10  ;;  %v5805_v15 = vpack.i.bf16 %v5451_v13, %v5450_v12  ;;  %v6507_v25 = vld [vmem:[%s947_s16] sm:$0xff]  ;;  %v6509_v26 = vld [vmem:[%s947_s16 + $0x10] sm:$0xff]  ;;  %v6511_v28 = vld [vmem:[%s947_s16 + $0x8] sm:$0xff] }
  0x79   : > { %5798 = vrot.lane.b32.xlu0 %v5797_v14, %s6241_s25  ;;  %s6257_s25 = smov 112  }
  0x7c   : > { %5806 = vrot.lane.b32.xlu1 %v5805_v15, %s6242_s11  ;;  %5812 = vrot.lane.b32.xlu2 %v5797_v14, %s6243_s15  ;;  %s6258_s11 = smov 110   ;;  %s6259_s15 = smov 96  }
  0x7d   : > { %5810 = vset.pattern.permute.xlu1 %v6244_v16  ;;  %5829 = vset.pattern.permute.xlu2 %v6245_v17 }
  0x81   : > { %1022 = vperm.xlu0 %5802, %v1009_v8  }
  0x84   : > { %1123 = vperm.xlu1 %5810, %v1009_v8   ;;  %5817 = vrot.lane.b32.xlu2 %v5805_v15, %s6246_s22  ;;  %s6260_s22 = smov 94  }
  0x89   : > { %5821 = vset.pattern.permute.xlu0 %v6247_v18 }
  0x8a   : > { %1160 = vperm.xlu0 %5821, %v1009_v8  }
  0x8c   : > { %5822 = vset.pattern.permute.xlu1 %v6248_v19  ;;  %5824 = vrot.lane.b32.xlu2 %v5797_v14, %s6249_s28  ;;  %s6261_s28 = smov 113  }
  0x8d   : > { %1197 = vperm.xlu1 %5822, %v1009_v8  }
  0x92   : > { %5837 = vset.pattern.permute.xlu0 %v6251_v21 }
  0x93   : > { %5831 = vrot.lane.b32.xlu0 %v5805_v15, %s6252_s23  ;;  %s9372_s23 = sld [smem:[#allocation11_spill]] }
  0x94   : > { %1259 = vperm.xlu2 %5829, %v1009_v8  }
  0x95   : > { %5828 = vset.pattern.permute.xlu1 %v6250_v20 }
  0x96   : > { %1222 = vperm.xlu1 %5828, %v1009_v8  }
  0x9c   : > { %5836 = vset.pattern.permute.xlu2 %v6251_v21 }
  0x9e   : > { %5835 = vset.pattern.permute.xlu1 %v6251_v21 }
  0x9f   : > { %1012 = vperm.xlu1 %5835, %v1009_v8  }
  0xce   : > { %v1099_v39 = vpop.permute.xlu2 %1098 }
  0xd6   : > { %v5813_v50 = vpop.permute.xlu2 %5812 }
  0xd7   : > { %v5815_v58 = vunpack.i.h.bf16 %v5813_v50  ;;  %v5814_v59 = vunpack.i.l.bf16 %v5813_v50  ;;  %v1770_v50 = vld [vmem:[%s6320_s19 + $0x8] sm:$0xff] }
  0xd9   : > { %v1152_v62 = vsel %vm1151_vm6, %v5814_v59, %v5815_v58  ;;  %v1158_v1 = vmul.f32 %v5815_v58, %v6509_v26  ;;  %v1156_v3 = vmul.f32 %v5814_v59, %v6507_v25  ;;  %v1833_v59 = vld [vmem:[%s9361_s6 + $0x8] sm:$0xff] }
  0xda   : > { %v1157_v2 = vmul.f32 %v1152_v62, %v6511_v28 }
  0xde   : > { %v5818_v0 = vpop.permute.xlu2 %5817 }
  0xdf   : > { %v5820_v4 = vunpack.i.h.bf16 %v5818_v0  ;;  %v5819_v5 = vunpack.i.l.bf16 %v5818_v0 }
  0xe1   : > { %v1189_v9 = vsel %vm1188_vm7, %v5819_v5, %v5820_v4  ;;  %v1195_v12 = vmul.f32 %v5820_v4, %v6509_v26  ;;  %v1193_v14 = vmul.f32 %v5819_v5, %v6507_v25 }
  0xe2   : > { %v1194_v13 = vmul.f32 %v1189_v9, %v6511_v28 }
  0xe6   : > { %v1062_v22 = vpop.permute.xlu1 %1061  ;;  %v5825_v11 = vpop.permute.xlu2 %5824 }
  0xe7   : > { %v5827_v15 = vunpack.i.h.bf16 %v5825_v11  ;;  %v5826_v16 = vunpack.i.l.bf16 %v5825_v11 }
  0xe9   : > { %v1251_v20 = vsel %vm1250_vm8, %v5826_v16, %v5827_v15  ;;  %v1257_v21 = vmul.f32 %v5827_v15, %v6509_v26 }
  0xeb   : > { %v5799_v23 = vpop.permute.xlu0 %5798 }
  0xec   : > { %v5801_v37 = vunpack.i.h.bf16 %v5799_v23  ;;  %v5800_v38 = vunpack.i.l.bf16 %v5799_v23  ;;  %v1255_v23 = vmul.f32 %v5826_v16, %v6507_v25 }
  0xee   : > { %v5807_v24 = vpop.permute.xlu1 %5806  ;;  %v1053_v44 = vsel %vm1052_vm4, %v5800_v38, %v5801_v37  ;;  %v1059_v45 = vmul.f32 %v5801_v37, %v6509_v26  ;;  %v1057_v47 = vmul.f32 %v5800_v38, %v6507_v25  ;;  %v1636_v38 = vld [vmem:[%s6315_s14 + $0x10] sm:$0xff] }
  0xef   : > { %v1058_v46 = vmul.f32 %v1053_v44, %v6511_v28  ;;  %v5809_v48 = vunpack.i.h.bf16 %v5807_v24  ;;  %v5808_v49 = vunpack.i.l.bf16 %v5807_v24  ;;  %v1260_v24 = vpop.permute.xlu2 %1259 }
  0xf0   : > { %v1066_v51 = vmul.f32 %v1062_v22, %v1059_v45  ;;  %v1064_v53 = vmul.f32 %v1062_v22, %v1057_v47 }
  0xf1   : > { %v1065_v52 = vmul.f32 %v1062_v22, %v1058_v46  ;;  %v1090_v54 = vsel %vm1089_vm5, %v5808_v49, %v5809_v48  ;;  %v1096_v55 = vmul.f32 %v5809_v48, %v6509_v26  ;;  %v1094_v57 = vmul.f32 %v5808_v49, %v6507_v25  ;;  %v1769_v46 = vld [vmem:[%s6320_s19] sm:$0xff] }
  0xf2   : > { %v1095_v56 = vmul.f32 %v1090_v54, %v6511_v28  ;;  %v1256_v22 = vmul.f32 %v1251_v20, %v6511_v28 }
  0xf3   : > { %v1023_v27 = vpop.permute.xlu0 %1022  ;;  %v1103_v60 = vmul.f32 %v1099_v39, %v1096_v55  ;;  %v1101_v63 = vmul.f32 %v1099_v39, %v1094_v57 }
  0xf4   : > { %v1027_v29 = vmul.f32 %v1023_v27, %v6509_v26  ;;  %v1026_v30 = vmul.f32 %v1023_v27, %v6511_v28  ;;  %v1025_v31 = vmul.f32 %v1023_v27, %v6507_v25  ;;  %v1102_v61 = vmul.f32 %v1099_v39, %v1095_v56 }
  0xf5   : > { %v1263_v27 = vmul.f32 %v1260_v24, %v1256_v22 }
  0xf6   : > { %1035 = vrot.lane.b32.xlu1 %v1027_v29, %s6253_s26  ;;  %1033 = vrot.lane.b32.xlu0 %v1026_v30, %s6253_s26  ;;  %v1124_v32 = vpop.permute.xlu1 %1123  ;;  %v1264_v29 = vmul.f32 %v1260_v24, %v1257_v21  ;;  %v1262_v30 = vmul.f32 %v1260_v24, %v1255_v23 }
  0xf7   : > { %1031 = vrot.lane.b32.xlu2 %v1025_v31, %s6253_s26  ;;  %v1128_v33 = vmul.f32 %v1124_v32, %v6509_v26  ;;  %v1127_v34 = vmul.f32 %v1124_v32, %v6511_v28  ;;  %v1126_v35 = vmul.f32 %v1124_v32, %v6507_v25  ;;  %v1292_v31 = vld [vmem:[%s6285_s17] sm:$0xff] }
  0xf8   : > { %v1283_v32 = vld [vmem:[%s6280_s13] sm:$0xff] }
  0xfc   : > { %v1161_v6 = vpop.permute.xlu0 %1160 }
  0xfd   : > { %v1165_v7 = vmul.f32 %v1161_v6, %v1158_v1  ;;  %v1164_v8 = vmul.f32 %v1161_v6, %v1157_v2  ;;  %v1163_v10 = vmul.f32 %v1161_v6, %v1156_v3  ;;  %v1835_v3 = vld [vmem:[%s9361_s6 + $0x18] sm:$0xff] }
  0xfe   : > { %1136 = vrot.lane.b32.xlu1 %v1128_v33, %s6254_s1  ;;  %1134 = vrot.lane.b32.xlu0 %v1127_v34, %s6254_s1  ;;  %v1633_v33 = vld [vmem:[%s9360_s8 + $0x18] sm:$0xff]  ;;  %v1632_v34 = vld [vmem:[%s9360_s8 + $0x10] sm:$0xff] }
  0xff   : > { %1132 = vrot.lane.b32.xlu2 %v1126_v35, %s6254_s1  ;;  %v6519_v36 = vpop.permute.xlu1 %1197  ;;  %v1637_v35 = vld [vmem:[%s6315_s14 + $0x18] sm:$0xff] }
 0x100   : > { %v1201_v17 = vmul.f32 %v6519_v36, %v1194_v13  ;;  %v1202_v18 = vmul.f32 %v6519_v36, %v1195_v12  ;;  %v1200_v19 = vmul.f32 %v6519_v36, %v1193_v14  ;;  %v1631_v36 = vld [vmem:[%s9360_s8 + $0x8] sm:$0xff] }
 0x108   : > { %v1223_v40 = vpop.permute.xlu1 %1222 }
 0x109   : > { %v1225_v41 = vmul.f32 %v1223_v40, %v6507_v25  ;;  %v1226_v42 = vmul.f32 %v1223_v40, %v6511_v28  ;;  %v1227_v43 = vmul.f32 %v1223_v40, %v6509_v26  ;;  %v5832_v40 = vpop.permute.xlu0 %5831 }
 0x10a   : > { %v5834_v57 = vunpack.i.h.bf16 %v5832_v40  ;;  %v5833_v58 = vunpack.i.l.bf16 %v5832_v40  ;;  %v1931_v40 = vld [vmem:[%s6345_s20] sm:$0xff] }
 0x10b   : > { %1235 = vrot.lane.b32.xlu1 %v1227_v43, %s6255_s2  ;;  %1233 = vrot.lane.b32.xlu0 %v1226_v42, %s6255_s2  ;;  %v1634_v42 = vld [vmem:[%s6315_s14] sm:$0xff] }
 0x10c   : > { %1231 = vrot.lane.b32.xlu2 %v1225_v41, %s6255_s2  ;;  %v1008_v62 = vmul.f32 %v5834_v57, %v6509_v26  ;;  %v1006_v1 = vmul.f32 %v5833_v58, %v6507_v25 }
 0x111   : > { %v1013_v39 = vpop.permute.xlu1 %1012 }
 0x112   : > { %v1017_v4 = vmul.f32 %v1013_v39, %v1008_v62  ;;  %v1015_v5 = vmul.f32 %v1013_v39, %v1006_v1 }
 0x113   : > { %1074 = vrot.lane.b32.xlu1 %v1066_v51, %s6256_s0  ;;  %1072 = vrot.lane.b32.xlu0 %v1065_v52, %s6256_s0 }
 0x114   : > { %1070 = vrot.lane.b32.xlu2 %v1064_v53, %s6256_s0  ;;  %v1819_v53 = vld [vmem:[%s6325_s24] sm:$0x1] }
 0x11b   : > { %1111 = vrot.lane.b32.xlu1 %v1103_v60, %s6257_s25  ;;  %1109 = vrot.lane.b32.xlu0 %v1102_v61, %s6257_s25  ;;  %v1002_v60 = vsel %vm1001_vm9, %v5833_v58, %v5834_v57 }
 0x11c   : > { %1107 = vrot.lane.b32.xlu2 %v1101_v63, %s6257_s25  ;;  %v1007_v2 = vmul.f32 %v1002_v60, %v6511_v28  ;;  %v2481_v60 = vld [vmem:[%s9359_s4 + $0x8] sm:$0xff] }
 0x11e   : > { %v1016_v6 = vmul.f32 %v1013_v39, %v1007_v2 }
 0x123   : > { %1173 = vrot.lane.b32.xlu1 %v1165_v7, %s6258_s11  ;;  %1171 = vrot.lane.b32.xlu0 %v1164_v8, %s6258_s11 }
 0x124   : > { %1169 = vrot.lane.b32.xlu2 %v1163_v10, %s6258_s11 }
 0x12b   : > { %1210 = vrot.lane.b32.xlu1 %v1202_v18, %s6259_s15  ;;  %1208 = vrot.lane.b32.xlu0 %v1201_v17, %s6259_s15 }
 0x12c   : > { %1206 = vrot.lane.b32.xlu2 %v1200_v19, %s6259_s15  ;;  %v1933_v19 = vld [vmem:[%s6345_s20 + $0x10] sm:$0xff]  ;;  %s9381_s15 = sld [smem:[#allocation15_spill]] }
 0x133   : > { %1272 = vrot.lane.b32.xlu1 %v1264_v29, %s6260_s22  ;;  %1270 = vrot.lane.b32.xlu0 %v1263_v27, %s6260_s22 }
 0x134   : > { %1268 = vrot.lane.b32.xlu2 %v1262_v30, %s6260_s22  ;;  %s9382_s22 = sld [smem:[#allocation17_spill]] }
 0x13b   : > { %1295 = vperm.xlu0 %5837, %v1292_v31  }
 0x13c   : > { %1286 = vperm.xlu2 %5836, %v1283_v32  }
 0x143   : > { %1730 = vperm.xlu0 %5837, %v1633_v33  }
 0x14b   : > { %1725 = vperm.xlu0 %5837, %v1632_v34  }
 0x151   : > { %v1032_v37 = vpop.permute.xlu2 %1031 }
 0x153   : > { %1758 = vperm.xlu0 %5837, %v1637_v35  }
 0x159   : > { %v6549_v41 = vpop.permute.xlu2 %1132 }
 0x15b   : > { %1720 = vperm.xlu0 %5837, %v1631_v36  }
 0x163   : > { %1753 = vperm.xlu0 %5837, %v1636_v38  }
 0x166   : > { %v6552_v45 = vpop.permute.xlu2 %1231 }
 0x168   : > { %v1036_v43 = vpop.permute.xlu1 %1035  ;;  %v1034_v44 = vpop.permute.xlu0 %1033 }
 0x169   : > { %v1038_v7 = vsel %vm1037_vm10, %v1032_v37, %v1034_v44  ;;  %v1039_v8 = vsel %vm1037_vm10, %v1034_v44, %v1036_v43  ;;  %v1045_v9 = vadd.f32 %v1036_v43, %v1017_v4 }
 0x16a   : > { %v1043_v13 = vadd.f32 %v1038_v7, %v1015_v5  ;;  %v1044_v25 = vadd.f32 %v1039_v8, %v1016_v6 }
 0x16b   : > { %1743 = vperm.xlu0 %5837, %v1634_v42  }
 0x16e   : > { %v1071_v49 = vpop.permute.xlu2 %1070 }
 0x170   : > { %v1137_v47 = vpop.permute.xlu1 %1136  ;;  %v1135_v48 = vpop.permute.xlu0 %1134 }
 0x171   : > { %v1139_v23 = vsel %vm1138_vm13, %v6549_v41, %v1135_v48  ;;  %v1140_v24 = vsel %vm1138_vm13, %v1135_v48, %v1137_v47 }
 0x173   : > { %1775 = vperm.xlu0 %5837, %v1769_v46  }
 0x176   : > { %v1108_v54 = vpop.permute.xlu2 %1107 }
 0x17b   : > { %1780 = vperm.xlu0 %5837, %v1770_v50  }
 0x17d   : > { %v6556_v51 = vpop.permute.xlu1 %1235  ;;  %v6558_v52 = vpop.permute.xlu0 %1233 }
 0x17e   : > { %v1170_v61 = vpop.permute.xlu2 %1169  ;;  %v1238_v46 = vsel %vm1237_vm0, %v6552_v45, %v6558_v52 }
 0x183   : > { %1822 = vperm.xlu0 %5837, %v1819_v53  }
 0x185   : > { %v1075_v55 = vpop.permute.xlu1 %1074  ;;  %v1073_v56 = vpop.permute.xlu0 %1072 }
 0x186   : > { %v1077_v10 = vsel %vm1076_vm11, %v1071_v49, %v1073_v56  ;;  %v1078_v26 = vsel %vm1076_vm11, %v1073_v56, %v1075_v55  ;;  %v1084_v14 = vadd.f32 %v1075_v55, %v1045_v9  ;;  %v1207_v28 = vpop.permute.xlu2 %1206 }
 0x187   : > { %v1082_v17 = vadd.f32 %v1077_v10, %v1043_v13  ;;  %v1083_v18 = vadd.f32 %v1078_v26, %v1044_v25 }
 0x18b   : > { %1843 = vperm.xlu0 %5837, %v1833_v59  }
 0x18d   : > { %v1112_v63 = vpop.permute.xlu1 %1111  ;;  %v1110_v0 = vpop.permute.xlu0 %1109 }
 0x18e   : > { %v1114_v15 = vsel %vm1113_vm12, %v1108_v54, %v1110_v0  ;;  %v1115_v16 = vsel %vm1113_vm12, %v1110_v0, %v1112_v63  ;;  %v1121_v20 = vadd.f32 %v1112_v63, %v1084_v14  ;;  %v1269_v42 = vpop.permute.xlu2 %1268 }
 0x18f   : > { %v1119_v21 = vadd.f32 %v1114_v15, %v1082_v17  ;;  %v1120_v22 = vadd.f32 %v1115_v16, %v1083_v18 }
 0x190   : > { %v1146_v27 = vadd.f32 %v1137_v47, %v1121_v20  ;;  %v1239_v47 = vsel %vm1237_vm0, %v6558_v52, %v6556_v51 }
 0x191   : > { %v1144_v33 = vadd.f32 %v1139_v23, %v1119_v21  ;;  %v1145_v34 = vadd.f32 %v1140_v24, %v1120_v22 }
 0x193   : > { %1853 = vperm.xlu0 %5837, %v1835_v3  }
 0x195   : > { %v1174_v11 = vpop.permute.xlu1 %1173  ;;  %v1172_v12 = vpop.permute.xlu0 %1171 }
 0x196   : > { %v1176_v29 = vsel %vm1175_vm14, %v1170_v61, %v1172_v12  ;;  %v1177_v30 = vsel %vm1175_vm14, %v1172_v12, %v1174_v11  ;;  %v1183_v35 = vadd.f32 %v1174_v11, %v1146_v27  ;;  %v1287_v61 = vpop.permute.xlu2 %1286  ;;  %vm1374_vm14 = vcmask 924672  }
 0x197   : > { %v1181_v38 = vadd.f32 %v1176_v29, %v1144_v33  ;;  %v1182_v39 = vadd.f32 %v1177_v30, %v1145_v34 }
 0x19b   : > { %1947 = vperm.xlu0 %5837, %v1933_v19  }
 0x19d   : > { %v1211_v31 = vpop.permute.xlu1 %1210  ;;  %v1209_v32 = vpop.permute.xlu0 %1208 }
 0x19e   : > { %v1213_v36 = vsel %vm1212_vm15, %v1207_v28, %v1209_v32  ;;  %v1214_v37 = vsel %vm1212_vm15, %v1209_v32, %v1211_v31  ;;  %v1220_v43 = vadd.f32 %v1211_v31, %v1183_v35  ;;  %vm1379_vm15 = vcmask 64512  }
 0x19f   : > { %v1218_v44 = vadd.f32 %v1213_v36, %v1181_v38  ;;  %v1219_v41 = vadd.f32 %v1214_v37, %v1182_v39 }
 0x1a0   : > { %v1245_v49 = vadd.f32 %v6556_v51, %v1220_v43 }
 0x1a1   : > { %v1243_v53 = vadd.f32 %v1238_v46, %v1218_v44  ;;  %v1244_v54 = vadd.f32 %v1239_v47, %v1219_v41  ;;  %v1480_v46 = vld [vmem:[#allocation2 + $0xf0] sm:$0xff] }
 0x1a2   : > { %v1512_v47 = vld [vmem:[#allocation2 + $0x1f0] sm:$0xff]  ;;  %1514 = vmatpush.msra.mxu2 %v1480_v46  ;;  %v1455_v46 = vld [vmem:[#allocation2 + $0x28] sm:$0xff] }
 0x1a3   : > { %1937 = vperm.xlu0 %5837, %v1931_v40   ;;  %1543 = vmatpush.msra.mxu3 %v1512_v47  ;;  %v1487_v47 = vld [vmem:[#allocation2 + $0x128] sm:$0xff] }
 0x1a5   : > { %v1273_v48 = vpop.permute.xlu1 %1272  ;;  %v1271_v50 = vpop.permute.xlu0 %1270 }
 0x1a6   : > { %v1275_v55 = vsel %vm1274_vm1, %v1269_v42, %v1271_v50  ;;  %v1276_v56 = vsel %vm1274_vm1, %v1271_v50, %v1273_v48  ;;  %v1282_v57 = vadd.f32 %v1273_v48, %v1245_v49  ;;  %v1478_v48 = vld [vmem:[#allocation2 + $0xe0] sm:$0xff]  ;;  %v1476_v50 = vld [vmem:[#allocation2 + $0xd0] sm:$0xff] }
 0x1a7   : > { %v1280_v58 = vadd.f32 %v1275_v55, %v1243_v53  ;;  %v1281_v59 = vadd.f32 %v1276_v56, %v1244_v54  ;;  %v1510_v49 = vld [vmem:[#allocation2 + $0x1e0] sm:$0xff]  ;;  %1515 = vmatpush.msra.mxu2 %v1478_v48  ;;  %v1508_v54 = vld [vmem:[#allocation2 + $0x1d0] sm:$0xff] }
 0x1a8   : > { %v1291_v45 = vmul.f32 %v1287_v61, %v1282_v57  ;;  %1544 = vmatpush.msra.mxu3 %v1510_v49  ;;  %v1452_v48 = vld [vmem:[#allocation2 + $0x10] sm:$0xff] }
 0x1a9   : > { %v1289_v62 = vmul.f32 %v1287_v61, %v1280_v58  ;;  %v1290_v63 = vmul.f32 %v1287_v61, %v1281_v59  ;;  %v1361_v58 = vld [vmem:[%s9372_s23] sm:$0xff]  ;;  %1516 = vmatpush.msra.mxu2 %v1476_v50  ;;  %v1481_v61 = vld [vmem:[#allocation2 + $0xf8] sm:$0xff]  ;;  %v1484_v49 = vld [vmem:[#allocation2 + $0x110] sm:$0xff] }
 0x1aa   : > { %1545 = vmatpush.msra.mxu3 %v1508_v54  ;;  %v1453_v50 = vld [vmem:[#allocation2 + $0x18] sm:$0xff]  ;;  %v1450_v54 = vld [vmem:[#allocation2] sm:$0xff] }
 0x1ab   : > { %2491 = vperm.xlu0 %5837, %v2481_v60  }
 0x1ad   : > { %v1296_v0 = vpop.permute.xlu0 %1295 }
 0x1ae   : > { %v1298_v1 = vadd.f32 %v1296_v0, %v1289_v62  ;;  %v1299_v52 = vadd.f32 %v1296_v0, %v1290_v63  ;;  %v1300_v2 = vadd.f32 %v1296_v0, %v1291_v45  ;;  %v1513_v62 = vld [vmem:[#allocation2 + $0x1f8] sm:$0xff]  ;;  %v1474_v63 = vld [vmem:[#allocation2 + $0xc0] sm:$0xff]  ;;  %v1479_v0 = vld [vmem:[#allocation2 + $0xe8] sm:$0xff] }
 0x1af   : > { %v1506_v45 = vld [vmem:[#allocation2 + $0x1c0] sm:$0xff]  ;;  %1517 = vmatpush.msra.mxu2 %v1474_v63 }
 0x1b0   : > { %v5454_v3 = vmul.f32 -1.442695, %v1298_v1  ;;  %v5455_v51 = vmul.f32 -1.442695, %v1299_v52  ;;  %v5456_v4 = vmul.f32 -1.442695, %v1300_v2  ;;  %1546 = vmatpush.msra.mxu3 %v1506_v45 }
 0x1b2   : > { %5843 = vpow2.f32 %v5454_v3  ;;  %v1477_v3 = vld [vmem:[#allocation2 + $0xd8] sm:$0xff] }
 0x1b3   : > { %5845 = vpow2.f32 %v5455_v51  ;;  %v1509_v51 = vld [vmem:[#allocation2 + $0x1d8] sm:$0xff] }
 0x1b4   : > { %5847 = vpow2.f32 %v5456_v4  ;;  %v1470_v4 = vld [vmem:[#allocation2 + $0xa0] sm:$0xff] }
 0x1b8   : > { %v5844_v5 = vpop.eup %5843 }
 0x1b9   : > { %v5846_v6 = vpop.eup %5845  ;;  %v1310_v7 = vadd.f32 1.0, %v5844_v5  ;;  %v1502_v5 = vld [vmem:[#allocation2 + $0x1a0] sm:$0xff] }
 0x1ba   : > { %v5848_v8 = vpop.eup %5847  ;;  %v1311_v9 = vadd.f32 1.0, %v5846_v6  ;;  %v1475_v6 = vld [vmem:[#allocation2 + $0xc8] sm:$0xff] }
 0x1bb   : > { %v1312_v10 = vadd.f32 1.0, %v5848_v8  ;;  %5849 = vrcp.f32 %v1310_v7  ;;  %vm1318_vm2 = vweird.f32 %v1310_v7  ;;  %v1322_v15 = vand.u32 2147483647, %v1310_v7  ;;  %v1362_v8 = vld [vmem:[%s9372_s23 + $0x8] sm:$0xff] }
 0x1bc   : > { %5851 = vrcp.f32 %v1311_v9  ;;  %v1324_v16 = vand.u32 2147483648, %v1310_v7  ;;  %v1339_v19 = vand.u32 2147483648, %v1311_v9  ;;  %v1337_v22 = vand.u32 2147483647, %v1311_v9 }
 0x1bd   : > { %5853 = vrcp.f32 %v1312_v10  ;;  %v1354_v23 = vand.u32 2147483648, %v1312_v10  ;;  %v1352_v29 = vand.u32 2147483647, %v1312_v10  ;;  %vm1323_vm7 = vcmp.eq.f32.partialorder %v1322_v15, 8.507059e+37  ;;  %v1501_v15 = vld [vmem:[#allocation2 + $0x198] sm:$0xff] }
 0x1be   : > { %v1325_v30 = vor.u32 1.1754944e-38, %v1324_v16  ;;  %vm1333_vm8 = vweird.f32 %v1311_v9  ;;  %v1340_v33 = vor.u32 1.1754944e-38, %v1339_v19  ;;  %vm1348_vm10 = vweird.f32 %v1312_v10  ;;  %v1464_v16 = vld [vmem:[#allocation2 + $0x70] sm:$0xff]  ;;  %v1499_v19 = vld [vmem:[#allocation2 + $0x188] sm:$0xff] }
 0x1bf   : > { %vm1338_vm11 = vcmp.eq.f32.partialorder %v1337_v22, 8.507059e+37  ;;  %v1355_v37 = vor.u32 1.1754944e-38, %v1354_v23  ;;  %vm1353_vm13 = vcmp.eq.f32.partialorder %v1352_v29, 8.507059e+37  ;;  %v1497_v22 = vld [vmem:[#allocation2 + $0x178] sm:$0xff]  ;;  %v1462_v23 = vld [vmem:[#allocation2 + $0x60] sm:$0xff]  ;;  %v1495_v29 = vld [vmem:[#allocation2 + $0x168] sm:$0xff] }
 0x1c1   : > { %v5850_v26 = vpop.eup %5849 }
 0x1c2   : > { %v5852_v11 = vpop.eup %5851  ;;  %v1314_v12 = vmul.f32 %v5850_v26, %v1310_v7  ;;  %vm1319_vm3 = vweird.f32 %v5850_v26  ;;  %v1507_v7 = vld [vmem:[#allocation2 + $0x1c8] sm:$0xff] }
 0x1c3   : > { %v5854_v13 = vpop.eup %5853  ;;  %v1329_v25 = vmul.f32 %v5852_v11, %v1311_v9  ;;  %vm1334_vm4 = vweird.f32 %v5852_v11  ;;  %vm1320_vm6 = vmor %vm1318_vm2, %vm1319_vm3  ;;  %v1473_v9 = vld [vmem:[#allocation2 + $0xb8] sm:$0xff]  ;;  %vm9299_vm3 = vcmask 261120  }
 0x1c4   : > { %v1315_v14 = vsub.f32 1.0, %v1314_v12  ;;  %v1344_v28 = vmul.f32 %v5854_v13, %v1312_v10  ;;  %vm1349_vm5 = vweird.f32 %v5854_v13  ;;  %vm1335_vm9 = vmor %vm1333_vm8, %vm1334_vm4  ;;  %v1505_v10 = vld [vmem:[#allocation2 + $0x1b8] sm:$0xff]  ;;  %v1471_v12 = vld [vmem:[#allocation2 + $0xa8] sm:$0xff] }
 0x1c5   : > { %v1330_v17 = vsub.f32 1.0, %v1329_v25  ;;  %vm1350_vm12 = vmor %vm1348_vm10, %vm1349_vm5  ;;  %v1466_v25 = vld [vmem:[#allocation2 + $0x80] sm:$0xff] }
 0x1c6   : > { %v1316_v18 = vmul.f32 %v5850_v26, %v1315_v14  ;;  %v1345_v20 = vsub.f32 1.0, %v1344_v28  ;;  %v1498_v14 = vld [vmem:[#allocation2 + $0x180] sm:$0xff]  ;;  %v1469_v28 = vld [vmem:[#allocation2 + $0x98] sm:$0xff] }
 0x1c7   : > { %v1331_v21 = vmul.f32 %v5852_v11, %v1330_v17  ;;  %v1496_v17 = vld [vmem:[#allocation2 + $0x170] sm:$0xff] }
 0x1c8   : > { %v1317_v24 = vadd.f32 %v5850_v26, %v1316_v18  ;;  %v1346_v27 = vmul.f32 %v5854_v13, %v1345_v20  ;;  %v1467_v18 = vld [vmem:[#allocation2 + $0x88] sm:$0xff]  ;;  %v1363_v20 = vld [vmem:[%s9372_s23 + $0x10] sm:$0xff] }
 0x1c9   : > { %v1332_v31 = vadd.f32 %v5852_v11, %v1331_v21  ;;  %v1465_v21 = vld [vmem:[#allocation2 + $0x78] sm:$0xff] }
 0x1ca   : > { %v1321_v32 = vsel %vm1320_vm6, %v5850_v26, %v1317_v24  ;;  %v1347_v34 = vadd.f32 %v5854_v13, %v1346_v27  ;;  %v1468_v26 = vld [vmem:[#allocation2 + $0x90] sm:$0xff]  ;;  %v1494_v24 = vld [vmem:[#allocation2 + $0x160] sm:$0xff]  ;;  %v1463_v27 = vld [vmem:[#allocation2 + $0x68] sm:$0xff] }
 0x1cb   : > { %v1326_v35 = vsel %vm1323_vm7, %v1325_v30, %v1321_v32  ;;  %v1336_v36 = vsel %vm1335_vm9, %v5852_v11, %v1332_v31  ;;  %v1500_v11 = vld [vmem:[#allocation2 + $0x190] sm:$0xff]  ;;  %v1461_v32 = vld [vmem:[#allocation2 + $0x58] sm:$0xff] }
 0x1cc   : > { %v1341_v38 = vsel %vm1338_vm11, %v1340_v33, %v1336_v36  ;;  %v1358_v39 = vmul.f32 %v1326_v35, %v1298_v1  ;;  %v1351_v40 = vsel %vm1350_vm12, %v5854_v13, %v1347_v34  ;;  %v1511_v1 = vld [vmem:[#allocation2 + $0x1e8] sm:$0xff]  ;;  %v1460_v30 = vld [vmem:[#allocation2 + $0x50] sm:$0xff]  ;;  %v1493_v33 = vld [vmem:[#allocation2 + $0x158] sm:$0xff] }
 0x1cd   : > { %v1359_v42 = vmul.f32 %v1341_v38, %v1299_v52  ;;  %v1356_v43 = vsel %vm1353_vm13, %v1355_v37, %v1351_v40  ;;  %v1472_v52 = vld [vmem:[#allocation2 + $0xb0] sm:$0xff]  ;;  %v1503_v13 = vld [vmem:[#allocation2 + $0x1a8] sm:$0xff]  ;;  %v1458_v34 = vld [vmem:[#allocation2 + $0x40] sm:$0xff] }
 0x1ce   : > { %v1360_v44 = vmul.f32 %v1356_v43, %v1300_v2  ;;  %v1504_v2 = vld [vmem:[#allocation2 + $0x1b0] sm:$0xff]  ;;  %1518 = vmatpush.msra.mxu2 %v1472_v52  ;;  %v1490_v35 = vld [vmem:[#allocation2 + $0x140] sm:$0xff]  ;;  %v1459_v36 = vld [vmem:[#allocation2 + $0x48] sm:$0xff] }
 0x1cf   : > { %v5838_v41 = vpack.i.bf16 %v1359_v42, %v1358_v39  ;;  %1547 = vmatpush.msra.mxu3 %v1504_v2  ;;  %v1492_v31 = vld [vmem:[#allocation2 + $0x150] sm:$0xff]  ;;  %v1491_v37 = vld [vmem:[#allocation2 + $0x148] sm:$0xff]  ;;  %v1364_v38 = vld [vmem:[%s9372_s23 + $0x18] sm:$0xff] }
 0x1d0   : > { %1372 = vrot.lane.b32.xlu2 %v1360_v44, %s6261_s28  ;;  %1519 = vmatpush.msra.mxu2 %v1470_v4  ;;  %v1456_v39 = vld [vmem:[#allocation2 + $0x30] sm:$0xff]  ;;  %v1457_v42 = vld [vmem:[#allocation2 + $0x38] sm:$0xff]  ;;  %v1454_v44 = vld [vmem:[#allocation2 + $0x20] sm:$0xff] }
 0x1d1   : > { %5839 = vrot.lane.b32.xlu1 %v5838_v41, %s6261_s28  ;;  %1548 = vmatpush.msra.mxu3 %v1502_v5  ;;  %v1488_v40 = vld [vmem:[#allocation2 + $0x130] sm:$0xff]  ;;  %v1489_v43 = vld [vmem:[#allocation2 + $0x138] sm:$0xff]  ;;  %v1486_v41 = vld [vmem:[#allocation2 + $0x120] sm:$0xff]  ;;  %s9383_s28 = sld [smem:[#allocation20_spill]] }
 0x1d2   : > { %1520 = vmatpush.msra.mxu2 %v1468_v26 }
 0x1d3   : > { %1549 = vmatpush.msra.mxu3 %v1500_v11 }
 0x1d4   : > { %1521 = vmatpush.msra.mxu2 %v1466_v25 }
 0x1d5   : > { %1550 = vmatpush.msra.mxu3 %v1498_v14 }
 0x1d6   : > { %1522 = vmatpush.msra.mxu2 %v1464_v16 }
 0x1d7   : > { %1551 = vmatpush.msra.mxu3 %v1496_v17 }
 0x1d8   : > { %1523 = vmatpush.msra.mxu2 %v1462_v23 }
 0x1d9   : > { %1552 = vmatpush.msra.mxu3 %v1494_v24 }
 0x1da   : > { %1524 = vmatpush.msra.mxu2 %v1460_v30 }
 0x1db   : > { %1553 = vmatpush.msra.mxu3 %v1492_v31 }
 0x1dc   : > { %1525 = vmatpush.msra.mxu2 %v1458_v34 }
 0x1dd   : > { %1554 = vmatpush.msra.mxu3 %v1490_v35 }
 0x1de   : > { %1526 = vmatpush.msra.mxu2 %v1456_v39 }
 0x1df   : > { %1555 = vmatpush.msra.mxu3 %v1488_v40 }
 0x1e0   : > { %1527 = vmatpush.msra.mxu2 %v1454_v44 }
 0x1e1   : > { %1556 = vmatpush.msra.mxu3 %v1486_v41 }
 0x1e2   : > { %1528 = vmatpush.msra.mxu2 %v1452_v48  ;;  %v1772_v48 = vld [vmem:[%s6320_s19 + $0x18] sm:$0xff] }
 0x1e3   : > { %1557 = vmatpush.msra.mxu3 %v1484_v49  ;;  %v1771_v49 = vld [vmem:[%s6320_s19 + $0x10] sm:$0xff] }
 0x1e4   : > { %1529 = vmatpush.msra.mxu2 %v1450_v54  ;;  %v1934_v54 = vld [vmem:[%s6345_s20 + $0x18] sm:$0xff] }
 0x22a   : > { %v1373_v57 = vpop.permute.xlu2 %1372 }
 0x243   : > { %v5840_v53 = vpop.permute.xlu1 %5839 }
 0x244   : > { %v5842_v55 = vunpack.i.h.bf16 %v5840_v53  ;;  %v5841_v56 = vunpack.i.l.bf16 %v5840_v53  ;;  %v1485_v53 = vld [vmem:[#allocation2 + $0x118] sm:$0xff] }
 0x246   : > { %v1375_v59 = vsel %vm1374_vm14, %v5841_v56, %v5842_v55  ;;  %v1376_v60 = vsel %vm1374_vm14, %v5842_v55, %v1373_v57  ;;  %v1482_v55 = vld [vmem:[#allocation2 + $0x100] sm:$0xff]  ;;  %v1451_v56 = vld [vmem:[#allocation2 + $0x8] sm:$0xff] }
 0x247   : > { %1407 = vmatpush.msra.mxu0 %v1375_v59  ;;  %1436 = vmatpush.msra.mxu1 %v1376_v60  ;;  %v1483_v57 = vld [vmem:[#allocation2 + $0x108] sm:$0xff] }
 0x248   : > { %5457 = vmatmul.msk.f32.vlgmr.msra.gmra.mxu0 %vm1379_vm15, %v1361_v58  ;;  %5461 = vmatmul.msk.f32.vlgmr.msra.gmra.mxu1 %vm1379_vm15, %v1361_v58 }
 0x249   : > { %1572 = vmatpush.msrb.mxu0 %v1481_v61  ;;  %1601 = vmatpush.msrb.mxu1 %v1513_v62 }
 0x24a   : > { %1558 = vmatpush.msra.mxu3 %v1482_v55  ;;  %v1932_v55 = vld [vmem:[%s6345_s20 + $0x8] sm:$0xff] }
 0x24b   : > { %1573 = vmatpush.msrb.mxu0 %v1479_v0  ;;  %1602 = vmatpush.msrb.mxu1 %v1511_v1 }
 0x24d   : > { %1574 = vmatpush.msrb.mxu0 %v1477_v3  ;;  %1603 = vmatpush.msrb.mxu1 %v1509_v51 }
 0x24f   : > { %1575 = vmatpush.msrb.mxu0 %v1475_v6  ;;  %1604 = vmatpush.msrb.mxu1 %v1507_v7 }
 0x250   : > { %5458 = vmatmul.msk.f32.gmra.mxu0 %vm1379_vm15, %v1362_v8  ;;  %5462 = vmatmul.msk.f32.gmra.mxu1 %vm1379_vm15, %v1362_v8 }
 0x251   : > { %1576 = vmatpush.msrb.mxu0 %v1473_v9  ;;  %1605 = vmatpush.msrb.mxu1 %v1505_v10 }
 0x253   : > { %1577 = vmatpush.msrb.mxu0 %v1471_v12  ;;  %1606 = vmatpush.msrb.mxu1 %v1503_v13 }
 0x255   : > { %1578 = vmatpush.msrb.mxu0 %v1469_v28  ;;  %1607 = vmatpush.msrb.mxu1 %v1501_v15 }
 0x257   : > { %1579 = vmatpush.msrb.mxu0 %v1467_v18  ;;  %1608 = vmatpush.msrb.mxu1 %v1499_v19 }
 0x258   : > { %5459 = vmatmul.msk.f32.gmra.mxu0 %vm1379_vm15, %v1363_v20  ;;  %5463 = vmatmul.msk.f32.gmra.mxu1 %vm1379_vm15, %v1363_v20 }
 0x259   : > { %1580 = vmatpush.msrb.mxu0 %v1465_v21  ;;  %1609 = vmatpush.msrb.mxu1 %v1497_v22 }
 0x25b   : > { %1581 = vmatpush.msrb.mxu0 %v1463_v27  ;;  %1610 = vmatpush.msrb.mxu1 %v1495_v29 }
 0x25d   : > { %1582 = vmatpush.msrb.mxu0 %v1461_v32  ;;  %1611 = vmatpush.msrb.mxu1 %v1493_v33 }
 0x25f   : > { %1583 = vmatpush.msrb.mxu0 %v1459_v36  ;;  %1612 = vmatpush.msrb.mxu1 %v1491_v37 }
 0x260   : > { %5460 = vmatmul.msk.f32.gmra.mxu0 %vm1379_vm15, %v1364_v38  ;;  %5464 = vmatmul.msk.f32.gmra.mxu1 %vm1379_vm15, %v1364_v38 }
 0x261   : > { %1584 = vmatpush.msrb.mxu0 %v1457_v42  ;;  %1613 = vmatpush.msrb.mxu1 %v1489_v43 }
 0x263   : > { %1585 = vmatpush.msrb.mxu0 %v1455_v46  ;;  %1614 = vmatpush.msrb.mxu1 %v1487_v47  ;;  %v1635_v46 = vld [vmem:[%s6315_s14 + $0x8] sm:$0xff]  ;;  %v1630_v47 = vld [vmem:[%s9360_s8] sm:$0xff] }
 0x265   : > { %1586 = vmatpush.msrb.mxu0 %v1453_v50  ;;  %1615 = vmatpush.msrb.mxu1 %v1485_v53  ;;  %v1832_v50 = vld [vmem:[%s9361_s6] sm:$0xff]  ;;  %v1834_v53 = vld [vmem:[%s9361_s6 + $0x10] sm:$0xff] }
 0x267   : > { %1587 = vmatpush.msrb.mxu0 %v1451_v56  ;;  %1616 = vmatpush.msrb.mxu1 %v1483_v57  ;;  %v2480_v56 = vld [vmem:[%s9359_s4] sm:$0xff]  ;;  %v2483_v57 = vld [vmem:[%s9359_s4 + $0x18] sm:$0xff] }
 0x2c5   : > { %v1409_v58 = vpop.f32.mrf.mxu0  ;;  %v1438_v59 = vpop.f32.mrf.mxu1 }
 0x2c6   : > { %1530 = vmatmul.f32.vlgmr.msra.gmra.mxu2 %v1409_v58  ;;  %1559 = vmatmul.f32.vlgmr.msra.gmra.mxu3 %v1438_v59 }
 0x2c7   : > { %1588 = vmatmul.f32.vlgmr.msrb.gmra.mxu0 %v1409_v58  ;;  %1617 = vmatmul.f32.vlgmr.msrb.gmra.mxu1 %v1438_v59 }
 0x2cd   : > { %v1412_v60 = vpop.f32.mrf.mxu0  ;;  %v1441_v61 = vpop.f32.mrf.mxu1 }
 0x2ce   : > { %1533 = vmatmul.f32.gmra.mxu2 %v1412_v60  ;;  %1562 = vmatmul.f32.gmra.mxu3 %v1441_v61 }
 0x2cf   : > { %1591 = vmatmul.f32.gmra.mxu0 %v1412_v60  ;;  %1620 = vmatmul.f32.gmra.mxu1 %v1441_v61 }
 0x2d5   : > { %v1415_v62 = vpop.f32.mrf.mxu0  ;;  %v1444_v63 = vpop.f32.mrf.mxu1 }
 0x2d6   : > { %1536 = vmatmul.f32.gmra.mxu2 %v1415_v62  ;;  %1565 = vmatmul.f32.gmra.mxu3 %v1444_v63 }
 0x2d7   : > { %1594 = vmatmul.f32.gmra.mxu0 %v1415_v62  ;;  %1623 = vmatmul.f32.gmra.mxu1 %v1444_v63 }
 0x2dd   : > { %v1418_v45 = vpop.f32.mrf.mxu0  ;;  %v1447_v0 = vpop.f32.mrf.mxu1 }
 0x2de   : > { %1539 = vmatmul.f32.gmra.mxu2 %v1418_v45  ;;  %1568 = vmatmul.f32.gmra.mxu3 %v1447_v0 }
 0x2df   : > { %1597 = vmatmul.f32.gmra.mxu0 %v1418_v45  ;;  %1626 = vmatmul.f32.gmra.mxu1 %v1447_v0 }
 0x344   : > { %v1589_v1 = vpop.f32.mrf.mxu0  ;;  %v1618_v52 = vpop.f32.mrf.mxu1 }
 0x345   : > { %v6591_v8 = vadd.f32 %v1618_v52, %v1589_v1 }
 0x347   : > { %9374 = vst [vmem:[#allocation30_spill] sm:$0xff] %v6591_v8  ;;  %v1656_v12 = vmul.f32 %v6591_v8, %v6591_v8 }
 0x349   : > { %v1531_v2 = vpop.f32.mrf.mxu2  ;;  %v1560_v3 = vpop.f32.mrf.mxu3 }
 0x34a   : > { %v6589_v5 = vadd.f32 %v1560_v3, %v1531_v2 }
 0x34c   : > { %v1592_v51 = vpop.f32.mrf.mxu0  ;;  %v1621_v4 = vpop.f32.mrf.mxu1  ;;  %9373 = vst [vmem:[#allocation29_spill] sm:$0xff] %v6589_v5  ;;  %v1655_v10 = vmul.f32 %v6589_v5, %v6589_v5  ;;  %v1638_v13 = vadd.f32 %v6591_v8, %v6589_v5 }
 0x34d   : > { %v6603_v28 = vadd.f32 %v1621_v4, %v1592_v51 }
 0x34e   : > { %v1663_v14 = vadd.f32 %v1656_v12, %v1655_v10 }
 0x34f   : > { %9376 = vst [vmem:[#allocation32_spill] sm:$0xff] %v6603_v28  ;;  %v1658_v20 = vmul.f32 %v6603_v28, %v6603_v28 }
 0x351   : > { %v1534_v6 = vpop.f32.mrf.mxu2  ;;  %v1563_v7 = vpop.f32.mrf.mxu3 }
 0x352   : > { %v6593_v9 = vadd.f32 %v1563_v7, %v1534_v6  ;;  %v1731_v7 = vpop.permute.xlu0 %1730 }
 0x354   : > { %9375 = vst [vmem:[#allocation31_spill] sm:$0xff] %v6593_v9  ;;  %v1595_v26 = vpop.f32.mrf.mxu0  ;;  %v1624_v11 = vpop.f32.mrf.mxu1  ;;  %v1657_v25 = vmul.f32 %v6593_v9, %v6593_v9  ;;  %v1639_v15 = vadd.f32 %v1638_v13, %v6593_v9 }
 0x355   : > { %v6613_v23 = vadd.f32 %v1624_v11, %v1595_v26 }
 0x356   : > { %v1664_v19 = vadd.f32 %v1663_v14, %v1657_v25  ;;  %v1640_v21 = vadd.f32 %v1639_v15, %v6603_v28 }
 0x357   : > { %9378 = vst [vmem:[#allocation34_spill] sm:$0xff] %v6613_v23  ;;  %v1660_v37 = vmul.f32 %v6613_v23, %v6613_v23 }
 0x358   : > { %v1665_v27 = vadd.f32 %v1664_v19, %v1658_v20 }
 0x359   : > { %v1537_v16 = vpop.f32.mrf.mxu2  ;;  %v1566_v17 = vpop.f32.mrf.mxu3 }
 0x35a   : > { %v6606_v18 = vadd.f32 %v1566_v17, %v1537_v16  ;;  %v1726_v25 = vpop.permute.xlu0 %1725 }
 0x35c   : > { %9377 = vst [vmem:[#allocation33_spill] sm:$0xff] %v6606_v18  ;;  %v1659_v22 = vmul.f32 %v6606_v18, %v6606_v18  ;;  %v1641_v24 = vadd.f32 %v1640_v21, %v6606_v18  ;;  %v1598_v29 = vpop.f32.mrf.mxu0  ;;  %v1627_v30 = vpop.f32.mrf.mxu1 }
 0x35d   : > { %v6616_v34 = vadd.f32 %v1627_v30, %v1598_v29 }
 0x35e   : > { %v1666_v31 = vadd.f32 %v1665_v27, %v1659_v22  ;;  %v1642_v36 = vadd.f32 %v1641_v24, %v6613_v23 }
 0x35f   : > { %9379 = vst [vmem:[#allocation35_spill] sm:$0xff] %v6616_v34  ;;  %v1662_v43 = vmul.f32 %v6616_v34, %v6616_v34 }
 0x360   : > { %v1667_v40 = vadd.f32 %v1666_v31, %v1660_v37 }
 0x361   : > { %v1540_v32 = vpop.f32.mrf.mxu2  ;;  %v1569_v33 = vpop.f32.mrf.mxu3 }
 0x362   : > { %v6618_v35 = vadd.f32 %v1569_v33, %v1540_v32  ;;  %v1759_v16 = vpop.permute.xlu0 %1758 }
 0x364   : > { %9380 = vst [vmem:[#allocation36_spill] sm:$0xff] %v6618_v35  ;;  %v1643_v38 = vadd.f32 %v1642_v36, %v6618_v35  ;;  %v1661_v39 = vmul.f32 %v6618_v35, %v6618_v35 }
 0x366   : > { %v1644_v42 = vadd.f32 %v1643_v38, %v6616_v34  ;;  %v1668_v44 = vadd.f32 %v1667_v40, %v1661_v39 }
 0x368   : > { %1645 = vadd.xlane.f32.xlu1 %v1644_v42  ;;  %v1669_v41 = vadd.f32 %v1668_v44, %v1662_v43 }
 0x36a   : > { %1670 = vadd.xlane.f32.xlu2 %v1669_v41  ;;  %v1721_v17 = vpop.permute.xlu0 %1720 }
 0x372   : > { %v1754_v19 = vpop.permute.xlu0 %1753 }
 0x37a   : > { %v1744_v20 = vpop.permute.xlu0 %1743 }
 0x381   : > { %1748 = vperm.xlu1 %5835, %v1635_v46  }
 0x382   : > { %1715 = vperm.xlu2 %5836, %v1630_v47   ;;  %v1776_v22 = vpop.permute.xlu0 %1775 }
 0x389   : > { %1790 = vperm.xlu1 %5835, %v1772_v48  }
 0x38a   : > { %1785 = vperm.xlu2 %5836, %v1771_v49  }
 0x391   : > { %1838 = vperm.xlu1 %5835, %v1832_v50  }
 0x399   : > { %1848 = vperm.xlu1 %5835, %v1834_v53  }
 0x3a1   : > { %1952 = vperm.xlu1 %5835, %v1934_v54  }
 0x3a9   : > { %1942 = vperm.xlu1 %5835, %v1932_v55  }
 0x3b1   : > { %2486 = vperm.xlu1 %5835, %v2480_v56  }
 0x3b9   : > { %2501 = vperm.xlu1 %5835, %v2483_v57  }
 0x3db   : > { %v1646_v58 = vpop.xlane.xlu1 %1645 }
 0x3dc   : > { %v1647_v59 = vrot.slane %v1646_v58, 4 }
 0x3dd   : > { %v1671_v60 = vpop.xlane.xlu2 %1670 }
 0x3de   : > { %v1648_v61 = vadd.f32 %v1647_v59, %v1646_v58  ;;  %v1672_v62 = vrot.slane %v1671_v60, 4 }
 0x3e0   : > { %v1649_v63 = vrot.slane %v1648_v61, 2  ;;  %v1673_v45 = vadd.f32 %v1672_v62, %v1671_v60 }
 0x3e2   : > { %v1674_v0 = vrot.slane %v1673_v45, 2  ;;  %v1650_v1 = vadd.f32 %v1649_v63, %v1648_v61 }
 0x3e4   : > { %v1651_v52 = vrot.slane %v1650_v1, 1  ;;  %v1675_v2 = vadd.f32 %v1674_v0, %v1673_v45 }
 0x3e5   : > { %v1716_v27 = vpop.permute.xlu2 %1715 }
 0x3e6   : > { %v1652_v3 = vadd.f32 %v1651_v52, %v1650_v1  ;;  %v1676_v51 = vrot.slane %v1675_v2, 1  ;;  %v1781_v1 = vpop.permute.xlu0 %1780 }
 0x3e8   : > { %5668 = vpush %v1652_v3  ;;  %v1677_v4 = vadd.f32 %v1676_v51, %v1675_v2 }
 0x3ea   : > { %5670 = vpush %v1677_v4 }
 0x3ed   : > { %v1786_v51 = vpop.permute.xlu2 %1785 }
 0x3f3   : > { %v1749_v39 = vpop.permute.xlu1 %1748 }
 0x419   : > { %s5669_s18 = spop %5668 }
 0x41a   : > { %s1654_s16 = smul.f32 0.00012207031, %s5669_s18  ;;  %s9384_s18 = sld [smem:[#allocation21_spill]] }
 0x41b   : > { %s5671_s26 = spop %5670 }
 0x41c   : > { %s1680_s1 = smul.f32 %s1654_s16, %s1654_s16  ;;  %v1682_v21 = vstv %s1654_s16  ;;  %s9385_s16 = sld [smem:[#allocation23_spill]] }
 0x41d   : > { %s1679_s2 = smul.f32 0.00012207031, %s5671_s26  ;;  %v1689_v24 = vsub.f32 %v6618_v35, %v1682_v21  ;;  %v1690_v29 = vsub.f32 %v6616_v34, %v1682_v21  ;;  %v1687_v30 = vsub.f32 %v6606_v18, %v1682_v21  ;;  %v1688_v31 = vsub.f32 %v6613_v23, %v1682_v21  ;;  %s9386_s26 = sld [smem:[#allocation25_spill]]  ;;  %v6846_v35 = vld [vmem:[#allocation6 + $0x28] sm:$0xff]  ;;  %v6852_v23 = vld [vmem:[#allocation6 + $0x10] sm:$0xff] }
 0x41e   : > { %v1685_v32 = vsub.f32 %v6593_v9, %v1682_v21  ;;  %v1686_v36 = vsub.f32 %v6603_v28, %v1682_v21  ;;  %v1683_v37 = vsub.f32 %v6589_v5, %v1682_v21  ;;  %v1684_v38 = vsub.f32 %v6591_v8, %v1682_v21  ;;  %v6848_v34 = vld [vmem:[#allocation6 + $0x128] sm:$0xff]  ;;  %v6854_v18 = vld [vmem:[#allocation6 + $0x110] sm:$0xff]  ;;  %v6858_v28 = vld [vmem:[#allocation6 + $0x18] sm:$0xff] }
 0x41f   : > { %s1681_s0 = ssub.f32 %s1679_s2, %s1680_s1  ;;  %v6860_v9 = vld [vmem:[#allocation6 + $0x118] sm:$0xff]  ;;  %v6864_v8 = vld [vmem:[#allocation6] sm:$0xff] }
 0x420   : > { %v6866_v5 = vld [vmem:[#allocation6 + $0x100] sm:$0xff]  ;;  %s9411_s2 = sld [smem:[#allocation18_spill]] }
 0x421   : > { %s1691_s25 = sadd.f32 1e-05, %s1681_s0 }
 0x423   : > { %v1692_v6 = vstv %s1691_s25 }
 0x424   : > { %5855 = vrsqrt.f32 %v1692_v6  ;;  %vm1699_vm1 = vweird.f32 %v1692_v6 }
 0x42a   : > { %v5856_v10 = vpop.eup %5855 }
 0x42b   : > { %v1694_v26 = vmul.f32 %v5856_v10, %v1692_v6  ;;  %vm1700_vm0 = vweird.f32 %v5856_v10 }
 0x42c   : > { %vm1701_vm2 = vmor %vm1699_vm1, %vm1700_vm0 }
 0x42d   : > { %v1695_v11 = vmul.f32 %v5856_v10, %v1694_v26 }
 0x42f   : > { %v1696_v12 = vmul.f32 0.5, %v1695_v11 }
 0x431   : > { %v1697_v13 = vsub.f32 1.5, %v1696_v12 }
 0x433   : > { %v1698_v14 = vmul.f32 %v5856_v10, %v1697_v13 }
 0x435   : > { %v1702_v15 = vsel %vm1701_vm2, %v5856_v10, %v1698_v14  ;;  %v1791_v10 = vpop.permute.xlu1 %1790 }
 0x436   : > { %5672 = vpush %v1702_v15 }
 0x467   : > { %s5673_s11 = spop %5672 }
 0x468   : > { %v1704_v33 = vstv %s5673_s11 }
 0x469   : > { %v1711_v40 = vmul.f32 %v1704_v33, %v1689_v24  ;;  %v1712_v42 = vmul.f32 %v1704_v33, %v1690_v29  ;;  %v1709_v43 = vmul.f32 %v1704_v33, %v1687_v30  ;;  %v1710_v44 = vmul.f32 %v1704_v33, %v1688_v31  ;;  %v1829_v29 = vld [vmem:[%s9381_s15 + $0x8] sm:$0xff] }
 0x46a   : > { %v1707_v41 = vmul.f32 %v1704_v33, %v1685_v32  ;;  %v1708_v46 = vmul.f32 %v1704_v33, %v1686_v36  ;;  %v1705_v47 = vmul.f32 %v1704_v33, %v1683_v37  ;;  %v1706_v48 = vmul.f32 %v1704_v33, %v1684_v38  ;;  %v1928_v30 = vld [vmem:[%s9382_s22 + $0x8] sm:$0xff]  ;;  %v1823_v37 = vpop.permute.xlu0 %1822 }
 0x46b   : > { %v1739_v49 = vmul.f32 %v1731_v7, %v1711_v40  ;;  %v1740_v50 = vmul.f32 %v1731_v7, %v1712_v42  ;;  %v1737_v53 = vmul.f32 %v1726_v25, %v1709_v43  ;;  %v1738_v54 = vmul.f32 %v1726_v25, %v1710_v44  ;;  %v1828_v25 = vld [vmem:[%s9381_s15] sm:$0xff]  ;;  %v1830_v44 = vld [vmem:[%s9381_s15 + $0x10] sm:$0xff] }
 0x46c   : > { %v1735_v55 = vmul.f32 %v1721_v17, %v1707_v41  ;;  %v1736_v56 = vmul.f32 %v1721_v17, %v1708_v46  ;;  %v1733_v57 = vmul.f32 %v1716_v27, %v1705_v47  ;;  %v1734_v58 = vmul.f32 %v1716_v27, %v1706_v48  ;;  %v1927_v17 = vld [vmem:[%s9382_s22] sm:$0xff]  ;;  %v1929_v41 = vld [vmem:[%s9382_s22 + $0x10] sm:$0xff] }
 0x46d   : > { %v1767_v59 = vadd.f32 %v1759_v16, %v1739_v49  ;;  %v1768_v60 = vadd.f32 %v1759_v16, %v1740_v50  ;;  %v1765_v61 = vadd.f32 %v1754_v19, %v1737_v53  ;;  %v1766_v52 = vadd.f32 %v1754_v19, %v1738_v54  ;;  %v1831_v49 = vld [vmem:[%s9381_s15 + $0x18] sm:$0xff]  ;;  %v2482_v53 = vld [vmem:[%s9359_s4 + $0x10] sm:$0xff] }
 0x46e   : > { %v1763_v62 = vadd.f32 %v1749_v39, %v1735_v55  ;;  %v1764_v63 = vadd.f32 %v1749_v39, %v1736_v56  ;;  %v1761_v45 = vadd.f32 %v1744_v20, %v1733_v57  ;;  %v1762_v0 = vadd.f32 %v1744_v20, %v1734_v58  ;;  %v1930_v50 = vld [vmem:[%s9382_s22 + $0x18] sm:$0xff]  ;;  %v2584_v55 = vld [vmem:[%s9383_s28 + $0x10] sm:$0xff]  ;;  %v2587_v58 = vld [vmem:[%s9384_s18 + $0x8] sm:$0xff] }
 0x46f   : > { %1881 = vmatpush.msrb.mxu2 %v1767_v59  ;;  %1910 = vmatpush.msrb.mxu3 %v1768_v60  ;;  %v1797_v7 = vmul.f32 %v1786_v51, %v1765_v61  ;;  %v1798_v26 = vmul.f32 %v1786_v51, %v1766_v52  ;;  %v1799_v13 = vmul.f32 %v1791_v10, %v1767_v59  ;;  %v1825_v40 = vperm.slane %v1823_v37, 0  ;;  %v2585_v54 = vld [vmem:[%s9383_s28 + $0x18] sm:$0xff]  ;;  %v2588_v57 = vld [vmem:[%s9384_s18 + $0x10] sm:$0xff]  ;;  %v6700_v51 = vld [vmem:[#allocation6 + $0x1e0] sm:$0xff] }
 0x470   : > { %1979 = vmatpush.msra.mxu0 %v1767_v59  ;;  %2008 = vmatpush.msra.mxu1 %v1768_v60  ;;  %v1795_v2 = vmul.f32 %v1781_v1, %v1763_v62  ;;  %v1796_v3 = vmul.f32 %v1781_v1, %v1764_v63  ;;  %v1793_v4 = vmul.f32 %v1776_v22, %v1761_v45  ;;  %v2589_v56 = vld [vmem:[%s9384_s18 + $0x18] sm:$0xff]  ;;  %v2586_v59 = vld [vmem:[%s9384_s18] sm:$0xff]  ;;  %v6690_v1 = vld [vmem:[#allocation6 + $0x1f0] sm:$0xff] }
 0x471   : > { %1882 = vmatpush.msrb.mxu2 %v1765_v61  ;;  %1911 = vmatpush.msrb.mxu3 %v1766_v52  ;;  %v1794_v6 = vmul.f32 %v1776_v22, %v1762_v0  ;;  %v1800_v14 = vmul.f32 %v1791_v10, %v1768_v60  ;;  %v2735_v60 = vld [vmem:[%s9385_s16 + $0x30] sm:$0xff]  ;;  %v6776_v37 = vld [vmem:[#allocation6 + $0x188] sm:$0xff] }
 0x472   : > { %1980 = vmatpush.msra.mxu0 %v1765_v61  ;;  %2009 = vmatpush.msra.mxu1 %v1766_v52  ;;  %v1801_v11 = vadd.f32 %v1795_v2, %v1793_v4  ;;  %v2732_v61 = vld [vmem:[%s9385_s16 + $0x18] sm:$0xff]  ;;  %v6704_v4 = vld [vmem:[#allocation6 + $0xe8] sm:$0xff]  ;;  %v6712_v10 = vld [vmem:[#allocation6 + $0x1d0] sm:$0xff] }
 0x473   : > { %1883 = vmatpush.msrb.mxu2 %v1763_v62  ;;  %1912 = vmatpush.msrb.mxu3 %v1764_v63  ;;  %v1810_v12 = vadd.f32 %v1796_v3, %v1794_v6  ;;  %v6692_v52 = vld [vmem:[#allocation6 + $0xf8] sm:$0xff]  ;;  %v6698_v3 = vld [vmem:[#allocation6 + $0xe0] sm:$0xff]  ;;  %v6706_v6 = vld [vmem:[#allocation6 + $0x1e8] sm:$0xff] }
 0x474   : > { %1981 = vmatpush.msra.mxu0 %v1763_v62  ;;  %2010 = vmatpush.msra.mxu1 %v1764_v63  ;;  %v1802_v15 = vadd.f32 %v1801_v11, %v1797_v7  ;;  %v2729_v62 = vld [vmem:[%s9385_s16] sm:$0xff]  ;;  %v3209_v63 = vld [vmem:[%s9386_s26 + $0x10] sm:$0xff]  ;;  %v6696_v2 = vld [vmem:[#allocation6 + $0x1f8] sm:$0xff] }
 0x475   : > { %1884 = vmatpush.msrb.mxu2 %v1761_v45  ;;  %v1811_v16 = vadd.f32 %v1810_v12, %v1798_v26  ;;  %1913 = vmatpush.msrb.mxu3 %v1762_v0  ;;  %v6708_v7 = vld [vmem:[#allocation6 + $0xd0] sm:$0xff]  ;;  %v6714_v26 = vld [vmem:[#allocation6 + $0xd8] sm:$0xff]  ;;  %v6720_v12 = vld [vmem:[#allocation6 + $0xc0] sm:$0xff] }
 0x476   : > { %1982 = vmatpush.msra.mxu0 %v1761_v45  ;;  %2011 = vmatpush.msra.mxu1 %v1762_v0  ;;  %v1803_v19 = vadd.f32 %v1802_v15, %v1799_v13  ;;  %v6688_v0 = vld [vmem:[#allocation6 + $0xf0] sm:$0xff]  ;;  %v6716_v11 = vld [vmem:[#allocation6 + $0x1d8] sm:$0xff]  ;;  %v6722_v13 = vld [vmem:[#allocation6 + $0x1c0] sm:$0xff] }
 0x477   : > { %5465 = vmatmul.msk.f32.vlgmr.msrb.gmra.mxu2 %vm9299_vm3, %v1828_v25  ;;  %5469 = vmatmul.msk.f32.vlgmr.msrb.gmra.mxu3 %vm9299_vm3, %v1828_v25  ;;  %v1812_v20 = vadd.f32 %v1811_v16, %v1800_v14  ;;  %v6726_v25 = vld [vmem:[#allocation6 + $0xc8] sm:$0xff]  ;;  %v6736_v15 = vld [vmem:[#allocation6 + $0xb0] sm:$0xff] }
 0x478   : > { %5473 = vmatmul.msk.f32.vlgmr.msra.gmra.mxu0 %vm9299_vm3, %v1927_v17  ;;  %5477 = vmatmul.msk.f32.vlgmr.msra.gmra.mxu1 %vm9299_vm3, %v1927_v17  ;;  %v1804_v21 = vrot.slane %v1803_v19, 4  ;;  %v6728_v14 = vld [vmem:[#allocation6 + $0x1c8] sm:$0xff]  ;;  %v6738_v16 = vld [vmem:[#allocation6 + $0x1b0] sm:$0xff]  ;;  %v6740_v17 = vld [vmem:[#allocation6 + $0xb8] sm:$0xff] }
 0x479   : > { %v1813_v22 = vrot.slane %v1812_v20, 4  ;;  %2108 = vmatpush.msra.mxu2 %v6688_v0  ;;  %2137 = vmatpush.msra.mxu3 %v6690_v1 }
 0x47a   : > { %v1805_v24 = vadd.f32 %v1804_v21, %v1803_v19  ;;  %2166 = vmatpush.msrb.mxu0 %v6692_v52  ;;  %2195 = vmatpush.msrb.mxu1 %v6696_v2  ;;  %v6744_v19 = vld [vmem:[#allocation6 + $0x1b8] sm:$0xff]  ;;  %v6748_v21 = vld [vmem:[#allocation6 + $0x1a0] sm:$0xff] }
 0x47b   : > { %v1814_v27 = vadd.f32 %v1813_v22, %v1812_v20  ;;  %2109 = vmatpush.msra.mxu2 %v6698_v3  ;;  %2138 = vmatpush.msra.mxu3 %v6700_v51  ;;  %v6746_v20 = vld [vmem:[#allocation6 + $0xa0] sm:$0xff]  ;;  %v6752_v22 = vld [vmem:[#allocation6 + $0xa8] sm:$0xff] }
 0x47c   : > { %v1806_v31 = vrot.slane %v1805_v24, 2  ;;  %2167 = vmatpush.msrb.mxu0 %v6704_v4  ;;  %2196 = vmatpush.msrb.mxu1 %v6706_v6 }
 0x47d   : > { %v1815_v32 = vrot.slane %v1814_v27, 2  ;;  %2110 = vmatpush.msra.mxu2 %v6708_v7  ;;  %2139 = vmatpush.msra.mxu3 %v6712_v10 }
 0x47e   : > { %v1807_v33 = vadd.f32 %v1806_v31, %v1805_v24  ;;  %2168 = vmatpush.msrb.mxu0 %v6714_v26  ;;  %2197 = vmatpush.msrb.mxu1 %v6716_v11  ;;  %v6754_v24 = vld [vmem:[#allocation6 + $0x1a8] sm:$0xff]  ;;  %v6764_v31 = vld [vmem:[#allocation6 + $0x198] sm:$0xff] }
 0x47f   : > { %5466 = vmatmul.msk.f32.gmra.mxu2 %vm9299_vm3, %v1829_v29  ;;  %5470 = vmatmul.msk.f32.gmra.mxu3 %vm9299_vm3, %v1829_v29  ;;  %v1816_v36 = vadd.f32 %v1815_v32, %v1814_v27  ;;  %v6756_v27 = vld [vmem:[#allocation6 + $0x90] sm:$0xff]  ;;  %v6768_v32 = vld [vmem:[#allocation6 + $0x80] sm:$0xff] }
 0x480   : > { %5474 = vmatmul.msk.f32.gmra.mxu0 %vm9299_vm3, %v1928_v30  ;;  %5478 = vmatmul.msk.f32.gmra.mxu1 %vm9299_vm3, %v1928_v30  ;;  %v1808_v38 = vrot.slane %v1807_v33, 1  ;;  %v6760_v29 = vld [vmem:[#allocation6 + $0x190] sm:$0xff]  ;;  %v6762_v30 = vld [vmem:[#allocation6 + $0x98] sm:$0xff] }
 0x481   : > { %v1817_v39 = vrot.slane %v1816_v36, 1  ;;  %2111 = vmatpush.msra.mxu2 %v6720_v12  ;;  %2140 = vmatpush.msra.mxu3 %v6722_v13 }
 0x482   : > { %v1809_v42 = vadd.f32 %v1808_v38, %v1807_v33  ;;  %2169 = vmatpush.msrb.mxu0 %v6726_v25  ;;  %2198 = vmatpush.msrb.mxu1 %v6728_v14  ;;  %v6770_v33 = vld [vmem:[#allocation6 + $0x180] sm:$0xff]  ;;  %v6784_v38 = vld [vmem:[#allocation6 + $0x70] sm:$0xff] }
 0x483   : > { %v1818_v43 = vadd.f32 %v1817_v39, %v1816_v36  ;;  %2112 = vmatpush.msra.mxu2 %v6736_v15  ;;  %2141 = vmatpush.msra.mxu3 %v6738_v16  ;;  %v6774_v36 = vld [vmem:[#allocation6 + $0x88] sm:$0xff]  ;;  %v6786_v39 = vld [vmem:[#allocation6 + $0x170] sm:$0xff] }
 0x484   : > { %v6661_v46 = vadd.f32 %v1825_v40, %v1809_v42  ;;  %2170 = vmatpush.msrb.mxu0 %v6740_v17  ;;  %2199 = vmatpush.msrb.mxu1 %v6744_v19  ;;  %v6792_v42 = vld [vmem:[#allocation6 + $0x178] sm:$0xff] }
 0x485   : > { %v6663_v47 = vadd.f32 %v1825_v40, %v1818_v43  ;;  %2113 = vmatpush.msra.mxu2 %v6746_v20  ;;  %2142 = vmatpush.msra.mxu3 %v6748_v21  ;;  %v6788_v40 = vld [vmem:[#allocation6 + $0x78] sm:$0xff]  ;;  %v6796_v43 = vld [vmem:[#allocation6 + $0x60] sm:$0xff] }
 0x486   : > { %2171 = vmatpush.msrb.mxu0 %v6752_v22  ;;  %2200 = vmatpush.msrb.mxu1 %v6754_v24 }
 0x487   : > { %5467 = vmatmul.msk.f32.gmra.mxu2 %vm9299_vm3, %v1830_v44  ;;  %5471 = vmatmul.msk.f32.gmra.mxu3 %vm9299_vm3, %v1830_v44  ;;  %v2025_v48 = vmax.f32 %v6661_v46, %v6663_v47  ;;  %v6798_v44 = vld [vmem:[#allocation6 + $0x160] sm:$0xff] }
 0x488   : > { %5475 = vmatmul.msk.f32.gmra.mxu0 %vm9299_vm3, %v1929_v41  ;;  %5479 = vmatmul.msk.f32.gmra.mxu1 %vm9299_vm3, %v1929_v41  ;;  %v6800_v41 = vld [vmem:[#allocation6 + $0x68] sm:$0xff] }
 0x489   : > { %2026 = vmax.xlane.f32.xlu2 %v2025_v48  ;;  %2114 = vmatpush.msra.mxu2 %v6756_v27  ;;  %v6804_v48 = vld [vmem:[#allocation6 + $0x168] sm:$0xff] }
 0x48a   : > { %2143 = vmatpush.msra.mxu3 %v6760_v29  ;;  %2172 = vmatpush.msrb.mxu0 %v6762_v30 }
 0x48b   : > { %2201 = vmatpush.msrb.mxu1 %v6764_v31  ;;  %2115 = vmatpush.msra.mxu2 %v6768_v32 }
 0x48c   : > { %2144 = vmatpush.msra.mxu3 %v6770_v33  ;;  %2173 = vmatpush.msrb.mxu0 %v6774_v36 }
 0x48d   : > { %2202 = vmatpush.msrb.mxu1 %v6776_v37  ;;  %2116 = vmatpush.msra.mxu2 %v6784_v38 }
 0x48e   : > { %2145 = vmatpush.msra.mxu3 %v6786_v39  ;;  %2174 = vmatpush.msrb.mxu0 %v6788_v40 }
 0x48f   : > { %5468 = vmatmul.msk.f32.gmra.mxu2 %vm9299_vm3, %v1831_v49  ;;  %5472 = vmatmul.msk.f32.gmra.mxu3 %vm9299_vm3, %v1831_v49  ;;  %v6808_v49 = vld [vmem:[#allocation6 + $0x50] sm:$0xff] }
 0x490   : > { %5476 = vmatmul.msk.f32.gmra.mxu0 %vm9299_vm3, %v1930_v50  ;;  %5480 = vmatmul.msk.f32.gmra.mxu1 %vm9299_vm3, %v1930_v50  ;;  %v6810_v50 = vld [vmem:[#allocation6 + $0x150] sm:$0xff] }
 0x491   : > { %2203 = vmatpush.msrb.mxu1 %v6792_v42  ;;  %2117 = vmatpush.msra.mxu2 %v6796_v43 }
 0x492   : > { %2146 = vmatpush.msra.mxu3 %v6798_v44  ;;  %2175 = vmatpush.msrb.mxu0 %v6800_v41 }
 0x493   : > { %2204 = vmatpush.msrb.mxu1 %v6804_v48  ;;  %2118 = vmatpush.msra.mxu2 %v6808_v49 }
 0x494   : > { %2147 = vmatpush.msra.mxu3 %v6810_v50 }
 0x4a1   : > { %2496 = vperm.xlu2 %5836, %v2482_v53   ;;  %v6812_v53 = vld [vmem:[#allocation6 + $0x58] sm:$0xff] }
 0x4a2   : > { %2176 = vmatpush.msrb.mxu0 %v6812_v53 }
 0x4a9   : > { %2682 = vperm.xlu2 %5836, %v2585_v54   ;;  %v6816_v54 = vld [vmem:[#allocation6 + $0x158] sm:$0xff] }
 0x4aa   : > { %2205 = vmatpush.msrb.mxu1 %v6816_v54 }
 0x4b1   : > { %2677 = vperm.xlu2 %5836, %v2584_v55   ;;  %v6820_v55 = vld [vmem:[#allocation6 + $0x40] sm:$0xff] }
 0x4b2   : > { %2119 = vmatpush.msra.mxu2 %v6820_v55 }
 0x4b9   : > { %2710 = vperm.xlu2 %5836, %v2589_v56   ;;  %v6822_v56 = vld [vmem:[#allocation6 + $0x140] sm:$0xff] }
 0x4ba   : > { %2148 = vmatpush.msra.mxu3 %v6822_v56 }
 0x4c1   : > { %2705 = vperm.xlu2 %5836, %v2588_v57   ;;  %v6824_v57 = vld [vmem:[#allocation6 + $0x48] sm:$0xff] }
 0x4c2   : > { %2177 = vmatpush.msrb.mxu0 %v6824_v57 }
 0x4c9   : > { %2700 = vperm.xlu2 %5836, %v2587_v58   ;;  %v6828_v58 = vld [vmem:[#allocation6 + $0x148] sm:$0xff] }
 0x4ca   : > { %2206 = vmatpush.msrb.mxu1 %v6828_v58 }
 0x4d1   : > { %2695 = vperm.xlu2 %5836, %v2586_v59   ;;  %v6830_v59 = vld [vmem:[#allocation6 + $0x30] sm:$0xff] }
 0x4d2   : > { %2120 = vmatpush.msra.mxu2 %v6830_v59 }
 0x4d9   : > { %2769 = vperm.xlu2 %5836, %v2735_v60   ;;  %v6832_v60 = vld [vmem:[#allocation6 + $0x130] sm:$0xff] }
 0x4da   : > { %2149 = vmatpush.msra.mxu3 %v6832_v60 }
 0x4e1   : > { %2754 = vperm.xlu2 %5836, %v2732_v61   ;;  %v6836_v61 = vld [vmem:[#allocation6 + $0x38] sm:$0xff] }
 0x4e2   : > { %2178 = vmatpush.msrb.mxu0 %v6836_v61 }
 0x4e4   : > { %2179 = vmatpush.msrb.mxu0 %v6846_v35 }
 0x4e6   : > { %2180 = vmatpush.msrb.mxu0 %v6858_v28 }
 0x4e9   : > { %2739 = vperm.xlu2 %5836, %v2729_v62   ;;  %v6838_v62 = vld [vmem:[#allocation6 + $0x138] sm:$0xff] }
 0x4ea   : > { %9387 = vst [vmem:[#allocation37_spill] sm:$0xff] %v6838_v62  ;;  %2207 = vmatpush.msrb.mxu1 %v6838_v62  ;;  %v6870_v62 = vld [vmem:[#allocation6 + $0x8] sm:$0xff] }
 0x4eb   : > { %2181 = vmatpush.msrb.mxu0 %v6870_v62 }
 0x4ec   : > { %2208 = vmatpush.msrb.mxu1 %v6848_v34 }
 0x4ed   : > { %2282 = vmatpush.msra.mxu0 %v6692_v52 }
 0x4ee   : > { %2209 = vmatpush.msrb.mxu1 %v6860_v9 }
 0x4ef   : > { %2283 = vmatpush.msra.mxu0 %v6704_v4 }
 0x4f1   : > { %3223 = vperm.xlu2 %5836, %v3209_v63   ;;  %v6840_v63 = vld [vmem:[#allocation6 + $0x20] sm:$0xff]  ;;  %2284 = vmatpush.msra.mxu0 %v6714_v26 }
 0x4f2   : > { %9388 = vst [vmem:[#allocation38_spill] sm:$0xff] %v6840_v63  ;;  %2121 = vmatpush.msra.mxu2 %v6840_v63  ;;  %v6872_v63 = vld [vmem:[#allocation6 + $0x108] sm:$0xff] }
 0x4f3   : > { %2210 = vmatpush.msrb.mxu1 %v6872_v63  ;;  %2285 = vmatpush.msra.mxu0 %v6726_v25 }
 0x4f4   : > { %2122 = vmatpush.msra.mxu2 %v6852_v23 }
 0x4f5   : > { %2311 = vmatpush.msra.mxu1 %v6696_v2  ;;  %2286 = vmatpush.msra.mxu0 %v6740_v17 }
 0x4f6   : > { %2123 = vmatpush.msra.mxu2 %v6864_v8 }
 0x4f7   : > { %2312 = vmatpush.msra.mxu1 %v6706_v6  ;;  %2287 = vmatpush.msra.mxu0 %v6752_v22 }
 0x4f8   : > { %2224 = vmatpush.msrb.mxu2 %v6688_v0 }
 0x4f9   : > { %2313 = vmatpush.msra.mxu1 %v6716_v11  ;;  %2288 = vmatpush.msra.mxu0 %v6762_v30 }
 0x4fa   : > { %2225 = vmatpush.msrb.mxu2 %v6698_v3  ;;  %v1915_v3 = vpop.f32.mrf.mxu3 }
 0x4fb   : > { %2314 = vmatpush.msra.mxu1 %v6728_v14  ;;  %2289 = vmatpush.msra.mxu0 %v6774_v36 }
 0x4fc   : > { %v2027_v45 = vpop.xlane.xlu2 %2026  ;;  %2226 = vmatpush.msrb.mxu2 %v6708_v7  ;;  %v9390_v7 = vld [vmem:[#allocation38_spill] sm:$0xff] }
 0x4fd   : > { %5674 = vpush %v2027_v45  ;;  %v6844_v45 = vld [vmem:[#allocation6 + $0x120] sm:$0xff]  ;;  %2315 = vmatpush.msra.mxu1 %v6744_v19  ;;  %2290 = vmatpush.msra.mxu0 %v6788_v40 }
 0x4fe   : > { %2150 = vmatpush.msra.mxu3 %v6844_v45  ;;  %2227 = vmatpush.msrb.mxu2 %v6720_v12 }
 0x4ff   : > { %2316 = vmatpush.msra.mxu1 %v6754_v24  ;;  %2291 = vmatpush.msra.mxu0 %v6800_v41 }
 0x500   : > { %2151 = vmatpush.msra.mxu3 %v6854_v18  ;;  %2228 = vmatpush.msrb.mxu2 %v6736_v15 }
 0x501   : > { %2317 = vmatpush.msra.mxu1 %v6764_v31  ;;  %2292 = vmatpush.msra.mxu0 %v6812_v53  ;;  %v6960_v31 = vpop.f32.mrf.mxu0 }
 0x502   : > { %2152 = vmatpush.msra.mxu3 %v6866_v5  ;;  %2229 = vmatpush.msrb.mxu2 %v6746_v20 }
 0x503   : > { %2318 = vmatpush.msra.mxu1 %v6776_v37  ;;  %2293 = vmatpush.msra.mxu0 %v6824_v57 }
 0x504   : > { %2253 = vmatpush.msrb.mxu3 %v6690_v1  ;;  %2230 = vmatpush.msrb.mxu2 %v6756_v27  ;;  %v1886_v1 = vpop.f32.mrf.mxu2 }
 0x505   : > { %2319 = vmatpush.msra.mxu1 %v6792_v42  ;;  %2294 = vmatpush.msra.mxu0 %v6836_v61 }
 0x506   : > { %2254 = vmatpush.msrb.mxu3 %v6700_v51  ;;  %2231 = vmatpush.msrb.mxu2 %v6768_v32  ;;  %v2013_v32 = vpop.f32.mrf.mxu1 }
 0x507   : > { %2320 = vmatpush.msra.mxu1 %v6804_v48  ;;  %2295 = vmatpush.msra.mxu0 %v6846_v35  ;;  %v1844_v35 = vpop.permute.xlu0 %1843 }
 0x508   : > { %2255 = vmatpush.msrb.mxu3 %v6712_v10  ;;  %2232 = vmatpush.msrb.mxu2 %v6784_v38 }
 0x509   : > { %2321 = vmatpush.msra.mxu1 %v6816_v54  ;;  %2296 = vmatpush.msra.mxu0 %v6858_v28 }
 0x50a   : > { %2256 = vmatpush.msrb.mxu3 %v6722_v13  ;;  %2233 = vmatpush.msrb.mxu2 %v6796_v43  ;;  %v1918_v13 = vpop.f32.mrf.mxu3 }
 0x50b   : > { %2322 = vmatpush.msra.mxu1 %v6828_v58  ;;  %2297 = vmatpush.msra.mxu0 %v6870_v62 }
 0x50c   : > { %2257 = vmatpush.msrb.mxu3 %v6738_v16  ;;  %2234 = vmatpush.msrb.mxu2 %v6808_v49  ;;  %v1889_v11 = vpop.f32.mrf.mxu2 }
 0x50e   : > { %2258 = vmatpush.msrb.mxu3 %v6748_v21  ;;  %2235 = vmatpush.msrb.mxu2 %v6820_v55  ;;  %v2016_v36 = vpop.f32.mrf.mxu1 }
 0x50f   : > { %v1854_v22 = vpop.permute.xlu0 %1853 }
 0x510   : > { %2259 = vmatpush.msrb.mxu3 %v6760_v29  ;;  %2236 = vmatpush.msrb.mxu2 %v6830_v59 }
 0x512   : > { %2260 = vmatpush.msrb.mxu3 %v6770_v33  ;;  %2237 = vmatpush.msrb.mxu2 %v9390_v7  ;;  %v1921_v17 = vpop.f32.mrf.mxu3  ;;  %v1987_v33 = vpop.f32.mrf.mxu0 }
 0x514   : > { %2261 = vmatpush.msrb.mxu3 %v6786_v39  ;;  %2238 = vmatpush.msrb.mxu2 %v6852_v23  ;;  %v1919_v23 = vadd.f32 %v1918_v13, %v1844_v35  ;;  %v1892_v15 = vpop.f32.mrf.mxu2 }
 0x516   : > { %2262 = vmatpush.msrb.mxu3 %v6798_v44  ;;  %2239 = vmatpush.msrb.mxu2 %v6864_v8  ;;  %v2019_v38 = vpop.f32.mrf.mxu1 }
 0x518   : > { %2263 = vmatpush.msrb.mxu3 %v6810_v50 }
 0x51a   : > { %2264 = vmatpush.msrb.mxu3 %v6822_v56  ;;  %v1924_v21 = vpop.f32.mrf.mxu3  ;;  %v1990_v37 = vpop.f32.mrf.mxu0 }
 0x51b   : > { %v1925_v27 = vadd.f32 %v1924_v21, %v1854_v22 }
 0x51c   : > { %2265 = vmatpush.msrb.mxu3 %v6832_v60  ;;  %v1895_v20 = vpop.f32.mrf.mxu2 }
 0x51d   : > { %v1896_v24 = vadd.f32 %v1895_v20, %v1854_v22 }
 0x51e   : > { %2266 = vmatpush.msrb.mxu3 %v6844_v45  ;;  %v2022_v40 = vpop.f32.mrf.mxu1 }
 0x520   : > { %2267 = vmatpush.msrb.mxu3 %v6854_v18 }
 0x522   : > { %2268 = vmatpush.msrb.mxu3 %v6866_v5  ;;  %v1993_v39 = vpop.f32.mrf.mxu0 }
 0x52e   : > { %s5675_s1 = spop %5674 }
 0x52f   : > { %v2029_v0 = vstv %s5675_s1 }
 0x530   : > { %v2030_v52 = vsub.f32 %v6661_v46, %v2029_v0  ;;  %v2031_v2 = vsub.f32 %v6663_v47, %v2029_v0  ;;  %v1839_v46 = vpop.permute.xlu1 %1838  ;;  %v9389_v47 = vld [vmem:[#allocation37_spill] sm:$0xff] }
 0x531   : > { %2323 = vmatpush.msra.mxu1 %v9389_v47  ;;  %v1887_v6 = vadd.f32 %v1886_v1, %v1839_v46  ;;  %v1916_v26 = vadd.f32 %v1915_v3, %v1839_v46  ;;  %v1948_v1 = vpop.permute.xlu0 %1947 }
 0x532   : > { %v2032_v51 = vmul.f32 1.442695, %v2030_v52  ;;  %v2034_v4 = vmul.f32 1.442695, %v2031_v2  ;;  %v7028_v21 = vadd.f32 %v1990_v37, %v1948_v1 }
 0x533   : > { %2324 = vmatpush.msra.mxu1 %v6848_v34  ;;  %v1890_v34 = vadd.f32 %v1889_v11, %v1844_v35 }
 0x534   : > { %5857 = vpow2.f32 %v2032_v51 }
 0x535   : > { %5859 = vpow2.f32 %v2034_v4  ;;  %2325 = vmatpush.msra.mxu1 %v6860_v9 }
 0x537   : > { %2326 = vmatpush.msra.mxu1 %v6872_v63 }
 0x538   : > { %v1849_v9 = vpop.permute.xlu1 %1848 }
 0x539   : > { %v1893_v28 = vadd.f32 %v1892_v15, %v1849_v9  ;;  %v1922_v8 = vadd.f32 %v1921_v17, %v1849_v9  ;;  %v6999_v11 = vpop.permute.xlu0 %1937 }
 0x53a   : > { %v6936_v10 = vpop.eup %5857 }
 0x53b   : > { %v5860_v12 = vpop.eup %5859  ;;  %v2036_v25 = vmul.f32 %v6936_v10, %v1887_v6  ;;  %v2038_v18 = vmul.f32 %v6936_v10, %v1890_v34  ;;  %v2040_v5 = vmul.f32 %v6936_v10, %v1893_v28  ;;  %v2042_v29 = vmul.f32 %v6936_v10, %v1896_v24 }
 0x53c   : > { %v2037_v14 = vmul.f32 %v5860_v12, %v1916_v26  ;;  %v2039_v16 = vmul.f32 %v5860_v12, %v1919_v23  ;;  %v2041_v19 = vmul.f32 %v5860_v12, %v1922_v8  ;;  %v2043_v30 = vmul.f32 %v5860_v12, %v1925_v27 }
 0x53d   : > { %2124 = vmatmul.f32.vlgmr.msra.gmra.mxu2 %v2036_v25  ;;  %2182 = vmatmul.f32.vlgmr.msrb.gmra.mxu0 %v2036_v25  ;;  %v7002_v25 = vadd.f32 %v2013_v32, %v6999_v11 }
 0x53e   : > { %2153 = vmatmul.f32.vlgmr.msra.gmra.mxu3 %v2037_v14  ;;  %2211 = vmatmul.f32.vlgmr.msrb.gmra.mxu1 %v2037_v14 }
 0x53f   : > { %v2461_v28 = vmax.f32 %v7002_v25, 0.0  ;;  %v2477_v25 = vld [vmem:[%s9411_s2 + $0x8] sm:$0xff] }
 0x540   : > { %v1953_v2 = vpop.permute.xlu1 %1952 }
 0x541   : > { %v7014_v15 = vadd.f32 %v1993_v39, %v1953_v2 }
 0x543   : > { %v2466_v27 = vmax.f32 %v7014_v15, 0.0 }
 0x545   : > { %2127 = vmatmul.f32.gmra.mxu2 %v2038_v18  ;;  %2185 = vmatmul.f32.gmra.mxu0 %v2038_v18  ;;  %v7012_v18 = vadd.f32 %v2019_v38, %v1948_v1 }
 0x546   : > { %2156 = vmatmul.f32.gmra.mxu3 %v2039_v16  ;;  %2214 = vmatmul.f32.gmra.mxu1 %v2039_v16  ;;  %v7016_v16 = vadd.f32 %v2022_v40, %v1953_v2 }
 0x547   : > { %v2465_v22 = vmax.f32 %v7012_v18, 0.0 }
 0x548   : > { %v1943_v13 = vpop.permute.xlu1 %1942 }
 0x549   : > { %v7010_v23 = vadd.f32 %v2016_v36, %v1943_v13 }
 0x54b   : > { %v2463_v20 = vmax.f32 %v7010_v23, 0.0 }
 0x54d   : > { %2130 = vmatmul.f32.gmra.mxu2 %v2040_v5  ;;  %2188 = vmatmul.f32.gmra.mxu0 %v2040_v5 }
 0x54e   : > { %2159 = vmatmul.f32.gmra.mxu3 %v2041_v19  ;;  %2217 = vmatmul.f32.gmra.mxu1 %v2041_v19  ;;  %v7025_v19 = vadd.f32 %v1987_v33, %v1943_v13 }
 0x555   : > { %2133 = vmatmul.f32.gmra.mxu2 %v2042_v29  ;;  %2191 = vmatmul.f32.gmra.mxu0 %v2042_v29  ;;  %v2467_v29 = vmax.f32 %v7016_v16, 0.0 }
 0x556   : > { %2162 = vmatmul.f32.gmra.mxu3 %v2043_v30  ;;  %2220 = vmatmul.f32.gmra.mxu1 %v2043_v30 }
 0x55d   : > { %2240 = vmatmul.f32.vlgmr.msrb.gmra.mxu2 %v6936_v10  ;;  %2298 = vmatmul.f32.vlgmr.msra.gmra.mxu0 %v6936_v10 }
 0x55e   : > { %2269 = vmatmul.f32.vlgmr.msrb.gmra.mxu3 %v5860_v12  ;;  %2327 = vmatmul.f32.vlgmr.msra.gmra.mxu1 %v5860_v12 }
 0x565   : > { %2243 = vmatmul.f32.gmra.mxu2 %v6936_v10  ;;  %2301 = vmatmul.f32.gmra.mxu0 %v6936_v10 }
 0x566   : > { %2272 = vmatmul.f32.gmra.mxu3 %v5860_v12  ;;  %2330 = vmatmul.f32.gmra.mxu1 %v5860_v12 }
 0x56d   : > { %2246 = vmatmul.f32.gmra.mxu2 %v6936_v10  ;;  %2304 = vmatmul.f32.gmra.mxu0 %v6936_v10 }
 0x56e   : > { %2275 = vmatmul.f32.gmra.mxu3 %v5860_v12  ;;  %2333 = vmatmul.f32.gmra.mxu1 %v5860_v12 }
 0x575   : > { %2249 = vmatmul.f32.gmra.mxu2 %v6936_v10  ;;  %2307 = vmatmul.f32.gmra.mxu0 %v6936_v10 }
 0x576   : > { %2278 = vmatmul.f32.gmra.mxu3 %v5860_v12  ;;  %2336 = vmatmul.f32.gmra.mxu1 %v5860_v12 }
 0x5ba   : > { %v6962_v42 = vpop.f32.mrf.mxu0 }
 0x5bb   : > { %v2212_v43 = vpop.f32.mrf.mxu1 }
 0x5bc   : > { %v7037_v38 = vadd.f32 %v2212_v43, %v6962_v42 }
 0x5c0   : > { %v6964_v44 = vpop.f32.mrf.mxu2 }
 0x5c1   : > { %v6966_v41 = vpop.f32.mrf.mxu3 }
 0x5c2   : > { %v2186_v48 = vpop.f32.mrf.mxu0 }
 0x5c3   : > { %v2215_v49 = vpop.f32.mrf.mxu1 }
 0x5c4   : > { %v7039_v33 = vadd.f32 %v2215_v49, %v2186_v48 }
 0x5c8   : > { %v6968_v50 = vpop.f32.mrf.mxu2 }
 0x5c9   : > { %v6970_v53 = vpop.f32.mrf.mxu3 }
 0x5ca   : > { %v6972_v54 = vpop.f32.mrf.mxu0 }
 0x5cb   : > { %v6974_v55 = vpop.f32.mrf.mxu1 }
 0x5cc   : > { %v7052_v42 = vadd.f32 %v6974_v55, %v6972_v54 }
 0x5d0   : > { %v6976_v56 = vpop.f32.mrf.mxu2 }
 0x5d1   : > { %v6978_v57 = vpop.f32.mrf.mxu3 }
 0x5d2   : > { %v6980_v58 = vpop.f32.mrf.mxu0  ;;  %v7056_v43 = vadd.f32 %v6978_v57, %v6976_v56 }
 0x5d3   : > { %v2221_v59 = vpop.f32.mrf.mxu1 }
 0x5d4   : > { %v7059_v48 = vadd.f32 %v2221_v59, %v6980_v58 }
 0x5d8   : > { %v6982_v60 = vpop.f32.mrf.mxu2 }
 0x5d9   : > { %v6984_v61 = vpop.f32.mrf.mxu3 }
 0x5da   : > { %v2299_v62 = vpop.f32.mrf.mxu0  ;;  %v7067_v2 = vadd.f32 %v6984_v61, %v6982_v60 }
 0x5db   : > { %v2328_v63 = vpop.f32.mrf.mxu1 }
 0x5dc   : > { %v6986_v45 = vadd.f32 %v2328_v63, %v2299_v62 }
 0x5de   : > { %5861 = vrcp.f32 %v6986_v45  ;;  %v2364_v40 = vand.u32 2147483647, %v6986_v45  ;;  %v2366_v1 = vand.u32 2147483648, %v6986_v45  ;;  %vm2360_vm5 = vweird.f32 %v6986_v45 }
 0x5e0   : > { %v2241_v0 = vpop.f32.mrf.mxu2  ;;  %vm7075_vm6 = vcmp.eq.f32.partialorder %v2364_v40, 8.507059e+37  ;;  %v2367_v60 = vor.u32 1.1754944e-38, %v2366_v1 }
 0x5e1   : > { %v2270_v52 = vpop.f32.mrf.mxu3 }
 0x5e2   : > { %v2302_v3 = vpop.f32.mrf.mxu0  ;;  %v6991_v46 = vadd.f32 %v2270_v52, %v2241_v0 }
 0x5e3   : > { %v2331_v51 = vpop.f32.mrf.mxu1 }
 0x5e4   : > { %v6989_v4 = vadd.f32 %v2331_v51, %v2302_v3  ;;  %v6993_v47 = vpop.eup %5861  ;;  %v2349_v61 = vand.u32 2147483647, %v6991_v46  ;;  %vm2345_vm2 = vweird.f32 %v6991_v46 }
 0x5e5   : > { %v2356_v10 = vmul.f32 %v6993_v47, %v6986_v45  ;;  %vm2361_vm4 = vweird.f32 %v6993_v47 }
 0x5e6   : > { %5863 = vrcp.f32 %v6989_v4  ;;  %v2394_v57 = vand.u32 2147483647, %v6989_v4  ;;  %vm7084_vm7 = vmor %vm2360_vm5, %vm2361_vm4  ;;  %vm2390_vm8 = vweird.f32 %v6989_v4 }
 0x5e7   : > { %5865 = vrcp.f32 %v6991_v46  ;;  %v2357_v17 = vsub.f32 1.0, %v2356_v10  ;;  %v2396_v10 = vand.u32 2147483648, %v6989_v4 }
 0x5e8   : > { %v2244_v6 = vpop.f32.mrf.mxu2  ;;  %vm7102_vm10 = vcmp.eq.f32.partialorder %v2394_v57, 8.507059e+37 }
 0x5e9   : > { %v2273_v7 = vpop.f32.mrf.mxu3  ;;  %v2358_v36 = vmul.f32 %v6993_v47, %v2357_v17 }
 0x5ea   : > { %v2305_v26 = vpop.f32.mrf.mxu0  ;;  %v7004_v14 = vadd.f32 %v2273_v7, %v2244_v6 }
 0x5eb   : > { %v2334_v12 = vpop.f32.mrf.mxu1  ;;  %v2359_v54 = vadd.f32 %v6993_v47, %v2358_v36 }
 0x5ec   : > { %v7006_v35 = vadd.f32 %v2334_v12, %v2305_v26  ;;  %v7008_v34 = vpop.eup %5863  ;;  %v2351_v26 = vand.u32 2147483648, %v6991_v46  ;;  %v2381_v57 = vand.u32 2147483648, %v7004_v14  ;;  %vm2375_vm1 = vweird.f32 %v7004_v14 }
 0x5ed   : > { %v7019_v9 = vpop.eup %5865  ;;  %v2386_v8 = vmul.f32 %v7008_v34, %v6989_v4  ;;  %vm2391_vm9 = vweird.f32 %v7008_v34  ;;  %v2363_v17 = vsel %vm7084_vm7, %v6993_v47, %v2359_v54 }
 0x5ee   : > { %5867 = vrcp.f32 %v7006_v35  ;;  %v2341_v37 = vmul.f32 %v7019_v9, %v6991_v46  ;;  %vm2420_vm12 = vweird.f32 %v7006_v35  ;;  %vm7117_vm13 = vmor %vm2390_vm8, %vm2391_vm9  ;;  %vm2346_vm14 = vweird.f32 %v7019_v9 }
 0x5ef   : > { %5869 = vrcp.f32 %v7004_v14  ;;  %v2387_v63 = vsub.f32 1.0, %v2386_v8  ;;  %v2382_v16 = vor.u32 1.1754944e-38, %v2381_v57 }
 0x5f0   : > { %v2247_v5 = vpop.f32.mrf.mxu2  ;;  %v2342_v55 = vsub.f32 1.0, %v2341_v37 }
 0x5f1   : > { %v2276_v24 = vpop.f32.mrf.mxu3  ;;  %v2388_v59 = vmul.f32 %v7008_v34, %v2387_v63 }
 0x5f2   : > { %v7033_v30 = vadd.f32 %v2276_v24, %v2247_v5  ;;  %v2308_v32 = vpop.f32.mrf.mxu0  ;;  %v2424_v5 = vand.u32 2147483647, %v7006_v35  ;;  %v2426_v24 = vand.u32 2147483648, %v7006_v35  ;;  %v2343_v36 = vmul.f32 %v7019_v9, %v2342_v55 }
 0x5f3   : > { %v2337_v39 = vpop.f32.mrf.mxu1  ;;  %v2389_v47 = vadd.f32 %v7008_v34, %v2388_v59  ;;  %v2368_v55 = vsel %vm7075_vm6, %v2367_v60, %v2363_v17 }
 0x5f4   : > { %v7044_v62 = vpop.eup %5867  ;;  %5871 = vrcp.f32 %v7033_v30  ;;  %v7047_v0 = vadd.f32 %v2337_v39, %v2308_v32  ;;  %vm7130_vm0 = vcmp.eq.f32.partialorder %v2424_v5, 8.507059e+37  ;;  %v2427_v59 = vor.u32 1.1754944e-38, %v2426_v24  ;;  %v2497_v32 = vpop.permute.xlu2 %2496 }
 0x5f5   : > { %v2416_v49 = vmul.f32 %v7044_v62, %v7006_v35  ;;  %v7063_v52 = vpop.eup %5869  ;;  %vm2421_vm11 = vweird.f32 %v7044_v62  ;;  %vm2405_vm6 = vweird.f32 %v7033_v30 }
 0x5f6   : > { %5873 = vrcp.f32 %v7047_v0  ;;  %v2371_v51 = vmul.f32 %v7063_v52, %v7004_v14  ;;  %vm7126_vm15 = vmor %vm2420_vm12, %vm2421_vm11  ;;  %v2456_v3 = vand.u32 2147483648, %v7047_v0  ;;  %v2454_v45 = vand.u32 2147483647, %v7047_v0 }
 0x5f7   : > { %v2417_v56 = vsub.f32 1.0, %v2416_v49  ;;  %v2397_v49 = vor.u32 1.1754944e-38, %v2396_v10  ;;  %vm2450_vm5 = vweird.f32 %v7047_v0  ;;  %vm2376_vm8 = vweird.f32 %v7063_v52 }
 0x5f8   : > { %v2250_v58 = vpop.f32.mrf.mxu2  ;;  %v2372_v40 = vsub.f32 1.0, %v2371_v51  ;;  %vm2455_vm11 = vcmp.eq.f32.partialorder %v2454_v45, 8.507059e+37 }
 0x5f9   : > { %v2279_v6 = vpop.f32.mrf.mxu3  ;;  %v2418_v7 = vmul.f32 %v7044_v62, %v2417_v56  ;;  %v2379_v56 = vand.u32 2147483647, %v7004_v14 }
 0x5fa   : > { %v7089_v12 = vpop.eup %5871  ;;  %v7091_v13 = vadd.f32 %v2279_v6, %v2250_v58  ;;  %v2393_v6 = vsel %vm7117_vm13, %v7008_v34, %v2389_v47  ;;  %v2373_v17 = vmul.f32 %v7063_v52, %v2372_v40  ;;  %v2411_v47 = vand.u32 2147483648, %v7033_v30 }
 0x5fb   : > { %v2401_v8 = vmul.f32 %v7089_v12, %v7033_v30  ;;  %v2419_v39 = vadd.f32 %v7044_v62, %v2418_v7  ;;  %v7144_v7 = vadd.f32 %v7019_v9, %v2343_v36  ;;  %vm2406_vm7 = vweird.f32 %v7089_v12 }
 0x5fc   : > { %v5874_v37 = vpop.eup %5873  ;;  %5875 = vrcp.f32 %v7091_v13  ;;  %v2457_v36 = vor.u32 1.1754944e-38, %v2456_v3  ;;  %v2441_v54 = vand.u32 2147483648, %v7091_v13  ;;  %v2439_v4 = vand.u32 2147483647, %v7091_v13 }
 0x5fd   : > { %v2402_v63 = vsub.f32 1.0, %v2401_v8  ;;  %v2446_v1 = vmul.f32 %v5874_v37, %v7047_v0  ;;  %v2423_v60 = vsel %vm7126_vm15, %v7044_v62, %v2419_v39  ;;  %vm2451_vm4 = vweird.f32 %v5874_v37  ;;  %vm7182_vm15 = vmor %vm2375_vm1, %vm2376_vm8 }
 0x5fe   : > { %v2428_v5 = vsel %vm7130_vm0, %v2427_v59, %v2423_v60  ;;  %vm2452_vm9 = vmor %vm2450_vm5, %vm2451_vm4  ;;  %v2398_v39 = vsel %vm7102_vm10, %v2397_v49, %v2393_v6  ;;  %v2409_v0 = vand.u32 2147483647, %v7033_v30  ;;  %vm7186_vm0 = vcmp.eq.f32.partialorder %v2379_v56, 8.507059e+37 }
 0x5ff   : > { %v2447_v58 = vsub.f32 1.0, %v2446_v1  ;;  %v2403_v51 = vmul.f32 %v7089_v12, %v2402_v63  ;;  %v2374_v1 = vadd.f32 %v7063_v52, %v2373_v17  ;;  %v2429_v35 = vmul.f32 %v2428_v5, %v7052_v42  ;;  %vm7169_vm10 = vmor %vm2405_vm6, %vm2406_vm7  ;;  %v9412_v5 = vld [vmem:[#allocation29_spill] sm:$0xff] }
 0x600   : > { %v2399_v42 = vmul.f32 %v2398_v39, %v7039_v33  ;;  %vm2410_vm13 = vcmp.eq.f32.partialorder %v2409_v0, 8.507059e+37  ;;  %vm2435_vm4 = vweird.f32 %v7091_v13  ;;  %vm7200_vm1 = vmor %vm2345_vm2, %vm2346_vm14  ;;  %v2442_v56 = vor.u32 1.1754944e-38, %v2441_v54  ;;  %v9414_v0 = vld [vmem:[#allocation30_spill] sm:$0xff] }
 0x601   : > { %v2448_v10 = vmul.f32 %v5874_v37, %v2447_v58  ;;  %v2404_v24 = vadd.f32 %v7089_v12, %v2403_v51  ;;  %v2412_v51 = vor.u32 1.1754944e-38, %v2411_v47  ;;  %vm2440_vm6 = vcmp.eq.f32.partialorder %v2439_v4, 8.507059e+37 }
 0x602   : > { %v5876_v8 = vpop.eup %5875  ;;  %v2471_v18 = vmul.f32 %v2463_v20, %v2399_v42  ;;  %vm2350_vm14 = vcmp.eq.f32.partialorder %v2349_v61, 8.507059e+37 }
 0x603   : > { %v2431_v34 = vmul.f32 %v5876_v8, %v7091_v13  ;;  %v2449_v62 = vadd.f32 %v5874_v37, %v2448_v10  ;;  %vm2436_vm12 = vweird.f32 %v5876_v8  ;;  %v2408_v59 = vsel %vm7169_vm10, %v7089_v12, %v2404_v24 }
 0x604   : > { %v2378_v12 = vsel %vm7182_vm15, %v7063_v52, %v2374_v1  ;;  %vm2437_vm5 = vmor %vm2435_vm4, %vm2436_vm12  ;;  %v2369_v13 = vmul.f32 %v2368_v55, %v7037_v38  ;;  %v2413_v60 = vsel %vm2410_vm13, %v2412_v51, %v2408_v59  ;;  %v2348_v52 = vsel %vm7200_vm1, %v7019_v9, %v7144_v7  ;;  %v2487_v7 = vpop.permute.xlu1 %2486 }
 0x605   : > { %v2432_v40 = vsub.f32 1.0, %v2431_v34  ;;  %v2453_v63 = vsel %vm2452_vm9, %v5874_v37, %v2449_v62  ;;  %v2158_v10 = vadd.f32 %v6970_v53, %v6968_v50  ;;  %v2383_v38 = vsel %vm7186_vm0, %v2382_v16, %v2378_v12  ;;  %v2492_v34 = vpop.permute.xlu0 %2491 }
 0x606   : > { %v2458_v58 = vsel %vm2455_vm11, %v2457_v36, %v2453_v63  ;;  %v2352_v55 = vor.u32 1.1754944e-38, %v2351_v26  ;;  %v2414_v57 = vmul.f32 %v2413_v60, %v7056_v43  ;;  %v1985_v50 = vadd.f32 %v6960_v31, %v6999_v11  ;;  %v2476_v43 = vld [vmem:[%s9411_s2] sm:$0xff] }
 0x607   : > { %v2433_v49 = vmul.f32 %v5876_v8, %v2432_v40  ;;  %v2459_v37 = vmul.f32 %v2458_v58, %v7059_v48  ;;  %v2464_v53 = vmax.f32 %v7028_v21, 0.0  ;;  %v2155_v26 = vadd.f32 %v6966_v41, %v6964_v44  ;;  %v9416_v40 = vld [vmem:[#allocation31_spill] sm:$0xff] }
 0x608   : > { %v2353_v9 = vsel %vm2350_vm14, %v2352_v55, %v2348_v52  ;;  %v2469_v20 = vmul.f32 %v2461_v28, %v2369_v13  ;;  %v2384_v46 = vmul.f32 %v2383_v38, %v2158_v10  ;;  %v2460_v44 = vmax.f32 %v1985_v50, 0.0  ;;  %v2478_v28 = vld [vmem:[%s9411_s2 + $0x10] sm:$0xff]  ;;  %v9426_v50 = vld [vmem:[#allocation36_spill] sm:$0xff] }
 0x609   : > { %v2475_v48 = vmul.f32 %v2467_v29, %v2459_v37  ;;  %v2434_v33 = vadd.f32 %v5876_v8, %v2433_v49  ;;  %v2473_v29 = vmul.f32 %v2465_v22, %v2429_v35  ;;  %v2472_v31 = vmul.f32 %v2464_v53, %v2414_v57  ;;  %v9418_v37 = vld [vmem:[#allocation32_spill] sm:$0xff] }
 0x60a   : > { %v2354_v11 = vmul.f32 %v2353_v9, %v2155_v26 }
 0x60b   : > { %2557 = vmatpush.msra.mxu3 %v2475_v48  ;;  %v2438_v6 = vsel %vm2437_vm5, %v5876_v8, %v2434_v33  ;;  %v9420_v48 = vld [vmem:[#allocation33_spill] sm:$0xff] }
 0x60c   : > { %v2443_v45 = vsel %vm2440_vm6, %v2442_v56, %v2438_v6  ;;  %v2468_v15 = vmul.f32 %v2460_v44, %v2354_v11  ;;  %v2502_v16 = vpop.permute.xlu1 %2501  ;;  %v2583_v44 = vld [vmem:[%s9383_s28 + $0x8] sm:$0xff] }
 0x60d   : > { %2558 = vmatpush.msra.mxu3 %v2473_v29  ;;  %v2444_v22 = vmul.f32 %v2443_v45, %v7067_v2  ;;  %v2462_v2 = vmax.f32 %v7025_v19, 0.0  ;;  %v2479_v19 = vld [vmem:[%s9411_s2 + $0x18] sm:$0xff]  ;;  %v9422_v29 = vld [vmem:[#allocation34_spill] sm:$0xff] }
 0x60f   : > { %2559 = vmatpush.msra.mxu3 %v2471_v18  ;;  %v2474_v23 = vmul.f32 %v2466_v27, %v2444_v22  ;;  %v2470_v41 = vmul.f32 %v2462_v2, %v2384_v46  ;;  %v9424_v22 = vld [vmem:[#allocation35_spill] sm:$0xff] }
 0x611   : > { %2528 = vmatpush.msra.mxu2 %v2474_v23  ;;  %2560 = vmatpush.msra.mxu3 %v2469_v20 }
 0x612   : > { %5485 = vmatmul.msk.f32.vlgmr.msra.gmra.mxu3 %vm9299_vm3, %v2476_v43 }
 0x613   : > { %2529 = vmatpush.msra.mxu2 %v2472_v31 }
 0x615   : > { %2530 = vmatpush.msra.mxu2 %v2470_v41  ;;  %v2582_v41 = vld [vmem:[%s9383_s28] sm:$0xff] }
 0x617   : > { %2531 = vmatpush.msra.mxu2 %v2468_v15  ;;  %v2736_v15 = vld [vmem:[%s9385_s16 + $0x38] sm:$0xff] }
 0x618   : > { %5481 = vmatmul.msk.f32.vlgmr.msra.gmra.mxu2 %vm9299_vm3, %v2476_v43 }
 0x61a   : > { %5486 = vmatmul.msk.f32.gmra.mxu3 %vm9299_vm3, %v2477_v25 }
 0x620   : > { %5482 = vmatmul.msk.f32.gmra.mxu2 %vm9299_vm3, %v2477_v25  ;;  %v2733_v25 = vld [vmem:[%s9385_s16 + $0x20] sm:$0xff] }
 0x622   : > { %5487 = vmatmul.msk.f32.gmra.mxu3 %vm9299_vm3, %v2478_v28 }
 0x628   : > { %5483 = vmatmul.msk.f32.gmra.mxu2 %vm9299_vm3, %v2478_v28  ;;  %v2734_v28 = vld [vmem:[%s9385_s16 + $0x28] sm:$0xff] }
 0x62a   : > { %5488 = vmatmul.msk.f32.gmra.mxu3 %vm9299_vm3, %v2479_v19 }
 0x630   : > { %5484 = vmatmul.msk.f32.gmra.mxu2 %vm9299_vm3, %v2479_v19  ;;  %v2730_v19 = vld [vmem:[%s9385_s16 + $0x8] sm:$0xff] }
 0x695   : > { %v2562_v21 = vpop.f32.mrf.mxu3 }
 0x696   : > { %v2563_v8 = vadd.f32 %v2562_v21, %v2487_v7  ;;  %v2731_v21 = vld [vmem:[%s9385_s16 + $0x10] sm:$0xff] }
 0x698   : > { %v7249_v47 = vadd.f32 %v2563_v8, %v9414_v0  ;;  %v5531_v8 = vld [vmem:[%s9360_s8 + $0x30] sm:$0xff] }
 0x69a   : > { %9415 = vst [vmem:[#allocation38_spill] sm:$0xff] %v7249_v47  ;;  %v2608_v58 = vmul.f32 %v7249_v47, %v7249_v47 }
 0x69b   : > { %v2533_v27 = vpop.f32.mrf.mxu2 }
 0x69c   : > { %v2534_v17 = vadd.f32 %v2533_v27, %v2487_v7  ;;  %v3208_v27 = vld [vmem:[%s9386_s26 + $0x8] sm:$0xff]  ;;  %v3210_v7 = vld [vmem:[%s9386_s26 + $0x18] sm:$0xff] }
 0x69d   : > { %v2565_v61 = vpop.f32.mrf.mxu3 }
 0x69e   : > { %v7246_v24 = vadd.f32 %v2534_v17, %v9412_v5  ;;  %v2566_v54 = vadd.f32 %v2565_v61, %v2492_v34  ;;  %v3207_v61 = vld [vmem:[%s9386_s26] sm:$0xff]  ;;  %v5532_v17 = vld [vmem:[%s9360_s8 + $0x38] sm:$0xff]  ;;  %v5535_v5 = vld [vmem:[%s6315_s14 + $0x30] sm:$0xff] }
 0x6a0   : > { %9413 = vst [vmem:[#allocation37_spill] sm:$0xff] %v7246_v24  ;;  %v2607_v1 = vmul.f32 %v7246_v24, %v7246_v24  ;;  %v2590_v35 = vadd.f32 %v7249_v47, %v7246_v24  ;;  %v7263_v59 = vadd.f32 %v2566_v54, %v9418_v37 }
 0x6a2   : > { %9419 = vst [vmem:[#allocation30_spill] sm:$0xff] %v7263_v59  ;;  %v2615_v30 = vadd.f32 %v2608_v58, %v2607_v1  ;;  %v2610_v13 = vmul.f32 %v7263_v59, %v7263_v59 }
 0x6a3   : > { %v2536_v62 = vpop.f32.mrf.mxu2 }
 0x6a4   : > { %v2537_v36 = vadd.f32 %v2536_v62, %v2492_v34  ;;  %v5536_v34 = vld [vmem:[%s6315_s14 + $0x38] sm:$0xff]  ;;  %v5530_v62 = vld [vmem:[%s9360_s8 + $0x28] sm:$0xff] }
 0x6a5   : > { %v2568_v39 = vpop.f32.mrf.mxu3 }
 0x6a6   : > { %v7252_v63 = vadd.f32 %v2537_v36, %v9416_v40  ;;  %v2569_v3 = vadd.f32 %v2568_v39, %v2497_v32  ;;  %v5533_v36 = vld [vmem:[%s6315_s14 + $0x20] sm:$0xff] }
 0x6a7   : > { %v5537_v39 = vld [vmem:[%s6320_s19 + $0x20] sm:$0xff] }
 0x6a8   : > { %9417 = vst [vmem:[#allocation29_spill] sm:$0xff] %v7252_v63  ;;  %v2609_v4 = vmul.f32 %v7252_v63, %v7252_v63  ;;  %v2591_v51 = vadd.f32 %v2590_v35, %v7252_v63  ;;  %v7275_v6 = vadd.f32 %v2569_v3, %v9422_v29 }
 0x6aa   : > { %v2616_v12 = vadd.f32 %v2615_v30, %v2609_v4  ;;  %v2592_v56 = vadd.f32 %v2591_v51, %v7263_v59  ;;  %9423 = vst [vmem:[#allocation32_spill] sm:$0xff] %v7275_v6  ;;  %v2612_v26 = vmul.f32 %v7275_v6, %v7275_v6 }
 0x6ab   : > { %v2539_v49 = vpop.f32.mrf.mxu2 }
 0x6ac   : > { %v2540_v42 = vadd.f32 %v2539_v49, %v2497_v32  ;;  %v2617_v45 = vadd.f32 %v2616_v12, %v2610_v13  ;;  %v5538_v32 = vld [vmem:[%s6320_s19 + $0x28] sm:$0xff]  ;;  %v5541_v12 = vld [vmem:[%s6325_s24 + $0x1] sm:$0x1]  ;;  %v5564_v13 = vld [vmem:[%s6345_s20 + $0x30] sm:$0xff] }
 0x6ad   : > { %v2571_v14 = vpop.f32.mrf.mxu3 }
 0x6ae   : > { %v7267_v33 = vadd.f32 %v2540_v42, %v9420_v48  ;;  %v2572_v52 = vadd.f32 %v2571_v14, %v2502_v16  ;;  %v5547_v14 = vld [vmem:[%s9361_s6 + $0x28] sm:$0xff] }
 0x6b0   : > { %9421 = vst [vmem:[#allocation31_spill] sm:$0xff] %v7267_v33  ;;  %v2611_v60 = vmul.f32 %v7267_v33, %v7267_v33  ;;  %v2593_v10 = vadd.f32 %v2592_v56, %v7267_v33  ;;  %v7279_v57 = vadd.f32 %v2572_v52, %v9424_v22  ;;  %v5549_v56 = vld [vmem:[%s9361_s6 + $0x38] sm:$0xff] }
 0x6b2   : > { %v2618_v18 = vadd.f32 %v2617_v45, %v2611_v60  ;;  %9425 = vst [vmem:[#allocation33_spill] sm:$0xff] %v7279_v57  ;;  %v2594_v9 = vadd.f32 %v2593_v10, %v7275_v6  ;;  %v2614_v2 = vmul.f32 %v7279_v57, %v7279_v57  ;;  %v5562_v60 = vld [vmem:[%s6345_s20 + $0x20] sm:$0xff] }
 0x6b3   : > { %v2542_v38 = vpop.f32.mrf.mxu2 }
 0x6b4   : > { %v2543_v55 = vadd.f32 %v2542_v38, %v2502_v16  ;;  %v2619_v43 = vadd.f32 %v2618_v18, %v2612_v26  ;;  %v5579_v16 = vld [vmem:[%s9359_s4 + $0x28] sm:$0xff] }
 0x6b6   : > { %v7282_v53 = vadd.f32 %v2543_v55, %v9426_v50  ;;  %v2683_v50 = vpop.permute.xlu2 %2682 }
 0x6b8   : > { %9427 = vst [vmem:[#allocation34_spill] sm:$0xff] %v7282_v53  ;;  %v2595_v23 = vadd.f32 %v2594_v9, %v7282_v53  ;;  %v2613_v20 = vmul.f32 %v7282_v53, %v7282_v53 }
 0x6ba   : > { %v2596_v46 = vadd.f32 %v2595_v23, %v7279_v57  ;;  %v2620_v31 = vadd.f32 %v2619_v43, %v2613_v20 }
 0x6bc   : > { %2597 = vadd.xlane.f32.xlu0 %v2596_v46  ;;  %v2621_v11 = vadd.f32 %v2620_v31, %v2614_v2 }
 0x6be   : > { %2622 = vadd.xlane.f32.xlu1 %v2621_v11  ;;  %v2678_v9 = vpop.permute.xlu2 %2677 }
 0x6c6   : > { %v2711_v26 = vpop.permute.xlu2 %2710 }
 0x6ce   : > { %v2706_v23 = vpop.permute.xlu2 %2705 }
 0x6d0   : > { %2672 = vperm.xlu0 %5837, %v2583_v44  }
 0x6d6   : > { %v2701_v44 = vpop.permute.xlu2 %2700 }
 0x6d7   : > { %2667 = vperm.xlu1 %5835, %v2582_v41  }
 0x6d8   : > { %2774 = vperm.xlu0 %5837, %v2736_v15  }
 0x6df   : > { %2759 = vperm.xlu1 %5835, %v2733_v25  }
 0x6e0   : > { %2764 = vperm.xlu0 %5837, %v2734_v28  }
 0x6e7   : > { %2744 = vperm.xlu1 %5835, %v2730_v19  }
 0x6e8   : > { %2749 = vperm.xlu0 %5837, %v2731_v21  }
 0x6ef   : > { %3218 = vperm.xlu1 %5835, %v3208_v27  }
 0x6f0   : > { %3213 = vperm.xlu0 %5837, %v3207_v61  }
 0x6f8   : > { %3228 = vperm.xlu0 %5837, %v3210_v7  }
 0x700   : > { %3412 = vperm.xlu0 %5837, %v5532_v17  }
 0x708   : > { %3407 = vperm.xlu0 %5837, %v5531_v8  }
 0x710   : > { %3440 = vperm.xlu0 %5837, %v5536_v34  }
 0x718   : > { %3402 = vperm.xlu0 %5837, %v5530_v62  }
 0x720   : > { %3435 = vperm.xlu0 %5837, %v5535_v5  }
 0x728   : > { %3425 = vperm.xlu0 %5837, %v5533_v36  }
 0x72f   : > { %v2598_v0 = vpop.xlane.xlu0 %2597 }
 0x730   : > { %v2599_v40 = vrot.slane %v2598_v0, 4  ;;  %3458 = vperm.xlu0 %5837, %v5537_v39  }
 0x731   : > { %v2623_v1 = vpop.xlane.xlu1 %2622 }
 0x732   : > { %v2600_v54 = vadd.f32 %v2599_v40, %v2598_v0  ;;  %v2624_v58 = vrot.slane %v2623_v1, 4 }
 0x734   : > { %v2601_v35 = vrot.slane %v2600_v54, 2  ;;  %v2625_v4 = vadd.f32 %v2624_v58, %v2623_v1 }
 0x736   : > { %v2626_v49 = vrot.slane %v2625_v4, 2  ;;  %v2602_v37 = vadd.f32 %v2601_v35, %v2600_v54 }
 0x738   : > { %3463 = vperm.xlu0 %5837, %v5538_v32   ;;  %v2603_v42 = vrot.slane %v2602_v37, 1  ;;  %v2627_v51 = vadd.f32 %v2626_v49, %v2625_v4 }
 0x73a   : > { %v2604_v30 = vadd.f32 %v2603_v42, %v2602_v37  ;;  %v2628_v3 = vrot.slane %v2627_v51, 1 }
 0x73c   : > { %5676 = vpush %v2604_v30  ;;  %v2629_v48 = vadd.f32 %v2628_v3, %v2627_v51  ;;  %v2696_v30 = vpop.permute.xlu2 %2695 }
 0x73e   : > { %5678 = vpush %v2629_v48 }
 0x740   : > { %3506 = vperm.xlu0 %5837, %v5541_v12  }
 0x742   : > { %v2673_v0 = vpop.permute.xlu0 %2672 }
 0x748   : > { %3529 = vperm.xlu0 %5837, %v5547_v14  }
 0x749   : > { %v2668_v40 = vpop.permute.xlu1 %2667 }
 0x750   : > { %3539 = vperm.xlu0 %5837, %v5549_v56  }
 0x758   : > { %3634 = vperm.xlu0 %5837, %v5564_v13  }
 0x760   : > { %3624 = vperm.xlu0 %5837, %v5562_v60  }
 0x768   : > { %4116 = vperm.xlu0 %5837, %v5579_v16  }
 0x76d   : > { %s5677_s0 = spop %5676 }
 0x76e   : > { %s2606_s25 = smul.f32 0.00012207031, %s5677_s0 }
 0x76f   : > { %s5679_s11 = spop %5678 }
 0x770   : > { %s2632_s1 = smul.f32 %s2606_s25, %s2606_s25  ;;  %v2634_v20 = vstv %s2606_s25 }
 0x771   : > { %s2631_s3 = smul.f32 0.00012207031, %s5679_s11  ;;  %v2641_v43 = vsub.f32 %v7282_v53, %v2634_v20  ;;  %v2642_v46 = vsub.f32 %v7279_v57, %v2634_v20  ;;  %v2639_v2 = vsub.f32 %v7267_v33, %v2634_v20  ;;  %v2640_v31 = vsub.f32 %v7275_v6, %v2634_v20 }
 0x772   : > { %v2637_v11 = vsub.f32 %v7252_v63, %v2634_v20  ;;  %v2638_v15 = vsub.f32 %v7263_v59, %v2634_v20  ;;  %v2635_v25 = vsub.f32 %v7246_v24, %v2634_v20  ;;  %v2636_v28 = vsub.f32 %v7249_v47, %v2634_v20 }
 0x773   : > { %s2633_s5 = ssub.f32 %s2631_s3, %s2632_s1 }
 0x774   : > { %s9529_s3 = sld [smem:[#allocation24_spill]] }
 0x775   : > { %s2643_s9 = sadd.f32 1e-05, %s2633_s5 }
 0x777   : > { %v2644_v29 = vstv %s2643_s9  ;;  %s9428_s9 = sld [smem:[#allocation22_spill]] }
 0x778   : > { %5877 = vrsqrt.f32 %v2644_v29  ;;  %vm2651_vm7 = vweird.f32 %v2644_v29 }
 0x77d   : > { %v2721_v12 = vld [vmem:[%s9428_s9] sm:$0xff]  ;;  %v2722_v14 = vld [vmem:[%s9428_s9 + $0x8] sm:$0xff]  ;;  %v2723_v56 = vld [vmem:[%s9428_s9 + $0x10] sm:$0xff] }
 0x77e   : > { %v5878_v52 = vpop.eup %5877  ;;  %v2724_v13 = vld [vmem:[%s9428_s9 + $0x18] sm:$0xff]  ;;  %v2725_v60 = vld [vmem:[%s9428_s9 + $0x20] sm:$0xff]  ;;  %v2726_v16 = vld [vmem:[%s9428_s9 + $0x28] sm:$0xff] }
 0x77f   : > { %v2646_v10 = vmul.f32 %v5878_v52, %v2644_v29  ;;  %vm2652_vm2 = vweird.f32 %v5878_v52  ;;  %v2727_v29 = vld [vmem:[%s9428_s9 + $0x30] sm:$0xff] }
 0x780   : > { %vm2653_vm8 = vmor %vm2651_vm7, %vm2652_vm2 }
 0x781   : > { %v2647_v45 = vmul.f32 %v5878_v52, %v2646_v10  ;;  %v7349_v10 = vpop.permute.xlu2 %2769 }
 0x783   : > { %v2648_v38 = vmul.f32 0.5, %v2647_v45 }
 0x785   : > { %v2649_v55 = vsub.f32 1.5, %v2648_v38 }
 0x787   : > { %v2650_v18 = vmul.f32 %v5878_v52, %v2649_v55 }
 0x789   : > { %v2654_v22 = vsel %vm2653_vm8, %v5878_v52, %v2650_v18  ;;  %v2728_v52 = vld [vmem:[%s9428_s9 + $0x38] sm:$0xff]  ;;  %v2755_v55 = vpop.permute.xlu2 %2754  ;;  %v7351_v18 = vpop.permute.xlu0 %2774 }
 0x78a   : > { %5680 = vpush %v2654_v22 }
 0x7bb   : > { %s5681_s5 = spop %5680 }
 0x7bc   : > { %v2656_v41 = vstv %s5681_s5 }
 0x7bd   : > { %v2663_v19 = vmul.f32 %v2656_v41, %v2641_v43  ;;  %v2664_v21 = vmul.f32 %v2656_v41, %v2642_v46  ;;  %v2661_v27 = vmul.f32 %v2656_v41, %v2639_v2  ;;  %v2662_v61 = vmul.f32 %v2656_v41, %v2640_v31 }
 0x7be   : > { %v2659_v7 = vmul.f32 %v2656_v41, %v2637_v11  ;;  %v2660_v17 = vmul.f32 %v2656_v41, %v2638_v15  ;;  %v2657_v8 = vmul.f32 %v2656_v41, %v2635_v25  ;;  %v2658_v34 = vmul.f32 %v2656_v41, %v2636_v28 }
 0x7bf   : > { %v2691_v62 = vmul.f32 %v2683_v50, %v2663_v19  ;;  %v2692_v5 = vmul.f32 %v2683_v50, %v2664_v21  ;;  %v2689_v36 = vmul.f32 %v2678_v9, %v2661_v27  ;;  %v2690_v39 = vmul.f32 %v2678_v9, %v2662_v61  ;;  %v2760_v9 = vpop.permute.xlu1 %2759 }
 0x7c0   : > { %v2687_v58 = vmul.f32 %v2673_v0, %v2659_v7  ;;  %v2688_v35 = vmul.f32 %v2673_v0, %v2660_v17  ;;  %v2685_v4 = vmul.f32 %v2668_v40, %v2657_v8  ;;  %v2686_v37 = vmul.f32 %v2668_v40, %v2658_v34 }
 0x7c1   : > { %v2719_v1 = vadd.f32 %v2711_v26, %v2691_v62  ;;  %v2720_v54 = vadd.f32 %v2711_v26, %v2692_v5  ;;  %v2717_v32 = vadd.f32 %v2706_v23, %v2689_v36  ;;  %v2718_v49 = vadd.f32 %v2706_v23, %v2690_v39  ;;  %v2740_v26 = vpop.permute.xlu2 %2739  ;;  %v7353_v23 = vpop.permute.xlu0 %2764 }
 0x7c2   : > { %v2715_v42 = vadd.f32 %v2701_v44, %v2687_v58  ;;  %v2716_v51 = vadd.f32 %v2701_v44, %v2688_v35  ;;  %v2713_v3 = vadd.f32 %v2696_v30, %v2685_v4  ;;  %v2714_v48 = vadd.f32 %v2696_v30, %v2686_v37 }
 0x7c3   : > { %2813 = vmatpush.msrb.mxu0 %v2719_v1  ;;  %2854 = vmatpush.msrb.mxu1 %v2720_v54 }
 0x7c5   : > { %2814 = vmatpush.msrb.mxu0 %v2717_v32  ;;  %2855 = vmatpush.msrb.mxu1 %v2718_v49 }
 0x7c7   : > { %2815 = vmatpush.msrb.mxu0 %v2715_v42  ;;  %2856 = vmatpush.msrb.mxu1 %v2716_v51  ;;  %v2745_v31 = vpop.permute.xlu1 %2744 }
 0x7c9   : > { %2816 = vmatpush.msrb.mxu0 %v2713_v3  ;;  %2857 = vmatpush.msrb.mxu1 %v2714_v48  ;;  %v2750_v28 = vpop.permute.xlu0 %2749 }
 0x7ca   : > { %5489 = vmatmul.msk.f32.vlgmr.msrb.gmra.mxu0 %vm9299_vm3, %v2721_v12  ;;  %5497 = vmatmul.msk.f32.vlgmr.msrb.gmra.mxu1 %vm9299_vm3, %v2721_v12 }
 0x7d2   : > { %5490 = vmatmul.msk.f32.gmra.mxu0 %vm9299_vm3, %v2722_v14  ;;  %5498 = vmatmul.msk.f32.gmra.mxu1 %vm9299_vm3, %v2722_v14 }
 0x7da   : > { %5491 = vmatmul.msk.f32.gmra.mxu0 %vm9299_vm3, %v2723_v56  ;;  %5499 = vmatmul.msk.f32.gmra.mxu1 %vm9299_vm3, %v2723_v56 }
 0x7e2   : > { %5492 = vmatmul.msk.f32.gmra.mxu0 %vm9299_vm3, %v2724_v13  ;;  %5500 = vmatmul.msk.f32.gmra.mxu1 %vm9299_vm3, %v2724_v13 }
 0x7ea   : > { %5493 = vmatmul.msk.f32.gmra.mxu0 %vm9299_vm3, %v2725_v60  ;;  %5501 = vmatmul.msk.f32.gmra.mxu1 %vm9299_vm3, %v2725_v60 }
 0x7f2   : > { %5494 = vmatmul.msk.f32.gmra.mxu0 %vm9299_vm3, %v2726_v16  ;;  %5502 = vmatmul.msk.f32.gmra.mxu1 %vm9299_vm3, %v2726_v16 }
 0x7fa   : > { %5495 = vmatmul.msk.f32.gmra.mxu0 %vm9299_vm3, %v2727_v29  ;;  %5503 = vmatmul.msk.f32.gmra.mxu1 %vm9299_vm3, %v2727_v29 }
 0x802   : > { %5496 = vmatmul.msk.f32.gmra.mxu0 %vm9299_vm3, %v2728_v52  ;;  %5504 = vmatmul.msk.f32.gmra.mxu1 %vm9299_vm3, %v2728_v52 }
 0x847   : > { %v2818_v45 = vpop.f32.mrf.mxu0  ;;  %v2859_v38 = vpop.f32.mrf.mxu1 }
 0x848   : > { %v7355_v46 = vadd.f32 %v2818_v45, %v2740_v26  ;;  %v7357_v2 = vadd.f32 %v2859_v38, %v2740_v26 }
 0x84a   : > { %9429 = vst [vmem:[#allocation35_spill] sm:$0xff] %v7355_v46  ;;  %v5505_v11 = vmul.f32 -1.442695, %v7355_v46  ;;  %v5506_v41 = vmul.f32 -1.442695, %v7357_v2 }
 0x84b   : > { %9430 = vst [vmem:[#allocation36_spill] sm:$0xff] %v7357_v2 }
 0x84c   : > { %5879 = vpow2.f32 %v5505_v11 }
 0x84d   : > { %5881 = vpow2.f32 %v5506_v41 }
 0x84f   : > { %v2821_v22 = vpop.f32.mrf.mxu0  ;;  %v2862_v50 = vpop.f32.mrf.mxu1 }
 0x850   : > { %v7360_v44 = vadd.f32 %v2821_v22, %v2745_v31  ;;  %v7366_v27 = vadd.f32 %v2862_v50, %v2745_v31 }
 0x852   : > { %9431 = vst [vmem:[#allocation39_spill] sm:$0xff] %v7360_v44  ;;  %v5507_v19 = vmul.f32 -1.442695, %v7360_v44  ;;  %v5880_v7 = vpop.eup %5879  ;;  %v5508_v17 = vmul.f32 -1.442695, %v7366_v27 }
 0x853   : > { %9433 = vst [vmem:[#allocation41_spill] sm:$0xff] %v7366_v27  ;;  %v5882_v5 = vpop.eup %5881  ;;  %v7374_v39 = vadd.f32 1.0, %v5880_v7 }
 0x854   : > { %5883 = vpow2.f32 %v5507_v19  ;;  %v7379_v54 = vadd.f32 1.0, %v5882_v5 }
 0x857   : > { %v2824_v20 = vpop.f32.mrf.mxu0  ;;  %v2865_v43 = vpop.f32.mrf.mxu1 }
 0x858   : > { %v7364_v21 = vadd.f32 %v2824_v20, %v2750_v28  ;;  %v7372_v36 = vadd.f32 %v2865_v43, %v2750_v28  ;;  %v2958_v43 = vand.u32 2147483648, %v7374_v39 }
 0x85a   : > { %9432 = vst [vmem:[#allocation40_spill] sm:$0xff] %v7364_v21  ;;  %v5509_v61 = vmul.f32 -1.442695, %v7364_v21  ;;  %v5884_v0 = vpop.eup %5883  ;;  %v5510_v35 = vmul.f32 -1.442695, %v7372_v36 }
 0x85b   : > { %9435 = vst [vmem:[#allocation43_spill] sm:$0xff] %v7372_v36  ;;  %v7385_v4 = vadd.f32 1.0, %v5884_v0  ;;  %v7440_v0 = vor.u32 1.1754944e-38, %v2958_v43 }
 0x85c   : > { %5885 = vpow2.f32 %v5509_v61 }
 0x85d   : > { %5887 = vpow2.f32 %v5508_v17  ;;  %9440 = vst [vmem:[#allocation48_spill] sm:$0xff] %v7440_v0  ;;  %vm2982_vm9 = vweird.f32 %v7385_v4 }
 0x85e   : > { %5889 = vrcp.f32 %v7374_v39 }
 0x85f   : > { %v2827_v15 = vpop.f32.mrf.mxu0  ;;  %v2868_v25 = vpop.f32.mrf.mxu1 }
 0x860   : > { %v7370_v8 = vadd.f32 %v2827_v15, %v2755_v55  ;;  %v7381_v58 = vadd.f32 %v2868_v25, %v2755_v55 }
 0x862   : > { %9434 = vst [vmem:[#allocation42_spill] sm:$0xff] %v7370_v8  ;;  %v5511_v40 = vmul.f32 -1.442695, %v7370_v8  ;;  %v5886_v49 = vpop.eup %5885  ;;  %v5512_v37 = vmul.f32 -1.442695, %v7381_v58 }
 0x863   : > { %9436 = vst [vmem:[#allocation44_spill] sm:$0xff] %v7381_v58  ;;  %v5888_v51 = vpop.eup %5887  ;;  %v7396_v12 = vadd.f32 1.0, %v5886_v49 }
 0x864   : > { %5891 = vpow2.f32 %v5511_v40  ;;  %v7398_v14 = vpop.eup %5889  ;;  %v7400_v56 = vadd.f32 1.0, %v5888_v51  ;;  %v2988_v40 = vand.u32 2147483648, %v7385_v4 }
 0x865   : > { %5893 = vrcp.f32 %v7379_v54  ;;  %v2948_v38 = vmul.f32 %v7398_v14, %v7374_v39  ;;  %vm3012_vm10 = vweird.f32 %v7396_v12 }
 0x866   : > { %5895 = vpow2.f32 %v5510_v35 }
 0x867   : > { %v2830_v34 = vpop.f32.mrf.mxu0  ;;  %v2871_v62 = vpop.f32.mrf.mxu1  ;;  %5897 = vrcp.f32 %v7385_v4  ;;  %v2949_v41 = vsub.f32 1.0, %v2948_v38 }
 0x868   : > { %v7377_v1 = vadd.f32 %v2830_v34, %v2760_v9  ;;  %v7390_v30 = vadd.f32 %v2871_v62, %v2760_v9 }
 0x86a   : > { %v5513_v32 = vmul.f32 -1.442695, %v7377_v1  ;;  %9437 = vst [vmem:[#allocation45_spill] sm:$0xff] %v7390_v30  ;;  %v5892_v13 = vpop.eup %5891  ;;  %v5514_v60 = vmul.f32 -1.442695, %v7390_v30 }
 0x86b   : > { %v7403_v16 = vpop.eup %5893  ;;  %v7412_v55 = vadd.f32 1.0, %v5892_v13 }
 0x86c   : > { %5899 = vpow2.f32 %v5513_v32  ;;  %v5896_v52 = vpop.eup %5895  ;;  %v2963_v26 = vmul.f32 %v7403_v16, %v7379_v54 }
 0x86d   : > { %5901 = vpow2.f32 %v5512_v37  ;;  %v7407_v45 = vpop.eup %5897  ;;  %v7416_v20 = vadd.f32 1.0, %v5896_v52  ;;  %v2950_v37 = vmul.f32 %v7398_v14, %v2949_v41  ;;  %vm3042_vm15 = vweird.f32 %v7412_v55 }
 0x86e   : > { %5903 = vrcp.f32 %v7396_v12  ;;  %9438 = vst [vmem:[#allocation46_spill] sm:$0xff] %v7407_v45  ;;  %v2978_v19 = vmul.f32 %v7407_v45, %v7385_v4  ;;  %v2964_v17 = vsub.f32 1.0, %v2963_v26  ;;  %vm2983_vm11 = vweird.f32 %v7407_v45 }
 0x86f   : > { %v2833_v42 = vpop.f32.mrf.mxu0  ;;  %v2874_v3 = vpop.f32.mrf.mxu1  ;;  %5905 = vrcp.f32 %v7400_v56  ;;  %v7474_v41 = vadd.f32 %v7398_v14, %v2950_v37  ;;  %v3018_v37 = vand.u32 2147483648, %v7396_v12  ;;  %vm7526_vm13 = vmor %vm2982_vm9, %vm2983_vm11 }
 0x870   : > { %v7394_v48 = vadd.f32 %v2833_v42, %v7353_v23  ;;  %5907 = vpow2.f32 %v5514_v60  ;;  %v7420_v31 = vadd.f32 %v2874_v3, %v7353_v23  ;;  %v2979_v13 = vsub.f32 1.0, %v2978_v19 }
 0x871   : > { %v2965_v52 = vmul.f32 %v7403_v16, %v2964_v17  ;;  %9443 = vst [vmem:[#allocation51_spill] sm:$0xff] %v7474_v41 }
 0x872   : > { %v5515_v29 = vmul.f32 -1.442695, %v7394_v48  ;;  %v5900_v50 = vpop.eup %5899  ;;  %9439 = vst [vmem:[#allocation47_spill] sm:$0xff] %v7420_v31  ;;  %v5516_v35 = vmul.f32 -1.442695, %v7420_v31 }
 0x873   : > { %v5902_v9 = vpop.eup %5901  ;;  %v7423_v15 = vadd.f32 1.0, %v5900_v50  ;;  %v7465_v50 = vor.u32 1.1754944e-38, %v2988_v40  ;;  %v7485_v34 = vadd.f32 %v7403_v16, %v2965_v52 }
 0x874   : > { %5909 = vpow2.f32 %v5515_v29  ;;  %v7425_v25 = vpop.eup %5903  ;;  %v7430_v61 = vadd.f32 1.0, %v5902_v9 }
 0x875   : > { %5911 = vrcp.f32 %v7412_v55  ;;  %v7435_v23 = vpop.eup %5905  ;;  %v3008_v51 = vmul.f32 %v7425_v25, %v7396_v12  ;;  %9442 = vst [vmem:[#allocation50_spill] sm:$0xff] %v7465_v50  ;;  %vm3013_vm12 = vweird.f32 %v7425_v25  ;;  %v3078_v27 = vand.u32 2147483648, %v7423_v15 }
 0x876   : > { %5913 = vrcp.f32 %v7416_v20  ;;  %v5908_v5 = vpop.eup %5907  ;;  %v2993_v9 = vmul.f32 %v7435_v23, %v7400_v56  ;;  %9444 = vst [vmem:[#allocation52_spill] sm:$0xff] %v7485_v34  ;;  %vm7550_vm0 = vmor %vm3012_vm10, %vm3013_vm12  ;;  %vm3072_vm1 = vweird.f32 %v7423_v15 }
 0x877   : > { %v2836_v22 = vpop.f32.mrf.mxu0  ;;  %v2877_v11 = vpop.f32.mrf.mxu1  ;;  %5915 = vrcp.f32 %v7423_v15  ;;  %v7459_v38 = vadd.f32 1.0, %v5908_v5  ;;  %v3009_v17 = vsub.f32 1.0, %v3008_v51  ;;  %v2980_v5 = vmul.f32 %v7407_v45, %v2979_v13 }
 0x878   : > { %v7433_v7 = vadd.f32 %v2836_v22, %v7349_v10  ;;  %v7445_v32 = vadd.f32 %v2877_v11, %v7349_v10  ;;  %5917 = vrcp.f32 %v7430_v61  ;;  %v2994_v13 = vsub.f32 1.0, %v2993_v9 }
 0x879   : > { %5919 = vpow2.f32 %v5516_v35  ;;  %v3010_v26 = vmul.f32 %v7425_v25, %v3009_v17  ;;  %v7501_v28 = vadd.f32 %v7407_v45, %v2980_v5  ;;  %v7595_v6 = vor.u32 1.1754944e-38, %v3078_v27 }
 0x87a   : > { %9441 = vst [vmem:[#allocation49_spill] sm:$0xff] %v7445_v32  ;;  %v5910_v49 = vpop.eup %5909  ;;  %v5517_v29 = vmul.f32 -1.442695, %v7433_v7  ;;  %v5518_v43 = vmul.f32 -1.442695, %v7445_v32  ;;  %v7516_v5 = vmul.f32 %v7435_v23, %v2994_v13  ;;  %v3048_v13 = vand.u32 2147483648, %v7412_v55 }
 0x87b   : > { %v7453_v60 = vadd.f32 1.0, %v5910_v49  ;;  %v7456_v10 = vpop.eup %5911  ;;  %9445 = vst [vmem:[#allocation53_spill] sm:$0xff] %v7501_v28  ;;  %v7531_v17 = vadd.f32 %v7425_v25, %v3010_v26 }
 0x87c   : > { %v7471_v11 = vpop.eup %5913  ;;  %v3038_v40 = vmul.f32 %v7456_v10, %v7412_v55  ;;  %v7566_v2 = vor.u32 1.1754944e-38, %v3048_v13  ;;  %vm3043_vm4 = vweird.f32 %v7456_v10 }
 0x87d   : > { %5921 = vrcp.f32 %v7453_v60  ;;  %vm7589_vm5 = vmor %vm3042_vm15, %vm3043_vm4  ;;  %vm3102_vm2 = vweird.f32 %v7453_v60 }
 0x87e   : > { %5923 = vpow2.f32 %v5517_v29  ;;  %v3023_v29 = vmul.f32 %v7471_v11, %v7416_v20  ;;  %v3039_v42 = vsub.f32 1.0, %v3038_v40 }
 0x87f   : > { %v2839_v3 = vpop.f32.mrf.mxu0  ;;  %v2880_v49 = vpop.f32.mrf.mxu1  ;;  %5925 = vrcp.f32 %v7459_v38 }
 0x880   : > { %v7462_v22 = vadd.f32 %v2839_v3, %v7351_v18  ;;  %v7482_v3 = vpop.eup %5915  ;;  %5927 = vpow2.f32 %v5518_v43  ;;  %v7498_v19 = vadd.f32 %v2880_v49, %v7351_v18  ;;  %v7509_v43 = vor.u32 1.1754944e-38, %v3018_v37 }
 0x881   : > { %v7490_v51 = vpop.eup %5917  ;;  %v3068_v9 = vmul.f32 %v7482_v3, %v7423_v15  ;;  %v3024_v40 = vsub.f32 1.0, %v3023_v29  ;;  %v9446_v37 = vmov 0  ;;  %v3040_v33 = vmul.f32 %v7456_v10, %v3039_v42 }
 0x882   : > { %v5519_v35 = vmul.f32 -1.442695, %v7462_v22  ;;  %v5920_v62 = vpop.eup %5919  ;;  %v5520_v18 = vmul.f32 -1.442695, %v7498_v19  ;;  %v9447_v37 = vsel %vm7526_vm13, 4294967295, %v9446_v37  ;;  %vm3073_vm6 = vweird.f32 %v7482_v3 }
 0x883   : > { %v7505_v57 = vadd.f32 1.0, %v5920_v62  ;;  %v7507_v53 = vpop.eup %5921  ;;  %9448 = vst [vmem:[#allocation54_spill] sm:$0xff] %v9447_v37  ;;  %v3069_v59 = vsub.f32 1.0, %v3068_v9  ;;  %v3025_v42 = vmul.f32 %v7471_v11, %v3024_v40  ;;  %v7570_v40 = vadd.f32 %v7456_v10, %v3040_v33  ;;  %vm7625_vm14 = vmor %vm3072_vm1, %vm3073_vm6 }
 0x884   : > { %5929 = vpow2.f32 %v5519_v35  ;;  %v3053_v35 = vmul.f32 %v7490_v51, %v7430_v61  ;;  %v5924_v49 = vpop.eup %5923  ;;  %v3098_v47 = vmul.f32 %v7507_v53, %v7453_v60  ;;  %vm3103_vm7 = vweird.f32 %v7507_v53 }
 0x885   : > { %v7520_v52 = vpop.eup %5925  ;;  %5931 = vrcp.f32 %v7505_v57  ;;  %v7535_v29 = vadd.f32 1.0, %v5924_v49  ;;  %v7581_v58 = vadd.f32 %v7471_v11, %v3025_v42  ;;  %vm7669_vm4 = vmor %vm3102_vm2, %vm3103_vm7  ;;  %vm3117_vm7 = vweird.f32 %v7505_v57 }
 0x886   : > { %v5928_v62 = vpop.eup %5927  ;;  %5933 = vpow2.f32 %v5520_v18  ;;  %v3054_v26 = vsub.f32 1.0, %v3053_v35  ;;  %v3083_v9 = vmul.f32 %v7520_v52, %v7459_v38  ;;  %v3099_v24 = vsub.f32 1.0, %v3098_v47 }
 0x887   : > { %5935 = vrcp.f32 %v7535_v29  ;;  %v7557_v18 = vadd.f32 1.0, %v5928_v62  ;;  %v3070_v62 = vmul.f32 %v7482_v3, %v3069_v59  ;;  %9451 = vst [vmem:[#allocation55_spill] sm:$0xff] %v7581_v58  ;;  %v3076_v47 = vand.u32 2147483647, %v7423_v15 }
 0x888   : > { %v3055_v36 = vmul.f32 %v7490_v51, %v3054_v26  ;;  %v3084_v33 = vsub.f32 1.0, %v3083_v9  ;;  %v3100_v27 = vmul.f32 %v7507_v53, %v3099_v24  ;;  %v3108_v9 = vand.u32 2147483648, %v7453_v60 }
 0x889   : > { %5937 = vrcp.f32 %v7557_v18  ;;  %v7603_v13 = vadd.f32 %v7482_v3, %v3070_v62  ;;  %v3136_v31 = vand.u32 2147483647, %v7535_v29  ;;  %v3138_v58 = vand.u32 2147483648, %v7535_v29 }
 0x88a   : > { %v5930_v63 = vpop.eup %5929  ;;  %v7609_v30 = vadd.f32 %v7490_v51, %v3055_v36  ;;  %v3085_v62 = vmul.f32 %v7520_v52, %v3084_v33  ;;  %v7642_v50 = vadd.f32 %v7507_v53, %v3100_v27  ;;  %v3109_v41 = vor.u32 1.1754944e-38, %v3108_v9 }
 0x88b   : > { %v7559_v35 = vadd.f32 1.0, %v5930_v63  ;;  %v7575_v63 = vpop.eup %5931  ;;  %vm3132_vm8 = vweird.f32 %v7535_v29  ;;  %vm7649_vm9 = vcmp.eq.f32.partialorder %v3136_v31, 8.507059e+37  ;;  %vm7660_vm12 = vcmp.eq.f32.partialorder %v3076_v47, 8.507059e+37 }
 0x88c   : > { %v5934_v46 = vpop.eup %5933  ;;  %9454 = vst [vmem:[#allocation56_spill] sm:$0xff] %v7609_v30  ;;  %v3113_v42 = vmul.f32 %v7575_v63, %v7505_v57  ;;  %v7646_v8 = vadd.f32 %v7520_v52, %v3085_v62  ;;  %v3139_v9 = vor.u32 1.1754944e-38, %v3138_v58  ;;  %v3123_v33 = vand.u32 2147483648, %v7505_v57 }
 0x88d   : > { %5939 = vrcp.f32 %v7559_v35  ;;  %v7585_v59 = vpop.eup %5935  ;;  %v7614_v0 = vadd.f32 1.0, %v5934_v46  ;;  %v3106_v46 = vand.u32 2147483647, %v7453_v60  ;;  %v9520_v30 = vand.u32 2147483647, %v7374_v39 }
 0x88e   : > { %v3128_v44 = vmul.f32 %v7585_v59, %v7535_v29  ;;  %v3114_v28 = vsub.f32 1.0, %v3113_v42  ;;  %vm3133_vm10 = vweird.f32 %v7585_v59 }
 0x88f   : > { %v7616_v21 = vpop.eup %5937  ;;  %5941 = vrcp.f32 %v7614_v0  ;;  %vm7653_vm11 = vcmp.eq.f32.partialorder %v3106_v46, 8.507059e+37  ;;  %vm7690_vm15 = vmor %vm3132_vm8, %vm3133_vm10  ;;  %vm3162_vm8 = vweird.f32 %v7559_v35 }
 0x890   : > { %v3129_v34 = vsub.f32 1.0, %v3128_v44  ;;  %v3143_v36 = vmul.f32 %v7616_v21, %v7557_v18  ;;  %v3115_v60 = vmul.f32 %v7575_v63, %v3114_v28  ;;  %vm3148_vm3 = vweird.f32 %v7616_v21 }
 0x892   : > { %v3130_v15 = vmul.f32 %v7585_v59, %v3129_v34  ;;  %v3144_v45 = vsub.f32 1.0, %v3143_v36  ;;  %v3166_v36 = vand.u32 2147483647, %v7559_v35 }
 0x893   : > { %v5940_v44 = vpop.eup %5939 }
 0x894   : > { %v3158_v37 = vmul.f32 %v5940_v44, %v7559_v35  ;;  %v3131_v27 = vadd.f32 %v7585_v59, %v3130_v15  ;;  %v3145_v46 = vmul.f32 %v7616_v21, %v3144_v45  ;;  %v3105_v15 = vsel %vm7669_vm4, %v7507_v53, %v7642_v50 }
 0x895   : > { %v7676_v47 = vpop.eup %5941  ;;  %vm3163_vm6 = vweird.f32 %v5940_v44  ;;  %v3151_v53 = vand.u32 2147483647, %v7557_v18  ;;  %v3153_v45 = vand.u32 2147483648, %v7557_v18  ;;  %v9467_v50 = vand.u32 2147483647, %v7412_v55 }
 0x896   : > { %v3159_v42 = vsub.f32 1.0, %v3158_v37  ;;  %v3168_v37 = vand.u32 2147483648, %v7559_v35  ;;  %v3173_v28 = vmul.f32 %v7676_v47, %v7614_v0  ;;  %v3135_v29 = vsel %vm7690_vm15, %v7585_v59, %v3131_v27  ;;  %vm3164_vm1 = vmor %vm3162_vm8, %vm3163_vm6 }
 0x897   : > { %vm7701_vm2 = vcmp.eq.f32.partialorder %v9467_v50, 8.507059e+37  ;;  %vm7709_vm10 = vcmp.eq.f32.partialorder %v3166_v36, 8.507059e+37  ;;  %v3146_v55 = vadd.f32 %v7616_v21, %v3145_v46  ;;  %v3116_v59 = vadd.f32 %v7575_v63, %v3115_v60 }
 0x898   : > { %v3160_v32 = vmul.f32 %v5940_v44, %v3159_v42  ;;  %v3169_v50 = vor.u32 1.1754944e-38, %v3168_v37  ;;  %v3174_v58 = vsub.f32 1.0, %v3173_v28  ;;  %v3181_v36 = vand.u32 2147483647, %v7614_v0 }
 0x899   : > { %v3183_v46 = vand.u32 2147483648, %v7614_v0  ;;  %v3140_v37 = vsel %vm7649_vm9, %v3139_v9, %v3135_v29  ;;  %vm9478_vm9 = vweird.f32 %v7557_v18  ;;  %vm2997_vm15 = vweird.f32 %v7400_v56 }
 0x89a   : > { %v3161_v31 = vadd.f32 %v5940_v44, %v3160_v32  ;;  %v9472_v32 = vand.u32 2147483647, %v7396_v12  ;;  %v3175_v28 = vmul.f32 %v7676_v47, %v3174_v58  ;;  %v3110_v9 = vsel %vm7653_vm11, %v3109_v41, %v3105_v15 }
 0x89b   : > { %vm9481_vm4 = vweird.f32 %v7575_v63  ;;  %v3199_v34 = vmul.f32 %v3140_v37, %v7433_v7  ;;  %v3154_v15 = vor.u32 1.1754944e-38, %v3153_v45  ;;  %vm9485_vm11 = vweird.f32 %v7676_v47 }
 0x89c   : > { %vm7721_vm13 = vcmp.eq.f32.partialorder %v9472_v32, 8.507059e+37  ;;  %v3165_v27 = vsel %vm3164_vm1, %v5940_v44, %v3161_v31  ;;  %v9475_v44 = vand.u32 2147483647, %v7385_v4  ;;  %v3121_v31 = vand.u32 2147483647, %v7505_v57  ;;  %vm7760_vm8 = vmor %vm3117_vm7, %vm9481_vm4  ;;  %v9504_v32 = vld [vmem:[#allocation51_spill] sm:$0xff] }
 0x89d   : > { %v3170_v12 = vsel %vm7709_vm10, %v3169_v50, %v3165_v27  ;;  %vm7749_vm10 = vmor %vm9478_vm9, %vm3148_vm3  ;;  %v3176_v29 = vadd.f32 %v7676_v47, %v3175_v28  ;;  %vm3177_vm3 = vweird.f32 %v7614_v0  ;;  %vm2967_vm4 = vweird.f32 %v7379_v54  ;;  %v9503_v50 = vld [vmem:[#allocation49_spill] sm:$0xff]  ;;  %v9513_v27 = vld [vmem:[#allocation46_spill] sm:$0xff] }
 0x89e   : > { %vm7738_vm1 = vcmp.eq.f32.partialorder %v9475_v44, 8.507059e+37  ;;  %v3201_v4 = vmul.f32 %v3170_v12, %v7462_v22  ;;  %v3150_v18 = vsel %vm7749_vm10, %v7616_v21, %v3146_v55  ;;  %v9484_v22 = vsel %vm7625_vm14, %v7482_v3, %v7603_v13  ;;  %vm3179_vm7 = vmor %vm3177_vm3, %vm9485_vm11  ;;  %v9517_v12 = vld [vmem:[#allocation55_spill] sm:$0xff] }
 0x89f   : > { %v3080_v41 = vsel %vm7660_vm12, %v7595_v6, %v9484_v22  ;;  %v3184_v21 = vor.u32 1.1754944e-38, %v3183_v46  ;;  %v3120_v0 = vsel %vm7760_vm8, %v7575_v63, %v3116_v59  ;;  %vm3152_vm9 = vcmp.eq.f32.partialorder %v3151_v53, 8.507059e+37  ;;  %v9511_v59 = vld [vmem:[#allocation54_spill] sm:$0xff] }
 0x8a0   : > { %3252 = vmatpush.msrb.mxu2 %v3201_v4  ;;  %v3180_v3 = vsel %vm3179_vm7, %v7676_v47, %v3176_v29  ;;  %vm3182_vm14 = vcmp.eq.f32.partialorder %v3181_v36, 8.507059e+37  ;;  %vm9486_vm12 = vweird.f32 %v7520_v52  ;;  %vm9487_vm10 = vweird.f32 %v7459_v38  ;;  %v9514_v36 = vld [vmem:[#allocation53_spill] sm:$0xff]  ;;  %v9516_v46 = vld [vmem:[#allocation50_spill] sm:$0xff]  ;;  %v9524_v4 = vld [vmem:[#allocation40_spill] sm:$0xff] }
 0x8a1   : > { %vm7789_vm6 = vmor %vm9487_vm10, %vm9486_vm12  ;;  %v3197_v7 = vmul.f32 %v3110_v9, %v7394_v48  ;;  %v3124_v13 = vor.u32 1.1754944e-38, %v3123_v33  ;;  %v3155_v24 = vsel %vm3152_vm9, %v3154_v15, %v3150_v18  ;;  %v3185_v62 = vsel %vm3182_vm14, %v3184_v21, %v3180_v3  ;;  %v9526_v18 = vld [vmem:[#allocation48_spill] sm:$0xff]  ;;  %v9533_v21 = vld [vmem:[#allocation39_spill] sm:$0xff] }
 0x8a2   : > { %3253 = vmatpush.msrb.mxu2 %v3199_v34  ;;  %v9490_v63 = vsel %vm7589_vm5, %v7456_v10, %v7570_v40  ;;  %v3090_v53 = vsel %vm7789_vm6, %v7520_v52, %v7646_v8  ;;  %vm3122_vm8 = vcmp.eq.f32.partialorder %v3121_v31, 8.507059e+37  ;;  %v3202_v48 = vmul.f32 %v3185_v62, %v7498_v19  ;;  %v9519_v31 = vld [vmem:[#allocation47_spill] sm:$0xff]  ;;  %v3203_v10 = vld [vmem:[%s9529_s3] sm:$0xff]  ;;  %v9543_v19 = vld [vmem:[#allocation36_spill] sm:$0xff] }
 0x8a3   : > { %v3050_v47 = vsel %vm7701_vm2, %v7566_v2, %v9490_v63  ;;  %v2996_v45 = vadd.f32 %v7435_v23, %v7516_v5  ;;  %vm9491_vm3 = vweird.f32 %v7490_v51  ;;  %vm9492_vm11 = vweird.f32 %v7430_v61  ;;  %v9501_v5 = vld [vmem:[#allocation56_spill] sm:$0xff]  ;;  %v9538_v63 = vld [vmem:[#allocation35_spill] sm:$0xff] }
 0x8a4   : > { %vm7813_vm5 = vmor %vm9492_vm11, %vm9491_vm3  ;;  %v3195_v2 = vmul.f32 %v3080_v41, %v7377_v1  ;;  %v9495_v40 = vand.u32 2147483648, %v7459_v38  ;;  %v3125_v8 = vsel %vm3122_vm8, %v3124_v13, %v3120_v0  ;;  %3254 = vmatpush.msrb.mxu2 %v3197_v7  ;;  %vm9496_vm2 = vweird.f32 %v7398_v14  ;;  %3281 = vmatpush.msrb.mxu3 %v3202_v48  ;;  %v9528_v41 = vld [vmem:[#allocation45_spill] sm:$0xff]  ;;  %v9554_v15 = vld [vmem:[#allocation32_spill] sm:$0xff] }
 0x8a5   : > { %vm9497_vm6 = vweird.f32 %v7374_v39  ;;  %v9500_v52 = vsel %vm7550_vm0, %v7425_v25, %v7531_v17  ;;  %v3060_v42 = vsel %vm7813_vm5, %v7490_v51, %v9501_v5  ;;  %v9502_v55 = vand.u32 2147483647, %v7459_v38  ;;  %v9509_v51 = vld [vmem:[#allocation42_spill] sm:$0xff]  ;;  %v3206_v5 = vld [vmem:[%s9529_s3 + $0x18] sm:$0xff] }
 0x8a6   : > { %v3094_v26 = vor.u32 1.1754944e-38, %v9495_v40  ;;  %vm7824_vm7 = vmor %vm9497_vm6, %vm9496_vm2  ;;  %v3020_v1 = vsel %vm7721_vm13, %v7509_v43, %v9500_v52  ;;  %v3200_v58 = vmul.f32 %v3155_v24, %v9503_v50  ;;  %vm9505_vm0 = vweird.f32 %v7471_v11  ;;  %3255 = vmatpush.msrb.mxu2 %v3195_v2  ;;  %v9537_v24 = vld [vmem:[#allocation44_spill] sm:$0xff] }
 0x8a7   : > { %vm3092_vm9 = vcmp.eq.f32.partialorder %v9502_v55, 8.507059e+37  ;;  %v2955_v25 = vsel %vm7824_vm7, %v7398_v14, %v9504_v32  ;;  %vm9506_vm13 = vweird.f32 %v7416_v20  ;;  %v3193_v17 = vmul.f32 %v3050_v47, %v9509_v51  ;;  %v3214_v55 = vpop.permute.xlu0 %3213 }
 0x8a8   : > { %vm7851_vm14 = vmor %vm9506_vm13, %vm9505_vm0  ;;  %v9510_v38 = vand.u32 2147483648, %v7430_v61  ;;  %v3095_v35 = vsel %vm3092_vm9, %v3094_v26, %v3090_v53  ;;  %vm9512_vm12 = vnez %v9511_v59  ;;  %v9518_v44 = vand.u32 2147483647, %v7430_v61  ;;  %3282 = vmatpush.msrb.mxu3 %v3200_v58  ;;  %v9542_v26 = vld [vmem:[#allocation41_spill] sm:$0xff] }
 0x8a9   : > { %v9515_v14 = vsel %vm9512_vm12, %v9513_v27, %v9514_v36  ;;  %v3030_v28 = vsel %vm7851_vm14, %v7471_v11, %v9517_v12  ;;  %v3198_v33 = vmul.f32 %v3125_v8, %v9519_v31  ;;  %vm2957_vm8 = vcmp.eq.f32.partialorder %v9520_v30, 8.507059e+37  ;;  %3256 = vmatpush.msrb.mxu2 %v3193_v17  ;;  %v9544_v17 = vld [vmem:[#allocation37_spill] sm:$0xff]  ;;  %v3224_v12 = vpop.permute.xlu2 %3223  ;;  %v9550_v30 = vld [vmem:[#allocation30_spill] sm:$0xff] }
 0x8aa   : > { %v3064_v49 = vor.u32 1.1754944e-38, %v9510_v38  ;;  %v2990_v37 = vsel %vm7738_vm1, %v9516_v46, %v9515_v14  ;;  %vm3062_vm10 = vcmp.eq.f32.partialorder %v9518_v44, 8.507059e+37  ;;  %vm9521_vm3 = vweird.f32 %v7435_v23  ;;  %v9548_v59 = vld [vmem:[#allocation29_spill] sm:$0xff] }
 0x8ab   : > { %vm7879_vm11 = vmor %vm2997_vm15, %vm9521_vm3  ;;  %v3191_v9 = vmul.f32 %v3020_v1, %v9524_v4  ;;  %v9525_v11 = vand.u32 2147483648, %v7416_v20  ;;  %v2960_v29 = vsel %vm2957_vm8, %v9526_v18, %v2955_v25  ;;  %v9527_v22 = vand.u32 2147483647, %v7416_v20  ;;  %3283 = vmatpush.msrb.mxu3 %v3198_v33  ;;  %v9535_v20 = vld [vmem:[#allocation52_spill] sm:$0xff]  ;;  %v3205_v1 = vld [vmem:[%s9529_s3 + $0x10] sm:$0xff]  ;;  %v3219_v25 = vpop.permute.xlu1 %3218 }
 0x8ac   : > { %v3065_v57 = vsel %vm3062_vm10, %v3064_v49, %v3060_v42  ;;  %v3000_v39 = vsel %vm7879_vm11, %v7435_v23, %v2996_v45  ;;  %v3196_v34 = vmul.f32 %v3095_v35, %v9528_v41  ;;  %vm9530_vm15 = vweird.f32 %v7403_v16  ;;  %v9546_v49 = vld [vmem:[#allocation38_spill] sm:$0xff] }
 0x8ad   : > { %v3034_v61 = vor.u32 1.1754944e-38, %v9525_v11  ;;  %vm3032_vm1 = vcmp.eq.f32.partialorder %v9527_v22, 8.507059e+37  ;;  %vm7897_vm5 = vmor %vm2967_vm4, %vm9530_vm15  ;;  %v3189_v0 = vmul.f32 %v2990_v37, %v9533_v21  ;;  %v9534_v3 = vand.u32 2147483648, %v7400_v56  ;;  %3257 = vmatpush.msrb.mxu2 %v3191_v9  ;;  %v9552_v11 = vld [vmem:[#allocation31_spill] sm:$0xff] }
 0x8ae   : > { %v2970_v7 = vsel %vm7897_vm5, %v7403_v16, %v9535_v20  ;;  %v9536_v13 = vand.u32 2147483647, %v7400_v56  ;;  %v3194_v62 = vmul.f32 %v3065_v57, %v9537_v24  ;;  %3284 = vmatpush.msrb.mxu3 %v3196_v34  ;;  %v3187_v47 = vmul.f32 %v2960_v29, %v9538_v63  ;;  %v9541_v16 = vld [vmem:[#allocation43_spill] sm:$0xff] }
 0x8af   : > { %v3004_v23 = vor.u32 1.1754944e-38, %v9534_v3  ;;  %v3035_v6 = vsel %vm3032_vm1, %v3034_v61, %v3030_v28  ;;  %v9539_v53 = vand.u32 2147483648, %v7379_v54  ;;  %3258 = vmatpush.msrb.mxu2 %v3189_v0  ;;  %vm9338_vm4 = vcmask 523264   ;;  %v3229_v34 = vpop.permute.xlu0 %3228 }
 0x8b0   : > { %vm3002_vm2 = vcmp.eq.f32.partialorder %v9536_v13, 8.507059e+37  ;;  %v9540_v2 = vand.u32 2147483647, %v7379_v54  ;;  %v3192_v56 = vmul.f32 %v3035_v6, %v9541_v16  ;;  %3285 = vmatpush.msrb.mxu3 %v3194_v62  ;;  %v3204_v54 = vld [vmem:[%s9529_s3 + $0x8] sm:$0xff]  ;;  %vm9560_vm13 = vcmask 261120  }
 0x8b1   : > { %v2974_v48 = vor.u32 1.1754944e-38, %v9539_v53  ;;  %v3005_v45 = vsel %vm3002_vm2, %v3004_v23, %v3000_v39  ;;  %3259 = vmatpush.msrb.mxu2 %v3187_v47  ;;  %vm9561_vm14 = vmmov %vm9560_vm13 }
 0x8b2   : > { %vm2972_vm6 = vcmp.eq.f32.partialorder %v9540_v2, 8.507059e+37  ;;  %v3190_v8 = vmul.f32 %v3005_v45, %v9542_v26  ;;  %3286 = vmatpush.msrb.mxu3 %v3192_v56  ;;  %5521 = vmatmul.msk.f32.vlgmr.msrb.gmra.mxu2 %vm9338_vm4, %v3203_v10  ;;  %vm9562_vm12 = vmmov %vm9560_vm13 }
 0x8b3   : > { %v2975_v40 = vsel %vm2972_vm6, %v2974_v48, %v2970_v7  ;;  %v9556_v7 = vld [vmem:[#allocation34_spill] sm:$0xff]  ;;  %vm9563_vm10 = vmmov %vm9562_vm12 }
 0x8b4   : > { %v3188_v52 = vmul.f32 %v2975_v40, %v9543_v19  ;;  %3287 = vmatpush.msrb.mxu3 %v3190_v8  ;;  %v5529_v8 = vld [vmem:[%s9360_s8 + $0x20] sm:$0xff]  ;;  %v5534_v19 = vld [vmem:[%s6315_s14 + $0x28] sm:$0xff]  ;;  %vm9564_vm8 = vmmov %vm9563_vm10 }
 0x8b5   : > { %vm9565_vm3 = vmmov %vm9564_vm8 }
 0x8b6   : > { %3288 = vmatpush.msrb.mxu3 %v3188_v52  ;;  %v5539_v52 = vld [vmem:[%s6320_s19 + $0x30] sm:$0xff]  ;;  %vm9566_vm11 = vmmov %vm9565_vm3 }
 0x8b7   : > { %5525 = vmatmul.msk.f32.vlgmr.msrb.gmra.mxu3 %vm9338_vm4, %v3203_v10  ;;  %v9558_v10 = vld [vmem:[#allocation33_spill] sm:$0xff]  ;;  %vm9567_vm1 = vmmov %vm9565_vm3 }
 0x8b8   : > { %vm9570_vm15 = vmmov %vm9567_vm1 }
 0x8b9   : > { %vm9571_vm5 = vmmov %vm9567_vm1 }
 0x8ba   : > { %5522 = vmatmul.msk.f32.gmra.mxu2 %vm9338_vm4, %v3204_v54  ;;  %vm9572_vm2 = vmmov %vm9567_vm1 }
 0x8bb   : > { %vm9573_vm6 = vmmov %vm9567_vm1 }
 0x8bf   : > { %5526 = vmatmul.msk.f32.gmra.mxu3 %vm9338_vm4, %v3204_v54  ;;  %v5540_v54 = vld [vmem:[%s6320_s19 + $0x38] sm:$0xff] }
 0x8c2   : > { %5523 = vmatmul.msk.f32.gmra.mxu2 %vm9338_vm4, %v3205_v1 }
 0x8c7   : > { %5527 = vmatmul.msk.f32.gmra.mxu3 %vm9338_vm4, %v3205_v1  ;;  %v5546_v1 = vld [vmem:[%s9361_s6 + $0x20] sm:$0xff] }
 0x8ca   : > { %5524 = vmatmul.msk.f32.gmra.mxu2 %vm9338_vm4, %v3206_v5 }
 0x8cf   : > { %5528 = vmatmul.msk.f32.gmra.mxu3 %vm9338_vm4, %v3206_v5  ;;  %v5548_v5 = vld [vmem:[%s9361_s6 + $0x30] sm:$0xff] }
 0x935   : > { %v3261_v42 = vpop.f32.mrf.mxu2 }
 0x936   : > { %v3262_v58 = vadd.f32 %v3261_v42, %v3214_v55  ;;  %v5565_v42 = vld [vmem:[%s6345_s20 + $0x38] sm:$0xff] }
 0x938   : > { %v7932_v38 = vadd.f32 %v3262_v58, %v9544_v17  ;;  %v5581_v58 = vld [vmem:[%s9359_s4 + $0x38] sm:$0xff] }
 0x93a   : > { %v3290_v50 = vpop.f32.mrf.mxu3  ;;  %9545 = vst [vmem:[#allocation56_spill] sm:$0xff] %v7932_v38  ;;  %v3337_v14 = vmul.f32 %v7932_v38, %v7932_v38 }
 0x93b   : > { %v3291_v32 = vadd.f32 %v3290_v50, %v3214_v55  ;;  %v5563_v55 = vld [vmem:[%s6345_s20 + $0x28] sm:$0xff]  ;;  %v5578_v50 = vld [vmem:[%s9359_s4 + $0x20] sm:$0xff] }
 0x93d   : > { %v3264_v43 = vpop.f32.mrf.mxu2  ;;  %v7935_v35 = vadd.f32 %v3291_v32, %v9546_v49 }
 0x93e   : > { %v3265_v51 = vadd.f32 %v3264_v43, %v3219_v25 }
 0x93f   : > { %9547 = vst [vmem:[#allocation49_spill] sm:$0xff] %v7935_v35  ;;  %v3338_v46 = vmul.f32 %v7935_v35, %v7935_v35  ;;  %v3320_v28 = vadd.f32 %v7935_v35, %v7932_v38 }
 0x940   : > { %v7938_v27 = vadd.f32 %v3265_v51, %v9548_v59 }
 0x941   : > { %v3345_v9 = vadd.f32 %v3338_v46, %v3337_v14 }
 0x942   : > { %9549 = vst [vmem:[#allocation51_spill] sm:$0xff] %v7938_v27  ;;  %v3293_v36 = vpop.f32.mrf.mxu3  ;;  %v3339_v44 = vmul.f32 %v7938_v27, %v7938_v27  ;;  %v3321_v4 = vadd.f32 %v3320_v28, %v7938_v27 }
 0x943   : > { %v3294_v37 = vadd.f32 %v3293_v36, %v3219_v25 }
 0x944   : > { %v3346_v57 = vadd.f32 %v3345_v9, %v3339_v44 }
 0x945   : > { %v3267_v31 = vpop.f32.mrf.mxu2  ;;  %v7949_v60 = vadd.f32 %v3294_v37, %v9550_v30 }
 0x946   : > { %v3268_v33 = vadd.f32 %v3267_v31, %v3224_v12 }
 0x947   : > { %9551 = vst [vmem:[#allocation42_spill] sm:$0xff] %v7949_v60  ;;  %v3322_v39 = vadd.f32 %v3321_v4, %v7949_v60  ;;  %v3340_v22 = vmul.f32 %v7949_v60, %v7949_v60 }
 0x948   : > { %v7953_v61 = vadd.f32 %v3268_v33, %v9552_v11  ;;  %v3413_v33 = vpop.permute.xlu0 %3412 }
 0x949   : > { %v3347_v23 = vadd.f32 %v3346_v57, %v3340_v22 }
 0x94a   : > { %9553 = vst [vmem:[#allocation54_spill] sm:$0xff] %v7953_v61  ;;  %v3296_v18 = vpop.f32.mrf.mxu3  ;;  %v3341_v41 = vmul.f32 %v7953_v61, %v7953_v61  ;;  %v3323_v3 = vadd.f32 %v3322_v39, %v7953_v61 }
 0x94b   : > { %v3297_v29 = vadd.f32 %v3296_v18, %v3224_v12 }
 0x94c   : > { %v3348_v20 = vadd.f32 %v3347_v23, %v3341_v41 }
 0x94d   : > { %v7961_v21 = vadd.f32 %v3297_v29, %v9554_v15  ;;  %v3270_v0 = vpop.f32.mrf.mxu2 }
 0x94e   : > { %v3271_v6 = vadd.f32 %v3270_v0, %v3229_v34 }
 0x94f   : > { %9555 = vst [vmem:[#allocation46_spill] sm:$0xff] %v7961_v21  ;;  %v3324_v24 = vadd.f32 %v3323_v3, %v7961_v21  ;;  %v3342_v62 = vmul.f32 %v7961_v21, %v7961_v21 }
 0x950   : > { %v7965_v13 = vadd.f32 %v3271_v6, %v9556_v7  ;;  %v3408_v18 = vpop.permute.xlu0 %3407 }
 0x951   : > { %v3349_v45 = vadd.f32 %v3348_v20, %v3342_v62 }
 0x952   : > { %9557 = vst [vmem:[#allocation53_spill] sm:$0xff] %v7965_v13  ;;  %v3299_v63 = vpop.f32.mrf.mxu3  ;;  %v3343_v47 = vmul.f32 %v7965_v13, %v7965_v13  ;;  %v3325_v48 = vadd.f32 %v3324_v24, %v7965_v13 }
 0x953   : > { %v3300_v53 = vadd.f32 %v3299_v63, %v3229_v34 }
 0x954   : > { %v3350_v16 = vadd.f32 %v3349_v45, %v3343_v47 }
 0x955   : > { %v7974_v2 = vadd.f32 %v3300_v53, %v9558_v10 }
 0x957   : > { %9559 = vst [vmem:[#allocation50_spill] sm:$0xff] %v7974_v2  ;;  %v3326_v56 = vadd.f32 %v3325_v48, %v7974_v2  ;;  %v3344_v40 = vmul.f32 %v7974_v2, %v7974_v2 }
 0x958   : > { %v3441_v22 = vpop.permute.xlu0 %3440 }
 0x959   : > { %3327 = vadd.xlane.f32.xlu1 %v3326_v56  ;;  %v3351_v26 = vadd.f32 %v3350_v16, %v3344_v40 }
 0x95b   : > { %3352 = vadd.xlane.f32.xlu2 %v3351_v26 }
 0x960   : > { %v3403_v41 = vpop.permute.xlu0 %3402 }
 0x968   : > { %v3436_v34 = vpop.permute.xlu0 %3435 }
 0x970   : > { %v3426_v15 = vpop.permute.xlu0 %3425 }
 0x972   : > { %3397 = vperm.xlu1 %5835, %v5529_v8  }
 0x973   : > { %3430 = vperm.xlu2 %5836, %v5534_v19  }
 0x978   : > { %v3459_v3 = vpop.permute.xlu0 %3458 }
 0x97a   : > { %3468 = vperm.xlu1 %5835, %v5539_v52  }
 0x97b   : > { %3473 = vperm.xlu2 %5836, %v5540_v54  }
 0x983   : > { %3524 = vperm.xlu2 %5836, %v5546_v1  }
 0x98b   : > { %3534 = vperm.xlu2 %5836, %v5548_v5  }
 0x993   : > { %3639 = vperm.xlu2 %5836, %v5565_v42  }
 0x99b   : > { %3629 = vperm.xlu2 %5836, %v5563_v55  }
 0x9a3   : > { %4111 = vperm.xlu2 %5836, %v5578_v50  }
 0x9ab   : > { %4126 = vperm.xlu2 %5836, %v5581_v58  }
 0x9cc   : > { %v3328_v32 = vpop.xlane.xlu1 %3327 }
 0x9cd   : > { %v3329_v25 = vrot.slane %v3328_v32, 4 }
 0x9ce   : > { %v3353_v43 = vpop.xlane.xlu2 %3352 }
 0x9cf   : > { %v3330_v51 = vadd.f32 %v3329_v25, %v3328_v32  ;;  %v3354_v17 = vrot.slane %v3353_v43, 4 }
 0x9d1   : > { %v3331_v49 = vrot.slane %v3330_v51, 2  ;;  %v3355_v59 = vadd.f32 %v3354_v17, %v3353_v43 }
 0x9d3   : > { %v3356_v36 = vrot.slane %v3355_v59, 2  ;;  %v3332_v14 = vadd.f32 %v3331_v49, %v3330_v51 }
 0x9d5   : > { %v3333_v46 = vrot.slane %v3332_v14, 1  ;;  %v3357_v37 = vadd.f32 %v3356_v36, %v3355_v59 }
 0x9d6   : > { %v3431_v45 = vpop.permute.xlu2 %3430 }
 0x9d7   : > { %v3334_v12 = vadd.f32 %v3333_v46, %v3332_v14  ;;  %v3358_v28 = vrot.slane %v3357_v37, 1  ;;  %v3464_v14 = vpop.permute.xlu0 %3463 }
 0x9d9   : > { %5682 = vpush %v3334_v12  ;;  %v3359_v44 = vadd.f32 %v3358_v28, %v3357_v37 }
 0x9db   : > { %5684 = vpush %v3359_v44 }
 0x9e4   : > { %v3398_v6 = vpop.permute.xlu1 %3397 }
 0x9ec   : > { %v3469_v28 = vpop.permute.xlu1 %3468 }
 0xa0a   : > { %s5683_s0 = spop %5682 }
 0xa0b   : > { %s3336_s25 = smul.f32 0.00012207031, %s5683_s0  ;;  %s9581_s0 = sld [smem:[#allocation27_spill]] }
 0xa0c   : > { %s5685_s11 = spop %5684 }
 0xa0d   : > { %s3362_s1 = smul.f32 %s3336_s25, %s3336_s25  ;;  %v3364_v0 = vstv %s3336_s25 }
 0xa0e   : > { %s3361_s5 = smul.f32 0.00012207031, %s5685_s11  ;;  %v3371_v23 = vsub.f32 %v7965_v13, %v3364_v0  ;;  %v3372_v20 = vsub.f32 %v7974_v2, %v3364_v0  ;;  %v3369_v7 = vsub.f32 %v7953_v61, %v3364_v0  ;;  %v3370_v24 = vsub.f32 %v7961_v21, %v3364_v0  ;;  %v8189_v13 = vld [vmem:[#allocation6 + $0x28] sm:$0xff]  ;;  %v8195_v21 = vld [vmem:[#allocation6 + $0x10] sm:$0xff] }
 0xa0f   : > { %v3367_v62 = vsub.f32 %v7938_v27, %v3364_v0  ;;  %v3368_v47 = vsub.f32 %v7949_v60, %v3364_v0  ;;  %v3365_v53 = vsub.f32 %v7932_v38, %v3364_v0  ;;  %v3366_v48 = vsub.f32 %v7935_v35, %v3364_v0  ;;  %v8192_v2 = vld [vmem:[#allocation6 + $0x128] sm:$0xff]  ;;  %v8198_v61 = vld [vmem:[#allocation6 + $0x110] sm:$0xff]  ;;  %v8201_v60 = vld [vmem:[#allocation6 + $0x18] sm:$0xff] }
 0xa10   : > { %s3363_s6 = ssub.f32 %s3361_s5, %s3362_s1  ;;  %9578 = vst [vmem:[#allocation40_spill] sm:$0xff] %v8198_v61  ;;  %v8204_v27 = vld [vmem:[#allocation6 + $0x118] sm:$0xff]  ;;  %v8207_v35 = vld [vmem:[#allocation6] sm:$0xff] }
 0xa11   : > { %v8210_v38 = vld [vmem:[#allocation6 + $0x100] sm:$0xff] }
 0xa12   : > { %s3373_s8 = sadd.f32 1e-05, %s3363_s6 }
 0xa13   : > { %s9580_s6 = sld [smem:[#allocation26_spill]] }
 0xa14   : > { %v3374_v31 = vstv %s3373_s8 }
 0xa15   : > { %5943 = vrsqrt.f32 %v3374_v31  ;;  %vm3381_vm9 = vweird.f32 %v3374_v31 }
 0xa1b   : > { %v5944_v30 = vpop.eup %5943 }
 0xa1c   : > { %v3376_v4 = vmul.f32 %v5944_v30, %v3374_v31  ;;  %vm3382_vm7 = vweird.f32 %v5944_v30 }
 0xa1d   : > { %vm3383_vm0 = vmor %vm3381_vm9, %vm3382_vm7 }
 0xa1e   : > { %v3377_v9 = vmul.f32 %v5944_v30, %v3376_v4  ;;  %vm9574_vm7 = vmmov %vm9567_vm1 }
 0xa1f   : > { %vm9575_vm9 = vmmov %vm9567_vm1 }
 0xa20   : > { %v3378_v11 = vmul.f32 0.5, %v3377_v9 }
 0xa22   : > { %v3379_v57 = vsub.f32 1.5, %v3378_v11 }
 0xa24   : > { %v3380_v29 = vmul.f32 %v5944_v30, %v3379_v57 }
 0xa26   : > { %v3384_v39 = vsel %vm3383_vm0, %v5944_v30, %v3380_v29  ;;  %v3474_v30 = vpop.permute.xlu2 %3473  ;;  %vm9576_vm0 = vmmov %vm9567_vm1 }
 0xa27   : > { %5686 = vpush %v3384_v39 }
 0xa58   : > { %s5687_s8 = spop %5686 }
 0xa59   : > { %v3386_v63 = vstv %s5687_s8 }
 0xa5a   : > { %v3393_v10 = vmul.f32 %v3386_v63, %v3371_v23  ;;  %v3394_v16 = vmul.f32 %v3386_v63, %v3372_v20  ;;  %v3391_v56 = vmul.f32 %v3386_v63, %v3369_v7  ;;  %v3392_v40 = vmul.f32 %v3386_v63, %v3370_v24  ;;  %v8003_v23 = vld [vmem:[#allocation6 + $0xf0] sm:$0xff]  ;;  %v8009_v20 = vld [vmem:[#allocation6 + $0xf8] sm:$0xff] }
 0xa5b   : > { %v3389_v26 = vmul.f32 %v3386_v63, %v3367_v62  ;;  %v3390_v8 = vmul.f32 %v3386_v63, %v3368_v47  ;;  %v3387_v19 = vmul.f32 %v3386_v63, %v3365_v53  ;;  %v3388_v52 = vmul.f32 %v3386_v63, %v3366_v48  ;;  %v8012_v7 = vld [vmem:[#allocation6 + $0x1f8] sm:$0xff]  ;;  %v8015_v63 = vld [vmem:[#allocation6 + $0xe0] sm:$0xff]  ;;  %v5543_v53 = vld [vmem:[%s9381_s15 + $0x28] sm:$0xff] }
 0xa5c   : > { %v3421_v54 = vmul.f32 %v3413_v33, %v3393_v10  ;;  %v3422_v1 = vmul.f32 %v3413_v33, %v3394_v16  ;;  %v3419_v5 = vmul.f32 %v3408_v18, %v3391_v56  ;;  %v3420_v42 = vmul.f32 %v3408_v18, %v3392_v40  ;;  %v5542_v18 = vld [vmem:[%s9381_s15 + $0x20] sm:$0xff]  ;;  %v8022_v48 = vld [vmem:[#allocation6 + $0xe8] sm:$0xff]  ;;  %v8029_v40 = vld [vmem:[#allocation6 + $0xd0] sm:$0xff] }
 0xa5d   : > { %v3417_v55 = vmul.f32 %v3403_v41, %v3389_v26  ;;  %v3418_v50 = vmul.f32 %v3403_v41, %v3390_v8  ;;  %v3415_v58 = vmul.f32 %v3398_v6, %v3387_v19  ;;  %v3416_v32 = vmul.f32 %v3398_v6, %v3388_v52  ;;  %v5558_v41 = vld [vmem:[%s9382_s22 + $0x20] sm:$0xff]  ;;  %v8006_v6 = vld [vmem:[#allocation6 + $0x1f0] sm:$0xff]  ;;  %v5559_v10 = vld [vmem:[%s9382_s22 + $0x28] sm:$0xff] }
 0xa5e   : > { %v3449_v25 = vadd.f32 %v3441_v22, %v3421_v54  ;;  %v3450_v43 = vadd.f32 %v3441_v22, %v3422_v1  ;;  %v3447_v51 = vadd.f32 %v3436_v34, %v3419_v5  ;;  %v3448_v46 = vadd.f32 %v3436_v34, %v3420_v42  ;;  %v8018_v47 = vld [vmem:[#allocation6 + $0x1e0] sm:$0xff]  ;;  %v8032_v26 = vld [vmem:[#allocation6 + $0x1d0] sm:$0xff]  ;;  %v8035_v8 = vld [vmem:[#allocation6 + $0xd8] sm:$0xff]  ;;  %v3507_v1 = vpop.permute.xlu0 %3506 }
 0xa5f   : > { %v3445_v17 = vadd.f32 %v3431_v45, %v3417_v55  ;;  %v3446_v49 = vadd.f32 %v3431_v45, %v3418_v50  ;;  %v3443_v59 = vadd.f32 %v3426_v15, %v3415_v58  ;;  %v3444_v36 = vadd.f32 %v3426_v15, %v3416_v32  ;;  %v8025_v45 = vld [vmem:[#allocation6 + $0x1e8] sm:$0xff]  ;;  %v8038_v19 = vld [vmem:[#allocation6 + $0x1d8] sm:$0xff]  ;;  %v8045_v55 = vld [vmem:[#allocation6 + $0xc0] sm:$0xff] }
 0xa60   : > { %3566 = vmatpush.msra.mxu2 %v3449_v25  ;;  %3595 = vmatpush.msra.mxu3 %v3450_v43  ;;  %v3480_v33 = vmul.f32 %v3469_v28, %v3447_v51  ;;  %v3481_v4 = vmul.f32 %v3469_v28, %v3448_v46  ;;  %v3482_v57 = vmul.f32 %v3474_v30, %v3449_v25  ;;  %v8048_v50 = vld [vmem:[#allocation6 + $0x1c0] sm:$0xff]  ;;  %v8051_v58 = vld [vmem:[#allocation6 + $0xc8] sm:$0xff] }
 0xa61   : > { %3666 = vmatpush.msra.mxu0 %v3449_v25  ;;  %3695 = vmatpush.msra.mxu1 %v3450_v43  ;;  %v3478_v37 = vmul.f32 %v3464_v14, %v3445_v17  ;;  %v3479_v12 = vmul.f32 %v3464_v14, %v3446_v49  ;;  %v3476_v44 = vmul.f32 %v3459_v3, %v3443_v59  ;;  %v8054_v32 = vld [vmem:[#allocation6 + $0x1c8] sm:$0xff]  ;;  %v3509_v25 = vperm.slane %v3507_v1, 0  ;;  %v8067_v14 = vld [vmem:[#allocation6 + $0x1b8] sm:$0xff]  ;;  %v8075_v28 = vld [vmem:[#allocation6 + $0xa0] sm:$0xff] }
 0xa62   : > { %3567 = vmatpush.msra.mxu2 %v3447_v51  ;;  %3596 = vmatpush.msra.mxu3 %v3448_v46  ;;  %v3477_v31 = vmul.f32 %v3459_v3, %v3444_v36  ;;  %v3483_v29 = vmul.f32 %v3474_v30, %v3450_v43  ;;  %v8156_v1 = vld [vmem:[#allocation6 + $0x158] sm:$0xff] }
 0xa63   : > { %3667 = vmatpush.msra.mxu0 %v3447_v51  ;;  %3696 = vmatpush.msra.mxu1 %v3448_v46  ;;  %v3484_v9 = vadd.f32 %v3478_v37, %v3476_v44  ;;  %v5560_v46 = vld [vmem:[%s9382_s22 + $0x30] sm:$0xff]  ;;  %v8078_v44 = vld [vmem:[#allocation6 + $0x1a0] sm:$0xff] }
 0xa64   : > { %3568 = vmatpush.msra.mxu2 %v3445_v17  ;;  %3597 = vmatpush.msra.mxu3 %v3446_v49  ;;  %v3493_v11 = vadd.f32 %v3479_v12, %v3477_v31  ;;  %v8081_v31 = vld [vmem:[#allocation6 + $0xa8] sm:$0xff] }
 0xa65   : > { %3668 = vmatpush.msra.mxu0 %v3445_v17  ;;  %3697 = vmatpush.msra.mxu1 %v3446_v49  ;;  %v3485_v39 = vadd.f32 %v3484_v9, %v3480_v33  ;;  %v8057_v17 = vld [vmem:[#allocation6 + $0xb0] sm:$0xff]  ;;  %v8084_v33 = vld [vmem:[#allocation6 + $0x1a8] sm:$0xff] }
 0xa66   : > { %3569 = vmatpush.msra.mxu2 %v3443_v59  ;;  %v3494_v22 = vadd.f32 %v3493_v11, %v3481_v4  ;;  %3598 = vmatpush.msra.mxu3 %v3444_v36  ;;  %v8060_v49 = vld [vmem:[#allocation6 + $0x1b0] sm:$0xff]  ;;  %v8099_v11 = vld [vmem:[#allocation6 + $0x98] sm:$0xff] }
 0xa67   : > { %3669 = vmatpush.msra.mxu0 %v3443_v59  ;;  %3698 = vmatpush.msra.mxu1 %v3444_v36  ;;  %v3486_v34 = vadd.f32 %v3485_v39, %v3482_v57  ;;  %v5544_v59 = vld [vmem:[%s9381_s15 + $0x30] sm:$0xff]  ;;  %v8064_v36 = vld [vmem:[#allocation6 + $0xb8] sm:$0xff]  ;;  %v8109_v39 = vld [vmem:[#allocation6 + $0x180] sm:$0xff] }
 0xa68   : > { %5550 = vmatmul.msk.f32.vlgmr.msra.gmra.mxu2 %vm9560_vm13, %v5542_v18  ;;  %5554 = vmatmul.msk.f32.vlgmr.msra.gmra.mxu3 %vm9561_vm14, %v5542_v18  ;;  %v3495_v15 = vadd.f32 %v3494_v22, %v3483_v29  ;;  %v8093_v4 = vld [vmem:[#allocation6 + $0x90] sm:$0xff]  ;;  %v8102_v57 = vld [vmem:[#allocation6 + $0x198] sm:$0xff]  ;;  %v8105_v18 = vld [vmem:[#allocation6 + $0x80] sm:$0xff] }
 0xa69   : > { %5566 = vmatmul.msk.f32.vlgmr.msra.gmra.mxu0 %vm9562_vm12, %v5558_v41  ;;  %5570 = vmatmul.msk.f32.vlgmr.msra.gmra.mxu1 %vm9563_vm10, %v5558_v41  ;;  %v3487_v0 = vrot.slane %v3486_v34, 4  ;;  %v8096_v9 = vld [vmem:[#allocation6 + $0x190] sm:$0xff]  ;;  %v5545_v29 = vld [vmem:[%s9381_s15 + $0x38] sm:$0xff]  ;;  %v8112_v22 = vld [vmem:[#allocation6 + $0x88] sm:$0xff] }
 0xa6a   : > { %v3496_v3 = vrot.slane %v3495_v15, 4  ;;  %3731 = vmatpush.msrb.mxu2 %v8003_v23  ;;  %3760 = vmatpush.msrb.mxu3 %v8006_v6  ;;  %v5561_v41 = vld [vmem:[%s9382_s22 + $0x38] sm:$0xff]  ;;  %vm9577_vm13 = vmmov %vm9576_vm0 }
 0xa6b   : > { %3789 = vmatpush.msrb.mxu0 %v8009_v20  ;;  %3818 = vmatpush.msrb.mxu1 %v8012_v7  ;;  %v3488_v24 = vadd.f32 %v3487_v0, %v3486_v34  ;;  %v8116_v34 = vld [vmem:[#allocation6 + $0x188] sm:$0xff]  ;;  %v8122_v0 = vld [vmem:[#allocation6 + $0x170] sm:$0xff] }
 0xa6c   : > { %v3497_v62 = vadd.f32 %v3496_v3, %v3495_v15  ;;  %3732 = vmatpush.msrb.mxu2 %v8015_v63  ;;  %3761 = vmatpush.msrb.mxu3 %v8018_v47  ;;  %v8119_v15 = vld [vmem:[#allocation6 + $0x70] sm:$0xff]  ;;  %v8125_v3 = vld [vmem:[#allocation6 + $0x78] sm:$0xff] }
 0xa6d   : > { %3790 = vmatpush.msrb.mxu0 %v8022_v48  ;;  %3819 = vmatpush.msrb.mxu1 %v8025_v45  ;;  %v3489_v16 = vrot.slane %v3488_v24, 2 }
 0xa6e   : > { %v3498_v56 = vrot.slane %v3497_v62, 2  ;;  %3733 = vmatpush.msrb.mxu2 %v8029_v40  ;;  %3762 = vmatpush.msrb.mxu3 %v8032_v26 }
 0xa6f   : > { %3791 = vmatpush.msrb.mxu0 %v8035_v8  ;;  %3820 = vmatpush.msrb.mxu1 %v8038_v19  ;;  %v3490_v52 = vadd.f32 %v3489_v16, %v3488_v24  ;;  %v8132_v24 = vld [vmem:[#allocation6 + $0x178] sm:$0xff]  ;;  %v8144_v16 = vld [vmem:[#allocation6 + $0x168] sm:$0xff] }
 0xa70   : > { %5551 = vmatmul.msk.f32.gmra.mxu2 %vm9564_vm8, %v5543_v53  ;;  %5555 = vmatmul.msk.f32.gmra.mxu3 %vm9565_vm3, %v5543_v53  ;;  %v3499_v54 = vadd.f32 %v3498_v56, %v3497_v62  ;;  %v8135_v62 = vld [vmem:[#allocation6 + $0x60] sm:$0xff]  ;;  %v8147_v56 = vld [vmem:[#allocation6 + $0x50] sm:$0xff] }
 0xa71   : > { %5567 = vmatmul.msk.f32.gmra.mxu0 %vm9566_vm11, %v5559_v10  ;;  %5571 = vmatmul.msk.f32.gmra.mxu1 %vm9567_vm1, %v5559_v10  ;;  %v3491_v5 = vrot.slane %v3490_v52, 1  ;;  %v8138_v53 = vld [vmem:[#allocation6 + $0x160] sm:$0xff]  ;;  %v8141_v10 = vld [vmem:[#allocation6 + $0x68] sm:$0xff] }
 0xa72   : > { %v3500_v42 = vrot.slane %v3499_v54, 1  ;;  %3734 = vmatpush.msrb.mxu2 %v8045_v55  ;;  %3763 = vmatpush.msrb.mxu3 %v8048_v50 }
 0xa73   : > { %3792 = vmatpush.msrb.mxu0 %v8051_v58  ;;  %3821 = vmatpush.msrb.mxu1 %v8054_v32  ;;  %v3492_v43 = vadd.f32 %v3491_v5, %v3490_v52  ;;  %v8150_v52 = vld [vmem:[#allocation6 + $0x150] sm:$0xff]  ;;  %v8159_v5 = vld [vmem:[#allocation6 + $0x40] sm:$0xff] }
 0xa74   : > { %v3501_v51 = vadd.f32 %v3500_v42, %v3499_v54  ;;  %3735 = vmatpush.msrb.mxu2 %v8057_v17  ;;  %3764 = vmatpush.msrb.mxu3 %v8060_v49  ;;  %v8153_v54 = vld [vmem:[#allocation6 + $0x58] sm:$0xff]  ;;  %v8162_v42 = vld [vmem:[#allocation6 + $0x140] sm:$0xff] }
 0xa75   : > { %3793 = vmatpush.msrb.mxu0 %v8064_v36  ;;  %3822 = vmatpush.msrb.mxu1 %v8067_v14  ;;  %v8071_v37 = vadd.f32 %v3509_v25, %v3492_v43  ;;  %v8168_v43 = vld [vmem:[#allocation6 + $0x148] sm:$0xff] }
 0xa76   : > { %v8073_v12 = vadd.f32 %v3509_v25, %v3501_v51  ;;  %3736 = vmatpush.msrb.mxu2 %v8075_v28  ;;  %3765 = vmatpush.msrb.mxu3 %v8078_v44  ;;  %v8165_v25 = vld [vmem:[#allocation6 + $0x48] sm:$0xff]  ;;  %v8171_v51 = vld [vmem:[#allocation6 + $0x30] sm:$0xff] }
 0xa77   : > { %9568 = vst [vmem:[#allocation55_spill] sm:$0xff] %v8071_v37  ;;  %3794 = vmatpush.msrb.mxu0 %v8081_v31  ;;  %3823 = vmatpush.msrb.mxu1 %v8084_v33 }
 0xa78   : > { %9569 = vst [vmem:[#allocation47_spill] sm:$0xff] %v8073_v12  ;;  %5552 = vmatmul.msk.f32.gmra.mxu2 %vm9570_vm15, %v5544_v59  ;;  %5556 = vmatmul.msk.f32.gmra.mxu3 %vm9571_vm5, %v5544_v59  ;;  %v3712_v30 = vmax.f32 %v8071_v37, %v8073_v12  ;;  %v8174_v59 = vld [vmem:[#allocation6 + $0x130] sm:$0xff]  ;;  %v8213_v12 = vld [vmem:[#allocation6 + $0x8] sm:$0xff] }
 0xa79   : > { %5568 = vmatmul.msk.f32.gmra.mxu0 %vm9572_vm2, %v5560_v46  ;;  %5572 = vmatmul.msk.f32.gmra.mxu1 %vm9573_vm6, %v5560_v46  ;;  %v8177_v46 = vld [vmem:[#allocation6 + $0x38] sm:$0xff]  ;;  %v5580_v37 = vld [vmem:[%s9359_s4 + $0x30] sm:$0xff] }
 0xa7a   : > { %3713 = vmax.xlane.f32.xlu1 %v3712_v30  ;;  %3737 = vmatpush.msrb.mxu2 %v8093_v4  ;;  %v8180_v30 = vld [vmem:[#allocation6 + $0x138] sm:$0xff] }
 0xa7b   : > { %3766 = vmatpush.msrb.mxu3 %v8096_v9  ;;  %3795 = vmatpush.msrb.mxu0 %v8099_v11 }
 0xa7c   : > { %3824 = vmatpush.msrb.mxu1 %v8102_v57  ;;  %3738 = vmatpush.msrb.mxu2 %v8105_v18 }
 0xa7d   : > { %3767 = vmatpush.msrb.mxu3 %v8109_v39  ;;  %3796 = vmatpush.msrb.mxu0 %v8112_v22 }
 0xa7e   : > { %3825 = vmatpush.msrb.mxu1 %v8116_v34  ;;  %3739 = vmatpush.msrb.mxu2 %v8119_v15 }
 0xa7f   : > { %3768 = vmatpush.msrb.mxu3 %v8122_v0  ;;  %3797 = vmatpush.msrb.mxu0 %v8125_v3 }
 0xa80   : > { %5553 = vmatmul.msk.f32.gmra.mxu2 %vm9574_vm7, %v5545_v29  ;;  %5557 = vmatmul.msk.f32.gmra.mxu3 %vm9575_vm9, %v5545_v29  ;;  %v8183_v29 = vld [vmem:[#allocation6 + $0x20] sm:$0xff] }
 0xa81   : > { %5569 = vmatmul.msk.f32.gmra.mxu0 %vm9576_vm0, %v5561_v41  ;;  %5573 = vmatmul.msk.f32.gmra.mxu1 %vm9577_vm13, %v5561_v41  ;;  %v8186_v41 = vld [vmem:[#allocation6 + $0x120] sm:$0xff] }
 0xa82   : > { %3826 = vmatpush.msrb.mxu1 %v8132_v24  ;;  %3740 = vmatpush.msrb.mxu2 %v8135_v62 }
 0xa83   : > { %3769 = vmatpush.msrb.mxu3 %v8138_v53  ;;  %3798 = vmatpush.msrb.mxu0 %v8141_v10 }
 0xa84   : > { %3827 = vmatpush.msrb.mxu1 %v8144_v16  ;;  %3741 = vmatpush.msrb.mxu2 %v8147_v56 }
 0xa85   : > { %3770 = vmatpush.msrb.mxu3 %v8150_v52  ;;  %3799 = vmatpush.msrb.mxu0 %v8153_v54 }
 0xa86   : > { %3828 = vmatpush.msrb.mxu1 %v8156_v1  ;;  %3742 = vmatpush.msrb.mxu2 %v8159_v5 }
 0xa87   : > { %3771 = vmatpush.msrb.mxu3 %v8162_v42  ;;  %3800 = vmatpush.msrb.mxu0 %v8165_v25 }
 0xa88   : > { %3829 = vmatpush.msrb.mxu1 %v8168_v43  ;;  %3743 = vmatpush.msrb.mxu2 %v8171_v51 }
 0xa89   : > { %3772 = vmatpush.msrb.mxu3 %v8174_v59  ;;  %3801 = vmatpush.msrb.mxu0 %v8177_v46 }
 0xa8a   : > { %3830 = vmatpush.msrb.mxu1 %v8180_v30  ;;  %3744 = vmatpush.msrb.mxu2 %v8183_v29 }
 0xa8b   : > { %3773 = vmatpush.msrb.mxu3 %v8186_v41  ;;  %3802 = vmatpush.msrb.mxu0 %v8189_v13 }
 0xa8c   : > { %3831 = vmatpush.msrb.mxu1 %v8192_v2  ;;  %3745 = vmatpush.msrb.mxu2 %v8195_v21 }
 0xa8d   : > { %3774 = vmatpush.msrb.mxu3 %v8198_v61  ;;  %3803 = vmatpush.msrb.mxu0 %v8201_v60  ;;  %v8217_v61 = vld [vmem:[#allocation6 + $0x108] sm:$0xff] }
 0xa8e   : > { %3832 = vmatpush.msrb.mxu1 %v8204_v27  ;;  %3746 = vmatpush.msrb.mxu2 %v8207_v35 }
 0xa8f   : > { %3775 = vmatpush.msrb.mxu3 %v8210_v38  ;;  %3804 = vmatpush.msrb.mxu0 %v8213_v12 }
 0xa90   : > { %3833 = vmatpush.msrb.mxu1 %v8217_v61  ;;  %3847 = vmatpush.msra.mxu2 %v8003_v23  ;;  %v5593_v23 = vld [vmem:[%s9383_s28 + $0x38] sm:$0xff] }
 0xa91   : > { %3876 = vmatpush.msra.mxu3 %v8006_v6  ;;  %3905 = vmatpush.msra.mxu0 %v8009_v20  ;;  %v5592_v6 = vld [vmem:[%s9383_s28 + $0x30] sm:$0xff]  ;;  %v5597_v20 = vld [vmem:[%s9384_s18 + $0x38] sm:$0xff] }
 0xa92   : > { %3934 = vmatpush.msra.mxu1 %v8012_v7  ;;  %3848 = vmatpush.msra.mxu2 %v8015_v63  ;;  %v9579_v7 = vld [vmem:[#allocation40_spill] sm:$0xff]  ;;  %v5596_v63 = vld [vmem:[%s9384_s18 + $0x30] sm:$0xff] }
 0xa93   : > { %4121 = vperm.xlu1 %5835, %v5580_v37   ;;  %3877 = vmatpush.msra.mxu3 %v8018_v47  ;;  %v4944_v47 = vld [vmem:[%s9581_s0] sm:$0xff] }
 0xa94   : > { %3906 = vmatpush.msra.mxu0 %v8022_v48  ;;  %3935 = vmatpush.msra.mxu1 %v8025_v45  ;;  %v4941_v48 = vld [vmem:[%s9580_s6 + $0x8] sm:$0xff] }
 0xa95   : > { %3849 = vmatpush.msra.mxu2 %v8029_v40  ;;  %3878 = vmatpush.msra.mxu3 %v8032_v26  ;;  %v4945_v45 = vld [vmem:[%s9581_s0 + $0x8] sm:$0xff]  ;;  %v4942_v40 = vld [vmem:[%s9580_s6 + $0x10] sm:$0xff]  ;;  %v4943_v26 = vld [vmem:[%s9580_s6 + $0x18] sm:$0xff] }
 0xa96   : > { %3907 = vmatpush.msra.mxu0 %v8035_v8  ;;  %3936 = vmatpush.msra.mxu1 %v8038_v19  ;;  %v5303_v8 = vld [vmem:[%s6405_s30] sm:$0xff] }
 0xa97   : > { %3850 = vmatpush.msra.mxu2 %v8045_v55  ;;  %3879 = vmatpush.msra.mxu3 %v8048_v50  ;;  %v5311_v55 = vld [vmem:[%s6410_s27] sm:$0xff] }
 0xa98   : > { %3908 = vmatpush.msra.mxu0 %v8051_v58  ;;  %3937 = vmatpush.msra.mxu1 %v8054_v32  ;;  %v9582_v58 = vld [vmem:[#allocation55_spill] sm:$0xff] }
 0xa99   : > { %3851 = vmatpush.msra.mxu2 %v8057_v17  ;;  %3880 = vmatpush.msra.mxu3 %v8060_v49  ;;  %v9583_v17 = vld [vmem:[#allocation47_spill] sm:$0xff] }
 0xa9a   : > { %3909 = vmatpush.msra.mxu0 %v8064_v36  ;;  %3938 = vmatpush.msra.mxu1 %v8067_v14 }
 0xa9b   : > { %4309 = vperm.xlu1 %5835, %v5593_v23   ;;  %3852 = vmatpush.msra.mxu2 %v8075_v28 }
 0xa9c   : > { %3881 = vmatpush.msra.mxu3 %v8078_v44  ;;  %3910 = vmatpush.msra.mxu0 %v8081_v31 }
 0xa9d   : > { %3939 = vmatpush.msra.mxu1 %v8084_v33  ;;  %3853 = vmatpush.msra.mxu2 %v8093_v4 }
 0xa9e   : > { %3882 = vmatpush.msra.mxu3 %v8096_v9  ;;  %3911 = vmatpush.msra.mxu0 %v8099_v11 }
 0xa9f   : > { %3940 = vmatpush.msra.mxu1 %v8102_v57  ;;  %3854 = vmatpush.msra.mxu2 %v8105_v18  ;;  %v3530_v18 = vpop.permute.xlu0 %3529 }
 0xaa0   : > { %3883 = vmatpush.msra.mxu3 %v8109_v39  ;;  %3912 = vmatpush.msra.mxu0 %v8112_v22 }
 0xaa1   : > { %3941 = vmatpush.msra.mxu1 %v8116_v34  ;;  %3855 = vmatpush.msra.mxu2 %v8119_v15 }
 0xaa2   : > { %3884 = vmatpush.msra.mxu3 %v8122_v0  ;;  %3913 = vmatpush.msra.mxu0 %v8125_v3 }
 0xaa3   : > { %4304 = vperm.xlu1 %5835, %v5592_v6   ;;  %3942 = vmatpush.msra.mxu1 %v8132_v24 }
 0xaa4   : > { %3856 = vmatpush.msra.mxu2 %v8135_v62  ;;  %3885 = vmatpush.msra.mxu3 %v8138_v53 }
 0xaa5   : > { %3914 = vmatpush.msra.mxu0 %v8141_v10  ;;  %3943 = vmatpush.msra.mxu1 %v8144_v16 }
 0xaa6   : > { %3857 = vmatpush.msra.mxu2 %v8147_v56  ;;  %3886 = vmatpush.msra.mxu3 %v8150_v52 }
 0xaa7   : > { %3915 = vmatpush.msra.mxu0 %v8153_v54  ;;  %3944 = vmatpush.msra.mxu1 %v8156_v1  ;;  %v3540_v54 = vpop.permute.xlu0 %3539 }
 0xaa8   : > { %3858 = vmatpush.msra.mxu2 %v8159_v5  ;;  %3887 = vmatpush.msra.mxu3 %v8162_v42 }
 0xaa9   : > { %3916 = vmatpush.msra.mxu0 %v8165_v25  ;;  %3945 = vmatpush.msra.mxu1 %v8168_v43 }
 0xaaa   : > { %3859 = vmatpush.msra.mxu2 %v8171_v51  ;;  %3888 = vmatpush.msra.mxu3 %v8174_v59 }
 0xaab   : > { %4337 = vperm.xlu1 %5835, %v5597_v20   ;;  %3917 = vmatpush.msra.mxu0 %v8177_v46 }
 0xaac   : > { %3946 = vmatpush.msra.mxu1 %v8180_v30  ;;  %3860 = vmatpush.msra.mxu2 %v8183_v29 }
 0xaad   : > { %3889 = vmatpush.msra.mxu3 %v8186_v41  ;;  %3918 = vmatpush.msra.mxu0 %v8189_v13  ;;  %v5613_v13 = vld [vmem:[%s9385_s16 + $0x78] sm:$0xff] }
 0xaae   : > { %3947 = vmatpush.msra.mxu1 %v8192_v2  ;;  %3861 = vmatpush.msra.mxu2 %v8195_v21  ;;  %v5595_v21 = vld [vmem:[%s9384_s18 + $0x28] sm:$0xff] }
 0xaaf   : > { %3890 = vmatpush.msra.mxu3 %v9579_v7  ;;  %3919 = vmatpush.msra.mxu0 %v8201_v60  ;;  %v5611_v60 = vld [vmem:[%s9385_s16 + $0x68] sm:$0xff] }
 0xab0   : > { %3948 = vmatpush.msra.mxu1 %v8204_v27  ;;  %3862 = vmatpush.msra.mxu2 %v8207_v35  ;;  %v5608_v27 = vld [vmem:[%s9385_s16 + $0x50] sm:$0xff]  ;;  %v5650_v35 = vld [vmem:[%s9386_s26 + $0x20] sm:$0xff] }
 0xab1   : > { %3891 = vmatpush.msra.mxu3 %v8210_v38  ;;  %3920 = vmatpush.msra.mxu0 %v8213_v12  ;;  %v5653_v38 = vld [vmem:[%s9386_s26 + $0x38] sm:$0xff]  ;;  %v3525_v12 = vpop.permute.xlu2 %3524 }
 0xab2   : > { %3949 = vmatpush.msra.mxu1 %v8217_v61  ;;  %v4940_v61 = vld [vmem:[%s9580_s6] sm:$0xff] }
 0xab3   : > { %4332 = vperm.xlu1 %5835, %v5596_v63  }
 0xab9   : > { %v3535_v24 = vpop.permute.xlu2 %3534 }
 0xabb   : > { %4327 = vperm.xlu1 %5835, %v5595_v21  }
 0xac3   : > { %4403 = vperm.xlu1 %5835, %v5613_v13  }
 0xacb   : > { %4393 = vperm.xlu1 %5835, %v5611_v60  }
 0xad3   : > { %4378 = vperm.xlu1 %5835, %v5608_v27  }
 0xadb   : > { %4844 = vperm.xlu1 %5835, %v5650_v35  }
 0xae3   : > { %4859 = vperm.xlu1 %5835, %v5653_v38  }
 0xae6   : > { %v8304_v43 = vpop.f32.mrf.mxu0  ;;  %v3700_v51 = vpop.f32.mrf.mxu1 }
 0xaeb   : > { %5025 = vperm.xlu1 %5835, %v4940_v61   ;;  %v3571_v50 = vpop.f32.mrf.mxu2  ;;  %v3600_v36 = vpop.f32.mrf.mxu3 }
 0xaec   : > { %v3572_v28 = vadd.f32 %v3571_v50, %v3525_v12  ;;  %v3601_v31 = vadd.f32 %v3600_v36, %v3525_v12 }
 0xaed   : > { %v3714_v2 = vpop.xlane.xlu1 %3713 }
 0xaee   : > { %5688 = vpush %v3714_v2  ;;  %v8306_v59 = vpop.f32.mrf.mxu0  ;;  %v8308_v46 = vpop.f32.mrf.mxu1 }
 0xaf3   : > { %5053 = vperm.xlu1 %5835, %v4944_v47   ;;  %v3574_v33 = vpop.f32.mrf.mxu2  ;;  %v3603_v9 = vpop.f32.mrf.mxu3 }
 0xaf4   : > { %v3575_v39 = vadd.f32 %v3574_v33, %v3530_v18  ;;  %v3604_v22 = vadd.f32 %v3603_v9, %v3530_v18 }
 0xaf6   : > { %v8310_v30 = vpop.f32.mrf.mxu0  ;;  %v8312_v29 = vpop.f32.mrf.mxu1 }
 0xafb   : > { %5030 = vperm.xlu1 %5835, %v4941_v48   ;;  %v3577_v15 = vpop.f32.mrf.mxu2  ;;  %v3606_v3 = vpop.f32.mrf.mxu3 }
 0xafc   : > { %v3578_v62 = vadd.f32 %v3577_v15, %v3535_v24  ;;  %v3607_v53 = vadd.f32 %v3606_v3, %v3535_v24 }
 0xafe   : > { %v8314_v41 = vpop.f32.mrf.mxu0  ;;  %v8316_v23 = vpop.f32.mrf.mxu1 }
 0xb03   : > { %5058 = vperm.xlu1 %5835, %v4945_v45   ;;  %v3580_v56 = vpop.f32.mrf.mxu2  ;;  %v3609_v52 = vpop.f32.mrf.mxu3 }
 0xb04   : > { %v3581_v1 = vadd.f32 %v3580_v56, %v3540_v54  ;;  %v3610_v5 = vadd.f32 %v3609_v52, %v3540_v54 }
 0xb0b   : > { %5035 = vperm.xlu1 %5835, %v4942_v40  }
 0xb13   : > { %5040 = vperm.xlu1 %5835, %v4943_v26  }
 0xb1b   : > { %5306 = vperm.xlu1 %5835, %v5303_v8  }
 0xb1f   : > { %s5689_s25 = spop %5688 }
 0xb20   : > { %v3716_v19 = vstv %s5689_s25 }
 0xb21   : > { %v3717_v32 = vsub.f32 %v9582_v58, %v3716_v19  ;;  %v3718_v49 = vsub.f32 %v9583_v17, %v3716_v19  ;;  %v8342_v17 = vpop.permute.xlu0 %3634 }
 0xb23   : > { %v3719_v14 = vmul.f32 1.442695, %v3717_v32  ;;  %v3721_v37 = vmul.f32 1.442695, %v3718_v49  ;;  %5314 = vperm.xlu1 %5835, %v5311_v55  }
 0xb25   : > { %5945 = vpow2.f32 %v3719_v14 }
 0xb26   : > { %5947 = vpow2.f32 %v3721_v37 }
 0xb2b   : > { %v5946_v44 = vpop.eup %5945 }
 0xb2c   : > { %v5948_v4 = vpop.eup %5947  ;;  %v3723_v11 = vmul.f32 %v5946_v44, %v3572_v28  ;;  %v3725_v34 = vmul.f32 %v5946_v44, %v3575_v39  ;;  %v3727_v10 = vmul.f32 %v5946_v44, %v3578_v62  ;;  %v3729_v42 = vmul.f32 %v5946_v44, %v3581_v1 }
 0xb2d   : > { %v3724_v57 = vmul.f32 %v5948_v4, %v3601_v31  ;;  %v3726_v0 = vmul.f32 %v5948_v4, %v3604_v22  ;;  %v3728_v16 = vmul.f32 %v5948_v4, %v3607_v53  ;;  %v3730_v25 = vmul.f32 %v5948_v4, %v3610_v5  ;;  %v8349_v31 = vpop.permute.xlu2 %3639  ;;  %v3625_v22 = vpop.permute.xlu0 %3624 }
 0xb2e   : > { %3747 = vmatmul.f32.vlgmr.msrb.gmra.mxu2 %v3723_v11  ;;  %3805 = vmatmul.f32.vlgmr.msrb.gmra.mxu0 %v3723_v11  ;;  %v3701_v3 = vadd.f32 %v3700_v51, %v3625_v22  ;;  %v8364_v5 = vadd.f32 %v8304_v43, %v3625_v22 }
 0xb2f   : > { %3776 = vmatmul.f32.vlgmr.msrb.gmra.mxu3 %v3724_v57  ;;  %3834 = vmatmul.f32.vlgmr.msrb.gmra.mxu1 %v3724_v57 }
 0xb36   : > { %3750 = vmatmul.f32.gmra.mxu2 %v3725_v34  ;;  %3808 = vmatmul.f32.gmra.mxu0 %v3725_v34 }
 0xb37   : > { %3779 = vmatmul.f32.gmra.mxu3 %v3726_v0  ;;  %3837 = vmatmul.f32.gmra.mxu1 %v3726_v0 }
 0xb3e   : > { %3753 = vmatmul.f32.gmra.mxu2 %v3727_v10  ;;  %3811 = vmatmul.f32.gmra.mxu0 %v3727_v10 }
 0xb3f   : > { %3782 = vmatmul.f32.gmra.mxu3 %v3728_v16  ;;  %3840 = vmatmul.f32.gmra.mxu1 %v3728_v16 }
 0xb46   : > { %3756 = vmatmul.f32.gmra.mxu2 %v3729_v42  ;;  %3814 = vmatmul.f32.gmra.mxu0 %v3729_v42  ;;  %v3630_v42 = vpop.permute.xlu2 %3629 }
 0xb47   : > { %3785 = vmatmul.f32.gmra.mxu3 %v3730_v25  ;;  %3843 = vmatmul.f32.gmra.mxu1 %v3730_v25  ;;  %v4084_v25 = vmax.f32 %v3701_v3, 0.0 }
 0xb4e   : > { %3863 = vmatmul.f32.vlgmr.msra.gmra.mxu2 %v5946_v44  ;;  %3921 = vmatmul.f32.vlgmr.msra.gmra.mxu0 %v5946_v44 }
 0xb4f   : > { %3892 = vmatmul.f32.vlgmr.msra.gmra.mxu3 %v5948_v4  ;;  %3950 = vmatmul.f32.vlgmr.msra.gmra.mxu1 %v5948_v4 }
 0xb56   : > { %3866 = vmatmul.f32.gmra.mxu2 %v5946_v44  ;;  %3924 = vmatmul.f32.gmra.mxu0 %v5946_v44 }
 0xb57   : > { %3895 = vmatmul.f32.gmra.mxu3 %v5948_v4  ;;  %3953 = vmatmul.f32.gmra.mxu1 %v5948_v4 }
 0xb5e   : > { %3869 = vmatmul.f32.gmra.mxu2 %v5946_v44  ;;  %3927 = vmatmul.f32.gmra.mxu0 %v5946_v44 }
 0xb5f   : > { %3898 = vmatmul.f32.gmra.mxu3 %v5948_v4  ;;  %3956 = vmatmul.f32.gmra.mxu1 %v5948_v4 }
 0xb66   : > { %3872 = vmatmul.f32.gmra.mxu2 %v5946_v44  ;;  %3930 = vmatmul.f32.gmra.mxu0 %v5946_v44 }
 0xb67   : > { %3901 = vmatmul.f32.gmra.mxu3 %v5948_v4  ;;  %3959 = vmatmul.f32.gmra.mxu1 %v5948_v4 }
 0xbab   : > { %v3806_v6 = vpop.f32.mrf.mxu0 }
 0xbac   : > { %v3835_v20 = vpop.f32.mrf.mxu1 }
 0xbad   : > { %v8318_v7 = vadd.f32 %v3835_v20, %v3806_v6 }
 0xbb1   : > { %v3748_v63 = vpop.f32.mrf.mxu2 }
 0xbb2   : > { %v3777_v21 = vpop.f32.mrf.mxu3 }
 0xbb3   : > { %v8320_v13 = vadd.f32 %v3777_v21, %v3748_v63  ;;  %v3809_v60 = vpop.f32.mrf.mxu0  ;;  %v8369_v63 = vadd.f32 %v8306_v59, %v3630_v42  ;;  %v3704_v21 = vadd.f32 %v8308_v46, %v3630_v42 }
 0xbb4   : > { %v3838_v27 = vpop.f32.mrf.mxu1 }
 0xbb5   : > { %v8322_v35 = vadd.f32 %v3838_v27, %v3809_v60 }
 0xbb9   : > { %v3751_v38 = vpop.f32.mrf.mxu2 }
 0xbba   : > { %v3780_v61 = vpop.f32.mrf.mxu3 }
 0xbbb   : > { %v8324_v2 = vadd.f32 %v3780_v61, %v3751_v38  ;;  %v8326_v47 = vpop.f32.mrf.mxu0 }
 0xbbc   : > { %v8328_v48 = vpop.f32.mrf.mxu1 }
 0xbc1   : > { %v8330_v45 = vpop.f32.mrf.mxu2 }
 0xbc2   : > { %v8332_v40 = vpop.f32.mrf.mxu3 }
 0xbc3   : > { %v8334_v26 = vpop.f32.mrf.mxu0 }
 0xbc4   : > { %v8336_v8 = vpop.f32.mrf.mxu1 }
 0xbc9   : > { %v8338_v19 = vpop.f32.mrf.mxu2 }
 0xbca   : > { %v8340_v55 = vpop.f32.mrf.mxu3 }
 0xbcb   : > { %v3922_v50 = vpop.f32.mrf.mxu0 }
 0xbcc   : > { %v3951_v58 = vpop.f32.mrf.mxu1 }
 0xbcd   : > { %v3952_v32 = vadd.f32 %v3951_v58, %v3922_v50 }
 0xbcf   : > { %5949 = vrcp.f32 %v3952_v32  ;;  %v3989_v18 = vand.u32 2147483648, %v3952_v32  ;;  %v3987_v0 = vand.u32 2147483647, %v3952_v32  ;;  %vm3983_vm12 = vweird.f32 %v3952_v32 }
 0xbd1   : > { %v3864_v49 = vpop.f32.mrf.mxu2  ;;  %v3990_v1 = vor.u32 1.1754944e-38, %v3989_v18  ;;  %vm3988_vm8 = vcmp.eq.f32.partialorder %v3987_v0, 8.507059e+37 }
 0xbd2   : > { %v3893_v36 = vpop.f32.mrf.mxu3 }
 0xbd3   : > { %v8344_v14 = vadd.f32 %v3893_v36, %v3864_v49  ;;  %v3925_v37 = vpop.f32.mrf.mxu0 }
 0xbd4   : > { %v3954_v12 = vpop.f32.mrf.mxu1 }
 0xbd5   : > { %v5950_v28 = vpop.eup %5949  ;;  %5951 = vrcp.f32 %v8344_v14  ;;  %v8347_v44 = vadd.f32 %v3954_v12, %v3925_v37  ;;  %v3974_v43 = vand.u32 2147483648, %v8344_v14  ;;  %vm3968_vm15 = vweird.f32 %v8344_v14 }
 0xbd6   : > { %v3979_v33 = vmul.f32 %v5950_v28, %v3952_v32  ;;  %vm3984_vm14 = vweird.f32 %v5950_v28 }
 0xbd7   : > { %5953 = vrcp.f32 %v8347_v44  ;;  %vm3985_vm10 = vmor %vm3983_vm12, %vm3984_vm14  ;;  %v4017_v50 = vand.u32 2147483647, %v8347_v44  ;;  %v4019_v58 = vand.u32 2147483648, %v8347_v44  ;;  %vm4013_vm1 = vweird.f32 %v8347_v44 }
 0xbd8   : > { %v3980_v4 = vsub.f32 1.0, %v3979_v33 }
 0xbd9   : > { %v3867_v9 = vpop.f32.mrf.mxu2  ;;  %v4020_v22 = vor.u32 1.1754944e-38, %v4019_v58  ;;  %vm4018_vm6 = vcmp.eq.f32.partialorder %v4017_v50, 8.507059e+37  ;;  %v3707_v58 = vadd.f32 %v8312_v29, %v8342_v17 }
 0xbda   : > { %v3981_v11 = vmul.f32 %v5950_v28, %v3980_v4  ;;  %v3896_v57 = vpop.f32.mrf.mxu3  ;;  %v3972_v4 = vand.u32 2147483647, %v8344_v14 }
 0xbdb   : > { %v8352_v39 = vpop.eup %5951  ;;  %v8354_v34 = vadd.f32 %v3896_v57, %v3867_v9  ;;  %v3928_v15 = vpop.f32.mrf.mxu0  ;;  %v3975_v9 = vor.u32 1.1754944e-38, %v3974_v43 }
 0xbdc   : > { %v3964_v24 = vmul.f32 %v8352_v39, %v8344_v14  ;;  %v3957_v62 = vpop.f32.mrf.mxu1  ;;  %v3982_v53 = vadd.f32 %v5950_v28, %v3981_v11  ;;  %vm3969_vm11 = vweird.f32 %v8352_v39  ;;  %vm3973_vm0 = vcmp.eq.f32.partialorder %v3972_v4, 8.507059e+37 }
 0xbdd   : > { %v5954_v10 = vpop.eup %5953  ;;  %5955 = vrcp.f32 %v8354_v34  ;;  %v8359_v16 = vadd.f32 %v3957_v62, %v3928_v15  ;;  %vm8399_vm2 = vmor %vm3968_vm15, %vm3969_vm11  ;;  %v4004_v15 = vand.u32 2147483648, %v8354_v34  ;;  %v4086_v62 = vmax.f32 %v3704_v21, 0.0 }
 0xbde   : > { %v3965_v56 = vsub.f32 1.0, %v3964_v24  ;;  %v4009_v52 = vmul.f32 %v5954_v10, %v8347_v44  ;;  %v3986_v54 = vsel %vm3985_vm10, %v5950_v28, %v3982_v53  ;;  %vm4014_vm3 = vweird.f32 %v5954_v10 }
 0xbdf   : > { %5957 = vrcp.f32 %v8359_v16  ;;  %v3991_v20 = vsel %vm3988_vm8, %v3990_v1, %v3986_v54  ;;  %vm4015_vm5 = vmor %vm4013_vm1, %vm4014_vm3  ;;  %vm3998_vm9 = vweird.f32 %v8354_v34  ;;  %v4049_v21 = vand.u32 2147483648, %v8359_v16 }
 0xbe0   : > { %v3966_v51 = vmul.f32 %v8352_v39, %v3965_v56  ;;  %v4010_v6 = vsub.f32 1.0, %v4009_v52  ;;  %v3992_v27 = vmul.f32 %v3991_v20, %v8318_v7  ;;  %vm4043_vm10 = vweird.f32 %v8359_v16 }
 0xbe1   : > { %v3870_v60 = vpop.f32.mrf.mxu2  ;;  %v4050_v4 = vor.u32 1.1754944e-38, %v4049_v21  ;;  %v3784_v20 = vadd.f32 %v8332_v40, %v8330_v45  ;;  %v3787_v21 = vadd.f32 %v8340_v55, %v8338_v19  ;;  %v5574_v40 = vld [vmem:[%s9411_s2 + $0x20] sm:$0xff]  ;;  %v5575_v55 = vld [vmem:[%s9411_s2 + $0x28] sm:$0xff] }
 0xbe2   : > { %v4011_v38 = vmul.f32 %v5954_v10, %v4010_v6  ;;  %v3899_v61 = vpop.f32.mrf.mxu3  ;;  %v8380_v36 = vmul.f32 %v4084_v25, %v3992_v27  ;;  %v3967_v46 = vadd.f32 %v8352_v39, %v3966_v51  ;;  %v4083_v25 = vmax.f32 %v8364_v5, 0.0 }
 0xbe3   : > { %v8376_v32 = vpop.eup %5955  ;;  %v8378_v49 = vadd.f32 %v3899_v61, %v3870_v60  ;;  %v3931_v59 = vpop.f32.mrf.mxu0  ;;  %v8420_v51 = vadd.f32 %v8316_v23, %v8349_v31  ;;  %v4005_v5 = vor.u32 1.1754944e-38, %v4004_v15 }
 0xbe4   : > { %v3994_v7 = vmul.f32 %v8376_v32, %v8354_v34  ;;  %v3960_v37 = vpop.f32.mrf.mxu1  ;;  %v4012_v12 = vadd.f32 %v5954_v10, %v4011_v38  ;;  %v3971_v14 = vsel %vm8399_vm2, %v8352_v39, %v3967_v46  ;;  %vm3999_vm7 = vweird.f32 %v8376_v32 }
 0xbe5   : > { %v8388_v28 = vpop.eup %5957  ;;  %5959 = vrcp.f32 %v8378_v49  ;;  %v8391_v33 = vadd.f32 %v3960_v37, %v3931_v59  ;;  %v4002_v39 = vand.u32 2147483647, %v8354_v34  ;;  %v3976_v1 = vsel %vm3973_vm0, %v3975_v9, %v3971_v14  ;;  %vm8428_vm13 = vmor %vm3998_vm9, %vm3999_vm7 }
 0xbe6   : > { %v3995_v11 = vsub.f32 1.0, %v3994_v7  ;;  %v4039_v57 = vmul.f32 %v8388_v28, %v8359_v16  ;;  %v4016_v18 = vsel %vm4015_vm5, %v5954_v10, %v4012_v12  ;;  %vm4044_vm14 = vweird.f32 %v8388_v28 }
 0xbe7   : > { %5961 = vrcp.f32 %v8391_v33  ;;  %v4021_v24 = vsel %vm4018_vm6, %v4020_v22, %v4016_v18  ;;  %v3977_v43 = vmul.f32 %v3976_v1, %v8320_v13  ;;  %v4085_v38 = vmax.f32 %v8369_v63, 0.0  ;;  %vm8450_vm8 = vmor %vm4043_vm10, %vm4044_vm14  ;;  %v9602_v13 = vld [vmem:[#allocation49_spill] sm:$0xff] }
 0xbe8   : > { %v3996_v0 = vmul.f32 %v8376_v32, %v3995_v11  ;;  %v4040_v3 = vsub.f32 1.0, %v4039_v57  ;;  %v4022_v10 = vmul.f32 %v4021_v24, %v8322_v35  ;;  %vm4003_vm12 = vcmp.eq.f32.partialorder %v4002_v39, 8.507059e+37 }
 0xbe9   : > { %v3873_v53 = vpop.f32.mrf.mxu2  ;;  %v4090_v46 = vmax.f32 %v8420_v51, 0.0  ;;  %v4079_v12 = vand.u32 2147483648, %v8391_v33  ;;  %v4077_v11 = vand.u32 2147483647, %v8391_v33  ;;  %v3842_v22 = vadd.f32 %v8328_v48, %v8326_v47 }
 0xbea   : > { %v4041_v56 = vmul.f32 %v8388_v28, %v4040_v3  ;;  %v3902_v52 = vpop.f32.mrf.mxu3  ;;  %v3997_v54 = vadd.f32 %v8376_v32, %v3996_v0  ;;  %v8424_v6 = vmul.f32 %v4086_v62, %v4022_v10  ;;  %vm4073_vm11 = vweird.f32 %v8391_v33 }
 0xbeb   : > { %v8415_v42 = vpop.eup %5959  ;;  %v8422_v35 = vadd.f32 %v3902_v52, %v3873_v53  ;;  %v3845_v14 = vadd.f32 %v8336_v8, %v8334_v26  ;;  %v4080_v0 = vor.u32 1.1754944e-38, %v4079_v12  ;;  %vm4028_vm2 = vweird.f32 %v8378_v49  ;;  %v9604_v12 = vld [vmem:[#allocation51_spill] sm:$0xff]  ;;  %v9610_v26 = vld [vmem:[#allocation46_spill] sm:$0xff] }
 0xbec   : > { %v4024_v34 = vmul.f32 %v8415_v42, %v8378_v49  ;;  %v4001_v23 = vsel %vm8428_vm13, %v8376_v32, %v3997_v54  ;;  %v4042_v27 = vadd.f32 %v8388_v28, %v4041_v56  ;;  %v4047_v32 = vand.u32 2147483647, %v8359_v16 }
 0xbed   : > { %v5962_v60 = vpop.eup %5961  ;;  %5963 = vrcp.f32 %v8422_v35  ;;  %v4006_v59 = vsel %vm4003_vm12, %v4005_v5, %v4001_v23  ;;  %v8459_v16 = vmul.f32 %v4083_v25, %v3977_v43  ;;  %vm4029_vm15 = vweird.f32 %v8415_v42 }
 0xbee   : > { %v4025_v61 = vsub.f32 1.0, %v4024_v34  ;;  %v4069_v50 = vmul.f32 %v5962_v60, %v8391_v33  ;;  %v4007_v63 = vmul.f32 %v4006_v59, %v8324_v2  ;;  %v4046_v29 = vsel %vm8450_vm8, %v8388_v28, %v4042_v27  ;;  %vm8477_vm7 = vmor %vm4028_vm2, %vm4029_vm15  ;;  %v9600_v59 = vld [vmem:[#allocation56_spill] sm:$0xff] }
 0xbef   : > { %vm4074_vm3 = vweird.f32 %v5962_v60  ;;  %vm4048_vm1 = vcmp.eq.f32.partialorder %v4047_v32, 8.507059e+37  ;;  %v4034_v47 = vand.u32 2147483648, %v8378_v49  ;;  %vm4078_vm6 = vcmp.eq.f32.partialorder %v4077_v11, 8.507059e+37 }
 0xbf0   : > { %v4026_v7 = vmul.f32 %v8415_v42, %v4025_v61  ;;  %v4070_v37 = vsub.f32 1.0, %v4069_v50  ;;  %v4093_v57 = vmul.f32 %v4085_v38, %v4007_v63  ;;  %v4051_v44 = vsel %vm4048_vm1, %v4050_v4, %v4046_v29  ;;  %vm4075_vm5 = vmor %vm4073_vm11, %vm4074_vm3  ;;  %v4112_v38 = vpop.permute.xlu2 %4111 }
 0xbf1   : > { %v4032_v3 = vand.u32 2147483647, %v8378_v49  ;;  %v4062_v24 = vand.u32 2147483647, %v8422_v35  ;;  %v4064_v62 = vand.u32 2147483648, %v8422_v35  ;;  %v4052_v10 = vmul.f32 %v4051_v44, %v3842_v22 }
 0xbf2   : > { %v4071_v9 = vmul.f32 %v5962_v60, %v4070_v37  ;;  %v4027_v15 = vadd.f32 %v8415_v42, %v4026_v7  ;;  %v4088_v49 = vmax.f32 %v3707_v58, 0.0  ;;  %v3681_v54 = vadd.f32 %v8314_v41, %v8349_v31  ;;  %v4117_v58 = vpop.permute.xlu0 %4116 }
 0xbf3   : > { %v5964_v18 = vpop.eup %5963  ;;  %v4035_v39 = vor.u32 1.1754944e-38, %v4034_v47  ;;  %vm4058_vm0 = vweird.f32 %v8422_v35  ;;  %vm4033_vm13 = vcmp.eq.f32.partialorder %v4032_v3, 8.507059e+37  ;;  %v3678_v51 = vadd.f32 %v8310_v30, %v8342_v17  ;;  %v9608_v47 = vld [vmem:[#allocation54_spill] sm:$0xff] }
 0xbf4   : > { %v4054_v2 = vmul.f32 %v5964_v18, %v8422_v35  ;;  %v4072_v28 = vadd.f32 %v5962_v60, %v4071_v9  ;;  %vm4059_vm9 = vweird.f32 %v5964_v18  ;;  %v4031_v52 = vsel %vm8477_vm7, %v8415_v42, %v4027_v15 }
 0xbf5   : > { %vm4060_vm14 = vmor %vm4058_vm0, %vm4059_vm9  ;;  %v4065_v34 = vor.u32 1.1754944e-38, %v4064_v62  ;;  %v4036_v42 = vsel %vm4033_vm13, %v4035_v39, %v4031_v52  ;;  %v4096_v41 = vmul.f32 %v4088_v49, %v4052_v10  ;;  %vm4063_vm12 = vcmp.eq.f32.partialorder %v4062_v24, 8.507059e+37 }
 0xbf6   : > { %v4055_v48 = vsub.f32 1.0, %v4054_v2  ;;  %v4076_v33 = vsel %vm4075_vm5, %v5962_v60, %v4072_v28  ;;  %v4089_v23 = vmax.f32 %v3681_v54, 0.0  ;;  %v4037_v30 = vmul.f32 %v4036_v42, %v3784_v20  ;;  %v5576_v60 = vld [vmem:[%s9411_s2 + $0x30] sm:$0xff]  ;;  %v9606_v28 = vld [vmem:[#allocation42_spill] sm:$0xff]  ;;  %v9614_v20 = vld [vmem:[#allocation53_spill] sm:$0xff] }
 0xbf7   : > { %v4081_v53 = vsel %vm4078_vm6, %v4080_v0, %v4076_v33  ;;  %v4087_v17 = vmax.f32 %v3678_v51, 0.0  ;;  %vm9592_vm10 = vcmask 261120  }
 0xbf8   : > { %v4056_v8 = vmul.f32 %v5964_v18, %v4055_v48  ;;  %v4082_v56 = vmul.f32 %v4081_v53, %v3845_v14  ;;  %vm9593_vm8 = vmmov %vm9592_vm10  ;;  %v4127_v10 = vpop.permute.xlu2 %4126 }
 0xbf9   : > { %v4095_v19 = vmul.f32 %v4087_v17, %v4037_v30  ;;  %vm9594_vm3 = vmmov %vm9593_vm8 }
 0xbfa   : > { %v4098_v1 = vmul.f32 %v4090_v46, %v4082_v56  ;;  %v4057_v25 = vadd.f32 %v5964_v18, %v4056_v8  ;;  %vm9595_vm11 = vmmov %vm9594_vm3 }
 0xbfb   : > { %vm9596_vm1 = vmmov %vm9594_vm3 }
 0xbfc   : > { %4182 = vmatpush.msrb.mxu3 %v4098_v1  ;;  %v4061_v31 = vsel %vm4060_vm14, %v5964_v18, %v4057_v25  ;;  %vm9597_vm15 = vmmov %vm9596_vm1  ;;  %v4122_v18 = vpop.permute.xlu1 %4121  ;;  %v9612_v25 = vld [vmem:[#allocation50_spill] sm:$0xff] }
 0xbfd   : > { %v4066_v35 = vsel %vm4063_vm12, %v4065_v34, %v4061_v31  ;;  %vm9598_vm5 = vmmov %vm9596_vm1 }
 0xbfe   : > { %4183 = vmatpush.msrb.mxu3 %v4096_v41  ;;  %v4067_v5 = vmul.f32 %v4066_v35, %v3787_v21  ;;  %vm9599_vm2 = vmmov %vm9596_vm1 }
 0xbff   : > { %vm9616_vm0 = vmmov %vm9596_vm1 }
 0xc00   : > { %4184 = vmatpush.msrb.mxu3 %v8424_v6  ;;  %v4097_v45 = vmul.f32 %v4089_v23, %v4067_v5  ;;  %v5577_v6 = vld [vmem:[%s9411_s2 + $0x38] sm:$0xff]  ;;  %vm9617_vm13 = vmmov %vm9616_vm0 }
 0xc01   : > { %vm9618_vm14 = vmmov %vm9616_vm0 }
 0xc02   : > { %4153 = vmatpush.msrb.mxu2 %v4097_v45  ;;  %4185 = vmatpush.msrb.mxu3 %v8380_v36  ;;  %v5591_v45 = vld [vmem:[%s9383_s28 + $0x28] sm:$0xff]  ;;  %vm9619_vm12 = vmmov %vm9616_vm0 }
 0xc03   : > { %5586 = vmatmul.msk.f32.vlgmr.msrb.gmra.mxu3 %vm9592_vm10, %v5574_v40  ;;  %vm9620_vm10 = vmmov %vm9616_vm0 }
 0xc04   : > { %4154 = vmatpush.msrb.mxu2 %v4095_v19  ;;  %v5594_v19 = vld [vmem:[%s9384_s18 + $0x20] sm:$0xff] }
 0xc06   : > { %4155 = vmatpush.msrb.mxu2 %v4093_v57 }
 0xc08   : > { %4156 = vmatpush.msrb.mxu2 %v8459_v16 }
 0xc09   : > { %5582 = vmatmul.msk.f32.vlgmr.msrb.gmra.mxu2 %vm9593_vm8, %v5574_v40  ;;  %v5590_v40 = vld [vmem:[%s9383_s28 + $0x20] sm:$0xff]  ;;  %vm9621_vm8 = vmmov %vm9616_vm0 }
 0xc0b   : > { %5587 = vmatmul.msk.f32.gmra.mxu3 %vm9594_vm3, %v5575_v55  ;;  %vm9622_vm3 = vmmov %vm9616_vm0 }
 0xc11   : > { %5583 = vmatmul.msk.f32.gmra.mxu2 %vm9595_vm11, %v5575_v55  ;;  %v5610_v55 = vld [vmem:[%s9385_s16 + $0x60] sm:$0xff]  ;;  %vm9623_vm11 = vmmov %vm9616_vm0 }
 0xc13   : > { %5588 = vmatmul.msk.f32.gmra.mxu3 %vm9596_vm1, %v5576_v60  ;;  %vm9624_vm1 = vmmov %vm9616_vm0 }
 0xc19   : > { %5584 = vmatmul.msk.f32.gmra.mxu2 %vm9597_vm15, %v5576_v60  ;;  %v5612_v60 = vld [vmem:[%s9385_s16 + $0x70] sm:$0xff]  ;;  %vm9625_vm15 = vmmov %vm9616_vm0 }
 0xc1b   : > { %5589 = vmatmul.msk.f32.gmra.mxu3 %vm9598_vm5, %v5577_v6  ;;  %vm9626_vm5 = vmmov %vm9616_vm0 }
 0xc21   : > { %5585 = vmatmul.msk.f32.gmra.mxu2 %vm9599_vm2, %v5577_v6  ;;  %v5607_v6 = vld [vmem:[%s9385_s16 + $0x48] sm:$0xff]  ;;  %vm9627_vm2 = vmmov %vm9616_vm0 }
 0xc86   : > { %v4187_v36 = vpop.f32.mrf.mxu3 }
 0xc87   : > { %v4188_v50 = vadd.f32 %v4187_v36, %v4112_v38  ;;  %v5609_v36 = vld [vmem:[%s9385_s16 + $0x58] sm:$0xff] }
 0xc89   : > { %v8512_v63 = vadd.f32 %v4188_v50, %v9602_v13 }
 0xc8b   : > { %9603 = vst [vmem:[#allocation45_spill] sm:$0xff] %v8512_v63  ;;  %v4235_v9 = vmul.f32 %v8512_v63, %v8512_v63 }
 0xc8c   : > { %v4158_v27 = vpop.f32.mrf.mxu2 }
 0xc8d   : > { %v4159_v61 = vadd.f32 %v4158_v27, %v4112_v38  ;;  %v5651_v27 = vld [vmem:[%s9386_s26 + $0x28] sm:$0xff]  ;;  %v5652_v38 = vld [vmem:[%s9386_s26 + $0x30] sm:$0xff] }
 0xc8e   : > { %v4190_v43 = vpop.f32.mrf.mxu3 }
 0xc8f   : > { %v8509_v46 = vadd.f32 %v4159_v61, %v9600_v59  ;;  %v4191_v16 = vadd.f32 %v4190_v43, %v4117_v58  ;;  %v5606_v43 = vld [vmem:[%s9385_s16 + $0x40] sm:$0xff] }
 0xc91   : > { %9601 = vst [vmem:[#allocation48_spill] sm:$0xff] %v8509_v46  ;;  %v4234_v4 = vmul.f32 %v8509_v46, %v8509_v46  ;;  %v4217_v11 = vadd.f32 %v8512_v63, %v8509_v46  ;;  %v8526_v44 = vadd.f32 %v4191_v16, %v9606_v28 }
 0xc93   : > { %v4242_v2 = vadd.f32 %v4235_v9, %v4234_v4  ;;  %9607 = vst [vmem:[#allocation52_spill] sm:$0xff] %v8526_v44  ;;  %v4237_v24 = vmul.f32 %v8526_v44, %v8526_v44 }
 0xc94   : > { %v4161_v32 = vpop.f32.mrf.mxu2 }
 0xc95   : > { %v4162_v7 = vadd.f32 %v4161_v32, %v4117_v58 }
 0xc96   : > { %v4193_v37 = vpop.f32.mrf.mxu3 }
 0xc97   : > { %v8515_v29 = vadd.f32 %v4162_v7, %v9604_v12  ;;  %v4194_v0 = vadd.f32 %v4193_v37, %v4122_v18 }
 0xc99   : > { %9605 = vst [vmem:[#allocation39_spill] sm:$0xff] %v8515_v29  ;;  %v4236_v57 = vmul.f32 %v8515_v29, %v8515_v29  ;;  %v4218_v15 = vadd.f32 %v4217_v11, %v8515_v29  ;;  %v8538_v8 = vadd.f32 %v4194_v0, %v9610_v26 }
 0xc9b   : > { %v4243_v33 = vadd.f32 %v4242_v2, %v4236_v57  ;;  %v4219_v62 = vadd.f32 %v4218_v15, %v8526_v44  ;;  %9611 = vst [vmem:[#allocation35_spill] sm:$0xff] %v8538_v8  ;;  %v4239_v21 = vmul.f32 %v8538_v8, %v8538_v8 }
 0xc9c   : > { %v4164_v22 = vpop.f32.mrf.mxu2 }
 0xc9d   : > { %v4165_v14 = vadd.f32 %v4164_v22, %v4122_v18  ;;  %v4244_v49 = vadd.f32 %v4243_v33, %v4237_v24  ;;  %v4310_v33 = vpop.permute.xlu1 %4309 }
 0xc9e   : > { %v4196_v3 = vpop.f32.mrf.mxu3 }
 0xc9f   : > { %v8530_v48 = vadd.f32 %v4165_v14, %v9608_v47  ;;  %v4197_v56 = vadd.f32 %v4196_v3, %v4127_v10 }
 0xca1   : > { %9609 = vst [vmem:[#allocation44_spill] sm:$0xff] %v8530_v48  ;;  %v4238_v53 = vmul.f32 %v8530_v48, %v8530_v48  ;;  %v4220_v52 = vadd.f32 %v4219_v62, %v8530_v48  ;;  %v8542_v51 = vadd.f32 %v4197_v56, %v9612_v25 }
 0xca3   : > { %v4245_v1 = vadd.f32 %v4244_v49, %v4238_v53  ;;  %9613 = vst [vmem:[#allocation43_spill] sm:$0xff] %v8542_v51  ;;  %v4221_v42 = vadd.f32 %v4220_v52, %v8538_v8  ;;  %v4241_v5 = vmul.f32 %v8542_v51, %v8542_v51 }
 0xca4   : > { %v4167_v54 = vpop.f32.mrf.mxu2 }
 0xca5   : > { %v4168_v39 = vadd.f32 %v4167_v54, %v4127_v10  ;;  %v4246_v35 = vadd.f32 %v4245_v1, %v4239_v21  ;;  %v4305_v3 = vpop.permute.xlu1 %4304 }
 0xca7   : > { %v8545_v34 = vadd.f32 %v4168_v39, %v9614_v20 }
 0xca9   : > { %9615 = vst [vmem:[#allocation41_spill] sm:$0xff] %v8545_v34  ;;  %v4222_v41 = vadd.f32 %v4221_v42, %v8545_v34  ;;  %v4240_v31 = vmul.f32 %v8545_v34, %v8545_v34 }
 0xcab   : > { %v4223_v23 = vadd.f32 %v4222_v41, %v8542_v51  ;;  %v4247_v30 = vadd.f32 %v4246_v35, %v4240_v31 }
 0xcad   : > { %4224 = vadd.xlane.f32.xlu0 %v4223_v23  ;;  %v4248_v17 = vadd.f32 %v4247_v30, %v4241_v5  ;;  %v4338_v24 = vpop.permute.xlu1 %4337 }
 0xcaf   : > { %4249 = vadd.xlane.f32.xlu2 %v4248_v17 }
 0xcb5   : > { %v4333_v53 = vpop.permute.xlu1 %4332 }
 0xcc1   : > { %4299 = vperm.xlu0 %5837, %v5591_v45  }
 0xcc7   : > { %4294 = vperm.xlu2 %5836, %v5590_v40  }
 0xcc9   : > { %4322 = vperm.xlu0 %5837, %v5594_v19  }
 0xccf   : > { %4388 = vperm.xlu2 %5836, %v5610_v55  }
 0xcd1   : > { %4398 = vperm.xlu0 %5837, %v5612_v60  }
 0xcd7   : > { %4373 = vperm.xlu2 %5836, %v5607_v6  }
 0xcd9   : > { %4383 = vperm.xlu0 %5837, %v5609_v36  }
 0xcdf   : > { %4849 = vperm.xlu2 %5836, %v5651_v27  }
 0xce1   : > { %4368 = vperm.xlu0 %5837, %v5606_v43  }
 0xce9   : > { %4854 = vperm.xlu0 %5837, %v5652_v38  }
 0xd20   : > { %v4225_v61 = vpop.xlane.xlu0 %4224 }
 0xd21   : > { %v4226_v50 = vrot.slane %v4225_v61, 4 }
 0xd22   : > { %v4250_v58 = vpop.xlane.xlu2 %4249 }
 0xd23   : > { %v4227_v32 = vadd.f32 %v4226_v50, %v4225_v61  ;;  %v4251_v59 = vrot.slane %v4250_v58, 4 }
 0xd25   : > { %v4228_v7 = vrot.slane %v4227_v32, 2  ;;  %v4252_v37 = vadd.f32 %v4251_v59, %v4250_v58  ;;  %v4328_v58 = vpop.permute.xlu1 %4327 }
 0xd27   : > { %v4253_v13 = vrot.slane %v4252_v37, 2  ;;  %v4229_v12 = vadd.f32 %v4228_v7, %v4227_v32 }
 0xd29   : > { %v4230_v4 = vrot.slane %v4229_v12, 1  ;;  %v4254_v16 = vadd.f32 %v4253_v13, %v4252_v37 }
 0xd2a   : > { %v4295_v55 = vpop.permute.xlu2 %4294 }
 0xd2b   : > { %v4231_v9 = vadd.f32 %v4230_v4, %v4229_v12  ;;  %v4255_v11 = vrot.slane %v4254_v16, 1  ;;  %v5598_v12 = vld [vmem:[%s9428_s9 + $0x40] sm:$0xff]  ;;  %v5599_v4 = vld [vmem:[%s9428_s9 + $0x48] sm:$0xff] }
 0xd2d   : > { %5690 = vpush %v4231_v9  ;;  %v4256_v57 = vadd.f32 %v4255_v11, %v4254_v16  ;;  %v5600_v16 = vld [vmem:[%s9428_s9 + $0x50] sm:$0xff]  ;;  %v5601_v9 = vld [vmem:[%s9428_s9 + $0x58] sm:$0xff]  ;;  %v5602_v11 = vld [vmem:[%s9428_s9 + $0x60] sm:$0xff] }
 0xd2f   : > { %5692 = vpush %v4256_v57  ;;  %v5603_v57 = vld [vmem:[%s9428_s9 + $0x68] sm:$0xff] }
 0xd33   : > { %v4300_v54 = vpop.permute.xlu0 %4299 }
 0xd3b   : > { %v4323_v7 = vpop.permute.xlu0 %4322 }
 0xd5e   : > { %s5691_s11 = spop %5690 }
 0xd5f   : > { %s4233_s1 = smul.f32 0.00012207031, %s5691_s11 }
 0xd60   : > { %s5693_s5 = spop %5692 }
 0xd61   : > { %s4259_s8 = smul.f32 %s4233_s1, %s4233_s1  ;;  %v4261_v62 = vstv %s4233_s1 }
 0xd62   : > { %s4258_s25 = smul.f32 0.00012207031, %s5693_s5  ;;  %v4268_v10 = vsub.f32 %v8545_v34, %v4261_v62  ;;  %v4269_v26 = vsub.f32 %v8542_v51, %v4261_v62  ;;  %v4266_v56 = vsub.f32 %v8530_v48, %v4261_v62  ;;  %v4267_v52 = vsub.f32 %v8538_v8, %v4261_v62 }
 0xd63   : > { %v4264_v49 = vsub.f32 %v8515_v29, %v4261_v62  ;;  %v4265_v1 = vsub.f32 %v8526_v44, %v4261_v62  ;;  %v4262_v25 = vsub.f32 %v8509_v46, %v4261_v62  ;;  %v4263_v20 = vsub.f32 %v8512_v63, %v4261_v62 }
 0xd64   : > { %s4260_s2 = ssub.f32 %s4258_s25, %s4259_s8 }
 0xd66   : > { %s4270_s4 = sadd.f32 1e-05, %s4260_s2 }
 0xd68   : > { %v4271_v18 = vstv %s4270_s4 }
 0xd69   : > { %5965 = vrsqrt.f32 %v4271_v18  ;;  %vm4278_vm7 = vweird.f32 %v4271_v18 }
 0xd6f   : > { %v5966_v22 = vpop.eup %5965 }
 0xd70   : > { %v4273_v2 = vmul.f32 %v5966_v22, %v4271_v18  ;;  %vm4279_vm6 = vweird.f32 %v5966_v22  ;;  %v5604_v18 = vld [vmem:[%s9428_s9 + $0x70] sm:$0xff] }
 0xd71   : > { %vm4280_vm9 = vmor %vm4278_vm7, %vm4279_vm6 }
 0xd72   : > { %v4274_v28 = vmul.f32 %v5966_v22, %v4273_v2  ;;  %vm9628_vm6 = vmmov %vm9616_vm0  ;;  %v8598_v2 = vpop.permute.xlu0 %4398 }
 0xd73   : > { %vm9629_vm7 = vmmov %vm9616_vm0 }
 0xd74   : > { %v4275_v15 = vmul.f32 0.5, %v4274_v28 }
 0xd76   : > { %v4276_v14 = vsub.f32 1.5, %v4275_v15 }
 0xd78   : > { %v4277_v0 = vmul.f32 %v5966_v22, %v4276_v14  ;;  %v8600_v14 = vpop.permute.xlu1 %4403 }
 0xd7a   : > { %v4281_v47 = vsel %vm4280_vm9, %v5966_v22, %v4277_v0  ;;  %v5605_v22 = vld [vmem:[%s9428_s9 + $0x78] sm:$0xff]  ;;  %vm9630_vm9 = vmmov %vm9616_vm0  ;;  %v4384_v0 = vpop.permute.xlu0 %4383 }
 0xd7b   : > { %5694 = vpush %v4281_v47 }
 0xd82   : > { %v4369_v62 = vpop.permute.xlu0 %4368 }
 0xdac   : > { %s5695_s4 = spop %5694 }
 0xdad   : > { %v4283_v39 = vstv %s5695_s4 }
 0xdae   : > { %v4290_v42 = vmul.f32 %v4283_v39, %v4268_v10  ;;  %v4291_v21 = vmul.f32 %v4283_v39, %v4269_v26  ;;  %v4288_v41 = vmul.f32 %v4283_v39, %v4266_v56  ;;  %v4289_v31 = vmul.f32 %v4283_v39, %v4267_v52 }
 0xdaf   : > { %v4286_v35 = vmul.f32 %v4283_v39, %v4264_v49  ;;  %v4287_v23 = vmul.f32 %v4283_v39, %v4265_v1  ;;  %v4284_v5 = vmul.f32 %v4283_v39, %v4262_v25  ;;  %v4285_v30 = vmul.f32 %v4283_v39, %v4263_v20 }
 0xdb0   : > { %v4318_v17 = vmul.f32 %v4310_v33, %v4290_v42  ;;  %v4319_v45 = vmul.f32 %v4310_v33, %v4291_v21  ;;  %v4316_v40 = vmul.f32 %v4305_v3, %v4288_v41  ;;  %v4317_v19 = vmul.f32 %v4305_v3, %v4289_v31  ;;  %v4389_v3 = vpop.permute.xlu2 %4388 }
 0xdb1   : > { %v4314_v36 = vmul.f32 %v4300_v54, %v4286_v35  ;;  %v4315_v27 = vmul.f32 %v4300_v54, %v4287_v23  ;;  %v4312_v43 = vmul.f32 %v4295_v55, %v4284_v5  ;;  %v4313_v50 = vmul.f32 %v4295_v55, %v4285_v30 }
 0xdb2   : > { %v4346_v60 = vadd.f32 %v4338_v24, %v4318_v17  ;;  %v4347_v6 = vadd.f32 %v4338_v24, %v4319_v45  ;;  %v4344_v38 = vadd.f32 %v4333_v53, %v4316_v40  ;;  %v4345_v61 = vadd.f32 %v4333_v53, %v4317_v19  ;;  %v8602_v24 = vpop.permute.xlu1 %4393 }
 0xdb3   : > { %v4342_v32 = vadd.f32 %v4328_v58, %v4314_v36  ;;  %v4343_v59 = vadd.f32 %v4328_v58, %v4315_v27  ;;  %v4340_v37 = vadd.f32 %v4323_v7, %v4312_v43  ;;  %v4341_v13 = vadd.f32 %v4323_v7, %v4313_v50 }
 0xdb4   : > { %4442 = vmatpush.msrb.mxu0 %v4346_v60  ;;  %4483 = vmatpush.msrb.mxu1 %v4347_v6 }
 0xdb6   : > { %4443 = vmatpush.msrb.mxu0 %v4344_v38  ;;  %4484 = vmatpush.msrb.mxu1 %v4345_v61 }
 0xdb8   : > { %4444 = vmatpush.msrb.mxu0 %v4342_v32  ;;  %4485 = vmatpush.msrb.mxu1 %v4343_v59  ;;  %v4374_v52 = vpop.permute.xlu2 %4373 }
 0xdba   : > { %4445 = vmatpush.msrb.mxu0 %v4340_v37  ;;  %4486 = vmatpush.msrb.mxu1 %v4341_v13  ;;  %v4379_v20 = vpop.permute.xlu1 %4378 }
 0xdbb   : > { %5614 = vmatmul.msk.f32.vlgmr.msrb.gmra.mxu0 %vm9616_vm0, %v5598_v12  ;;  %5622 = vmatmul.msk.f32.vlgmr.msrb.gmra.mxu1 %vm9617_vm13, %v5598_v12 }
 0xdc3   : > { %5615 = vmatmul.msk.f32.gmra.mxu0 %vm9618_vm14, %v5599_v4  ;;  %5623 = vmatmul.msk.f32.gmra.mxu1 %vm9619_vm12, %v5599_v4 }
 0xdcb   : > { %5616 = vmatmul.msk.f32.gmra.mxu0 %vm9620_vm10, %v5600_v16  ;;  %5624 = vmatmul.msk.f32.gmra.mxu1 %vm9621_vm8, %v5600_v16 }
 0xdd3   : > { %5617 = vmatmul.msk.f32.gmra.mxu0 %vm9622_vm3, %v5601_v9  ;;  %5625 = vmatmul.msk.f32.gmra.mxu1 %vm9623_vm11, %v5601_v9 }
 0xddb   : > { %5618 = vmatmul.msk.f32.gmra.mxu0 %vm9624_vm1, %v5602_v11  ;;  %5626 = vmatmul.msk.f32.gmra.mxu1 %vm9625_vm15, %v5602_v11 }
 0xde3   : > { %5619 = vmatmul.msk.f32.gmra.mxu0 %vm9626_vm5, %v5603_v57  ;;  %5627 = vmatmul.msk.f32.gmra.mxu1 %vm9627_vm2, %v5603_v57 }
 0xdeb   : > { %5620 = vmatmul.msk.f32.gmra.mxu0 %vm9628_vm6, %v5604_v18  ;;  %5628 = vmatmul.msk.f32.gmra.mxu1 %vm9629_vm7, %v5604_v18 }
 0xdf3   : > { %5621 = vmatmul.msk.f32.gmra.mxu0 %vm9630_vm9, %v5605_v22  ;;  %5629 = vmatmul.msk.f32.gmra.mxu1 %vm9616_vm0, %v5605_v22 }
 0xe38   : > { %v4447_v28 = vpop.f32.mrf.mxu0  ;;  %v4488_v15 = vpop.f32.mrf.mxu1 }
 0xe39   : > { %v8604_v26 = vadd.f32 %v4447_v28, %v4369_v62  ;;  %v8606_v56 = vadd.f32 %v4488_v15, %v4369_v62 }
 0xe3b   : > { %9631 = vst [vmem:[#allocation36_spill] sm:$0xff] %v8604_v26  ;;  %v5630_v49 = vmul.f32 -1.442695, %v8604_v26  ;;  %v5631_v39 = vmul.f32 -1.442695, %v8606_v56 }
 0xe3c   : > { %9632 = vst [vmem:[#allocation37_spill] sm:$0xff] %v8606_v56 }
 0xe3d   : > { %5967 = vpow2.f32 %v5630_v49 }
 0xe3e   : > { %5969 = vpow2.f32 %v5631_v39 }
 0xe40   : > { %v4450_v47 = vpop.f32.mrf.mxu0  ;;  %v4491_v33 = vpop.f32.mrf.mxu1 }
 0xe41   : > { %v8609_v54 = vadd.f32 %v4450_v47, %v4374_v52  ;;  %v8615_v41 = vadd.f32 %v4491_v33, %v4374_v52 }
 0xe43   : > { %9633 = vst [vmem:[#allocation38_spill] sm:$0xff] %v8609_v54  ;;  %v5632_v42 = vmul.f32 -1.442695, %v8609_v54  ;;  %v5968_v35 = vpop.eup %5967  ;;  %v5633_v23 = vmul.f32 -1.442695, %v8615_v41 }
 0xe44   : > { %9635 = vst [vmem:[#allocation30_spill] sm:$0xff] %v8615_v41  ;;  %v5970_v45 = vpop.eup %5969  ;;  %v8623_v19 = vadd.f32 1.0, %v5968_v35 }
 0xe45   : > { %5971 = vpow2.f32 %v5632_v42  ;;  %v8628_v36 = vadd.f32 1.0, %v5970_v45 }
 0xe48   : > { %v4453_v53 = vpop.f32.mrf.mxu0  ;;  %v4494_v10 = vpop.f32.mrf.mxu1 }
 0xe49   : > { %v8613_v21 = vadd.f32 %v4453_v53, %v4379_v20  ;;  %v8621_v40 = vadd.f32 %v4494_v10, %v4379_v20  ;;  %v4587_v10 = vand.u32 2147483648, %v8623_v19 }
 0xe4b   : > { %9634 = vst [vmem:[#allocation29_spill] sm:$0xff] %v8613_v21  ;;  %v5634_v31 = vmul.f32 -1.442695, %v8613_v21  ;;  %v5972_v55 = vpop.eup %5971  ;;  %v5635_v43 = vmul.f32 -1.442695, %v8621_v40 }
 0xe4c   : > { %9637 = vst [vmem:[#allocation32_spill] sm:$0xff] %v8621_v40  ;;  %v8634_v38 = vadd.f32 1.0, %v5972_v55  ;;  %v8689_v55 = vor.u32 1.1754944e-38, %v4587_v10 }
 0xe4d   : > { %5973 = vpow2.f32 %v5634_v31 }
 0xe4e   : > { %5975 = vpow2.f32 %v5633_v23  ;;  %9642 = vst [vmem:[#allocation47_spill] sm:$0xff] %v8689_v55  ;;  %vm4611_vm13 = vweird.f32 %v8634_v38 }
 0xe4f   : > { %5977 = vrcp.f32 %v8623_v19 }
 0xe50   : > { %v4456_v1 = vpop.f32.mrf.mxu0  ;;  %v4497_v25 = vpop.f32.mrf.mxu1 }
 0xe51   : > { %v8619_v5 = vadd.f32 %v4456_v1, %v4384_v0  ;;  %v8630_v27 = vadd.f32 %v4497_v25, %v4384_v0 }
 0xe53   : > { %9636 = vst [vmem:[#allocation31_spill] sm:$0xff] %v8619_v5  ;;  %v5636_v60 = vmul.f32 -1.442695, %v8619_v5  ;;  %v5974_v50 = vpop.eup %5973  ;;  %v5637_v58 = vmul.f32 -1.442695, %v8630_v27 }
 0xe54   : > { %9638 = vst [vmem:[#allocation34_spill] sm:$0xff] %v8630_v27  ;;  %v5976_v59 = vpop.eup %5975  ;;  %v8645_v12 = vadd.f32 1.0, %v5974_v50 }
 0xe55   : > { %5979 = vpow2.f32 %v5636_v60  ;;  %v8647_v4 = vpop.eup %5977  ;;  %v8649_v16 = vadd.f32 1.0, %v5976_v59  ;;  %v4617_v60 = vand.u32 2147483648, %v8634_v38 }
 0xe56   : > { %5981 = vrcp.f32 %v8628_v36  ;;  %v4577_v15 = vmul.f32 %v8647_v4, %v8623_v19  ;;  %vm4641_vm12 = vweird.f32 %v8645_v12 }
 0xe57   : > { %5983 = vpow2.f32 %v5635_v43 }
 0xe58   : > { %v4459_v30 = vpop.f32.mrf.mxu0  ;;  %v4500_v17 = vpop.f32.mrf.mxu1  ;;  %5985 = vrcp.f32 %v8634_v38  ;;  %v4578_v39 = vsub.f32 1.0, %v4577_v15 }
 0xe59   : > { %v8626_v6 = vadd.f32 %v4459_v30, %v4389_v3  ;;  %v8639_v7 = vadd.f32 %v4500_v17, %v4389_v3 }
 0xe5b   : > { %v5638_v61 = vmul.f32 -1.442695, %v8626_v6  ;;  %9639 = vst [vmem:[#allocation33_spill] sm:$0xff] %v8639_v7  ;;  %v5980_v9 = vpop.eup %5979  ;;  %v5639_v11 = vmul.f32 -1.442695, %v8639_v7 }
 0xe5c   : > { %v8652_v57 = vpop.eup %5981  ;;  %v8661_v0 = vadd.f32 1.0, %v5980_v9 }
 0xe5d   : > { %5987 = vpow2.f32 %v5638_v61  ;;  %v5984_v22 = vpop.eup %5983  ;;  %v4592_v62 = vmul.f32 %v8652_v57, %v8628_v36 }
 0xe5e   : > { %5989 = vpow2.f32 %v5637_v58  ;;  %v8656_v28 = vpop.eup %5985  ;;  %v8665_v53 = vadd.f32 1.0, %v5984_v22  ;;  %v4579_v58 = vmul.f32 %v8647_v4, %v4578_v39  ;;  %vm4671_vm3 = vweird.f32 %v8661_v0 }
 0xe5f   : > { %5991 = vrcp.f32 %v8645_v12  ;;  %9640 = vst [vmem:[#allocation40_spill] sm:$0xff] %v8656_v28  ;;  %v4607_v42 = vmul.f32 %v8656_v28, %v8634_v38  ;;  %v4593_v23 = vsub.f32 1.0, %v4592_v62  ;;  %vm4612_vm14 = vweird.f32 %v8656_v28 }
 0xe60   : > { %v4462_v32 = vpop.f32.mrf.mxu0  ;;  %v4503_v37 = vpop.f32.mrf.mxu1  ;;  %5993 = vrcp.f32 %v8649_v16  ;;  %v8723_v39 = vadd.f32 %v8647_v4, %v4579_v58  ;;  %v4647_v58 = vand.u32 2147483648, %v8645_v12  ;;  %vm8775_vm8 = vmor %vm4611_vm13, %vm4612_vm14 }
 0xe61   : > { %v8643_v13 = vadd.f32 %v4462_v32, %v8602_v24  ;;  %5995 = vpow2.f32 %v5639_v11  ;;  %v8669_v52 = vadd.f32 %v4503_v37, %v8602_v24  ;;  %v4608_v9 = vsub.f32 1.0, %v4607_v42 }
 0xe62   : > { %v4594_v22 = vmul.f32 %v8652_v57, %v4593_v23  ;;  %9645 = vst [vmem:[#allocation51_spill] sm:$0xff] %v8723_v39 }
 0xe63   : > { %v5640_v18 = vmul.f32 -1.442695, %v8643_v13  ;;  %v5988_v33 = vpop.eup %5987  ;;  %9641 = vst [vmem:[#allocation55_spill] sm:$0xff] %v8669_v52  ;;  %v5641_v43 = vmul.f32 -1.442695, %v8669_v52 }
 0xe64   : > { %v5990_v3 = vpop.eup %5989  ;;  %v8672_v1 = vadd.f32 1.0, %v5988_v33  ;;  %v8714_v33 = vor.u32 1.1754944e-38, %v4617_v60  ;;  %v8734_v30 = vadd.f32 %v8652_v57, %v4594_v22 }
 0xe65   : > { %5997 = vpow2.f32 %v5640_v18  ;;  %v8674_v25 = vpop.eup %5991  ;;  %v8679_v31 = vadd.f32 1.0, %v5990_v3 }
 0xe66   : > { %5999 = vrcp.f32 %v8661_v0  ;;  %v8684_v24 = vpop.eup %5993  ;;  %v4637_v59 = vmul.f32 %v8674_v25, %v8645_v12  ;;  %9644 = vst [vmem:[#allocation49_spill] sm:$0xff] %v8714_v33  ;;  %vm4642_vm10 = vweird.f32 %v8674_v25  ;;  %v4707_v41 = vand.u32 2147483648, %v8672_v1 }
 0xe67   : > { %6001 = vrcp.f32 %v8665_v53  ;;  %v5996_v45 = vpop.eup %5995  ;;  %v4622_v3 = vmul.f32 %v8684_v24, %v8649_v16  ;;  %9646 = vst [vmem:[#allocation42_spill] sm:$0xff] %v8734_v30  ;;  %vm8799_vm11 = vmor %vm4641_vm12, %vm4642_vm10  ;;  %vm4701_vm15 = vweird.f32 %v8672_v1 }
 0xe68   : > { %v4465_v47 = vpop.f32.mrf.mxu0  ;;  %v4506_v49 = vpop.f32.mrf.mxu1  ;;  %6003 = vrcp.f32 %v8672_v1  ;;  %v8708_v15 = vadd.f32 1.0, %v5996_v45  ;;  %v4638_v23 = vsub.f32 1.0, %v4637_v59  ;;  %v4609_v45 = vmul.f32 %v8656_v28, %v4608_v9 }
 0xe69   : > { %v8682_v35 = vadd.f32 %v4465_v47, %v8598_v2  ;;  %v8694_v61 = vadd.f32 %v4506_v49, %v8598_v2  ;;  %6005 = vrcp.f32 %v8679_v31  ;;  %v4623_v9 = vsub.f32 1.0, %v4622_v3 }
 0xe6a   : > { %6007 = vpow2.f32 %v5641_v43  ;;  %v4639_v62 = vmul.f32 %v8674_v25, %v4638_v23  ;;  %v8750_v20 = vadd.f32 %v8656_v28, %v4609_v45  ;;  %v8844_v8 = vor.u32 1.1754944e-38, %v4707_v41 }
 0xe6b   : > { %9643 = vst [vmem:[#allocation56_spill] sm:$0xff] %v8694_v61  ;;  %v5998_v50 = vpop.eup %5997  ;;  %v5642_v18 = vmul.f32 -1.442695, %v8682_v35  ;;  %v5643_v10 = vmul.f32 -1.442695, %v8694_v61  ;;  %v8765_v45 = vmul.f32 %v8684_v24, %v4623_v9  ;;  %v4677_v9 = vand.u32 2147483648, %v8661_v0 }
 0xe6c   : > { %v8702_v11 = vadd.f32 1.0, %v5998_v50  ;;  %v8705_v2 = vpop.eup %5999  ;;  %9647 = vst [vmem:[#allocation54_spill] sm:$0xff] %v8750_v20  ;;  %v8780_v23 = vadd.f32 %v8674_v25, %v4639_v62 }
 0xe6d   : > { %v8720_v49 = vpop.eup %6001  ;;  %v4667_v60 = vmul.f32 %v8705_v2, %v8661_v0  ;;  %v8815_v56 = vor.u32 1.1754944e-38, %v4677_v9  ;;  %vm4672_vm1 = vweird.f32 %v8705_v2 }
 0xe6e   : > { %6009 = vrcp.f32 %v8702_v11  ;;  %vm8838_vm5 = vmor %vm4671_vm3, %vm4672_vm1  ;;  %vm4731_vm7 = vweird.f32 %v8702_v11 }
 0xe6f   : > { %6011 = vpow2.f32 %v5642_v18  ;;  %v4652_v18 = vmul.f32 %v8720_v49, %v8665_v53  ;;  %v4668_v32 = vsub.f32 1.0, %v4667_v60 }
 0xe70   : > { %v4468_v37 = vpop.f32.mrf.mxu0  ;;  %v4509_v50 = vpop.f32.mrf.mxu1  ;;  %6013 = vrcp.f32 %v8708_v15 }
 0xe71   : > { %v8711_v47 = vadd.f32 %v4468_v37, %v8600_v14  ;;  %v8731_v37 = vpop.eup %6003  ;;  %6015 = vpow2.f32 %v5643_v10  ;;  %v8747_v42 = vadd.f32 %v4509_v50, %v8600_v14  ;;  %v8758_v10 = vor.u32 1.1754944e-38, %v4647_v58 }
 0xe72   : > { %v8739_v59 = vpop.eup %6005  ;;  %v4697_v3 = vmul.f32 %v8731_v37, %v8672_v1  ;;  %v4653_v60 = vsub.f32 1.0, %v4652_v18  ;;  %v9648_v58 = vmov 0  ;;  %v4669_v48 = vmul.f32 %v8705_v2, %v4668_v32 }
 0xe73   : > { %v5644_v43 = vmul.f32 -1.442695, %v8711_v47  ;;  %v6008_v17 = vpop.eup %6007  ;;  %v5645_v14 = vmul.f32 -1.442695, %v8747_v42  ;;  %v9649_v58 = vsel %vm8775_vm8, 4294967295, %v9648_v58  ;;  %vm4702_vm2 = vweird.f32 %v8731_v37 }
 0xe74   : > { %v8754_v51 = vadd.f32 1.0, %v6008_v17  ;;  %v8756_v34 = vpop.eup %6009  ;;  %9650 = vst [vmem:[#allocation46_spill] sm:$0xff] %v9649_v58  ;;  %v4698_v44 = vsub.f32 1.0, %v4697_v3  ;;  %v4654_v32 = vmul.f32 %v8720_v49, %v4653_v60  ;;  %v8819_v60 = vadd.f32 %v8705_v2, %v4669_v48  ;;  %vm8874_vm6 = vmor %vm4701_vm15, %vm4702_vm2 }
 0xe75   : > { %6017 = vpow2.f32 %v5644_v43  ;;  %v4682_v43 = vmul.f32 %v8739_v59, %v8679_v31  ;;  %v6012_v50 = vpop.eup %6011  ;;  %v4727_v63 = vmul.f32 %v8756_v34, %v8702_v11  ;;  %vm4732_vm9 = vweird.f32 %v8756_v34 }
 0xe76   : > { %v8769_v22 = vpop.eup %6013  ;;  %6019 = vrcp.f32 %v8754_v51  ;;  %v8784_v18 = vadd.f32 1.0, %v6012_v50  ;;  %v8830_v27 = vadd.f32 %v8720_v49, %v4654_v32  ;;  %vm8918_vm1 = vmor %vm4731_vm7, %vm4732_vm9  ;;  %vm4746_vm9 = vweird.f32 %v8754_v51 }
 0xe77   : > { %v6016_v17 = vpop.eup %6015  ;;  %6021 = vpow2.f32 %v5645_v14  ;;  %v4683_v62 = vsub.f32 1.0, %v4682_v43  ;;  %v4712_v3 = vmul.f32 %v8769_v22, %v8708_v15  ;;  %v4728_v46 = vsub.f32 1.0, %v4727_v63 }
 0xe78   : > { %6023 = vrcp.f32 %v8784_v18  ;;  %v8806_v14 = vadd.f32 1.0, %v6016_v17  ;;  %v4699_v17 = vmul.f32 %v8731_v37, %v4698_v44  ;;  %9653 = vst [vmem:[#allocation50_spill] sm:$0xff] %v8830_v27  ;;  %v4705_v63 = vand.u32 2147483647, %v8672_v1 }
 0xe79   : > { %v4684_v40 = vmul.f32 %v8739_v59, %v4683_v62  ;;  %v4713_v48 = vsub.f32 1.0, %v4712_v3  ;;  %v4729_v41 = vmul.f32 %v8756_v34, %v4728_v46  ;;  %v4737_v3 = vand.u32 2147483648, %v8702_v11 }
 0xe7a   : > { %6025 = vrcp.f32 %v8806_v14  ;;  %v8852_v9 = vadd.f32 %v8731_v37, %v4699_v17  ;;  %v4765_v52 = vand.u32 2147483647, %v8784_v18  ;;  %v4767_v27 = vand.u32 2147483648, %v8784_v18 }
 0xe7b   : > { %v6018_v29 = vpop.eup %6017  ;;  %v8858_v7 = vadd.f32 %v8739_v59, %v4684_v40  ;;  %v4714_v17 = vmul.f32 %v8769_v22, %v4713_v48  ;;  %v8891_v33 = vadd.f32 %v8756_v34, %v4729_v41  ;;  %v4738_v39 = vor.u32 1.1754944e-38, %v4737_v3 }
 0xe7c   : > { %v8808_v43 = vadd.f32 1.0, %v6018_v29  ;;  %v8824_v29 = vpop.eup %6019  ;;  %vm4761_vm0 = vweird.f32 %v8784_v18  ;;  %vm8898_vm13 = vcmp.eq.f32.partialorder %v4765_v52, 8.507059e+37  ;;  %vm8909_vm10 = vcmp.eq.f32.partialorder %v4705_v63, 8.507059e+37 }
 0xe7d   : > { %v6022_v26 = vpop.eup %6021  ;;  %9656 = vst [vmem:[#allocation53_spill] sm:$0xff] %v8858_v7  ;;  %v4742_v32 = vmul.f32 %v8824_v29, %v8754_v51  ;;  %v8895_v5 = vadd.f32 %v8769_v22, %v4714_v17  ;;  %v4768_v3 = vor.u32 1.1754944e-38, %v4767_v27  ;;  %v4752_v48 = vand.u32 2147483648, %v8754_v51 }
 0xe7e   : > { %6027 = vrcp.f32 %v8808_v43  ;;  %v8834_v44 = vpop.eup %6023  ;;  %v8863_v55 = vadd.f32 1.0, %v6022_v26  ;;  %v4735_v26 = vand.u32 2147483647, %v8702_v11  ;;  %v9722_v7 = vand.u32 2147483647, %v8623_v19 }
 0xe7f   : > { %v4757_v54 = vmul.f32 %v8834_v44, %v8784_v18  ;;  %v4743_v20 = vsub.f32 1.0, %v4742_v32  ;;  %vm4762_vm12 = vweird.f32 %v8834_v44 }
 0xe80   : > { %v8865_v21 = vpop.eup %6025  ;;  %6029 = vrcp.f32 %v8863_v55  ;;  %vm8902_vm14 = vcmp.eq.f32.partialorder %v4735_v26, 8.507059e+37  ;;  %vm8939_vm3 = vmor %vm4761_vm0, %vm4762_vm12  ;;  %vm4791_vm0 = vweird.f32 %v8808_v43 }
 0xe81   : > { %v4758_v30 = vsub.f32 1.0, %v4757_v54  ;;  %v4772_v40 = vmul.f32 %v8865_v21, %v8806_v14  ;;  %v4744_v11 = vmul.f32 %v8824_v29, %v4743_v20  ;;  %vm4777_vm4 = vweird.f32 %v8865_v21 }
 0xe83   : > { %v4759_v1 = vmul.f32 %v8834_v44, %v4758_v30  ;;  %v4773_v28 = vsub.f32 1.0, %v4772_v40  ;;  %v4795_v40 = vand.u32 2147483647, %v8808_v43 }
 0xe84   : > { %v6028_v54 = vpop.eup %6027 }
 0xe85   : > { %v4787_v58 = vmul.f32 %v6028_v54, %v8808_v43  ;;  %v4760_v41 = vadd.f32 %v8834_v44, %v4759_v1  ;;  %v4774_v26 = vmul.f32 %v8865_v21, %v4773_v28  ;;  %v4734_v1 = vsel %vm8918_vm1, %v8756_v34, %v8891_v33 }
 0xe86   : > { %v8925_v63 = vpop.eup %6029  ;;  %vm4792_vm2 = vweird.f32 %v6028_v54  ;;  %v4780_v34 = vand.u32 2147483647, %v8806_v14  ;;  %v4782_v28 = vand.u32 2147483648, %v8806_v14  ;;  %v9669_v33 = vand.u32 2147483647, %v8661_v0 }
 0xe87   : > { %v4788_v32 = vsub.f32 1.0, %v4787_v58  ;;  %v4797_v58 = vand.u32 2147483648, %v8808_v43  ;;  %v4802_v20 = vmul.f32 %v8925_v63, %v8863_v55  ;;  %v4764_v18 = vsel %vm8939_vm3, %v8834_v44, %v4760_v41  ;;  %vm4793_vm15 = vmor %vm4791_vm0, %vm4792_vm2 }
 0xe88   : > { %vm8950_vm7 = vcmp.eq.f32.partialorder %v9669_v33, 8.507059e+37  ;;  %vm8958_vm12 = vcmp.eq.f32.partialorder %v4795_v40, 8.507059e+37  ;;  %v4775_v0 = vadd.f32 %v8865_v21, %v4774_v26  ;;  %v4745_v44 = vadd.f32 %v8824_v29, %v4744_v11 }
 0xe89   : > { %v4789_v61 = vmul.f32 %v6028_v54, %v4788_v32  ;;  %v4798_v33 = vor.u32 1.1754944e-38, %v4797_v58  ;;  %v4803_v27 = vsub.f32 1.0, %v4802_v20  ;;  %v4810_v40 = vand.u32 2147483647, %v8863_v55 }
 0xe8a   : > { %v4812_v26 = vand.u32 2147483648, %v8863_v55  ;;  %v4769_v58 = vsel %vm8898_vm13, %v4768_v3, %v4764_v18  ;;  %vm9680_vm13 = vweird.f32 %v8806_v14  ;;  %vm4626_vm3 = vweird.f32 %v8649_v16 }
 0xe8b   : > { %v4790_v52 = vadd.f32 %v6028_v54, %v4789_v61  ;;  %v9674_v61 = vand.u32 2147483647, %v8645_v12  ;;  %v4804_v20 = vmul.f32 %v8925_v63, %v4803_v27  ;;  %v4739_v3 = vsel %vm8902_vm14, %v4738_v39, %v4734_v1 }
 0xe8c   : > { %vm9683_vm1 = vweird.f32 %v8824_v29  ;;  %v4828_v30 = vmul.f32 %v4769_v58, %v8682_v35  ;;  %v4783_v1 = vor.u32 1.1754944e-38, %v4782_v28  ;;  %vm9687_vm14 = vweird.f32 %v8925_v63 }
 0xe8d   : > { %vm8970_vm8 = vcmp.eq.f32.partialorder %v9674_v61, 8.507059e+37  ;;  %v4794_v41 = vsel %vm4793_vm15, %v6028_v54, %v4790_v52  ;;  %v9677_v54 = vand.u32 2147483647, %v8634_v38  ;;  %v4750_v52 = vand.u32 2147483647, %v8754_v51  ;;  %vm9009_vm0 = vmor %vm4746_vm9, %vm9683_vm1  ;;  %v9706_v61 = vld [vmem:[#allocation51_spill] sm:$0xff] }
 0xe8e   : > { %v4799_v12 = vsel %vm8958_vm12, %v4798_v33, %v4794_v41  ;;  %vm8998_vm12 = vmor %vm9680_vm13, %vm4777_vm4  ;;  %v4805_v18 = vadd.f32 %v8925_v63, %v4804_v20  ;;  %vm4806_vm4 = vweird.f32 %v8863_v55  ;;  %vm4596_vm1 = vweird.f32 %v8628_v36  ;;  %v9705_v33 = vld [vmem:[#allocation56_spill] sm:$0xff] }
 0xe8f   : > { %vm8987_vm15 = vcmp.eq.f32.partialorder %v9677_v54, 8.507059e+37  ;;  %v4830_v38 = vmul.f32 %v4799_v12, %v8711_v47  ;;  %v4779_v14 = vsel %vm8998_vm12, %v8865_v21, %v4775_v0  ;;  %v9686_v47 = vsel %vm8874_vm6, %v8731_v37, %v8852_v9  ;;  %vm4808_vm9 = vmor %vm4806_vm4, %vm9687_vm14  ;;  %v9715_v41 = vld [vmem:[#allocation40_spill] sm:$0xff]  ;;  %v9719_v12 = vld [vmem:[#allocation50_spill] sm:$0xff] }
 0xe90   : > { %v4709_v39 = vsel %vm8909_vm10, %v8844_v8, %v9686_v47  ;;  %v4813_v21 = vor.u32 1.1754944e-38, %v4812_v26  ;;  %v4749_v55 = vsel %vm9009_vm0, %v8824_v29, %v4745_v44  ;;  %vm4781_vm13 = vcmp.eq.f32.partialorder %v4780_v34, 8.507059e+37  ;;  %v9713_v44 = vld [vmem:[#allocation46_spill] sm:$0xff]  ;;  %v9718_v26 = vld [vmem:[#allocation49_spill] sm:$0xff] }
 0xe91   : > { %4882 = vmatpush.msra.mxu2 %v4830_v38  ;;  %v4809_v37 = vsel %vm4808_vm9, %v8925_v63, %v4805_v18  ;;  %vm4811_vm6 = vcmp.eq.f32.partialorder %v4810_v40, 8.507059e+37  ;;  %vm9688_vm10 = vweird.f32 %v8769_v22  ;;  %vm9689_vm12 = vweird.f32 %v8708_v15  ;;  %v9716_v40 = vld [vmem:[#allocation54_spill] sm:$0xff]  ;;  %v9726_v38 = vld [vmem:[#allocation29_spill] sm:$0xff] }
 0xe92   : > { %vm9038_vm2 = vmor %vm9689_vm12, %vm9688_vm10  ;;  %v4826_v35 = vmul.f32 %v4739_v3, %v8643_v13  ;;  %v4753_v9 = vor.u32 1.1754944e-38, %v4752_v48  ;;  %v4784_v46 = vsel %vm4781_vm13, %v4783_v1, %v4779_v14  ;;  %v4814_v17 = vsel %vm4811_vm6, %v4813_v21, %v4809_v37  ;;  %v9728_v14 = vld [vmem:[#allocation47_spill] sm:$0xff]  ;;  %v9734_v21 = vld [vmem:[#allocation38_spill] sm:$0xff] }
 0xe93   : > { %4883 = vmatpush.msra.mxu2 %v4828_v30  ;;  %v9692_v29 = vsel %vm8838_vm5, %v8705_v2, %v8819_v60  ;;  %v4719_v34 = vsel %vm9038_vm2, %v8769_v22, %v8895_v5  ;;  %vm4751_vm0 = vcmp.eq.f32.partialorder %v4750_v52, 8.507059e+37  ;;  %v4831_v13 = vmul.f32 %v4814_v17, %v8747_v42  ;;  %v9721_v52 = vld [vmem:[#allocation55_spill] sm:$0xff]  ;;  %v5646_v2 = vld [vmem:[%s9529_s3 + $0x20] sm:$0xff] }
 0xe94   : > { %v4679_v63 = vsel %vm8950_vm7, %v8815_v56, %v9692_v29  ;;  %v4625_v28 = vadd.f32 %v8684_v24, %v8765_v45  ;;  %vm9693_vm4 = vweird.f32 %v8739_v59  ;;  %vm9694_vm14 = vweird.f32 %v8679_v31  ;;  %v9703_v45 = vld [vmem:[#allocation53_spill] sm:$0xff]  ;;  %v9739_v29 = vld [vmem:[#allocation36_spill] sm:$0xff] }
 0xe95   : > { %vm9062_vm5 = vmor %vm9694_vm14, %vm9693_vm4  ;;  %v4824_v56 = vmul.f32 %v4709_v39, %v8626_v6  ;;  %v9697_v60 = vand.u32 2147483648, %v8708_v15  ;;  %v4754_v5 = vsel %vm4751_vm0, %v4753_v9, %v4749_v55  ;;  %4884 = vmatpush.msra.mxu2 %v4826_v35  ;;  %vm9698_vm7 = vweird.f32 %v8647_v4  ;;  %4911 = vmatpush.msra.mxu3 %v4831_v13  ;;  %v9730_v39 = vld [vmem:[#allocation33_spill] sm:$0xff] }
 0xe96   : > { %vm9699_vm2 = vweird.f32 %v8623_v19  ;;  %v9702_v22 = vsel %vm8799_vm11, %v8674_v25, %v8780_v23  ;;  %v4689_v32 = vsel %vm9062_vm5, %v8739_v59, %v9703_v45  ;;  %v9704_v0 = vand.u32 2147483647, %v8708_v15  ;;  %v9711_v59 = vld [vmem:[#allocation31_spill] sm:$0xff]  ;;  %v9745_v42 = vld [vmem:[#allocation37_spill] sm:$0xff]  ;;  %v5649_v45 = vld [vmem:[%s9529_s3 + $0x38] sm:$0xff] }
 0xe97   : > { %v4723_v62 = vor.u32 1.1754944e-38, %v9697_v60  ;;  %vm9073_vm9 = vmor %vm9699_vm2, %vm9698_vm7  ;;  %v4649_v6 = vsel %vm8970_vm8, %v8758_v10, %v9702_v22  ;;  %v4829_v27 = vmul.f32 %v4784_v46, %v9705_v33  ;;  %vm9707_vm11 = vweird.f32 %v8720_v49  ;;  %4885 = vmatpush.msra.mxu2 %v4824_v56  ;;  %v9738_v46 = vld [vmem:[#allocation34_spill] sm:$0xff] }
 0xe98   : > { %vm4721_vm13 = vcmp.eq.f32.partialorder %v9704_v0, 8.507059e+37  ;;  %v4584_v25 = vsel %vm9073_vm9, %v8647_v4, %v9706_v61  ;;  %vm9708_vm8 = vweird.f32 %v8665_v53  ;;  %v4822_v23 = vmul.f32 %v4679_v63, %v9711_v59  ;;  %v4845_v0 = vpop.permute.xlu1 %4844 }
 0xe99   : > { %vm9100_vm6 = vmor %vm9708_vm8, %vm9707_vm11  ;;  %v9712_v15 = vand.u32 2147483648, %v8679_v31  ;;  %v4724_v43 = vsel %vm4721_vm13, %v4723_v62, %v4719_v34  ;;  %vm9714_vm10 = vnez %v9713_v44  ;;  %v9720_v54 = vand.u32 2147483647, %v8679_v31  ;;  %4912 = vmatpush.msra.mxu3 %v4829_v27  ;;  %v9743_v62 = vld [vmem:[#allocation30_spill] sm:$0xff]  ;;  %v9755_v44 = vld [vmem:[#allocation39_spill] sm:$0xff] }
 0xe9a   : > { %v9717_v4 = vsel %vm9714_vm10, %v9715_v41, %v9716_v40  ;;  %v4659_v20 = vsel %vm9100_vm6, %v8720_v49, %v9719_v12  ;;  %v4827_v48 = vmul.f32 %v4754_v5, %v9721_v52  ;;  %vm4586_vm0 = vcmp.eq.f32.partialorder %v9722_v7, 8.507059e+37  ;;  %4886 = vmatpush.msra.mxu2 %v4822_v23  ;;  %v9753_v23 = vld [vmem:[#allocation48_spill] sm:$0xff]  ;;  %v4855_v12 = vpop.permute.xlu0 %4854 }
 0xe9b   : > { %v4693_v50 = vor.u32 1.1754944e-38, %v9712_v15  ;;  %v4619_v58 = vsel %vm8987_vm15, %v9718_v26, %v9717_v4  ;;  %vm4691_vm12 = vcmp.eq.f32.partialorder %v9720_v54, 8.507059e+37  ;;  %vm9723_vm4 = vweird.f32 %v8684_v24 }
 0xe9c   : > { %vm9128_vm14 = vmor %vm4626_vm3, %vm9723_vm4  ;;  %v4820_v3 = vmul.f32 %v4649_v6, %v9726_v38  ;;  %v9727_v49 = vand.u32 2147483648, %v8665_v53  ;;  %v4589_v18 = vsel %vm4586_vm0, %v9728_v14, %v4584_v25  ;;  %v9729_v47 = vand.u32 2147483647, %v8665_v53  ;;  %4913 = vmatpush.msra.mxu3 %v4827_v48  ;;  %v9736_v53 = vld [vmem:[#allocation42_spill] sm:$0xff]  ;;  %v5648_v6 = vld [vmem:[%s9529_s3 + $0x30] sm:$0xff]  ;;  %v4850_v25 = vpop.permute.xlu2 %4849 }
 0xe9d   : > { %v4694_v51 = vsel %vm4691_vm12, %v4693_v50, %v4689_v32  ;;  %v4629_v19 = vsel %vm9128_vm14, %v8684_v24, %v4625_v28  ;;  %v4825_v30 = vmul.f32 %v4724_v43, %v9730_v39  ;;  %vm9731_vm3 = vweird.f32 %v8652_v57  ;;  %v9754_v50 = vld [vmem:[#allocation45_spill] sm:$0xff]  ;;  %v9756_v38 = vld [vmem:[#allocation52_spill] sm:$0xff] }
 0xe9e   : > { %v4663_v31 = vor.u32 1.1754944e-38, %v9727_v49  ;;  %vm4661_vm15 = vcmp.eq.f32.partialorder %v9729_v47, 8.507059e+37  ;;  %vm9146_vm5 = vmor %vm4596_vm1, %vm9731_vm3  ;;  %v4818_v55 = vmul.f32 %v4619_v58, %v9734_v21  ;;  %v9735_v37 = vand.u32 2147483648, %v8649_v16  ;;  %4887 = vmatpush.msra.mxu2 %v4820_v3  ;;  %v9757_v49 = vld [vmem:[#allocation44_spill] sm:$0xff] }
 0xe9f   : > { %v4599_v35 = vsel %vm9146_vm5, %v8652_v57, %v9736_v53  ;;  %v9737_v9 = vand.u32 2147483647, %v8649_v16  ;;  %v4823_v17 = vmul.f32 %v4694_v51, %v9738_v46  ;;  %4914 = vmatpush.msra.mxu3 %v4825_v30  ;;  %v4816_v63 = vmul.f32 %v4589_v18, %v9739_v29  ;;  %v9742_v57 = vld [vmem:[#allocation32_spill] sm:$0xff] }
 0xea0   : > { %v4633_v24 = vor.u32 1.1754944e-38, %v9735_v37  ;;  %v4664_v8 = vsel %vm4661_vm15, %v4663_v31, %v4659_v20  ;;  %v9740_v34 = vand.u32 2147483648, %v8628_v36  ;;  %4888 = vmatpush.msra.mxu2 %v4818_v55  ;;  %v9741_v56 = vand.u32 2147483647, %v8628_v36  ;;  %v5647_v36 = vld [vmem:[%s9529_s3 + $0x28] sm:$0xff]  ;;  %v4860_v30 = vpop.permute.xlu1 %4859  ;;  %v9758_v55 = vld [vmem:[#allocation35_spill] sm:$0xff] }
 0xea1   : > { %vm4631_vm7 = vcmp.eq.f32.partialorder %v9737_v9, 8.507059e+37  ;;  %v4821_v60 = vmul.f32 %v4664_v8, %v9742_v57  ;;  %4915 = vmatpush.msra.mxu3 %v4823_v17  ;;  %vm9744_vm2 = vcmask 523264   ;;  %vm9761_vm15 = vcmask 261120  }
 0xea2   : > { %v4603_v13 = vor.u32 1.1754944e-38, %v9740_v34  ;;  %v4634_v28 = vsel %vm4631_vm7, %v4633_v24, %v4629_v19  ;;  %vm4601_vm1 = vcmp.eq.f32.partialorder %v9741_v56, 8.507059e+37  ;;  %4889 = vmatpush.msra.mxu2 %v4816_v63  ;;  %vm9746_vm9 = vmmov %vm9744_vm2 }
 0xea3   : > { %v4819_v5 = vmul.f32 %v4634_v28, %v9743_v62  ;;  %4916 = vmatpush.msra.mxu3 %v4821_v60  ;;  %5654 = vmatmul.msk.f32.vlgmr.msra.gmra.mxu2 %vm9744_vm2, %v5646_v2  ;;  %vm9747_vm13 = vmmov %vm9744_vm2 }
 0xea4   : > { %v4604_v16 = vsel %vm4601_vm1, %v4603_v13, %v4599_v35  ;;  %vm9748_vm11 = vmmov %vm9744_vm2  ;;  %v9759_v35 = vld [vmem:[#allocation41_spill] sm:$0xff] }
 0xea5   : > { %v4817_v22 = vmul.f32 %v4604_v16, %v9745_v42  ;;  %4917 = vmatpush.msra.mxu3 %v4819_v5  ;;  %vm9749_vm8 = vmmov %vm9744_vm2  ;;  %v4947_v5 = vld [vmem:[%s9581_s0 + $0x18] sm:$0xff]  ;;  %v4946_v42 = vld [vmem:[%s9581_s0 + $0x10] sm:$0xff] }
 0xea6   : > { %vm9750_vm6 = vmmov %vm9744_vm2 }
 0xea7   : > { %4918 = vmatpush.msra.mxu3 %v4817_v22  ;;  %vm9751_vm10 = vmmov %vm9744_vm2 }
 0xea8   : > { %5658 = vmatmul.msk.f32.vlgmr.msra.gmra.mxu3 %vm9746_vm9, %v5646_v2  ;;  %vm9752_vm12 = vmmov %vm9744_vm2  ;;  %v9760_v2 = vld [vmem:[#allocation43_spill] sm:$0xff] }
 0xea9   : > { %vm9762_vm3 = vmmov %vm9761_vm15 }
 0xeab   : > { %5655 = vmatmul.msk.f32.gmra.mxu2 %vm9747_vm13, %v5647_v36 }
 0xeb0   : > { %5659 = vmatmul.msk.f32.gmra.mxu3 %vm9748_vm11, %v5647_v36 }
 0xeb3   : > { %5656 = vmatmul.msk.f32.gmra.mxu2 %vm9749_vm8, %v5648_v6 }
 0xeb8   : > { %5660 = vmatmul.msk.f32.gmra.mxu3 %vm9750_vm6, %v5648_v6 }
 0xebb   : > { %5657 = vmatmul.msk.f32.gmra.mxu2 %vm9751_vm10, %v5649_v45 }
 0xec0   : > { %5661 = vmatmul.msk.f32.gmra.mxu3 %vm9752_vm12, %v5649_v45 }
 0xf26   : > { %v4891_v32 = vpop.f32.mrf.mxu2 }
 0xf27   : > { %v4892_v27 = vadd.f32 %v4891_v32, %v4845_v0 }
 0xf29   : > { %v9181_v15 = vadd.f32 %v4892_v27, %v9753_v23 }
 0xf2b   : > { %v4920_v33 = vpop.f32.mrf.mxu3  ;;  %v4965_v4 = vmul.f32 %v9181_v15, %v9181_v15 }
 0xf2c   : > { %v4921_v61 = vadd.f32 %v4920_v33, %v4845_v0 }
 0xf2e   : > { %v4894_v10 = vpop.f32.mrf.mxu2  ;;  %v9184_v43 = vadd.f32 %v4921_v61, %v9754_v50 }
 0xf2f   : > { %v4895_v59 = vadd.f32 %v4894_v10, %v4850_v25 }
 0xf30   : > { %v4966_v26 = vmul.f32 %v9184_v43, %v9184_v43  ;;  %v4948_v20 = vadd.f32 %v9184_v43, %v9181_v15 }
 0xf31   : > { %v9187_v41 = vadd.f32 %v4895_v59, %v9755_v44  ;;  %v5110_v44 = vld [vmem:[#allocation4 + $0xf8] sm:$0xff] }
 0xf32   : > { %v4973_v7 = vadd.f32 %v4966_v26, %v4965_v4  ;;  %v5109_v4 = vld [vmem:[#allocation4 + $0xf0] sm:$0xff]  ;;  %5201 = vmatpush.msra.mxu0 %v5110_v44 }
 0xf33   : > { %v4923_v40 = vpop.f32.mrf.mxu3  ;;  %v4967_v54 = vmul.f32 %v9187_v41, %v9187_v41  ;;  %v4949_v11 = vadd.f32 %v4948_v20, %v9187_v41  ;;  %v5141_v26 = vld [vmem:[#allocation4 + $0x1f0] sm:$0xff]  ;;  %5143 = vmatpush.msrb.mxu2 %v5109_v4  ;;  %v5108_v20 = vld [vmem:[#allocation4 + $0xe8] sm:$0xff]  ;;  %v5086_v4 = vld [vmem:[#allocation4 + $0x38] sm:$0xff] }
 0xf34   : > { %v4924_v58 = vadd.f32 %v4923_v40, %v4850_v25  ;;  %v5142_v40 = vld [vmem:[#allocation4 + $0x1f8] sm:$0xff]  ;;  %5172 = vmatpush.msrb.mxu3 %v5141_v26  ;;  %5202 = vmatpush.msra.mxu0 %v5108_v20  ;;  %v5085_v44 = vld [vmem:[#allocation4 + $0x30] sm:$0xff]  ;;  %v5084_v20 = vld [vmem:[#allocation4 + $0x28] sm:$0xff] }
 0xf35   : > { %v4974_v51 = vadd.f32 %v4973_v7, %v4967_v54  ;;  %5230 = vmatpush.msra.mxu1 %v5142_v40  ;;  %v5140_v54 = vld [vmem:[#allocation4 + $0x1e8] sm:$0xff]  ;;  %v5106_v7 = vld [vmem:[#allocation4 + $0xd8] sm:$0xff]  ;;  %v5117_v40 = vld [vmem:[#allocation4 + $0x130] sm:$0xff] }
 0xf36   : > { %v4897_v52 = vpop.f32.mrf.mxu2  ;;  %v9199_v3 = vadd.f32 %v4924_v58, %v9756_v38  ;;  %v5107_v58 = vld [vmem:[#allocation4 + $0xe0] sm:$0xff]  ;;  %v5104_v38 = vld [vmem:[#allocation4 + $0xc8] sm:$0xff]  ;;  %5203 = vmatpush.msra.mxu0 %v5106_v7  ;;  %v5118_v26 = vld [vmem:[#allocation4 + $0x138] sm:$0xff] }
 0xf37   : > { %v4898_v48 = vadd.f32 %v4897_v52, %v4855_v12  ;;  %v5105_v52 = vld [vmem:[#allocation4 + $0xd0] sm:$0xff]  ;;  %5231 = vmatpush.msra.mxu1 %v5140_v54  ;;  %5144 = vmatpush.msrb.mxu2 %v5107_v58  ;;  %v5083_v58 = vld [vmem:[#allocation4 + $0x20] sm:$0xff]  ;;  %v5116_v54 = vld [vmem:[#allocation4 + $0x128] sm:$0xff] }
 0xf38   : > { %v4950_v18 = vadd.f32 %v4949_v11, %v9199_v3  ;;  %v4968_v19 = vmul.f32 %v9199_v3, %v9199_v3  ;;  %v5138_v11 = vld [vmem:[#allocation4 + $0x1d8] sm:$0xff]  ;;  %5204 = vmatpush.msra.mxu0 %v5104_v38  ;;  %v5079_v38 = vld [vmem:[#allocation4] sm:$0xff] }
 0xf39   : > { %v9202_v31 = vadd.f32 %v4898_v48, %v9757_v49  ;;  %v5137_v48 = vld [vmem:[#allocation4 + $0x1d0] sm:$0xff]  ;;  %5232 = vmatpush.msra.mxu1 %v5138_v11  ;;  %v5103_v49 = vld [vmem:[#allocation4 + $0xc0] sm:$0xff]  ;;  %5145 = vmatpush.msrb.mxu2 %v5105_v52  ;;  %v5082_v7 = vld [vmem:[#allocation4 + $0x18] sm:$0xff] }
 0xf3a   : > { %v4975_v1 = vadd.f32 %v4974_v51, %v4968_v19  ;;  %v5135_v51 = vld [vmem:[#allocation4 + $0x1c0] sm:$0xff]  ;;  %v5134_v19 = vld [vmem:[#allocation4 + $0x1b8] sm:$0xff]  ;;  %v5081_v52 = vld [vmem:[#allocation4 + $0x10] sm:$0xff] }
 0xf3b   : > { %v4926_v14 = vpop.f32.mrf.mxu3  ;;  %v4969_v47 = vmul.f32 %v9202_v31, %v9202_v31  ;;  %v4951_v21 = vadd.f32 %v4950_v18, %v9202_v31  ;;  %v5102_v18 = vld [vmem:[#allocation4 + $0xb8] sm:$0xff]  ;;  %5146 = vmatpush.msrb.mxu2 %v5103_v49  ;;  %v5111_v49 = vld [vmem:[#allocation4 + $0x100] sm:$0xff] }
 0xf3c   : > { %v4927_v39 = vadd.f32 %v4926_v14, %v4855_v12  ;;  %v5139_v12 = vld [vmem:[#allocation4 + $0x1e0] sm:$0xff]  ;;  %v5136_v14 = vld [vmem:[#allocation4 + $0x1c8] sm:$0xff]  ;;  %5205 = vmatpush.msra.mxu0 %v5102_v18  ;;  %v5114_v11 = vld [vmem:[#allocation4 + $0x118] sm:$0xff] }
 0xf3d   : > { %v4976_v53 = vadd.f32 %v4975_v1, %v4969_v47  ;;  %5173 = vmatpush.msrb.mxu3 %v5139_v12  ;;  %5233 = vmatpush.msra.mxu1 %v5136_v14  ;;  %v5101_v47 = vld [vmem:[#allocation4 + $0xb0] sm:$0xff]  ;;  %v5132_v1 = vld [vmem:[#allocation4 + $0x1a8] sm:$0xff]  ;;  %v5115_v12 = vld [vmem:[#allocation4 + $0x120] sm:$0xff] }
 0xf3e   : > { %v9211_v37 = vadd.f32 %v4927_v39, %v9758_v55  ;;  %v4900_v24 = vpop.f32.mrf.mxu2  ;;  %v5133_v39 = vld [vmem:[#allocation4 + $0x1b0] sm:$0xff]  ;;  %v5131_v55 = vld [vmem:[#allocation4 + $0x1a0] sm:$0xff]  ;;  %5147 = vmatpush.msrb.mxu2 %v5101_v47  ;;  %v5080_v14 = vld [vmem:[#allocation4 + $0x8] sm:$0xff] }
 0xf3f   : > { %v4901_v8 = vadd.f32 %v4900_v24, %v4860_v30  ;;  %5174 = vmatpush.msrb.mxu3 %v5137_v48  ;;  %5234 = vmatpush.msra.mxu1 %v5134_v19  ;;  %v5098_v24 = vld [vmem:[#allocation4 + $0x98] sm:$0xff]  ;;  %v5113_v48 = vld [vmem:[#allocation4 + $0x110] sm:$0xff]  ;;  %v5112_v18 = vld [vmem:[#allocation4 + $0x108] sm:$0xff] }
 0xf40   : > { %v4970_v46 = vmul.f32 %v9211_v37, %v9211_v37  ;;  %v4952_v17 = vadd.f32 %v4951_v21, %v9211_v37  ;;  %v5099_v21 = vld [vmem:[#allocation4 + $0xa0] sm:$0xff] }
 0xf41   : > { %v9214_v9 = vadd.f32 %v4901_v8, %v9759_v35  ;;  %5175 = vmatpush.msrb.mxu3 %v5135_v51  ;;  %v5130_v8 = vld [vmem:[#allocation4 + $0x198] sm:$0xff]  ;;  %5235 = vmatpush.msra.mxu1 %v5132_v1  ;;  %v5129_v35 = vld [vmem:[#allocation4 + $0x190] sm:$0xff]  ;;  %v5026_v51 = vpop.permute.xlu1 %5025 }
 0xf42   : > { %v4977_v28 = vadd.f32 %v4976_v53, %v4970_v46  ;;  %v5097_v53 = vld [vmem:[#allocation4 + $0x90] sm:$0xff]  ;;  %5148 = vmatpush.msrb.mxu2 %v5099_v21  ;;  %v5096_v46 = vld [vmem:[#allocation4 + $0x88] sm:$0xff] }
 0xf43   : > { %v4971_v29 = vmul.f32 %v9214_v9, %v9214_v9  ;;  %v4929_v63 = vpop.f32.mrf.mxu3  ;;  %v4953_v13 = vadd.f32 %v4952_v17, %v9214_v9  ;;  %5176 = vmatpush.msrb.mxu3 %v5133_v39  ;;  %v5128_v17 = vld [vmem:[#allocation4 + $0x188] sm:$0xff]  ;;  %5236 = vmatpush.msra.mxu1 %v5130_v8 }
 0xf44   : > { %v4930_v34 = vadd.f32 %v4929_v63, %v4860_v30  ;;  %v5100_v30 = vld [vmem:[#allocation4 + $0xa8] sm:$0xff]  ;;  %v5095_v63 = vld [vmem:[#allocation4 + $0x80] sm:$0xff]  ;;  %5149 = vmatpush.msrb.mxu2 %v5097_v53 }
 0xf45   : > { %v4978_v57 = vadd.f32 %v4977_v28, %v4971_v29  ;;  %5206 = vmatpush.msra.mxu0 %v5100_v30  ;;  %5177 = vmatpush.msrb.mxu3 %v5131_v55  ;;  %v5126_v28 = vld [vmem:[#allocation4 + $0x178] sm:$0xff] }
 0xf46   : > { %v9223_v56 = vadd.f32 %v4930_v34, %v9760_v2  ;;  %v5127_v34 = vld [vmem:[#allocation4 + $0x180] sm:$0xff]  ;;  %5237 = vmatpush.msra.mxu1 %v5128_v17  ;;  %v5093_v2 = vld [vmem:[#allocation4 + $0x70] sm:$0xff]  ;;  %5150 = vmatpush.msrb.mxu2 %v5095_v63 }
 0xf47   : > { %5207 = vmatpush.msra.mxu0 %v5098_v24  ;;  %5178 = vmatpush.msrb.mxu3 %v5129_v35 }
 0xf48   : > { %v4954_v60 = vadd.f32 %v4953_v13, %v9223_v56  ;;  %v4972_v16 = vmul.f32 %v9223_v56, %v9223_v56  ;;  %v5094_v13 = vld [vmem:[#allocation4 + $0x78] sm:$0xff]  ;;  %5238 = vmatpush.msra.mxu1 %v5126_v28  ;;  %5151 = vmatpush.msrb.mxu2 %v5093_v2 }
 0xf49   : > { %5208 = vmatpush.msra.mxu0 %v5096_v46  ;;  %5179 = vmatpush.msrb.mxu3 %v5127_v34  ;;  %v5054_v19 = vpop.permute.xlu1 %5053 }
 0xf4a   : > { %4955 = vadd.xlane.f32.xlu2 %v4954_v60  ;;  %v4979_v62 = vadd.f32 %v4978_v57, %v4972_v16  ;;  %v5125_v57 = vld [vmem:[#allocation4 + $0x170] sm:$0xff]  ;;  %v5092_v60 = vld [vmem:[#allocation4 + $0x68] sm:$0xff] }
 0xf4b   : > { %v5124_v16 = vld [vmem:[#allocation4 + $0x168] sm:$0xff]  ;;  %5209 = vmatpush.msra.mxu0 %v5094_v13  ;;  %5180 = vmatpush.msrb.mxu3 %v5125_v57 }
 0xf4c   : > { %4980 = vadd.xlane.f32.xlu0 %v4979_v62  ;;  %v5091_v62 = vld [vmem:[#allocation4 + $0x60] sm:$0xff]  ;;  %5239 = vmatpush.msra.mxu1 %v5124_v16 }
 0xf4d   : > { %5210 = vmatpush.msra.mxu0 %v5092_v60  ;;  %5152 = vmatpush.msrb.mxu2 %v5091_v62 }
 0xf51   : > { %v5031_v47 = vpop.permute.xlu1 %5030 }
 0xf59   : > { %v5059_v17 = vpop.permute.xlu1 %5058 }
 0xf60   : > { %5068 = vperm.xlu0 %5837, %v4947_v5   ;;  %v5123_v5 = vld [vmem:[#allocation4 + $0x160] sm:$0xff] }
 0xf61   : > { %5181 = vmatpush.msrb.mxu3 %v5123_v5 }
 0xf62   : > { %5063 = vperm.xlu2 %5836, %v4946_v42   ;;  %v5090_v42 = vld [vmem:[#allocation4 + $0x58] sm:$0xff] }
 0xf63   : > { %5211 = vmatpush.msra.mxu0 %v5090_v42 }
 0xfbd   : > { %v4956_v22 = vpop.xlane.xlu2 %4955 }
 0xfbe   : > { %v4957_v36 = vrot.slane %v4956_v22, 4 }
 0xfbf   : > { %v4981_v6 = vpop.xlane.xlu0 %4980 }
 0xfc0   : > { %v4958_v45 = vadd.f32 %v4957_v36, %v4956_v22  ;;  %v4982_v32 = vrot.slane %v4981_v6, 4  ;;  %v5122_v22 = vld [vmem:[#allocation4 + $0x158] sm:$0xff]  ;;  %v5089_v36 = vld [vmem:[#allocation4 + $0x50] sm:$0xff] }
 0xfc1   : > { %5240 = vmatpush.msra.mxu1 %v5122_v22  ;;  %5153 = vmatpush.msrb.mxu2 %v5089_v36 }
 0xfc2   : > { %v4959_v0 = vrot.slane %v4958_v45, 2  ;;  %v4983_v33 = vadd.f32 %v4982_v32, %v4981_v6  ;;  %v5121_v6 = vld [vmem:[#allocation4 + $0x150] sm:$0xff]  ;;  %v5088_v32 = vld [vmem:[#allocation4 + $0x48] sm:$0xff] }
 0xfc3   : > { %5182 = vmatpush.msrb.mxu3 %v5121_v6  ;;  %5212 = vmatpush.msra.mxu0 %v5088_v32 }
 0xfc4   : > { %v4984_v27 = vrot.slane %v4983_v33, 2  ;;  %v4960_v61 = vadd.f32 %v4959_v0, %v4958_v45  ;;  %v5120_v0 = vld [vmem:[#allocation4 + $0x148] sm:$0xff] }
 0xfc5   : > { %5241 = vmatpush.msra.mxu1 %v5120_v0  ;;  %5213 = vmatpush.msra.mxu0 %v5086_v4  ;;  %v5064_v36 = vpop.permute.xlu2 %5063 }
 0xfc6   : > { %v4961_v25 = vrot.slane %v4960_v61, 1  ;;  %v4985_v10 = vadd.f32 %v4984_v27, %v4983_v33  ;;  %v5087_v27 = vld [vmem:[#allocation4 + $0x40] sm:$0xff] }
 0xfc7   : > { %5154 = vmatpush.msrb.mxu2 %v5087_v27  ;;  %5242 = vmatpush.msra.mxu1 %v5118_v26 }
 0xfc8   : > { %v4962_v59 = vadd.f32 %v4961_v25, %v4960_v61  ;;  %v4986_v23 = vrot.slane %v4985_v10, 1  ;;  %v5119_v61 = vld [vmem:[#allocation4 + $0x140] sm:$0xff]  ;;  %5214 = vmatpush.msra.mxu0 %v5084_v20 }
 0xfc9   : > { %5183 = vmatpush.msrb.mxu3 %v5119_v61  ;;  %5155 = vmatpush.msrb.mxu2 %v5085_v44 }
 0xfca   : > { %5696 = vpush %v4962_v59  ;;  %v4987_v50 = vadd.f32 %v4986_v23, %v4985_v10  ;;  %5243 = vmatpush.msra.mxu1 %v5116_v54  ;;  %5215 = vmatpush.msra.mxu0 %v5082_v7 }
 0xfcb   : > { %5184 = vmatpush.msrb.mxu3 %v5117_v40  ;;  %5156 = vmatpush.msrb.mxu2 %v5083_v58 }
 0xfcc   : > { %5698 = vpush %v4987_v50  ;;  %5244 = vmatpush.msra.mxu1 %v5114_v11  ;;  %5216 = vmatpush.msra.mxu0 %v5080_v14  ;;  %v5259_v14 = vld [vmem:[%s6400_s12] sm:$0xff] }
 0xfcd   : > { %5185 = vmatpush.msrb.mxu3 %v5115_v12  ;;  %5157 = vmatpush.msrb.mxu2 %v5081_v52 }
 0xfce   : > { %5245 = vmatpush.msra.mxu1 %v5112_v18 }
 0xfcf   : > { %5186 = vmatpush.msrb.mxu3 %v5113_v48  ;;  %5158 = vmatpush.msrb.mxu2 %v5079_v38 }
 0xfd1   : > { %5187 = vmatpush.msrb.mxu3 %v5111_v49 }
 0xfd2   : > { %v5069_v27 = vpop.permute.xlu0 %5068 }
 0xffb   : > { %s5697_s2 = spop %5696 }
 0xffc   : > { %s9230_s11 = smul.f32 0.00012207031, %s5697_s2 }
 0xffd   : > { %s5699_s1 = spop %5698 }
 0xffe   : > { %s4990_s5 = smul.f32 %s9230_s11, %s9230_s11  ;;  %v4992_v39 = vstv %s9230_s11  ;;  %s5666_s11 = sshll.u32 %s9764_s10, 4 }
 0xfff   : > { %s4989_s8 = smul.f32 0.00012207031, %s5699_s1  ;;  %v4993_v30 = vsub.f32 %v9181_v15, %v4992_v39  ;;  %v4994_v1 = vsub.f32 %v9184_v43, %v4992_v39  ;;  %v4995_v35 = vsub.f32 %v9187_v41, %v4992_v39  ;;  %v4996_v46 = vsub.f32 %v9199_v3, %v4992_v39  ;;  %v5036_v3 = vpop.permute.xlu1 %5035  ;;  %s952_s1 = scalar_lea.vmem %s6415_s21, %s5666_s11 }
0x1000   : > { %v4997_v28 = vsub.f32 %v9202_v31, %v4992_v39  ;;  %v4998_v2 = vsub.f32 %v9211_v37, %v4992_v39  ;;  %v4999_v42 = vsub.f32 %v9214_v9, %v4992_v39  ;;  %v5000_v22 = vsub.f32 %v9223_v56, %v4992_v39 }
0x1001   : > { %s4991_s25 = ssub.f32 %s4989_s8, %s4990_s5 }
0x1003   : > { %s5001_s4 = sadd.f32 1e-05, %s4991_s25 }
0x1005   : > { %v5002_v29 = vstv %s5001_s4 }
0x1006   : > { %6031 = vrsqrt.f32 %v5002_v29  ;;  %vm5009_vm4 = vweird.f32 %v5002_v29 }
0x1007   : > { %v5041_v32 = vpop.permute.xlu1 %5040 }
0x100c   : > { %v6032_v45 = vpop.eup %6031 }
0x100d   : > { %v5004_v33 = vmul.f32 %v6032_v45, %v5002_v29  ;;  %vm5010_vm0 = vweird.f32 %v6032_v45 }
0x100e   : > { %vm5011_vm14 = vmor %vm5009_vm4, %vm5010_vm0 }
0x100f   : > { %v5005_v25 = vmul.f32 %v6032_v45, %v5004_v33  ;;  %v5307_v39 = vpop.permute.xlu1 %5306 }
0x1011   : > { %v5006_v10 = vmul.f32 0.5, %v5005_v25 }
0x1013   : > { %v5007_v59 = vsub.f32 1.5, %v5006_v10 }
0x1015   : > { %v5008_v23 = vmul.f32 %v6032_v45, %v5007_v59 }
0x1017   : > { %v5012_v50 = vsel %vm5011_vm14, %v6032_v45, %v5008_v23 }
0x1018   : > { %5700 = vpush %v5012_v50 }
0x1049   : > { %s5701_s2 = spop %5700 }
0x104a   : > { %v5014_v21 = vstv %s5701_s2 }
0x104b   : > { %v5015_v55 = vmul.f32 %v5014_v21, %v4993_v30  ;;  %v5016_v24 = vmul.f32 %v5014_v21, %v4994_v1  ;;  %v5017_v34 = vmul.f32 %v5014_v21, %v4995_v35  ;;  %v5018_v13 = vmul.f32 %v5014_v21, %v4996_v46 }
0x104c   : > { %v5019_v41 = vmul.f32 %v5014_v21, %v4997_v28  ;;  %v5020_v16 = vmul.f32 %v5014_v21, %v4998_v2  ;;  %v5021_v45 = vmul.f32 %v5014_v21, %v4999_v42  ;;  %v5022_v37 = vmul.f32 %v5014_v21, %v5000_v22  ;;  %v5315_v21 = vpop.permute.xlu1 %5314 }
0x104d   : > { %v5043_v8 = vmul.f32 %v5026_v51, %v5015_v55  ;;  %v5044_v53 = vmul.f32 %v5026_v51, %v5016_v24  ;;  %v5045_v15 = vmul.f32 %v5031_v47, %v5017_v34  ;;  %v5046_v43 = vmul.f32 %v5031_v47, %v5018_v13 }
0x104e   : > { %v5047_v62 = vmul.f32 %v5036_v3, %v5019_v41  ;;  %v5048_v5 = vmul.f32 %v5036_v3, %v5020_v16  ;;  %v5049_v0 = vmul.f32 %v5041_v32, %v5021_v45  ;;  %v5050_v33 = vmul.f32 %v5041_v32, %v5022_v37 }
0x104f   : > { %v5071_v29 = vadd.f32 %v5054_v19, %v5043_v8  ;;  %v5072_v63 = vadd.f32 %v5054_v19, %v5044_v53  ;;  %v5073_v57 = vadd.f32 %v5059_v17, %v5045_v15  ;;  %v5074_v60 = vadd.f32 %v5059_v17, %v5046_v43 }
0x1050   : > { %v5075_v6 = vadd.f32 %v5064_v36, %v5047_v62  ;;  %v5076_v31 = vadd.f32 %v5064_v36, %v5048_v5  ;;  %v5077_v61 = vadd.f32 %v5069_v27, %v5049_v0  ;;  %v5078_v25 = vadd.f32 %v5069_v27, %v5050_v33 }
0x1051   : > { %5159 = vmatmul.f32.vlgmr.msrb.gmra.mxu2 %v5071_v29  ;;  %5188 = vmatmul.f32.vlgmr.msrb.gmra.mxu3 %v5072_v63 }
0x1052   : > { %5217 = vmatmul.f32.vlgmr.msra.gmra.mxu0 %v5071_v29  ;;  %5246 = vmatmul.f32.vlgmr.msra.gmra.mxu1 %v5072_v63 }
0x1059   : > { %5162 = vmatmul.f32.gmra.mxu2 %v5073_v57  ;;  %5191 = vmatmul.f32.gmra.mxu3 %v5074_v60 }
0x105a   : > { %5220 = vmatmul.f32.gmra.mxu0 %v5073_v57  ;;  %5249 = vmatmul.f32.gmra.mxu1 %v5074_v60 }
0x1061   : > { %5165 = vmatmul.f32.gmra.mxu2 %v5075_v6  ;;  %5194 = vmatmul.f32.gmra.mxu3 %v5076_v31 }
0x1062   : > { %5223 = vmatmul.f32.gmra.mxu0 %v5075_v6  ;;  %5252 = vmatmul.f32.gmra.mxu1 %v5076_v31 }
0x1069   : > { %5168 = vmatmul.f32.gmra.mxu2 %v5077_v61  ;;  %5197 = vmatmul.f32.gmra.mxu3 %v5078_v25 }
0x106a   : > { %5226 = vmatmul.f32.gmra.mxu0 %v5077_v61  ;;  %5255 = vmatmul.f32.gmra.mxu1 %v5078_v25 }
0x10cf   : > { %v5218_v9 = vpop.f32.mrf.mxu0  ;;  %v5247_v56 = vpop.f32.mrf.mxu1 }
0x10d0   : > { %v5248_v51 = vadd.f32 %v5247_v56, %v5218_v9 }
0x10d4   : > { %v5160_v10 = vpop.f32.mrf.mxu2  ;;  %v5189_v59 = vpop.f32.mrf.mxu3 }
0x10d5   : > { %v5190_v47 = vadd.f32 %v5189_v59, %v5160_v10 }
0x10d7   : > { %v5221_v23 = vpop.f32.mrf.mxu0  ;;  %v5250_v50 = vpop.f32.mrf.mxu1 }
0x10d8   : > { %v5251_v7 = vadd.f32 %v5250_v50, %v5221_v23 }
0x10dc   : > { %v5163_v44 = vpop.f32.mrf.mxu2  ;;  %v5192_v40 = vpop.f32.mrf.mxu3 }
0x10dd   : > { %v5193_v19 = vadd.f32 %v5192_v40, %v5163_v44 }
0x10df   : > { %v5224_v4 = vpop.f32.mrf.mxu0  ;;  %v5253_v26 = vpop.f32.mrf.mxu1 }
0x10e0   : > { %v5254_v48 = vadd.f32 %v5253_v26, %v5224_v4 }
0x10e4   : > { %v5166_v58 = vpop.f32.mrf.mxu2  ;;  %v5195_v12 = vpop.f32.mrf.mxu3 }
0x10e5   : > { %v5196_v18 = vadd.f32 %v5195_v12, %v5166_v58 }
0x10e7   : > { %v5227_v20 = vpop.f32.mrf.mxu0  ;;  %v5256_v54 = vpop.f32.mrf.mxu1 }
0x10e8   : > { %v5257_v52 = vadd.f32 %v5256_v54, %v5227_v20 }
0x10ea   : > { %5295 = vmatpush.msra.mxu3 %v5257_v52 }
0x10ec   : > { %5296 = vmatpush.msra.mxu3 %v5254_v48  ;;  %v5169_v11 = vpop.f32.mrf.mxu2  ;;  %v5198_v38 = vpop.f32.mrf.mxu3 }
0x10ed   : > { %v5199_v49 = vadd.f32 %v5198_v38, %v5169_v11 }
0x10ee   : > { %5297 = vmatpush.msra.mxu3 %v5251_v7 }
0x10ef   : > { %5275 = vmatpush.msra.mxu2 %v5199_v49 }
0x10f0   : > { %5298 = vmatpush.msra.mxu3 %v5248_v51 }
0x10f1   : > { %5663 = vmatmul.msk.f32.vlgmr.msra.gmra.mxu3 %vm9761_vm15, %v5259_v14  ;;  %5276 = vmatpush.msra.mxu2 %v5196_v18 }
0x10f3   : > { %5277 = vmatpush.msra.mxu2 %v5193_v19 }
0x10f5   : > { %5278 = vmatpush.msra.mxu2 %v5190_v47 }
0x10f6   : > { %5662 = vmatmul.msk.f32.vlgmr.msra.gmra.mxu2 %vm9762_vm3, %v5259_v14 }
0x1174   : > { %v5300_v30 = vpop.f32.mrf.mxu3 }
0x1175   : > { %v5310_v1 = vmul.f32 %v5307_v39, %v5300_v30 }
0x1177   : > { %v5318_v55 = vadd.f32 %v5315_v21, %v5310_v1 }
0x1179   : > { %5320 = vst [vmem:[%s952_s1 + $0x8] sm:$0xff] %v5318_v55  ;;  %v5280_v24 = vpop.f32.mrf.mxu2 }
0x117a   : > { %v5309_v8 = vmul.f32 %v5307_v39, %v5280_v24 }
0x117c   : > { %v5317_v53 = vadd.f32 %v5315_v21, %v5309_v8 }
0x117e   : > { %5319 = vst [vmem:[%s952_s1] sm:$0xff] %v5317_v53 }
0x117f PF: > { %s71_s7 = sadd.s32 1, %s6201_s7  }
0x1180   : > { %p68_p3 = scmp.ge.s32.totalorder %s71_s7, 4  }
0x1182   :  { %70 = sbr.rel (!%p68_p3) target bundleno = 52 (0x34), region = 224 }
0x1187   :  { %5342 = vsyncpa [#allocation3], 1 }
0x1188   :  { %5344 = vsyncpa [#allocation3 + $0x1], 1 }
0x1189   :  { %5345 = vsyncpa [#allocation5], 1 }

</bundles_post_ra>
